<compile_context>
chip_gen: v6e
topology: v6e:2x2x1
jax: 0.10.0
libtpu: 0.0.40
codegen_flags: <defaults>
</compile_context>

<pallas_src>
import functools

import jax
import jax.numpy as jnp
from jax.experimental import pallas as pl
from jax.experimental.pallas import tpu as pltpu

GROUPNORM_GROUPS = 32
DEFAULT_TIME_DIM = 64
GN_EPS = 1e-5                     # torch.nn.GroupNorm default eps


# ---------------------------------------------------------------------------
# Kernel 1: per-channel sum / sum-of-squares of the raw input (GroupNorm #1 stats).
# (GroupNorm #2 stats are fused into conv kernel #1 below.)
# ---------------------------------------------------------------------------
def _group_stats_kernel(x_ref, o_ref):
    # x_ref: (1, tm, C) row-tile of the NHWC-flattened activation.
    # o_ref: (1, 2, C)  accumulator: row 0 = sum(x), row 1 = sum(x*x).
    @pl.when(pl.program_id(1) == 0)
    def _init():
        o_ref[...] = jnp.zeros_like(o_ref)

    x = x_ref[0]                                             # (tm, C)
    o_ref[0, 0:1, :] = o_ref[0, 0:1, :] + jnp.sum(x, axis=0, keepdims=True)
    o_ref[0, 1:2, :] = o_ref[0, 1:2, :] + jnp.sum(x * x, axis=0, keepdims=True)


def _row_tile(hw, cap=1024):
    """Largest divisor of hw that is a multiple of 8 and <= cap; else hw (full block
    is always a legal BlockSpec)."""
    for t in range(min(cap, hw), 7, -1):
        if hw % t == 0 and t % 8 == 0:
            return t
    return hw


def group_stats(x_flat):
    """x_flat: (B, HW, C) -> (B, 2, C) with [sum, sum_sq] per (batch, channel)."""
    B, HW, C = x_flat.shape
    tm = _row_tile(HW)
    return pl.pallas_call(
        _group_stats_kernel,
        out_shape=jax.ShapeDtypeStruct((B, 2, C), jnp.float32),
        grid=(B, HW // tm),
        in_specs=[pl.BlockSpec((1, tm, C), lambda b, r: (b, r, 0))],
        out_specs=pl.BlockSpec((1, 2, C), lambda b, r: (b, 0, 0)),
        compiler_params=pltpu.CompilerParams(
            dimension_semantics=("parallel", "arbitrary")),
    )(x_flat)


def group_scale_shift(stats, gamma, beta, groups, hw, eps=GN_EPS):
    """Tiny (B, C)-sized glue: fold per-group mean/rstd and the affine params into
    per-(batch, channel) scale/shift so the normalize-apply fuses into the conv.
    NOTE: single-pass E[x^2]-E[x]^2 variance (guarded); fine for zero-mean-ish
    UNet activations, two-pass would be needed for mean >> std inputs."""
    B, _, C = stats.shape
    cg = C // groups
    n = float(cg * hw)
    s = stats[:, 0, :].reshape(B, groups, cg).sum(-1)            # (B, G)
    sq = stats[:, 1, :].reshape(B, groups, cg).sum(-1)           # (B, G)
    mean = s / n
    var = jnp.maximum(sq / n - mean * mean, 0.0)
    rstd = jax.lax.rsqrt(var + eps)
    mean_c = jnp.repeat(mean, cg, axis=-1)                       # (B, C)
    rstd_c = jnp.repeat(rstd, cg, axis=-1)                       # (B, C)
    scale = rstd_c * gamma[None, :]
    shift = beta[None, :] - mean_c * scale
    return scale[:, None, :], shift[:, None, :]                  # (B, 1, C)


# ---------------------------------------------------------------------------
# Kernel 2: fused  GroupNorm-apply + SiLU + 3x3 conv  (+ fused extras)
#   mode "time":     + time-bias add + GroupNorm #2 statistics output
#   mode "res":      + identity residual add
#   mode "res_proj": + 1x1-conv residual projection + add
# ---------------------------------------------------------------------------
def _fused_conv3x3_kernel(*args, H, W, mode):
    if mode == "time":
        x_ref, sc_ref, sh_ref, w_ref, b_ref, tb_ref, o_ref, st_ref = args
    elif mode == "res":
        x_ref, sc_ref, sh_ref, w_ref, b_ref, r_ref, o_ref = args
    else:  # "res_proj"
        x_ref, sc_ref, sh_ref, w_ref, b_ref, r_ref, rw_ref, rb_ref, o_ref = args

    cin = x_ref.shape[-1]
    x = x_ref[0]                                    # (HW, Cin) raw (pre-norm) input

    # Fused GroupNorm apply (precomputed per-channel scale/shift) + SiLU, interior only.
    xn = x * sc_ref[0] + sh_ref[0]
    xn = xn * jax.nn.sigmoid(xn)
    xn = xn.reshape(H, W, cin)

    # Zero halo built in vregs / VMEM values (no XLA jnp.pad HBM round trip).
    zr = jnp.zeros((1, W, cin), jnp.float32)
    zc = jnp.zeros((H + 2, 1, cin), jnp.float32)
    xpad = jnp.concatenate([zc, jnp.concatenate([zr, xn, zr], axis=0), zc], axis=1)

    # 3x3 conv as 9 per-tap MXU dots (K = Cin), bf16 operands, f32 accumulation.
    acc = None
    for dy in range(3):
        for dx in range(3):
            patch = jax.lax.slice(xpad, (dy, dx, 0), (dy + H, dx + W, cin))
            patch = patch.reshape(H * W, cin).astype(jnp.bfloat16)
            d = jnp.dot(patch, w_ref[dy, dx], preferred_element_type=jnp.float32)
            acc = d if acc is None else acc + d

    acc = acc + b_ref[...]                          # (1, Cout) bias broadcast

    if mode == "time":
        acc = acc + tb_ref[0]                       # precomputed silu(t) @ Wt + bt
        # Fused GroupNorm #2 statistics of the merged feature (still in vregs).
        st_ref[0, 0:1, :] = jnp.sum(acc, axis=0, keepdims=True)
        st_ref[0, 1:2, :] = jnp.sum(acc * acc, axis=0, keepdims=True)
    elif mode == "res":
        acc = acc + r_ref[0]                        # identity residual, fused add
    else:  # "res_proj": fused 1x1-conv residual projection + add
        res = r_ref[0].astype(jnp.bfloat16)
        acc = acc + (jnp.dot(res, rw_ref[...], preferred_element_type=jnp.float32)
                     + rb_ref[...])

    o_ref[0] = acc


def fused_gn_silu_conv3x3(x_flat, scale, shift, w3x3, bias, *, H, W, mode, extras):
    """x_flat: (B, HW, Cin) NHWC-flat raw (pre-norm) input
       scale/shift: (B, 1, Cin) per-(batch, channel) GroupNorm apply
       w3x3: (3, 3, Cin, Cout), bias: (Cout,)
       mode "time":     extras = (t_bias (B, 1, Cout),)   -> returns (out, stats)
       mode "res":      extras = (residual (B, HW, Cout),)
       mode "res_proj": extras = (residual (B, HW, Cin), Wr (Cin, Cout), br (Cout,))"""
    B, HW, Cin = x_flat.shape
    Cout = w3x3.shape[-1]
    w_bf = w3x3.astype(jnp.bfloat16)                # bf16 MXU operand, f32 accumulate
    bias2 = bias.reshape(1, Cout)

    in_specs = [
        pl.BlockSpec((1, HW, Cin), lambda b: (b, 0, 0)),
        pl.BlockSpec((1, 1, Cin), lambda b: (b, 0, 0)),
        pl.BlockSpec((1, 1, Cin), lambda b: (b, 0, 0)),
        pl.BlockSpec((3, 3, Cin, Cout), lambda b: (0, 0, 0, 0)),
        pl.BlockSpec((1, Cout), lambda b: (0, 0)),
    ]
    ins = [x_flat, scale, shift, w_bf, bias2]

    if mode == "time":
        (t_bias,) = extras
        ins += [t_bias]
        in_specs += [pl.BlockSpec((1, 1, Cout), lambda b: (b, 0, 0))]
        out_shape = (jax.ShapeDtypeStruct((B, HW, Cout), jnp.float32),
                     jax.ShapeDtypeStruct((B, 2, Cout), jnp.float32))
        out_specs = (pl.BlockSpec((1, HW, Cout), lambda b: (b, 0, 0)),
                     pl.BlockSpec((1, 2, Cout), lambda b: (b, 0, 0)))
    elif mode == "res":
        (res,) = extras
        ins += [res]
        in_specs += [pl.BlockSpec((1, HW, res.shape[-1]), lambda b: (b, 0, 0))]
        out_shape = jax.ShapeDtypeStruct((B, HW, Cout), jnp.float32)
        out_specs = pl.BlockSpec((1, HW, Cout), lambda b: (b, 0, 0))
    elif mode == "res_proj":
        res, rw, rb = extras
        ins += [res, rw.astype(jnp.bfloat16), rb.reshape(1, Cout)]
        in_specs += [
            pl.BlockSpec((1, HW, res.shape[-1]), lambda b: (b, 0, 0)),
            pl.BlockSpec(rw.shape, lambda b: (0, 0)),
            pl.BlockSpec((1, Cout), lambda b: (0, 0)),
        ]
        out_shape = jax.ShapeDtypeStruct((B, HW, Cout), jnp.float32)
        out_specs = pl.BlockSpec((1, HW, Cout), lambda b: (b, 0, 0))
    else:
        raise ValueError(mode)

    return pl.pallas_call(
        functools.partial(_fused_conv3x3_kernel, H=H, W=W, mode=mode),
        out_shape=out_shape,
        grid=(B,),
        in_specs=in_specs,
        out_specs=out_specs,
        compiler_params=pltpu.CompilerParams(
            dimension_semantics=("parallel",),
            vmem_limit_bytes=32 * 1024 * 1024),
    )(*ins)


# ---------------------------------------------------------------------------
# Module forward (mirrors UNETResidualBlock.forward)
# ---------------------------------------------------------------------------
def unet_residual_block_nhwc(params, x_nhwc, time_emb):
    """NHWC-native entry point: x_nhwc (B, H, W, Cin), time_emb (B, Tdim)
       -> (B, H, W, Cout).  Use this when chaining blocks inside a UNet."""
    B, H, W, Cin = x_nhwc.shape
    Cout = params["conv_feature"]["w"].shape[-1]
    HW = H * W
    x_flat = x_nhwc.reshape(B, HW, Cin)

    # Time path hoisted out of the kernel: one small XLA GEMM -> per-batch (1, Cout) bias.
    t = jax.nn.silu(time_emb)
    t_bias = (jnp.dot(t, params["time_proj"]["w"],
                      precision=jax.lax.Precision.HIGHEST)
              + params["time_proj"]["b"]).reshape(B, 1, Cout)

    # GroupNorm #1 stats (Pallas) -> scale/shift applied inside conv #1.
    st1 = group_stats(x_flat)
    sc1, sh1 = group_scale_shift(st1, params["gn_feature"]["g"],
                                 params["gn_feature"]["b"], GROUPNORM_GROUPS, HW)

    # conv #1: GN-apply + SiLU + conv3x3 + time-bias add + GroupNorm #2 stats, fused.
    h_flat, st2 = fused_gn_silu_conv3x3(
        x_flat, sc1, sh1, params["conv_feature"]["w"], params["conv_feature"]["b"],
        H=H, W=W, mode="time", extras=(t_bias,))

    sc2, sh2 = group_scale_shift(st2, params["gn_merged"]["g"],
                                 params["gn_merged"]["b"], GROUPNORM_GROUPS, HW)

    if "residual" in params:
        mode, extras = "res_proj", (x_flat, params["residual"]["w"],
                                    params["residual"]["b"])
    else:
        mode, extras = "res", (x_flat,)

    # conv #2: GN-apply + SiLU + conv3x3 + residual add (identity or fused 1x1 proj).
    out_flat = fused_gn_silu_conv3x3(
        h_flat, sc2, sh2, params["conv_merged"]["w"], params["conv_merged"]["b"],
        H=H, W=W, mode=mode, extras=extras)
    return out_flat.reshape(B, H, W, Cout)


def unet_residual_block(params, x, time_emb):
    """NCHW entry point matching the PyTorch module interface.
       x: (B, Cin, H, W) float32; time_emb: (B, time_dim) -> (B, Cout, H, W)."""
    out = unet_residual_block_nhwc(params, jnp.transpose(x, (0, 2, 3, 1)), time_emb)
    return jnp.transpose(out, (0, 3, 1, 2))


# ---------------------------------------------------------------------------
# Deterministic synthetic parameters
# ---------------------------------------------------------------------------
def _nrm(key, shape, scale=0.02):
    return scale * jax.random.normal(key, shape, jnp.float32)


def init_residual_block(key, cin, cout, tdim):
    ks = jax.random.split(key, 12)
    p = {
        "gn_feature": {"g": 1.0 + _nrm(ks[0], (cin,), 0.1), "b": _nrm(ks[1], (cin,), 0.1)},
        "conv_feature": {"w": _nrm(ks[2], (3, 3, cin, cout)), "b": _nrm(ks[3], (cout,))},
        "time_proj": {"w": _nrm(ks[4], (tdim, cout)), "b": _nrm(ks[5], (cout,))},
        "gn_merged": {"g": 1.0 + _nrm(ks[6], (cout,), 0.1), "b": _nrm(ks[7], (cout,), 0.1)},
        "conv_merged": {"w": _nrm(ks[8], (3, 3, cout, cout)), "b": _nrm(ks[9], (cout,))},
    }
    if cin != cout:
        p["residual"] = {"w": _nrm(ks[10], (cin, cout)), "b": _nrm(ks[11], (cout,))}
    return p


# ---------------------------------------------------------------------------
# Pure-JAX reference (for correctness validation only)
# ---------------------------------------------------------------------------
def _ref_groupnorm_silu(x, g, b, groups, eps=GN_EPS):
    B, C, H, W = x.shape
    xg = x.reshape(B, groups, (C // groups) * H * W)
    mean = jnp.mean(xg, axis=-1, keepdims=True)
    var = jnp.mean(jnp.square(xg - mean), axis=-1, keepdims=True)
    xn = ((xg - mean) * jax.lax.rsqrt(var + eps)).reshape(B, C, H, W)
    y = xn * g[None, :, None, None] + b[None, :, None, None]
    return y * jax.nn.sigmoid(y)


def _ref_conv3x3(x, w, b):
    wt = jnp.transpose(w, (3, 2, 0, 1))                       # (Cout, Cin, 3, 3)
    y = jax.lax.conv_general_dilated(
        x, wt, window_strides=(1, 1), padding=((1, 1), (1, 1)),
        dimension_numbers=("NCHW", "OIHW", "NCHW"),
        precision=jax.lax.Precision.HIGHEST)
    return y + b[None, :, None, None]


def _ref_block(p, x, temb):
    res = x
    h = _ref_conv3x3(_ref_groupnorm_silu(x, p["gn_feature"]["g"], p["gn_feature"]["b"],
                                         GROUPNORM_GROUPS),
                     p["conv_feature"]["w"], p["conv_feature"]["b"])
    t = jax.nn.silu(temb)
    t = jnp.dot(t, p["time_proj"]["w"],
                precision=jax.lax.Precision.HIGHEST) + p["time_proj"]["b"]
    h = h + t[:, :, None, None]
    h = _ref_conv3x3(_ref_groupnorm_silu(h, p["gn_merged"]["g"], p["gn_merged"]["b"],
                                         GROUPNORM_GROUPS),
                     p["conv_merged"]["w"], p["conv_merged"]["b"])
    if "residual" in p:
        res = jnp.einsum("bchw,cd->bdhw", x, p["residual"]["w"],
                         precision=jax.lax.Precision.HIGHEST) \
              + p["residual"]["b"][None, :, None, None]
    return h + res


# ---------------------------------------------------------------------------
if __name__ == "__main__":
    key = jax.random.PRNGKey(0)
    kp1, kp2, kx, kt = jax.random.split(key, 4)

    B, H, W = 2, 16, 16
    CIN, TDIM = 128, DEFAULT_TIME_DIM     # channels divisible by 32 (GroupNorm) and 128 (lanes)

    params_id = init_residual_block(kp1, CIN, CIN, TDIM)        # identity residual path
    params_pr = init_residual_block(kp2, CIN, 2 * CIN, TDIM)    # 1x1-conv residual path

    x = jax.random.normal(kx, (B, CIN, H, W), jnp.float32)
    temb = jax.random.normal(kt, (B, TDIM), jnp.float32)

    fwd = jax.jit(unet_residual_block)
    out_id = jax.block_until_ready(fwd(params_id, x, temb))
    out_pr = jax.block_until_ready(fwd(params_pr, x, temb))

    assert out_id.shape == (B, CIN, H, W), out_id.shape
    assert out_pr.shape == (B, 2 * CIN, H, W), out_pr.shape
    assert out_id.dtype == jnp.float32 and out_pr.dtype == jnp.float32
    assert bool(jnp.all(jnp.isfinite(out_id))) and bool(jnp.all(jnp.isfinite(out_pr)))

    # correctness vs. pure-JAX reference of the PyTorch module
    # (tolerance loosened vs. an all-f32 run: matmul operands are bf16 with f32 accumulation)
    err = max(float(jnp.max(jnp.abs(out_id - _ref_block(params_id, x, temb)))),
              float(jnp.max(jnp.abs(out_pr - _ref_block(params_pr, x, temb)))))
    assert err < 5e-2, f"mismatch vs reference: {err}"

    print("KERNEL_OK")
</pallas_src>

<mosaic_0001>
module attributes {stable_mosaic.version = 11 : i64} {
  func.func @_group_stats_kernel(%arg0: i32, %arg1: i32, %arg2: memref<1x256x128xf32, #tpu.memory_space<vmem>>, %arg3: memref<1x2x128xf32, #tpu.memory_space<vmem>>) attributes {dimension_semantics = [#tpu.dimension_semantics<parallel>, #tpu.dimension_semantics<arbitrary>], iteration_bounds = array<i64: 2, 1>, scalar_prefetch = 0 : i64, scratch_operands = 0 : i64, tpu.core_type = #tpu.core_type<tc>, window_params = [{transform_indices = @transform_0, window_bounds = array<i64: 1, 256, 128>}, {transform_indices = @transform_1, window_bounds = array<i64: 1, 2, 128>}]} {
    %c0_i32 = arith.constant 0 : i32
    %0 = arith.cmpi eq, %arg1, %c0_i32 : i32
    %1 = arith.extui %0 : i1 to i32
    %c0_i32_0 = arith.constant 0 : i32
    %2 = arith.cmpi ne, %1, %c0_i32_0 : i32
    scf.if %2 {
      %cst_15 = arith.constant 0.000000e+00 : f32
      %22 = vector.broadcast %cst_15 : f32 to vector<1x2x128xf32>
      %c0_16 = arith.constant 0 : index
      %c0_17 = arith.constant 0 : index
      %c0_18 = arith.constant 0 : index
      %23 = vector.load %arg3[%c0_16, %c0_17, %c0_18] : memref<1x2x128xf32, #tpu.memory_space<vmem>>, vector<1x2x128xf32>
      tpu.vector_store %arg3[%c0_16, %c0_17, %c0_18], %22 {strides = array<i32>} : memref<1x2x128xf32, #tpu.memory_space<vmem>>, vector<1x2x128xf32>,
    } else {
    }
    %c0 = arith.constant 0 : index
    %c0_1 = arith.constant 0 : index
    %c0_2 = arith.constant 0 : index
    %3 = vector.load %arg2[%c0, %c0_1, %c0_2] : memref<1x256x128xf32, #tpu.memory_space<vmem>>, vector<1x256x128xf32>
    %4 = vector.shape_cast %3 : vector<1x256x128xf32> to vector<256x128xf32>
    %c0_3 = arith.constant 0 : index
    %c0_4 = arith.constant 0 : index
    %c0_5 = arith.constant 0 : index
    %5 = vector.load %arg3[%c0_3, %c0_4, %c0_5] : memref<1x2x128xf32, #tpu.memory_space<vmem>>, vector<1x1x128xf32>
    %6 = vector.shape_cast %5 : vector<1x1x128xf32> to vector<1x128xf32>
    %cst = arith.constant dense<0.000000e+00> : vector<128xf32>
    %7 = vector.multi_reduction <add>, %4, %cst [0] : vector<256x128xf32> to vector<128xf32>
    %8 = vector.shape_cast %7 : vector<128xf32> to vector<1x128xf32>
    %9 = arith.addf %6, %8 : vector<1x128xf32>
    %c0_6 = arith.constant 0 : index
    %c0_7 = arith.constant 0 : index
    %c0_8 = arith.constant 0 : index
    %10 = vector.load %arg3[%c0_6, %c0_7, %c0_8] : memref<1x2x128xf32, #tpu.memory_space<vmem>>, vector<1x1x128xf32>
    %11 = vector.shape_cast %10 : vector<1x1x128xf32> to vector<1x128xf32>
    %12 = vector.shape_cast %9 : vector<1x128xf32> to vector<1x1x128xf32>
    tpu.vector_store %arg3[%c0_6, %c0_7, %c0_8], %12 {strides = array<i32>} : memref<1x2x128xf32, #tpu.memory_space<vmem>>, vector<1x1x128xf32>,
    %c0_9 = arith.constant 0 : index
    %c1 = arith.constant 1 : index
    %c0_10 = arith.constant 0 : index
    %13 = vector.load %arg3[%c0_9, %c1, %c0_10] : memref<1x2x128xf32, #tpu.memory_space<vmem>>, vector<1x1x128xf32>
    %14 = vector.shape_cast %13 : vector<1x1x128xf32> to vector<1x128xf32>
    %15 = arith.mulf %4, %4 : vector<256x128xf32>
    %cst_11 = arith.constant dense<0.000000e+00> : vector<128xf32>
    %16 = vector.multi_reduction <add>, %15, %cst_11 [0] : vector<256x128xf32> to vector<128xf32>
    %17 = vector.shape_cast %16 : vector<128xf32> to vector<1x128xf32>
    %18 = arith.addf %14, %17 : vector<1x128xf32>
    %c0_12 = arith.constant 0 : index
    %c1_13 = arith.constant 1 : index
    %c0_14 = arith.constant 0 : index
    %19 = vector.load %arg3[%c0_12, %c1_13, %c0_14] : memref<1x2x128xf32, #tpu.memory_space<vmem>>, vector<1x1x128xf32>
    %20 = vector.shape_cast %19 : vector<1x1x128xf32> to vector<1x128xf32>
    %21 = vector.shape_cast %18 : vector<1x128xf32> to vector<1x1x128xf32>
    tpu.vector_store %arg3[%c0_12, %c1_13, %c0_14], %21 {strides = array<i32>} : memref<1x2x128xf32, #tpu.memory_space<vmem>>, vector<1x1x128xf32>,
    return
  }
  func.func @transform_0(%arg0: i32, %arg1: i32) -> (i32, i32, i32) {
    %c0_i32 = arith.constant 0 : i32
    %c0_i32_0 = arith.constant 0 : i32
    return %arg0, %arg1, %c0_i32 : i32, i32, i32
  }
  func.func @transform_1(%arg0: i32, %arg1: i32) -> (i32, i32, i32) {
    %c0_i32 = arith.constant 0 : i32
    %c0_i32_0 = arith.constant 0 : i32
    %c0_i32_1 = arith.constant 0 : i32
    return %arg0, %c0_i32, %c0_i32_0 : i32, i32, i32
  }
}

module attributes {stable_mosaic.version = 11 : i64} {
  func.func @_fused_conv3x3_kernel(%arg0: i32, %arg1: memref<1x256x128xf32, #tpu.memory_space<vmem>>, %arg2: memref<1x1x128xf32, #tpu.memory_space<vmem>>, %arg3: memref<1x1x128xf32, #tpu.memory_space<vmem>>, %arg4: memref<3x3x128x128xbf16, #tpu.memory_space<vmem>>, %arg5: memref<1x128xf32, #tpu.memory_space<vmem>>, %arg6: memref<1x1x128xf32, #tpu.memory_space<vmem>>, %arg7: memref<1x256x128xf32, #tpu.memory_space<vmem>>, %arg8: memref<1x2x128xf32, #tpu.memory_space<vmem>>) attributes {dimension_semantics = [#tpu.dimension_semantics<parallel>], iteration_bounds = array<i64: 2>, scalar_prefetch = 0 : i64, scratch_operands = 0 : i64, tpu.core_type = #tpu.core_type<tc>, window_params = [{transform_indices = @transform_0, window_bounds = array<i64: 1, 256, 128>}, {transform_indices = @transform_1, window_bounds = array<i64: 1, 1, 128>}, {transform_indices = @transform_2, window_bounds = array<i64: 1, 1, 128>}, {pipeline_mode = #tpu.pipeline_mode<synchronous>, transform_indices = @transform_3, window_bounds = array<i64: 3, 3, 128, 128>}, {pipeline_mode = #tpu.pipeline_mode<synchronous>, transform_indices = @transform_4, window_bounds = array<i64: 1, 128>}, {transform_indices = @transform_5, window_bounds = array<i64: 1, 1, 128>}, {transform_indices = @transform_6, window_bounds = array<i64: 1, 256, 128>}, {transform_indices = @transform_7, window_bounds = array<i64: 1, 2, 128>}]} {
    %c0 = arith.constant 0 : index
    %c0_0 = arith.constant 0 : index
    %c0_1 = arith.constant 0 : index
    %0 = vector.load %arg1[%c0, %c0_0, %c0_1] : memref<1x256x128xf32, #tpu.memory_space<vmem>>, vector<1x256x128xf32>
    %1 = vector.shape_cast %0 : vector<1x256x128xf32> to vector<256x128xf32>
    %c0_2 = arith.constant 0 : index
    %c0_3 = arith.constant 0 : index
    %c0_4 = arith.constant 0 : index
    %2 = vector.load %arg2[%c0_2, %c0_3, %c0_4] : memref<1x1x128xf32, #tpu.memory_space<vmem>>, vector<1x1x128xf32>
    %3 = vector.shape_cast %2 : vector<1x1x128xf32> to vector<1x128xf32>
    %4 = vector.broadcast %3 : vector<1x128xf32> to vector<256x128xf32>
    %5 = arith.mulf %1, %4 : vector<256x128xf32>
    %c0_5 = arith.constant 0 : index
    %c0_6 = arith.constant 0 : index
    %c0_7 = arith.constant 0 : index
    %6 = vector.load %arg3[%c0_5, %c0_6, %c0_7] : memref<1x1x128xf32, #tpu.memory_space<vmem>>, vector<1x1x128xf32>
    %7 = vector.shape_cast %6 : vector<1x1x128xf32> to vector<1x128xf32>
    %8 = vector.broadcast %7 : vector<1x128xf32> to vector<256x128xf32>
    %9 = arith.addf %5, %8 : vector<256x128xf32>
    %10 = arith.negf %9 : vector<256x128xf32>
    %11 = math.exp %10 : vector<256x128xf32>
    %cst = arith.constant 1.000000e+00 : f32
    %12 = vector.broadcast %cst : f32 to vector<256x128xf32>
    %13 = arith.addf %12, %11 : vector<256x128xf32>
    %14 = arith.divf %12, %13 : vector<256x128xf32>
    %15 = arith.mulf %9, %14 : vector<256x128xf32>
    %16 = vector.shape_cast %15 : vector<256x128xf32> to vector<16x16x128xf32>
    %cst_8 = arith.constant 0.000000e+00 : f32
    %17 = vector.broadcast %cst_8 : f32 to vector<1x16x128xf32>
    %cst_9 = arith.constant 0.000000e+00 : f32
    %18 = vector.broadcast %cst_9 : f32 to vector<18x1x128xf32>
    %19 = tpu.concatenate %17, %16, %17 in 0 : vector<1x16x128xf32>, vector<16x16x128xf32>, vector<1x16x128xf32> -> vector<18x16x128xf32>
    %20 = tpu.concatenate %18, %19, %18 in 1 : vector<18x1x128xf32>, vector<18x16x128xf32>, vector<18x1x128xf32> -> vector<18x18x128xf32>
    %21 = vector.extract_strided_slice %20 {offsets = [0, 0, 0], sizes = [16, 16, 128], strides = [1, 1, 1]} : vector<18x18x128xf32> to vector<16x16x128xf32>
    %22 = vector.shape_cast %21 : vector<16x16x128xf32> to vector<256x128xf32>
    %23 = arith.truncf %22 : vector<256x128xf32> to vector<256x128xbf16>
    %c0_10 = arith.constant 0 : index
    %c0_11 = arith.constant 0 : index
    %c0_12 = arith.constant 0 : index
    %c0_13 = arith.constant 0 : index
    %24 = vector.load %arg4[%c0_10, %c0_11, %c0_12, %c0_13] : memref<3x3x128x128xbf16, #tpu.memory_space<vmem>>, vector<1x1x128x128xbf16>
    %25 = vector.shape_cast %24 : vector<1x1x128x128xbf16> to vector<128x128xbf16>
    %cst_14 = arith.constant dense<0.000000e+00> : vector<256x128xf32>
    %26 = tpu.matmul %23, %25, %cst_14 {dimension_numbers = #tpu.dot_dimension_numbers<[1], [0], [0], [1], [0, 0, 1, 1], [], []>} : vector<256x128xbf16>, vector<128x128xbf16>, vector<256x128xf32> -> vector<256x128xf32>
    %27 = vector.extract_strided_slice %20 {offsets = [0, 1, 0], sizes = [16, 16, 128], strides = [1, 1, 1]} : vector<18x18x128xf32> to vector<16x16x128xf32>
    %28 = vector.shape_cast %27 : vector<16x16x128xf32> to vector<256x128xf32>
    %29 = arith.truncf %28 : vector<256x128xf32> to vector<256x128xbf16>
    %c0_15 = arith.constant 0 : index
    %c1 = arith.constant 1 : index
    %c0_16 = arith.constant 0 : index
    %c0_17 = arith.constant 0 : index
    %30 = vector.load %arg4[%c0_15, %c1, %c0_16, %c0_17] : memref<3x3x128x128xbf16, #tpu.memory_space<vmem>>, vector<1x1x128x128xbf16>
    %31 = vector.shape_cast %30 : vector<1x1x128x128xbf16> to vector<128x128xbf16>
    %cst_18 = arith.constant dense<0.000000e+00> : vector<256x128xf32>
    %32 = tpu.matmul %29, %31, %cst_18 {dimension_numbers = #tpu.dot_dimension_numbers<[1], [0], [0], [1], [0, 0, 1, 1], [], []>} : vector<256x128xbf16>, vector<128x128xbf16>, vector<256x128xf32> -> vector<256x128xf32>
    %33 = arith.addf %26, %32 : vector<256x128xf32>
    %34 = vector.extract_strided_slice %20 {offsets = [0, 2, 0], sizes = [16, 16, 128], strides = [1, 1, 1]} : vector<18x18x128xf32> to vector<16x16x128xf32>
    %35 = vector.shape_cast %34 : vector<16x16x128xf32> to vector<256x128xf32>
    %36 = arith.truncf %35 : vector<256x128xf32> to vector<256x128xbf16>
    %c0_19 = arith.constant 0 : index
    %c2 = arith.constant 2 : index
    %c0_20 = arith.constant 0 : index
    %c0_21 = arith.constant 0 : index
    %37 = vector.load %arg4[%c0_19, %c2, %c0_20, %c0_21] : memref<3x3x128x128xbf16, #tpu.memory_space<vmem>>, vector<1x1x128x128xbf16>
    %38 = vector.shape_cast %37 : vector<1x1x128x128xbf16> to vector<128x128xbf16>
    %cst_22 = arith.constant dense<0.000000e+00> : vector<256x128xf32>
    %39 = tpu.matmul %36, %38, %cst_22 {dimension_numbers = #tpu.dot_dimension_numbers<[1], [0], [0], [1], [0, 0, 1, 1], [], []>} : vector<256x128xbf16>, vector<128x128xbf16>, vector<256x128xf32> -> vector<256x128xf32>
    %40 = arith.addf %33, %39 : vector<256x128xf32>
    %41 = vector.extract_strided_slice %20 {offsets = [1, 0, 0], sizes = [16, 16, 128], strides = [1, 1, 1]} : vector<18x18x128xf32> to vector<16x16x128xf32>
    %42 = vector.shape_cast %41 : vector<16x16x128xf32> to vector<256x128xf32>
    %43 = arith.truncf %42 : vector<256x128xf32> to vector<256x128xbf16>
    %c1_23 = arith.constant 1 : index
    %c0_24 = arith.constant 0 : index
    %c0_25 = arith.constant 0 : index
    %c0_26 = arith.constant 0 : index
    %44 = vector.load %arg4[%c1_23, %c0_24, %c0_25, %c0_26] : memref<3x3x128x128xbf16, #tpu.memory_space<vmem>>, vector<1x1x128x128xbf16>
    %45 = vector.shape_cast %44 : vector<1x1x128x128xbf16> to vector<128x128xbf16>
    %cst_27 = arith.constant dense<0.000000e+00> : vector<256x128xf32>
    %46 = tpu.matmul %43, %45, %cst_27 {dimension_numbers = #tpu.dot_dimension_numbers<[1], [0], [0], [1], [0, 0, 1, 1], [], []>} : vector<256x128xbf16>, vector<128x128xbf16>, vector<256x128xf32> -> vector<256x128xf32>
    %47 = arith.addf %40, %46 : vector<256x128xf32>
    %48 = vector.extract_strided_slice %20 {offsets = [1, 1, 0], sizes = [16, 16, 128], strides = [1, 1, 1]} : vector<18x18x128xf32> to vector<16x16x128xf32>
    %49 = vector.shape_cast %48 : vector<16x16x128xf32> to vector<256x128xf32>
    %50 = arith.truncf %49 : vector<256x128xf32> to vector<256x128xbf16>
    %c1_28 = arith.constant 1 : index
    %c1_29 = arith.constant 1 : index
    %c0_30 = arith.constant 0 : index
    %c0_31 = arith.constant 0 : index
    %51 = vector.load %arg4[%c1_28, %c1_29, %c0_30, %c0_31] : memref<3x3x128x128xbf16, #tpu.memory_space<vmem>>, vector<1x1x128x128xbf16>
    %52 = vector.shape_cast %51 : vector<1x1x128x128xbf16> to vector<128x128xbf16>
    %cst_32 = arith.constant dense<0.000000e+00> : vector<256x128xf32>
    %53 = tpu.matmul %50, %52, %cst_32 {dimension_numbers = #tpu.dot_dimension_numbers<[1], [0], [0], [1], [0, 0, 1, 1], [], []>} : vector<256x128xbf16>, vector<128x128xbf16>, vector<256x128xf32> -> vector<256x128xf32>
    %54 = arith.addf %47, %53 : vector<256x128xf32>
    %55 = vector.extract_strided_slice %20 {offsets = [1, 2, 0], sizes = [16, 16, 128], strides = [1, 1, 1]} : vector<18x18x128xf32> to vector<16x16x128xf32>
    %56 = vector.shape_cast %55 : vector<16x16x128xf32> to vector<256x128xf32>
    %57 = arith.truncf %56 : vector<256x128xf32> to vector<256x128xbf16>
    %c1_33 = arith.constant 1 : index
    %c2_34 = arith.constant 2 : index
    %c0_35 = arith.constant 0 : index
    %c0_36 = arith.constant 0 : index
    %58 = vector.load %arg4[%c1_33, %c2_34, %c0_35, %c0_36] : memref<3x3x128x128xbf16, #tpu.memory_space<vmem>>, vector<1x1x128x128xbf16>
    %59 = vector.shape_cast %58 : vector<1x1x128x128xbf16> to vector<128x128xbf16>
    %cst_37 = arith.constant dense<0.000000e+00> : vector<256x128xf32>
    %60 = tpu.matmul %57, %59, %cst_37 {dimension_numbers = #tpu.dot_dimension_numbers<[1], [0], [0], [1], [0, 0, 1, 1], [], []>} : vector<256x128xbf16>, vector<128x128xbf16>, vector<256x128xf32> -> vector<256x128xf32>
    %61 = arith.addf %54, %60 : vector<256x128xf32>
    %62 = vector.extract_strided_slice %20 {offsets = [2, 0, 0], sizes = [16, 16, 128], strides = [1, 1, 1]} : vector<18x18x128xf32> to vector<16x16x128xf32>
    %63 = vector.shape_cast %62 : vector<16x16x128xf32> to vector<256x128xf32>
    %64 = arith.truncf %63 : vector<256x128xf32> to vector<256x128xbf16>
    %c2_38 = arith.constant 2 : index
    %c0_39 = arith.constant 0 : index
    %c0_40 = arith.constant 0 : index
    %c0_41 = arith.constant 0 : index
    %65 = vector.load %arg4[%c2_38, %c0_39, %c0_40, %c0_41] : memref<3x3x128x128xbf16, #tpu.memory_space<vmem>>, vector<1x1x128x128xbf16>
    %66 = vector.shape_cast %65 : vector<1x1x128x128xbf16> to vector<128x128xbf16>
    %cst_42 = arith.constant dense<0.000000e+00> : vector<256x128xf32>
    %67 = tpu.matmul %64, %66, %cst_42 {dimension_numbers = #tpu.dot_dimension_numbers<[1], [0], [0], [1], [0, 0, 1, 1], [], []>} : vector<256x128xbf16>, vector<128x128xbf16>, vector<256x128xf32> -> vector<256x128xf32>
    %68 = arith.addf %61, %67 : vector<256x128xf32>
    %69 = vector.extract_strided_slice %20 {offsets = [2, 1, 0], sizes = [16, 16, 128], strides = [1, 1, 1]} : vector<18x18x128xf32> to vector<16x16x128xf32>
    %70 = vector.shape_cast %69 : vector<16x16x128xf32> to vector<256x128xf32>
    %71 = arith.truncf %70 : vector<256x128xf32> to vector<256x128xbf16>
    %c2_43 = arith.constant 2 : index
    %c1_44 = arith.constant 1 : index
    %c0_45 = arith.constant 0 : index
    %c0_46 = arith.constant 0 : index
    %72 = vector.load %arg4[%c2_43, %c1_44, %c0_45, %c0_46] : memref<3x3x128x128xbf16, #tpu.memory_space<vmem>>, vector<1x1x128x128xbf16>
    %73 = vector.shape_cast %72 : vector<1x1x128x128xbf16> to vector<128x128xbf16>
    %cst_47 = arith.constant dense<0.000000e+00> : vector<256x128xf32>
    %74 = tpu.matmul %71, %73, %cst_47 {dimension_numbers = #tpu.dot_dimension_numbers<[1], [0], [0], [1], [0, 0, 1, 1], [], []>} : vector<256x128xbf16>, vector<128x128xbf16>, vector<256x128xf32> -> vector<256x128xf32>
    %75 = arith.addf %68, %74 : vector<256x128xf32>
    %76 = vector.extract_strided_slice %20 {offsets = [2, 2, 0], sizes = [16, 16, 128], strides = [1, 1, 1]} : vector<18x18x128xf32> to vector<16x16x128xf32>
    %77 = vector.shape_cast %76 : vector<16x16x128xf32> to vector<256x128xf32>
    %78 = arith.truncf %77 : vector<256x128xf32> to vector<256x128xbf16>
    %c2_48 = arith.constant 2 : index
    %c2_49 = arith.constant 2 : index
    %c0_50 = arith.constant 0 : index
    %c0_51 = arith.constant 0 : index
    %79 = vector.load %arg4[%c2_48, %c2_49, %c0_50, %c0_51] : memref<3x3x128x128xbf16, #tpu.memory_space<vmem>>, vector<1x1x128x128xbf16>
    %80 = vector.shape_cast %79 : vector<1x1x128x128xbf16> to vector<128x128xbf16>
    %cst_52 = arith.constant dense<0.000000e+00> : vector<256x128xf32>
    %81 = tpu.matmul %78, %80, %cst_52 {dimension_numbers = #tpu.dot_dimension_numbers<[1], [0], [0], [1], [0, 0, 1, 1], [], []>} : vector<256x128xbf16>, vector<128x128xbf16>, vector<256x128xf32> -> vector<256x128xf32>
    %82 = arith.addf %75, %81 : vector<256x128xf32>
    %c0_53 = arith.constant 0 : index
    %c0_54 = arith.constant 0 : index
    %83 = vector.load %arg5[%c0_53, %c0_54] : memref<1x128xf32, #tpu.memory_space<vmem>>, vector<1x128xf32>
    %84 = vector.broadcast %83 : vector<1x128xf32> to vector<256x128xf32>
    %85 = arith.addf %82, %84 : vector<256x128xf32>
    %c0_55 = arith.constant 0 : index
    %c0_56 = arith.constant 0 : index
    %c0_57 = arith.constant 0 : index
    %86 = vector.load %arg6[%c0_55, %c0_56, %c0_57] : memref<1x1x128xf32, #tpu.memory_space<vmem>>, vector<1x1x128xf32>
    %87 = vector.shape_cast %86 : vector<1x1x128xf32> to vector<1x128xf32>
    %88 = vector.broadcast %87 : vector<1x128xf32> to vector<256x128xf32>
    %89 = arith.addf %85, %88 : vector<256x128xf32>
    %cst_58 = arith.constant dense<0.000000e+00> : vector<128xf32>
    %90 = vector.multi_reduction <add>, %89, %cst_58 [0] : vector<256x128xf32> to vector<128xf32>
    %91 = vector.shape_cast %90 : vector<128xf32> to vector<1x128xf32>
    %c0_59 = arith.constant 0 : index
    %c0_60 = arith.constant 0 : index
    %c0_61 = arith.constant 0 : index
    %92 = vector.load %arg8[%c0_59, %c0_60, %c0_61] : memref<1x2x128xf32, #tpu.memory_space<vmem>>, vector<1x1x128xf32>
    %93 = vector.shape_cast %92 : vector<1x1x128xf32> to vector<1x128xf32>
    %94 = vector.shape_cast %91 : vector<1x128xf32> to vector<1x1x128xf32>
    tpu.vector_store %arg8[%c0_59, %c0_60, %c0_61], %94 {strides = array<i32>} : memref<1x2x128xf32, #tpu.memory_space<vmem>>, vector<1x1x128xf32>,
    %95 = arith.mulf %89, %89 : vector<256x128xf32>
    %cst_62 = arith.constant dense<0.000000e+00> : vector<128xf32>
    %96 = vector.multi_reduction <add>, %95, %cst_62 [0] : vector<256x128xf32> to vector<128xf32>
    %97 = vector.shape_cast %96 : vector<128xf32> to vector<1x128xf32>
    %c0_63 = arith.constant 0 : index
    %c1_64 = arith.constant 1 : index
    %c0_65 = arith.constant 0 : index
    %98 = vector.load %arg8[%c0_63, %c1_64, %c0_65] : memref<1x2x128xf32, #tpu.memory_space<vmem>>, vector<1x1x128xf32>
    %99 = vector.shape_cast %98 : vector<1x1x128xf32> to vector<1x128xf32>
    %100 = vector.shape_cast %97 : vector<1x128xf32> to vector<1x1x128xf32>
    tpu.vector_store %arg8[%c0_63, %c1_64, %c0_65], %100 {strides = array<i32>} : memref<1x2x128xf32, #tpu.memory_space<vmem>>, vector<1x1x128xf32>,
    %c0_66 = arith.constant 0 : index
    %c0_67 = arith.constant 0 : index
    %c0_68 = arith.constant 0 : index
    %101 = vector.load %arg7[%c0_66, %c0_67, %c0_68] : memref<1x256x128xf32, #tpu.memory_space<vmem>>, vector<1x256x128xf32>
    %102 = vector.shape_cast %101 : vector<1x256x128xf32> to vector<256x128xf32>
    %103 = vector.shape_cast %89 : vector<256x128xf32> to vector<1x256x128xf32>
    tpu.vector_store %arg7[%c0_66, %c0_67, %c0_68], %103 {strides = array<i32>} : memref<1x256x128xf32, #tpu.memory_space<vmem>>, vector<1x256x128xf32>,
    return
  }
  func.func @transform_0(%arg0: i32) -> (i32, i32, i32) {
    %c0_i32 = arith.constant 0 : i32
    %c0_i32_0 = arith.constant 0 : i32
    %c0_i32_1 = arith.constant 0 : i32
    return %arg0, %c0_i32, %c0_i32_0 : i32, i32, i32
  }
  func.func @transform_1(%arg0: i32) -> (i32, i32, i32) {
    %c0_i32 = arith.constant 0 : i32
    %c0_i32_0 = arith.constant 0 : i32
    %c0_i32_1 = arith.constant 0 : i32
    return %arg0, %c0_i32, %c0_i32_0 : i32, i32, i32
  }
  func.func @transform_2(%arg0: i32) -> (i32, i32, i32) {
    %c0_i32 = arith.constant 0 : i32
    %c0_i32_0 = arith.constant 0 : i32
    %c0_i32_1 = arith.constant 0 : i32
    return %arg0, %c0_i32, %c0_i32_0 : i32, i32, i32
  }
  func.func @transform_3(%arg0: i32) -> (i32, i32, i32, i32) {
    %c0_i32 = arith.constant 0 : i32
    %c0_i32_0 = arith.constant 0 : i32
    %c0_i32_1 = arith.constant 0 : i32
    %c0_i32_2 = arith.constant 0 : i32
    %c0_i32_3 = arith.constant 0 : i32
    return %c0_i32, %c0_i32_0, %c0_i32_1, %c0_i32_2 : i32, i32, i32, i32
  }
  func.func @transform_4(%arg0: i32) -> (i32, i32) {
    %c0_i32 = arith.constant 0 : i32
    %c0_i32_0 = arith.constant 0 : i32
    %c0_i32_1 = arith.constant 0 : i32
    return %c0_i32, %c0_i32_0 : i32, i32
  }
  func.func @transform_5(%arg0: i32) -> (i32, i32, i32) {
    %c0_i32 = arith.constant 0 : i32
    %c0_i32_0 = arith.constant 0 : i32
    %c0_i32_1 = arith.constant 0 : i32
    return %arg0, %c0_i32, %c0_i32_0 : i32, i32, i32
  }
  func.func @transform_6(%arg0: i32) -> (i32, i32, i32) {
    %c0_i32 = arith.constant 0 : i32
    %c0_i32_0 = arith.constant 0 : i32
    %c0_i32_1 = arith.constant 0 : i32
    return %arg0, %c0_i32, %c0_i32_0 : i32, i32, i32
  }
  func.func @transform_7(%arg0: i32) -> (i32, i32, i32) {
    %c0_i32 = arith.constant 0 : i32
    %c0_i32_0 = arith.constant 0 : i32
    %c0_i32_1 = arith.constant 0 : i32
    return %arg0, %c0_i32, %c0_i32_0 : i32, i32, i32
  }
}

module attributes {stable_mosaic.version = 11 : i64} {
  func.func @_fused_conv3x3_kernel(%arg0: i32, %arg1: memref<1x256x128xf32, #tpu.memory_space<vmem>>, %arg2: memref<1x1x128xf32, #tpu.memory_space<vmem>>, %arg3: memref<1x1x128xf32, #tpu.memory_space<vmem>>, %arg4: memref<3x3x128x128xbf16, #tpu.memory_space<vmem>>, %arg5: memref<1x128xf32, #tpu.memory_space<vmem>>, %arg6: memref<1x256x128xf32, #tpu.memory_space<vmem>>, %arg7: memref<1x256x128xf32, #tpu.memory_space<vmem>>) attributes {dimension_semantics = [#tpu.dimension_semantics<parallel>], iteration_bounds = array<i64: 2>, scalar_prefetch = 0 : i64, scratch_operands = 0 : i64, tpu.core_type = #tpu.core_type<tc>, window_params = [{transform_indices = @transform_0, window_bounds = array<i64: 1, 256, 128>}, {transform_indices = @transform_1, window_bounds = array<i64: 1, 1, 128>}, {transform_indices = @transform_2, window_bounds = array<i64: 1, 1, 128>}, {pipeline_mode = #tpu.pipeline_mode<synchronous>, transform_indices = @transform_3, window_bounds = array<i64: 3, 3, 128, 128>}, {pipeline_mode = #tpu.pipeline_mode<synchronous>, transform_indices = @transform_4, window_bounds = array<i64: 1, 128>}, {transform_indices = @transform_5, window_bounds = array<i64: 1, 256, 128>}, {transform_indices = @transform_6, window_bounds = array<i64: 1, 256, 128>}]} {
    %c0 = arith.constant 0 : index
    %c0_0 = arith.constant 0 : index
    %c0_1 = arith.constant 0 : index
    %0 = vector.load %arg1[%c0, %c0_0, %c0_1] : memref<1x256x128xf32, #tpu.memory_space<vmem>>, vector<1x256x128xf32>
    %1 = vector.shape_cast %0 : vector<1x256x128xf32> to vector<256x128xf32>
    %c0_2 = arith.constant 0 : index
    %c0_3 = arith.constant 0 : index
    %c0_4 = arith.constant 0 : index
    %2 = vector.load %arg2[%c0_2, %c0_3, %c0_4] : memref<1x1x128xf32, #tpu.memory_space<vmem>>, vector<1x1x128xf32>
    %3 = vector.shape_cast %2 : vector<1x1x128xf32> to vector<1x128xf32>
    %4 = vector.broadcast %3 : vector<1x128xf32> to vector<256x128xf32>
    %5 = arith.mulf %1, %4 : vector<256x128xf32>
    %c0_5 = arith.constant 0 : index
    %c0_6 = arith.constant 0 : index
    %c0_7 = arith.constant 0 : index
    %6 = vector.load %arg3[%c0_5, %c0_6, %c0_7] : memref<1x1x128xf32, #tpu.memory_space<vmem>>, vector<1x1x128xf32>
    %7 = vector.shape_cast %6 : vector<1x1x128xf32> to vector<1x128xf32>
    %8 = vector.broadcast %7 : vector<1x128xf32> to vector<256x128xf32>
    %9 = arith.addf %5, %8 : vector<256x128xf32>
    %10 = arith.negf %9 : vector<256x128xf32>
    %11 = math.exp %10 : vector<256x128xf32>
    %cst = arith.constant 1.000000e+00 : f32
    %12 = vector.broadcast %cst : f32 to vector<256x128xf32>
    %13 = arith.addf %12, %11 : vector<256x128xf32>
    %14 = arith.divf %12, %13 : vector<256x128xf32>
    %15 = arith.mulf %9, %14 : vector<256x128xf32>
    %16 = vector.shape_cast %15 : vector<256x128xf32> to vector<16x16x128xf32>
    %cst_8 = arith.constant 0.000000e+00 : f32
    %17 = vector.broadcast %cst_8 : f32 to vector<1x16x128xf32>
    %cst_9 = arith.constant 0.000000e+00 : f32
    %18 = vector.broadcast %cst_9 : f32 to vector<18x1x128xf32>
    %19 = tpu.concatenate %17, %16, %17 in 0 : vector<1x16x128xf32>, vector<16x16x128xf32>, vector<1x16x128xf32> -> vector<18x16x128xf32>
    %20 = tpu.concatenate %18, %19, %18 in 1 : vector<18x1x128xf32>, vector<18x16x128xf32>, vector<18x1x128xf32> -> vector<18x18x128xf32>
    %21 = vector.extract_strided_slice %20 {offsets = [0, 0, 0], sizes = [16, 16, 128], strides = [1, 1, 1]} : vector<18x18x128xf32> to vector<16x16x128xf32>
    %22 = vector.shape_cast %21 : vector<16x16x128xf32> to vector<256x128xf32>
    %23 = arith.truncf %22 : vector<256x128xf32> to vector<256x128xbf16>
    %c0_10 = arith.constant 0 : index
    %c0_11 = arith.constant 0 : index
    %c0_12 = arith.constant 0 : index
    %c0_13 = arith.constant 0 : index
    %24 = vector.load %arg4[%c0_10, %c0_11, %c0_12, %c0_13] : memref<3x3x128x128xbf16, #tpu.memory_space<vmem>>, vector<1x1x128x128xbf16>
    %25 = vector.shape_cast %24 : vector<1x1x128x128xbf16> to vector<128x128xbf16>
    %cst_14 = arith.constant dense<0.000000e+00> : vector<256x128xf32>
    %26 = tpu.matmul %23, %25, %cst_14 {dimension_numbers = #tpu.dot_dimension_numbers<[1], [0], [0], [1], [0, 0, 1, 1], [], []>} : vector<256x128xbf16>, vector<128x128xbf16>, vector<256x128xf32> -> vector<256x128xf32>
    %27 = vector.extract_strided_slice %20 {offsets = [0, 1, 0], sizes = [16, 16, 128], strides = [1, 1, 1]} : vector<18x18x128xf32> to vector<16x16x128xf32>
    %28 = vector.shape_cast %27 : vector<16x16x128xf32> to vector<256x128xf32>
    %29 = arith.truncf %28 : vector<256x128xf32> to vector<256x128xbf16>
    %c0_15 = arith.constant 0 : index
    %c1 = arith.constant 1 : index
    %c0_16 = arith.constant 0 : index
    %c0_17 = arith.constant 0 : index
    %30 = vector.load %arg4[%c0_15, %c1, %c0_16, %c0_17] : memref<3x3x128x128xbf16, #tpu.memory_space<vmem>>, vector<1x1x128x128xbf16>
    %31 = vector.shape_cast %30 : vector<1x1x128x128xbf16> to vector<128x128xbf16>
    %cst_18 = arith.constant dense<0.000000e+00> : vector<256x128xf32>
    %32 = tpu.matmul %29, %31, %cst_18 {dimension_numbers = #tpu.dot_dimension_numbers<[1], [0], [0], [1], [0, 0, 1, 1], [], []>} : vector<256x128xbf16>, vector<128x128xbf16>, vector<256x128xf32> -> vector<256x128xf32>
    %33 = arith.addf %26, %32 : vector<256x128xf32>
    %34 = vector.extract_strided_slice %20 {offsets = [0, 2, 0], sizes = [16, 16, 128], strides = [1, 1, 1]} : vector<18x18x128xf32> to vector<16x16x128xf32>
    %35 = vector.shape_cast %34 : vector<16x16x128xf32> to vector<256x128xf32>
    %36 = arith.truncf %35 : vector<256x128xf32> to vector<256x128xbf16>
    %c0_19 = arith.constant 0 : index
    %c2 = arith.constant 2 : index
    %c0_20 = arith.constant 0 : index
    %c0_21 = arith.constant 0 : index
    %37 = vector.load %arg4[%c0_19, %c2, %c0_20, %c0_21] : memref<3x3x128x128xbf16, #tpu.memory_space<vmem>>, vector<1x1x128x128xbf16>
    %38 = vector.shape_cast %37 : vector<1x1x128x128xbf16> to vector<128x128xbf16>
    %cst_22 = arith.constant dense<0.000000e+00> : vector<256x128xf32>
    %39 = tpu.matmul %36, %38, %cst_22 {dimension_numbers = #tpu.dot_dimension_numbers<[1], [0], [0], [1], [0, 0, 1, 1], [], []>} : vector<256x128xbf16>, vector<128x128xbf16>, vector<256x128xf32> -> vector<256x128xf32>
    %40 = arith.addf %33, %39 : vector<256x128xf32>
    %41 = vector.extract_strided_slice %20 {offsets = [1, 0, 0], sizes = [16, 16, 128], strides = [1, 1, 1]} : vector<18x18x128xf32> to vector<16x16x128xf32>
    %42 = vector.shape_cast %41 : vector<16x16x128xf32> to vector<256x128xf32>
    %43 = arith.truncf %42 : vector<256x128xf32> to vector<256x128xbf16>
    %c1_23 = arith.constant 1 : index
    %c0_24 = arith.constant 0 : index
    %c0_25 = arith.constant 0 : index
    %c0_26 = arith.constant 0 : index
    %44 = vector.load %arg4[%c1_23, %c0_24, %c0_25, %c0_26] : memref<3x3x128x128xbf16, #tpu.memory_space<vmem>>, vector<1x1x128x128xbf16>
    %45 = vector.shape_cast %44 : vector<1x1x128x128xbf16> to vector<128x128xbf16>
    %cst_27 = arith.constant dense<0.000000e+00> : vector<256x128xf32>
    %46 = tpu.matmul %43, %45, %cst_27 {dimension_numbers = #tpu.dot_dimension_numbers<[1], [0], [0], [1], [0, 0, 1, 1], [], []>} : vector<256x128xbf16>, vector<128x128xbf16>, vector<256x128xf32> -> vector<256x128xf32>
    %47 = arith.addf %40, %46 : vector<256x128xf32>
    %48 = vector.extract_strided_slice %20 {offsets = [1, 1, 0], sizes = [16, 16, 128], strides = [1, 1, 1]} : vector<18x18x128xf32> to vector<16x16x128xf32>
    %49 = vector.shape_cast %48 : vector<16x16x128xf32> to vector<256x128xf32>
    %50 = arith.truncf %49 : vector<256x128xf32> to vector<256x128xbf16>
    %c1_28 = arith.constant 1 : index
    %c1_29 = arith.constant 1 : index
    %c0_30 = arith.constant 0 : index
    %c0_31 = arith.constant 0 : index
    %51 = vector.load %arg4[%c1_28, %c1_29, %c0_30, %c0_31] : memref<3x3x128x128xbf16, #tpu.memory_space<vmem>>, vector<1x1x128x128xbf16>
    %52 = vector.shape_cast %51 : vector<1x1x128x128xbf16> to vector<128x128xbf16>
    %cst_32 = arith.constant dense<0.000000e+00> : vector<256x128xf32>
    %53 = tpu.matmul %50, %52, %cst_32 {dimension_numbers = #tpu.dot_dimension_numbers<[1], [0], [0], [1], [0, 0, 1, 1], [], []>} : vector<256x128xbf16>, vector<128x128xbf16>, vector<256x128xf32> -> vector<256x128xf32>
    %54 = arith.addf %47, %53 : vector<256x128xf32>
    %55 = vector.extract_strided_slice %20 {offsets = [1, 2, 0], sizes = [16, 16, 128], strides = [1, 1, 1]} : vector<18x18x128xf32> to vector<16x16x128xf32>
    %56 = vector.shape_cast %55 : vector<16x16x128xf32> to vector<256x128xf32>
    %57 = arith.truncf %56 : vector<256x128xf32> to vector<256x128xbf16>
    %c1_33 = arith.constant 1 : index
    %c2_34 = arith.constant 2 : index
    %c0_35 = arith.constant 0 : index
    %c0_36 = arith.constant 0 : index
    %58 = vector.load %arg4[%c1_33, %c2_34, %c0_35, %c0_36] : memref<3x3x128x128xbf16, #tpu.memory_space<vmem>>, vector<1x1x128x128xbf16>
    %59 = vector.shape_cast %58 : vector<1x1x128x128xbf16> to vector<128x128xbf16>
    %cst_37 = arith.constant dense<0.000000e+00> : vector<256x128xf32>
    %60 = tpu.matmul %57, %59, %cst_37 {dimension_numbers = #tpu.dot_dimension_numbers<[1], [0], [0], [1], [0, 0, 1, 1], [], []>} : vector<256x128xbf16>, vector<128x128xbf16>, vector<256x128xf32> -> vector<256x128xf32>
    %61 = arith.addf %54, %60 : vector<256x128xf32>
    %62 = vector.extract_strided_slice %20 {offsets = [2, 0, 0], sizes = [16, 16, 128], strides = [1, 1, 1]} : vector<18x18x128xf32> to vector<16x16x128xf32>
    %63 = vector.shape_cast %62 : vector<16x16x128xf32> to vector<256x128xf32>
    %64 = arith.truncf %63 : vector<256x128xf32> to vector<256x128xbf16>
    %c2_38 = arith.constant 2 : index
    %c0_39 = arith.constant 0 : index
    %c0_40 = arith.constant 0 : index
    %c0_41 = arith.constant 0 : index
    %65 = vector.load %arg4[%c2_38, %c0_39, %c0_40, %c0_41] : memref<3x3x128x128xbf16, #tpu.memory_space<vmem>>, vector<1x1x128x128xbf16>
    %66 = vector.shape_cast %65 : vector<1x1x128x128xbf16> to vector<128x128xbf16>
    %cst_42 = arith.constant dense<0.000000e+00> : vector<256x128xf32>
    %67 = tpu.matmul %64, %66, %cst_42 {dimension_numbers = #tpu.dot_dimension_numbers<[1], [0], [0], [1], [0, 0, 1, 1], [], []>} : vector<256x128xbf16>, vector<128x128xbf16>, vector<256x128xf32> -> vector<256x128xf32>
    %68 = arith.addf %61, %67 : vector<256x128xf32>
    %69 = vector.extract_strided_slice %20 {offsets = [2, 1, 0], sizes = [16, 16, 128], strides = [1, 1, 1]} : vector<18x18x128xf32> to vector<16x16x128xf32>
    %70 = vector.shape_cast %69 : vector<16x16x128xf32> to vector<256x128xf32>
    %71 = arith.truncf %70 : vector<256x128xf32> to vector<256x128xbf16>
    %c2_43 = arith.constant 2 : index
    %c1_44 = arith.constant 1 : index
    %c0_45 = arith.constant 0 : index
    %c0_46 = arith.constant 0 : index
    %72 = vector.load %arg4[%c2_43, %c1_44, %c0_45, %c0_46] : memref<3x3x128x128xbf16, #tpu.memory_space<vmem>>, vector<1x1x128x128xbf16>
    %73 = vector.shape_cast %72 : vector<1x1x128x128xbf16> to vector<128x128xbf16>
    %cst_47 = arith.constant dense<0.000000e+00> : vector<256x128xf32>
    %74 = tpu.matmul %71, %73, %cst_47 {dimension_numbers = #tpu.dot_dimension_numbers<[1], [0], [0], [1], [0, 0, 1, 1], [], []>} : vector<256x128xbf16>, vector<128x128xbf16>, vector<256x128xf32> -> vector<256x128xf32>
    %75 = arith.addf %68, %74 : vector<256x128xf32>
    %76 = vector.extract_strided_slice %20 {offsets = [2, 2, 0], sizes = [16, 16, 128], strides = [1, 1, 1]} : vector<18x18x128xf32> to vector<16x16x128xf32>
    %77 = vector.shape_cast %76 : vector<16x16x128xf32> to vector<256x128xf32>
    %78 = arith.truncf %77 : vector<256x128xf32> to vector<256x128xbf16>
    %c2_48 = arith.constant 2 : index
    %c2_49 = arith.constant 2 : index
    %c0_50 = arith.constant 0 : index
    %c0_51 = arith.constant 0 : index
    %79 = vector.load %arg4[%c2_48, %c2_49, %c0_50, %c0_51] : memref<3x3x128x128xbf16, #tpu.memory_space<vmem>>, vector<1x1x128x128xbf16>
    %80 = vector.shape_cast %79 : vector<1x1x128x128xbf16> to vector<128x128xbf16>
    %cst_52 = arith.constant dense<0.000000e+00> : vector<256x128xf32>
    %81 = tpu.matmul %78, %80, %cst_52 {dimension_numbers = #tpu.dot_dimension_numbers<[1], [0], [0], [1], [0, 0, 1, 1], [], []>} : vector<256x128xbf16>, vector<128x128xbf16>, vector<256x128xf32> -> vector<256x128xf32>
    %82 = arith.addf %75, %81 : vector<256x128xf32>
    %c0_53 = arith.constant 0 : index
    %c0_54 = arith.constant 0 : index
    %83 = vector.load %arg5[%c0_53, %c0_54] : memref<1x128xf32, #tpu.memory_space<vmem>>, vector<1x128xf32>
    %84 = vector.broadcast %83 : vector<1x128xf32> to vector<256x128xf32>
    %85 = arith.addf %82, %84 : vector<256x128xf32>
    %c0_55 = arith.constant 0 : index
    %c0_56 = arith.constant 0 : index
    %c0_57 = arith.constant 0 : index
    %86 = vector.load %arg6[%c0_55, %c0_56, %c0_57] : memref<1x256x128xf32, #tpu.memory_space<vmem>>, vector<1x256x128xf32>
    %87 = vector.shape_cast %86 : vector<1x256x128xf32> to vector<256x128xf32>
    %88 = arith.addf %85, %87 : vector<256x128xf32>
    %c0_58 = arith.constant 0 : index
    %c0_59 = arith.constant 0 : index
    %c0_60 = arith.constant 0 : index
    %89 = vector.load %arg7[%c0_58, %c0_59, %c0_60] : memref<1x256x128xf32, #tpu.memory_space<vmem>>, vector<1x256x128xf32>
    %90 = vector.shape_cast %89 : vector<1x256x128xf32> to vector<256x128xf32>
    %91 = vector.shape_cast %88 : vector<256x128xf32> to vector<1x256x128xf32>
    tpu.vector_store %arg7[%c0_58, %c0_59, %c0_60], %91 {strides = array<i32>} : memref<1x256x128xf32, #tpu.memory_space<vmem>>, vector<1x256x128xf32>,
    return
  }
  func.func @transform_0(%arg0: i32) -> (i32, i32, i32) {
    %c0_i32 = arith.constant 0 : i32
    %c0_i32_0 = arith.constant 0 : i32
    %c0_i32_1 = arith.constant 0 : i32
    return %arg0, %c0_i32, %c0_i32_0 : i32, i32, i32
  }
  func.func @transform_1(%arg0: i32) -> (i32, i32, i32) {
    %c0_i32 = arith.constant 0 : i32
    %c0_i32_0 = arith.constant 0 : i32
    %c0_i32_1 = arith.constant 0 : i32
    return %arg0, %c0_i32, %c0_i32_0 : i32, i32, i32
  }
  func.func @transform_2(%arg0: i32) -> (i32, i32, i32) {
    %c0_i32 = arith.constant 0 : i32
    %c0_i32_0 = arith.constant 0 : i32
    %c0_i32_1 = arith.constant 0 : i32
    return %arg0, %c0_i32, %c0_i32_0 : i32, i32, i32
  }
  func.func @transform_3(%arg0: i32) -> (i32, i32, i32, i32) {
    %c0_i32 = arith.constant 0 : i32
    %c0_i32_0 = arith.constant 0 : i32
    %c0_i32_1 = arith.constant 0 : i32
    %c0_i32_2 = arith.constant 0 : i32
    %c0_i32_3 = arith.constant 0 : i32
    return %c0_i32, %c0_i32_0, %c0_i32_1, %c0_i32_2 : i32, i32, i32, i32
  }
  func.func @transform_4(%arg0: i32) -> (i32, i32) {
    %c0_i32 = arith.constant 0 : i32
    %c0_i32_0 = arith.constant 0 : i32
    %c0_i32_1 = arith.constant 0 : i32
    return %c0_i32, %c0_i32_0 : i32, i32
  }
  func.func @transform_5(%arg0: i32) -> (i32, i32, i32) {
    %c0_i32 = arith.constant 0 : i32
    %c0_i32_0 = arith.constant 0 : i32
    %c0_i32_1 = arith.constant 0 : i32
    return %arg0, %c0_i32, %c0_i32_0 : i32, i32, i32
  }
  func.func @transform_6(%arg0: i32) -> (i32, i32, i32) {
    %c0_i32 = arith.constant 0 : i32
    %c0_i32_0 = arith.constant 0 : i32
    %c0_i32_1 = arith.constant 0 : i32
    return %arg0, %c0_i32, %c0_i32_0 : i32, i32, i32
  }
}

</mosaic_0001>

<bundles_post_ra>
// kernel: squeeze.4
= control target key start
LH: loop header
LB: loop body
LE: loop exit
PB: predicated region body
PF: predicated region fallthrough
CT: control target
= control target key end

     0   :  { %s355_s8 = smov 116   ;;  %s356_s9 = smov 120   ;;  %vm8_vm0 = vcmask 31744   ;;  %s654_s0 = inlined_call_operand.vmem [shape: f32[2,128], index: 0, kind: input, shape index: {}]   ;;  %s655_s1 = inlined_call_operand.vmem [shape: f32[2,32,4], index: 1, kind: output, shape index: {}]  }
   0x1   :  { %v5_v0 = vld [vmem:[%s654_s0] sm:$0x3]  ;;  %s354_s0 = smov 124   ;;  %s357_s10 = smov 112  }
   0x2   :  { %6 = vst [vmem:[#allocation0] sm:$0x3] %v5_v0  ;;  %s358_s11 = smov 108   ;;  %s359_s12 = smov 104  }
   0x3   :  { %s360_s13 = smov 100   ;;  %s361_s14 = smov 96  }
   0x4   :  { %s362_s15 = smov 92   ;;  %s363_s16 = smov 88  }
   0x5   :  { %s364_s17 = smov 84   ;;  %s365_s18 = smov 80  }
   0x6   :  { %s366_s19 = smov 76   ;;  %s367_s20 = smov 72  }
   0x7   :  { %s368_s21 = smov 68   ;;  %s369_s22 = smov 64  }
   0x8   :  { %s370_s23 = smov 60   ;;  %s371_s24 = smov 56  }
   0x9   :  { %v12_v1 = vld [vmem:[#allocation0] sm:$0x3]   ;;  %s372_s25 = smov 52   ;;  %s373_s26 = smov 48  }
   0xa   :  { %v28_v2 = vld [vmem:[#allocation0] sm:$0x3]   ;;  %13 = vrot.lane.b32.xlu0 %v12_v1, %s354_s0  ;;  %s374_s27 = smov 44   ;;  %s375_s28 = smov 40  }
   0xb   :  { %29 = vrot.lane.b32.xlu1 %v28_v2, %s355_s8  ;;  %v20_v3 = vld [vmem:[#allocation0] sm:$0x3]   ;;  %s376_s29 = smov 36   ;;  %s377_s30 = smov 32  }
   0xc   :  { %v36_v4 = vld [vmem:[#allocation0] sm:$0x3]   ;;  %s378_s6 = smov 28   ;;  %s379_s7 = smov 24  }
   0xd   :  { %v44_v5 = vld [vmem:[#allocation0] sm:$0x3]   ;;  %s380_s0 = smov 20   ;;  %s381_s8 = smov 16  }
   0xe   :  { %21 = vrot.lane.b32.xlu0 %v20_v3, %s356_s9  ;;  %v52_v6 = vld [vmem:[#allocation0] sm:$0x3]   ;;  %s382_s9 = smov 12  }
   0xf   :  { %37 = vrot.lane.b32.xlu1 %v36_v4, %s357_s10  ;;  %v60_v7 = vld [vmem:[#allocation0] sm:$0x3]   ;;  %s383_s10 = smov 8  }
  0x10   :  { %v68_v8 = vld [vmem:[#allocation0] sm:$0x3]  }
  0x11   :  { %v76_v9 = vld [vmem:[#allocation0] sm:$0x3]  }
  0x12   :  { %45 = vrot.lane.b32.xlu0 %v44_v5, %s358_s11  ;;  %v84_v10 = vld [vmem:[#allocation0] sm:$0x3]   ;;  %s384_s11 = smov 4  }
  0x13   :  { %53 = vrot.lane.b32.xlu1 %v52_v6, %s359_s12  ;;  %v92_v11 = vld [vmem:[#allocation0] sm:$0x3]  }
  0x14   :  { %v100_v12 = vld [vmem:[#allocation0] sm:$0x3]  }
  0x15   :  { %v108_v13 = vld [vmem:[#allocation0] sm:$0x3]  }
  0x16   :  { %61 = vrot.lane.b32.xlu0 %v60_v7, %s360_s13  ;;  %v116_v14 = vld [vmem:[#allocation0] sm:$0x3]  }
  0x17   :  { %69 = vrot.lane.b32.xlu1 %v68_v8, %s361_s14  ;;  %v124_v15 = vld [vmem:[#allocation0] sm:$0x3]  }
  0x18   :  { %v132_v16 = vld [vmem:[#allocation0] sm:$0x3]  }
  0x19   :  { %v140_v17 = vld [vmem:[#allocation0] sm:$0x3]  }
  0x1a   :  { %77 = vrot.lane.b32.xlu0 %v76_v9, %s362_s15  ;;  %v148_v18 = vld [vmem:[#allocation0] sm:$0x3]  }
  0x1b   :  { %85 = vrot.lane.b32.xlu1 %v84_v10, %s363_s16  ;;  %v156_v19 = vld [vmem:[#allocation0] sm:$0x3]  }
  0x1c   :  { %v164_v20 = vld [vmem:[#allocation0] sm:$0x3]  }
  0x1d   :  { %v172_v21 = vld [vmem:[#allocation0] sm:$0x3]  }
  0x1e   :  { %93 = vrot.lane.b32.xlu0 %v92_v11, %s364_s17  ;;  %v180_v22 = vld [vmem:[#allocation0] sm:$0x3]  }
  0x1f   :  { %101 = vrot.lane.b32.xlu1 %v100_v12, %s365_s18  ;;  %v188_v23 = vld [vmem:[#allocation0] sm:$0x3]  }
  0x20   :  { %v196_v24 = vld [vmem:[#allocation0] sm:$0x3]  }
  0x21   :  { %v204_v25 = vld [vmem:[#allocation0] sm:$0x3]  }
  0x22   :  { %109 = vrot.lane.b32.xlu0 %v108_v13, %s366_s19  ;;  %v212_v26 = vld [vmem:[#allocation0] sm:$0x3]  }
  0x23   :  { %117 = vrot.lane.b32.xlu1 %v116_v14, %s367_s20  ;;  %v7_v27 = vld [vmem:[#allocation0] sm:$0x3]  }
  0x24   :  { %9 = vst.msk [vmem:[%s655_s1] sm:$0x1] %vm8_vm0, %v7_v27   ;;  %260 = vst.msk [vmem:[%s655_s1 + $0x1f] sm:$0x2] %vm8_vm0, %v7_v27   ;;  %v220_v28 = vld [vmem:[#allocation0] sm:$0x3]  }
  0x25   :  { %v228_v29 = vld [vmem:[#allocation0] sm:$0x3]  }
  0x26   :  { %125 = vrot.lane.b32.xlu0 %v124_v15, %s368_s21  ;;  %v236_v30 = vld [vmem:[#allocation0] sm:$0x3]  }
  0x27   :  { %133 = vrot.lane.b32.xlu1 %v132_v16, %s369_s22  ;;  %v244_v31 = vld [vmem:[#allocation0] sm:$0x3]  }
  0x28   :  { %v252_v32 = vld [vmem:[#allocation0] sm:$0x3]  }
  0x2a   :  { %141 = vrot.lane.b32.xlu0 %v140_v17, %s370_s23 }
  0x2b   :  { %149 = vrot.lane.b32.xlu1 %v148_v18, %s371_s24 }
  0x2e   :  { %157 = vrot.lane.b32.xlu0 %v156_v19, %s372_s25 }
  0x2f   :  { %165 = vrot.lane.b32.xlu1 %v164_v20, %s373_s26 }
  0x32   :  { %173 = vrot.lane.b32.xlu0 %v172_v21, %s374_s27 }
  0x33   :  { %181 = vrot.lane.b32.xlu1 %v180_v22, %s375_s28 }
  0x36   :  { %189 = vrot.lane.b32.xlu0 %v188_v23, %s376_s29 }
  0x37   :  { %197 = vrot.lane.b32.xlu1 %v196_v24, %s377_s30 }
  0x3a   :  { %205 = vrot.lane.b32.xlu0 %v204_v25, %s378_s6 }
  0x3b   :  { %213 = vrot.lane.b32.xlu1 %v212_v26, %s379_s7 }
  0x3e   :  { %221 = vrot.lane.b32.xlu0 %v220_v28, %s380_s0 }
  0x3f   :  { %229 = vrot.lane.b32.xlu1 %v228_v29, %s381_s8 }
  0x42   :  { %237 = vrot.lane.b32.xlu0 %v236_v30, %s382_s9 }
  0x43   :  { %245 = vrot.lane.b32.xlu1 %v244_v31, %s383_s10 }
  0x46   :  { %253 = vrot.lane.b32.xlu0 %v252_v32, %s384_s11 }
  0x7c   :  { %v14_v33 = vpop.permute.xlu0 %13  }
  0x7d   :  { %v30_v34 = vpop.permute.xlu1 %29   ;;  %261 = vst.msk [vmem:[%s655_s1 + $0x1] sm:$0x1] %vm8_vm0, %v14_v33   ;;  %262 = vst.msk [vmem:[%s655_s1 + $0x20] sm:$0x2] %vm8_vm0, %v14_v33  }
  0x7e   :  { %265 = vst.msk [vmem:[%s655_s1 + $0x3] sm:$0x1] %vm8_vm0, %v30_v34   ;;  %266 = vst.msk [vmem:[%s655_s1 + $0x22] sm:$0x2] %vm8_vm0, %v30_v34  }
  0x80   :  { %v22_v35 = vpop.permute.xlu0 %21  }
  0x81   :  { %v38_v36 = vpop.permute.xlu1 %37   ;;  %263 = vst.msk [vmem:[%s655_s1 + $0x2] sm:$0x1] %vm8_vm0, %v22_v35   ;;  %264 = vst.msk [vmem:[%s655_s1 + $0x21] sm:$0x2] %vm8_vm0, %v22_v35  }
  0x82   :  { %267 = vst.msk [vmem:[%s655_s1 + $0x4] sm:$0x1] %vm8_vm0, %v38_v36   ;;  %268 = vst.msk [vmem:[%s655_s1 + $0x23] sm:$0x2] %vm8_vm0, %v38_v36  }
  0x84   :  { %v46_v37 = vpop.permute.xlu0 %45  }
  0x85   :  { %v54_v38 = vpop.permute.xlu1 %53   ;;  %269 = vst.msk [vmem:[%s655_s1 + $0x5] sm:$0x1] %vm8_vm0, %v46_v37   ;;  %270 = vst.msk [vmem:[%s655_s1 + $0x24] sm:$0x2] %vm8_vm0, %v46_v37  }
  0x86   :  { %271 = vst.msk [vmem:[%s655_s1 + $0x6] sm:$0x1] %vm8_vm0, %v54_v38   ;;  %272 = vst.msk [vmem:[%s655_s1 + $0x25] sm:$0x2] %vm8_vm0, %v54_v38  }
  0x88   :  { %v62_v39 = vpop.permute.xlu0 %61  }
  0x89   :  { %v70_v40 = vpop.permute.xlu1 %69   ;;  %273 = vst.msk [vmem:[%s655_s1 + $0x7] sm:$0x1] %vm8_vm0, %v62_v39   ;;  %274 = vst.msk [vmem:[%s655_s1 + $0x26] sm:$0x2] %vm8_vm0, %v62_v39  }
  0x8a   :  { %275 = vst.msk [vmem:[%s655_s1 + $0x8] sm:$0x1] %vm8_vm0, %v70_v40   ;;  %276 = vst.msk [vmem:[%s655_s1 + $0x27] sm:$0x2] %vm8_vm0, %v70_v40  }
  0x8c   :  { %v78_v41 = vpop.permute.xlu0 %77  }
  0x8d   :  { %v86_v42 = vpop.permute.xlu1 %85   ;;  %277 = vst.msk [vmem:[%s655_s1 + $0x9] sm:$0x1] %vm8_vm0, %v78_v41   ;;  %278 = vst.msk [vmem:[%s655_s1 + $0x28] sm:$0x2] %vm8_vm0, %v78_v41  }
  0x8e   :  { %279 = vst.msk [vmem:[%s655_s1 + $0xa] sm:$0x1] %vm8_vm0, %v86_v42   ;;  %280 = vst.msk [vmem:[%s655_s1 + $0x29] sm:$0x2] %vm8_vm0, %v86_v42  }
  0x90   :  { %v94_v43 = vpop.permute.xlu0 %93  }
  0x91   :  { %v102_v44 = vpop.permute.xlu1 %101   ;;  %281 = vst.msk [vmem:[%s655_s1 + $0xb] sm:$0x1] %vm8_vm0, %v94_v43   ;;  %282 = vst.msk [vmem:[%s655_s1 + $0x2a] sm:$0x2] %vm8_vm0, %v94_v43  }
  0x92   :  { %283 = vst.msk [vmem:[%s655_s1 + $0xc] sm:$0x1] %vm8_vm0, %v102_v44   ;;  %284 = vst.msk [vmem:[%s655_s1 + $0x2b] sm:$0x2] %vm8_vm0, %v102_v44  }
  0x94   :  { %v110_v45 = vpop.permute.xlu0 %109  }
  0x95   :  { %v118_v46 = vpop.permute.xlu1 %117   ;;  %285 = vst.msk [vmem:[%s655_s1 + $0xd] sm:$0x1] %vm8_vm0, %v110_v45   ;;  %286 = vst.msk [vmem:[%s655_s1 + $0x2c] sm:$0x2] %vm8_vm0, %v110_v45  }
  0x96   :  { %287 = vst.msk [vmem:[%s655_s1 + $0xe] sm:$0x1] %vm8_vm0, %v118_v46   ;;  %288 = vst.msk [vmem:[%s655_s1 + $0x2d] sm:$0x2] %vm8_vm0, %v118_v46  }
  0x98   :  { %v126_v47 = vpop.permute.xlu0 %125  }
  0x99   :  { %v134_v48 = vpop.permute.xlu1 %133   ;;  %289 = vst.msk [vmem:[%s655_s1 + $0xf] sm:$0x1] %vm8_vm0, %v126_v47   ;;  %290 = vst.msk [vmem:[%s655_s1 + $0x2e] sm:$0x2] %vm8_vm0, %v126_v47  }
  0x9a   :  { %291 = vst.msk [vmem:[%s655_s1 + $0x10] sm:$0x1] %vm8_vm0, %v134_v48   ;;  %292 = vst.msk [vmem:[%s655_s1 + $0x2f] sm:$0x2] %vm8_vm0, %v134_v48  }
  0x9c   :  { %v142_v49 = vpop.permute.xlu0 %141  }
  0x9d   :  { %v150_v50 = vpop.permute.xlu1 %149   ;;  %293 = vst.msk [vmem:[%s655_s1 + $0x11] sm:$0x1] %vm8_vm0, %v142_v49   ;;  %294 = vst.msk [vmem:[%s655_s1 + $0x30] sm:$0x2] %vm8_vm0, %v142_v49  }
  0x9e   :  { %295 = vst.msk [vmem:[%s655_s1 + $0x12] sm:$0x1] %vm8_vm0, %v150_v50   ;;  %296 = vst.msk [vmem:[%s655_s1 + $0x31] sm:$0x2] %vm8_vm0, %v150_v50  }
  0xa0   :  { %v158_v51 = vpop.permute.xlu0 %157  }
  0xa1   :  { %v166_v52 = vpop.permute.xlu1 %165   ;;  %297 = vst.msk [vmem:[%s655_s1 + $0x13] sm:$0x1] %vm8_vm0, %v158_v51   ;;  %298 = vst.msk [vmem:[%s655_s1 + $0x32] sm:$0x2] %vm8_vm0, %v158_v51  }
  0xa2   :  { %299 = vst.msk [vmem:[%s655_s1 + $0x14] sm:$0x1] %vm8_vm0, %v166_v52   ;;  %300 = vst.msk [vmem:[%s655_s1 + $0x33] sm:$0x2] %vm8_vm0, %v166_v52  }
  0xa4   :  { %v174_v53 = vpop.permute.xlu0 %173  }
  0xa5   :  { %v182_v54 = vpop.permute.xlu1 %181   ;;  %301 = vst.msk [vmem:[%s655_s1 + $0x15] sm:$0x1] %vm8_vm0, %v174_v53   ;;  %302 = vst.msk [vmem:[%s655_s1 + $0x34] sm:$0x2] %vm8_vm0, %v174_v53  }
  0xa6   :  { %303 = vst.msk [vmem:[%s655_s1 + $0x16] sm:$0x1] %vm8_vm0, %v182_v54   ;;  %304 = vst.msk [vmem:[%s655_s1 + $0x35] sm:$0x2] %vm8_vm0, %v182_v54  }
  0xa8   :  { %v190_v55 = vpop.permute.xlu0 %189  }
  0xa9   :  { %v198_v56 = vpop.permute.xlu1 %197   ;;  %305 = vst.msk [vmem:[%s655_s1 + $0x17] sm:$0x1] %vm8_vm0, %v190_v55   ;;  %306 = vst.msk [vmem:[%s655_s1 + $0x36] sm:$0x2] %vm8_vm0, %v190_v55  }
  0xaa   :  { %307 = vst.msk [vmem:[%s655_s1 + $0x18] sm:$0x1] %vm8_vm0, %v198_v56   ;;  %308 = vst.msk [vmem:[%s655_s1 + $0x37] sm:$0x2] %vm8_vm0, %v198_v56  }
  0xac   :  { %v206_v57 = vpop.permute.xlu0 %205  }
  0xad   :  { %v214_v58 = vpop.permute.xlu1 %213   ;;  %309 = vst.msk [vmem:[%s655_s1 + $0x19] sm:$0x1] %vm8_vm0, %v206_v57   ;;  %310 = vst.msk [vmem:[%s655_s1 + $0x38] sm:$0x2] %vm8_vm0, %v206_v57  }
  0xae   :  { %311 = vst.msk [vmem:[%s655_s1 + $0x1a] sm:$0x1] %vm8_vm0, %v214_v58   ;;  %312 = vst.msk [vmem:[%s655_s1 + $0x39] sm:$0x2] %vm8_vm0, %v214_v58  }
  0xb0   :  { %v222_v59 = vpop.permute.xlu0 %221  }
  0xb1   :  { %v230_v60 = vpop.permute.xlu1 %229   ;;  %313 = vst.msk [vmem:[%s655_s1 + $0x1b] sm:$0x1] %vm8_vm0, %v222_v59   ;;  %314 = vst.msk [vmem:[%s655_s1 + $0x3a] sm:$0x2] %vm8_vm0, %v222_v59  }
  0xb2   :  { %315 = vst.msk [vmem:[%s655_s1 + $0x1c] sm:$0x1] %vm8_vm0, %v230_v60   ;;  %316 = vst.msk [vmem:[%s655_s1 + $0x3b] sm:$0x2] %vm8_vm0, %v230_v60  }
  0xb4   :  { %v238_v61 = vpop.permute.xlu0 %237  }
  0xb5   :  { %v246_v62 = vpop.permute.xlu1 %245   ;;  %317 = vst.msk [vmem:[%s655_s1 + $0x1d] sm:$0x1] %vm8_vm0, %v238_v61   ;;  %318 = vst.msk [vmem:[%s655_s1 + $0x3c] sm:$0x2] %vm8_vm0, %v238_v61  }
  0xb6   :  { %319 = vst.msk [vmem:[%s655_s1 + $0x1e] sm:$0x1] %vm8_vm0, %v246_v62   ;;  %320 = vst.msk [vmem:[%s655_s1 + $0x3d] sm:$0x2] %vm8_vm0, %v246_v62  }
  0xb8   :  { %v254_v63 = vpop.permute.xlu0 %253  }
  0xb9   :  { %321 = vst.msk [vmem:[%s655_s1 + $0x1f] sm:$0x1] %vm8_vm0, %v254_v63   ;;  %322 = vst.msk [vmem:[%s655_s1 + $0x3e] sm:$0x2] %vm8_vm0, %v254_v63  }

// kernel: unet_residual_block.3
= control target key start
LH: loop header
LB: loop body
LE: loop exit
PB: predicated region body
PF: predicated region fallthrough
CT: control target
= control target key end

     0   :  { %6 = vsyncpa [#allocation3], 0  ;;  %s679_s0 = inlined_call_operand.hbm [shape: f32[2,256,128], index: 0, kind: input, shape index: {}]   ;;  %s680_s1 = inlined_call_operand.vmem [shape: f32[2,2,128], index: 1, kind: output, shape index: {}]  }
   0x1   :  { %8 = vsyncpa [#allocation3 + $0x1], 0  ;;  %s542_s6 = smov 0   ;;  %s544_s7 = smov 0  }
   0x2   :  { %s546_s8 = smov 0   ;;  %s548_s9 = smov 0  }
   0x3   :  { %s550_s10 = smov 0   ;;  %s552_s11 = smov 0  }
   0x4 LB: > { %s377_s12 = sadd.s32 4294967295, %s526_s11   ;;  %s26_s13 = sadd.s32 1, %s522_s10  ;;  %s526_s11 = sphi %s552_s11, %s14_s11   ;;  %s522_s10 = sphi %s550_s10, %s688_s10   ;;  %s518_s9 = sphi %s548_s9, %s687_s9   ;;  %s514_s8 = sphi %s546_s8, %s686_s8   ;;  %s510_s7 = sphi %s544_s7, %s685_s7   ;;  %s506_s6 = sphi %s542_s6, %s684_s6  }
   0x5   : > { %p28_p0 = scmp.ge.s32.totalorder %s26_s13, 2  ;;  %s35_s14 = sadd.s32 1, %s514_s8 }
   0x6   : > { %p42_p1 = scmp.ne.s32.totalorder %s514_s8, %s510_s7  ;;  %p43_p2 = scmp.eq.s32.totalorder %s526_s11, 0 }
   0x7   : > { %s690_s13 = smov (%p28_p0, %s26_s13), 0  ;;  %p48_p4 = scmp.ne.s32.totalorder %s510_s7, %s506_s6 }
   0x8   : > { %p578_p3 = por %p43_p2, %p42_p1  ;;  %s30_s16 = ssub.s32 %s522_s10, %s690_s13 }
   0x9   : > { %p49_p5 = scmp.eq.s32.totalorder %s377_s12, 0  ;;  %p33_p6 = scmp.eq.s32.totalorder %s30_s16, 0 }
   0xa   : > { %p396_p8 = scmp.lt.s32.totalorder %s526_s11, 2  ;;  %s98_s19 = sand.u32 1, %s514_s8  }
   0xb   : > { %p585_p7 = por %p49_p5, %p48_p4  ;;  %s389_s20 = sshll.u32 %s522_s10, 12 }
   0xc   : > { %s591_s18 = scalar_select %p33_p6, %s514_s8, %s35_s14  }
   0xd   : > { %s381_s21 = sshll.u32 %s98_s19, 8  ;;  %s110_s24 = scalar_lea.hbm %s679_s0, %s389_s20 }
   0xe   : > { %s102_s25 = scalar_lea.vmem [#allocation2], %s381_s21  ;;  %p600_p9 = pnand %p396_p8, %p578_p3 }
   0xf   : > { %s111_s26 = sshll.u32 %s102_s25, 4  ;;  %s99_s28 = scalar_lea.sflag [#allocation3], %s98_s19  ;;  %s112_s26 = int_to_ptr.vmem [resolvable:$true] %s111_s26 }
  0x10   : > { %p450_p10 = pneg %p600_p9  ;;  %s461_s29 = scalar_lea.vmem %s112_s26, 4096 }
  0x11   : > { %p462_p11 = scmp.ne.s32.totalorder %s112_s26, %s461_s29  ;;  %s528_s30 = smov [#allocation2]  }
  0x12   : > { %s466_s2 = sshll.u32 %s528_s30, 4  ;;  %s467_s2 = int_to_ptr.vmem [resolvable:$false] %s466_s2 }
  0x13   : > { %p464_p12 = pnand %p462_p11, %p450_p10  ;;  %s468_s3 = scalar_lea.vmem %s467_s2, 8192 }
  0x14   : > { %p469_p0 = scmp.lt.s32.totalorder %s112_s26, %s467_s2  ;;  %p470_p1 = scmp.lt.s32.totalorder %s468_s3, %s461_s29 }
  0x15   : > { %p465_p13 = pneg %p464_p12 }
  0x16   : > { %p471_p2 = por %p470_p1, %p469_p0 }
  0x18   : > { %p472_p3 = pnand %p471_p2, %p465_p13 }
  0x1a   : > { %475 = shalt.err (!%p472_p3)
}
  0x1b   : > { %s529_s4 = smov 128   ;;  %s530_s5 = smov 8  }
  0x1c   : > { %395 = dma.hbm_to_vmem [thread:$0]  (!%p600_p9), %s110_s24, 4096, %s112_s26, %s99_s28, %s529_s4, %s529_s4, %s530_s5  }
  0x1d   : > { %p384_p4 = scmp.ge.s32.totalorder %s526_s11, 1  ;;  %p119_p5 = scmp.lt.s32.totalorder %s526_s11, 3 }
  0x1f   : > { %p120_p6 = pnand %p384_p4, %p119_p5 }
  0x20   : > { %s125_s6 = sand.u32 (!%p120_p6), 1, %s510_s7  }
  0x21   : > { %123 = sbr.rel (%p120_p6) target bundleno = 119 (0x77), region = 24  ;;  %s385_s12 = sshll.u32 (!%p120_p6), %s125_s6, 8 }
  0x22   : > { %s126_s14 = scalar_lea.sflag (!%p120_p6), [#allocation3], %s125_s6  ;;  %s611_s15 = scalar_lea.vmem (!%p120_p6), [#allocation2], %s385_s12 }
  0x26   : > { %501 = dma.done.wait (%p585_p7), %s126_s14, 4096  }
  0x27   : > { %503 = vsyncadd (%p585_p7), %s126_s14, 4294963200  ;;  %p148_p8 = scmp.lt.s32.totalorder %s518_s9, 1  ;;  %v531_v0 = vmov 0.0   ;;  %v157_v1 = vld [vmem:[%s611_s15] sm:$0xff]  ;;  %v158_v2 = vld [vmem:[%s611_s15 + $0x8] sm:$0xff] }
  0x28   : > { %v159_v3 = vld [vmem:[%s611_s15 + $0x10] sm:$0xff]  ;;  %v160_v4 = vld [vmem:[%s611_s15 + $0x18] sm:$0xff]  ;;  %v190_v5 = vadd.f32 %v158_v2, %v157_v1  ;;  %v230_v6 = vmul.f32 %v157_v1, %v157_v1  ;;  %v231_v7 = vmul.f32 %v158_v2, %v158_v2  ;;  %v161_v9 = vld [vmem:[%s611_s15 + $0x20] sm:$0xff] }
  0x29   : > { %s692_s9 = smov (!%p148_p8, %s518_s9), 1  ;;  %v232_v8 = vmul.f32 %v159_v3, %v159_v3  ;;  %v233_v11 = vmul.f32 %v160_v4, %v160_v4  ;;  %v162_v13 = vld [vmem:[%s611_s15 + $0x28] sm:$0xff]  ;;  %v234_v15 = vmul.f32 %v161_v9, %v161_v9  ;;  %v163_v17 = vld [vmem:[%s611_s15 + $0x30] sm:$0xff]  ;;  %v164_v21 = vld [vmem:[%s611_s15 + $0x38] sm:$0xff] }
  0x2a   : > { %s386_s16 = sshll.u32 %s692_s9, 1  ;;  %v191_v10 = vadd.f32 %v190_v5, %v159_v3  ;;  %v262_v12 = vadd.f32 %v231_v7, %v230_v6  ;;  %v235_v19 = vmul.f32 %v162_v13, %v162_v13  ;;  %v236_v23 = vmul.f32 %v163_v17, %v163_v17  ;;  %v165_v25 = vld [vmem:[%s611_s15 + $0x40] sm:$0xff]  ;;  %v166_v29 = vld [vmem:[%s611_s15 + $0x48] sm:$0xff]  ;;  %v167_v33 = vld [vmem:[%s611_s15 + $0x50] sm:$0xff] }
  0x2b   : > { %s622_s21 = scalar_lea.vmem %s680_s1, %s386_s16  ;;  %v237_v27 = vmul.f32 %v164_v21, %v164_v21  ;;  %v238_v31 = vmul.f32 %v165_v25, %v165_v25  ;;  %v239_v35 = vmul.f32 %v166_v29, %v166_v29  ;;  %v168_v37 = vld [vmem:[%s611_s15 + $0x58] sm:$0xff]  ;;  %v240_v39 = vmul.f32 %v167_v33, %v167_v33  ;;  %v169_v41 = vld [vmem:[%s611_s15 + $0x60] sm:$0xff]  ;;  %v170_v45 = vld [vmem:[%s611_s15 + $0x68] sm:$0xff] }
  0x2c   : > { %156 = vst [vmem:[%s622_s21] sm:$0x3] %v531_v0  ;;  %v192_v14 = vadd.f32 %v191_v10, %v160_v4  ;;  %v263_v16 = vadd.f32 %v262_v12, %v232_v8  ;;  %v241_v43 = vmul.f32 %v168_v37, %v168_v37  ;;  %v242_v47 = vmul.f32 %v169_v41, %v169_v41  ;;  %v171_v49 = vld [vmem:[%s611_s15 + $0x70] sm:$0xff]  ;;  %v172_v53 = vld [vmem:[%s611_s15 + $0x78] sm:$0xff]  ;;  %v173_v57 = vld [vmem:[%s611_s15 + $0x80] sm:$0xff] }
  0x2d   : > { %v243_v51 = vmul.f32 %v170_v45, %v170_v45  ;;  %v244_v55 = vmul.f32 %v171_v49, %v171_v49  ;;  %v245_v59 = vmul.f32 %v172_v53, %v172_v53  ;;  %v174_v61 = vld [vmem:[%s611_s15 + $0x88] sm:$0xff]  ;;  %v246_v63 = vmul.f32 %v173_v57, %v173_v57  ;;  %v175_v1 = vld [vmem:[%s611_s15 + $0x90] sm:$0xff]  ;;  %v176_v5 = vld [vmem:[%s611_s15 + $0x98] sm:$0xff] }
  0x2e   : > { %v193_v18 = vadd.f32 %v192_v14, %v161_v9  ;;  %v264_v20 = vadd.f32 %v263_v16, %v233_v11  ;;  %v247_v3 = vmul.f32 %v174_v61, %v174_v61  ;;  %v248_v7 = vmul.f32 %v175_v1, %v175_v1  ;;  %v177_v9 = vld [vmem:[%s611_s15 + $0xa0] sm:$0xff] }
  0x2f   : > { %v249_v11 = vmul.f32 %v176_v5, %v176_v5 }
  0x30   : > { %v194_v22 = vadd.f32 %v193_v18, %v162_v13  ;;  %v265_v24 = vadd.f32 %v264_v20, %v234_v15  ;;  %v178_v13 = vld [vmem:[%s611_s15 + $0xa8] sm:$0xff]  ;;  %v250_v15 = vmul.f32 %v177_v9, %v177_v9 }
  0x32   : > { %v195_v26 = vadd.f32 %v194_v22, %v163_v17  ;;  %v266_v28 = vadd.f32 %v265_v24, %v235_v19  ;;  %v179_v17 = vld [vmem:[%s611_s15 + $0xb0] sm:$0xff]  ;;  %v251_v19 = vmul.f32 %v178_v13, %v178_v13 }
  0x34   : > { %v196_v30 = vadd.f32 %v195_v26, %v164_v21  ;;  %v267_v32 = vadd.f32 %v266_v28, %v236_v23  ;;  %v180_v21 = vld [vmem:[%s611_s15 + $0xb8] sm:$0xff]  ;;  %v252_v23 = vmul.f32 %v179_v17, %v179_v17 }
  0x36   : > { %v197_v34 = vadd.f32 %v196_v30, %v165_v25  ;;  %v268_v36 = vadd.f32 %v267_v32, %v237_v27  ;;  %v181_v25 = vld [vmem:[%s611_s15 + $0xc0] sm:$0xff]  ;;  %v253_v27 = vmul.f32 %v180_v21, %v180_v21 }
  0x38   : > { %v198_v38 = vadd.f32 %v197_v34, %v166_v29  ;;  %v269_v40 = vadd.f32 %v268_v36, %v238_v31  ;;  %v182_v29 = vld [vmem:[%s611_s15 + $0xc8] sm:$0xff]  ;;  %v254_v31 = vmul.f32 %v181_v25, %v181_v25 }
  0x3a   : > { %v199_v42 = vadd.f32 %v198_v38, %v167_v33  ;;  %v270_v44 = vadd.f32 %v269_v40, %v239_v35  ;;  %v183_v33 = vld [vmem:[%s611_s15 + $0xd0] sm:$0xff]  ;;  %v255_v35 = vmul.f32 %v182_v29, %v182_v29 }
  0x3c   : > { %v200_v46 = vadd.f32 %v199_v42, %v168_v37  ;;  %v271_v48 = vadd.f32 %v270_v44, %v240_v39  ;;  %v184_v37 = vld [vmem:[%s611_s15 + $0xd8] sm:$0xff]  ;;  %v256_v39 = vmul.f32 %v183_v33, %v183_v33 }
  0x3e   : > { %v201_v50 = vadd.f32 %v200_v46, %v169_v41  ;;  %v272_v52 = vadd.f32 %v271_v48, %v241_v43  ;;  %v185_v41 = vld [vmem:[%s611_s15 + $0xe0] sm:$0xff]  ;;  %v257_v43 = vmul.f32 %v184_v37, %v184_v37 }
  0x40   : > { %v202_v54 = vadd.f32 %v201_v50, %v170_v45  ;;  %v273_v56 = vadd.f32 %v272_v52, %v242_v47  ;;  %v186_v45 = vld [vmem:[%s611_s15 + $0xe8] sm:$0xff]  ;;  %v258_v47 = vmul.f32 %v185_v41, %v185_v41 }
  0x42   : > { %v203_v58 = vadd.f32 %v202_v54, %v171_v49  ;;  %v274_v60 = vadd.f32 %v273_v56, %v243_v51  ;;  %v187_v49 = vld [vmem:[%s611_s15 + $0xf0] sm:$0xff]  ;;  %v259_v51 = vmul.f32 %v186_v45, %v186_v45 }
  0x44   : > { %v204_v62 = vadd.f32 %v203_v58, %v172_v53  ;;  %v275_v0 = vadd.f32 %v274_v60, %v244_v55  ;;  %v188_v53 = vld [vmem:[%s611_s15 + $0xf8] sm:$0xff]  ;;  %v260_v55 = vmul.f32 %v187_v49, %v187_v49 }
  0x45   : > { %v261_v58 = vmul.f32 %v188_v53, %v188_v53 }
  0x46   : > { %v205_v2 = vadd.f32 %v204_v62, %v173_v57  ;;  %v276_v4 = vadd.f32 %v275_v0, %v245_v59 }
  0x48   : > { %v206_v6 = vadd.f32 %v205_v2, %v174_v61  ;;  %v277_v8 = vadd.f32 %v276_v4, %v246_v63 }
  0x4a   : > { %v207_v10 = vadd.f32 %v206_v6, %v175_v1  ;;  %v278_v12 = vadd.f32 %v277_v8, %v247_v3 }
  0x4c   : > { %v208_v14 = vadd.f32 %v207_v10, %v176_v5  ;;  %v279_v16 = vadd.f32 %v278_v12, %v248_v7  ;;  %v189_v7 = vld [vmem:[%s622_s21] sm:$0x1]  ;;  %v229_v12 = vld [vmem:[%s622_s21 + $0x1] sm:$0x1] }
  0x4e   : > { %v209_v18 = vadd.f32 %v208_v14, %v177_v9  ;;  %v280_v20 = vadd.f32 %v279_v16, %v249_v11 }
  0x50   : > { %v210_v22 = vadd.f32 %v209_v18, %v178_v13  ;;  %v281_v24 = vadd.f32 %v280_v20, %v250_v15 }
  0x52   : > { %v211_v26 = vadd.f32 %v210_v22, %v179_v17  ;;  %v282_v28 = vadd.f32 %v281_v24, %v251_v19 }
  0x54   : > { %v212_v30 = vadd.f32 %v211_v26, %v180_v21  ;;  %v283_v32 = vadd.f32 %v282_v28, %v252_v23 }
  0x56   : > { %v213_v34 = vadd.f32 %v212_v30, %v181_v25  ;;  %v284_v36 = vadd.f32 %v283_v32, %v253_v27 }
  0x58   : > { %v214_v38 = vadd.f32 %v213_v34, %v182_v29  ;;  %v285_v40 = vadd.f32 %v284_v36, %v254_v31 }
  0x5a   : > { %v215_v42 = vadd.f32 %v214_v38, %v183_v33  ;;  %v286_v44 = vadd.f32 %v285_v40, %v255_v35 }
  0x5c   : > { %v216_v46 = vadd.f32 %v215_v42, %v184_v37  ;;  %v287_v48 = vadd.f32 %v286_v44, %v256_v39 }
  0x5e   : > { %v217_v50 = vadd.f32 %v216_v46, %v185_v41  ;;  %v288_v52 = vadd.f32 %v287_v48, %v257_v43 }
  0x60   : > { %v218_v54 = vadd.f32 %v217_v50, %v186_v45  ;;  %v289_v56 = vadd.f32 %v288_v52, %v258_v47 }
  0x62   : > { %v219_v57 = vadd.f32 %v218_v54, %v187_v49  ;;  %v290_v59 = vadd.f32 %v289_v56, %v259_v51 }
  0x64   : > { %v220_v60 = vadd.f32 %v219_v57, %v188_v53  ;;  %v291_v61 = vadd.f32 %v290_v59, %v260_v55 }
  0x66   : > { %v221_v62 = vrot.slane %v220_v60, 4  ;;  %v292_v63 = vadd.f32 %v291_v61, %v261_v58 }
  0x68   : > { %v222_v0 = vadd.f32 %v221_v62, %v220_v60  ;;  %v293_v1 = vrot.slane %v292_v63, 4 }
  0x6a   : > { %v223_v2 = vrot.slane %v222_v0, 2  ;;  %v294_v3 = vadd.f32 %v293_v1, %v292_v63 }
  0x6c   : > { %v224_v4 = vadd.f32 %v223_v2, %v222_v0  ;;  %v295_v5 = vrot.slane %v294_v3, 2 }
  0x6e   : > { %v225_v6 = vrot.slane %v224_v4, 1  ;;  %v296_v8 = vadd.f32 %v295_v5, %v294_v3 }
  0x70   : > { %v226_v9 = vadd.f32 %v225_v6, %v224_v4  ;;  %v297_v10 = vrot.slane %v296_v8, 1 }
  0x72   : > { %v227_v11 = vadd.f32 %v226_v9, %v189_v7  ;;  %v298_v13 = vadd.f32 %v297_v10, %v296_v8 }
  0x74   : > { %228 = vst [vmem:[%s622_s21] sm:$0x1] %v227_v11  ;;  %v299_v14 = vadd.f32 %v298_v13, %v229_v12 }
  0x76   : > { %300 = vst [vmem:[%s622_s21 + $0x1] sm:$0x1] %v299_v14 }
  0x77 PF: > { %s14_s11 = sadd.s32 1, %s526_s11   ;;  %s684_s6 = smov %s510_s7 }
  0x78   : > { %p11_p7 = scmp.ge.s32.totalorder %s14_s11, 4   ;;  %s685_s7 = smov %s514_s8 }
  0x79   : > { %s686_s8 = smov %s591_s18  ;;  %s687_s9 = smov %s522_s10 }
  0x7a   : > { %s688_s10 = smov %s690_s13  ;;  %13 = sbr.rel (!%p11_p7) target bundleno = 4 (0x4), region = 68 }
  0x7f   :  { %320 = vsyncpa [#allocation3], 1 }
  0x80   :  { %322 = vsyncpa [#allocation3 + $0x1], 1 }

// kernel: unet_residual_block.4
= control target key start
LH: loop header
LB: loop body
LE: loop exit
PB: predicated region body
PF: predicated region fallthrough
CT: control target
= control target key end

     0   :  { %s5116_s24 = smov 0   ;;  %s7040_s0 = inlined_call_operand.vmem [shape: f32[2,256,128], index: 0, kind: input, shape index: {}]   ;;  %s7041_s1 = inlined_call_operand.vmem [shape: f32[2,1,128], index: 1, kind: input, shape index: {}]   ;;  %s7042_s2 = inlined_call_operand.vmem [shape: f32[2,1,128], index: 2, kind: input, shape index: {}]   ;;  %s7043_s3 = inlined_call_operand.vmem [shape: bf16[3,3,128,128], index: 3, kind: input, shape index: {}]   ;;  %s7044_s4 = inlined_call_operand.vmem [shape: f32[1,128], index: 4, kind: input, shape index: {}]   ;;  %s7045_s5 = inlined_call_operand.vmem [shape: f32[2,1,128], index: 5, kind: input, shape index: {}]   ;;  %s7046_s6 = inlined_call_operand.vmem [shape: f32[2,256,128], index: 6, kind: output, shape index: {0}]   ;;  %s7047_s7 = inlined_call_operand.vmem [shape: f32[2,2,128], index: 7, kind: output, shape index: {1}]  }
   0x1 LB: > { %s3748_s25 = sadd.s32 4294967295, %s5072_s24   ;;  %p3752_p0 = scmp.ge.s32.totalorder %s5072_s24, 1  ;;  %s5072_s24 = sphi %s5116_s24, %s18_s24  }
   0x2   : > { %p264_p1 = scmp.lt.s32.totalorder %s5072_s24, 3 }
   0x4   : > { %p265_p2 = pnand %p3752_p0, %p264_p1 }
   0x6   : > { %268 = sbr.rel (%p265_p2) target bundleno = 627 (0x273), region = 44 }
   0xb   : > { %v4864_v0 = vld [vmem:[%s7043_s3 + $0x78] sm:$0xff]   ;;  %vm700_vm0 = vcmask 1040384   ;;  %v4865_v1 = vld [vmem:[%s7043_s3 + $0x70] sm:$0xff]   ;;  %v5074_v2 = vmov 0.0   ;;  %v4866_v4 = vld [vmem:[%s7043_s3 + $0x68] sm:$0xff]   ;;  %vm899_vm1 = vcmask 1046528  }
   0xc   : > { %4406 = vmatprep.subr.bf16.mxu0 %v4864_v0  ;;  %4838 = vmatprep.subr.bf16.mxu1 %v4864_v0  ;;  %v5130_v3 = vrot.slane %v5074_v2, 7  ;;  %v4867_v9 = vld [vmem:[%s7043_s3 + $0x60] sm:$0xff]   ;;  %p309_p3 = scmp.lt.s32.totalorder %s3748_s25, 1  ;;  %vm1463_vm2 = vcmask 1045504   ;;  %v4868_v17 = vld [vmem:[%s7043_s3 + $0x58] sm:$0xff]   ;;  %v4869_v21 = vld [vmem:[%s7043_s3 + $0x50] sm:$0xff]  }
   0xd   : > { %4407 = vmatpush3.bf16.msra.mxu0 %v4864_v0  ;;  %4846 = vmatpush3.bf16.msra.mxu1 %v4864_v0  ;;  %v4870_v43 = vld [vmem:[%s7043_s3 + $0x48] sm:$0xff]   ;;  %v4871_v2 = vld [vmem:[%s7043_s3 + $0x40] sm:$0xff]   ;;  %vm3824_vm3 = vmneg %vm700_vm0  ;;  %vm5075_vm4 = vmmov 1  }
   0xe   : > { %7086 = vst [vmem:[#allocation2_spill] sm:$0xff] %v5130_v3  ;;  %4408 = vmatprep.subr.bf16.mxu0 %v4865_v1  ;;  %4839 = vmatprep.subr.bf16.mxu1 %v4865_v1  ;;  %v801_v5 = vsel %vm700_vm0, 0.0, %v5130_v3  ;;  %v818_v6 = vsel %vm700_vm0, %v5130_v3, 0.0  ;;  %v901_v8 = vrot.slane %v5130_v3, 1  ;;  %s7252_s25 = smov (!%p309_p3, %s3748_s25), 1  ;;  %v1465_v16 = vrot.slane %v5130_v3, 2  ;;  %vm5918_vm5 = vmpackc.low %vm5075_vm4, %vm3824_vm3 }
   0xf   : > { %v900_v7 = vrot.slane %v801_v5, 1  ;;  %v903_v10 = vrot.slane %v818_v6, 1  ;;  %v1464_v12 = vrot.slane %v801_v5, 2  ;;  %v1467_v13 = vrot.slane %v818_v6, 2  ;;  %s4188_s13 = sshll.u32 %s7252_s25, 8  ;;  %s5162_s16 = scalar_lea.vmem %s7041_s1, %s7252_s25  ;;  %v4877_v3 = vld [vmem:[%s7043_s3 + $0xa8] sm:$0xff]  }
  0x10   : > { %s5170_s19 = scalar_lea.vmem %s7040_s0, %s4188_s13  ;;  %s5176_s22 = scalar_lea.vmem %s7042_s2, %s7252_s25  ;;  %v5179_v18 = vld [vmem:[%s5162_s16] ss:$0 sm:$0xff] }
  0x11   : > { %4409 = vmatpush3.bf16.msra.mxu0 %v4865_v1  ;;  %4847 = vmatpush3.bf16.msra.mxu1 %v4865_v1  ;;  %v902_v11 = vsel %vm899_vm1, %v900_v7, %v901_v8  ;;  %v904_v14 = vsel %vm899_vm1, %v901_v8, %v903_v10  ;;  %v1466_v19 = vsel %vm1463_vm2, %v1464_v12, %v1465_v16  ;;  %v333_v22 = vld [vmem:[%s5170_s19] sm:$0xff]  ;;  %v334_v23 = vld [vmem:[%s5170_s19 + $0x8] sm:$0xff]  ;;  %v347_v28 = vld [vmem:[%s5170_s19 + $0x70] sm:$0xff]  ;;  %s322_s27 = scalar_lea.vmem %s7045_s5, %s7252_s25  ;;  %s6827_s9 = scalar_lea.vmem %s7046_s6, %s4188_s13 }
  0x12   : > { %4410 = vmatprep.subr.bf16.mxu0 %v4866_v4  ;;  %4840 = vmatprep.subr.bf16.mxu1 %v4866_v4  ;;  %v5151_v15 = vpack.c.bf16 %v904_v14, %v902_v11  ;;  %v1468_v20 = vsel %vm1463_vm2, %v1465_v16, %v1467_v13  ;;  %v5189_v24 = vld [vmem:[%s5176_s22] ss:$0 sm:$0xff]  ;;  %v372_v26 = vmul.f32 %v5179_v18, %v333_v22  ;;  %v348_v29 = vld [vmem:[%s5170_s19 + $0x78] sm:$0xff]  ;;  %v350_v33 = vld [vmem:[%s5170_s19 + $0x88] sm:$0xff]  ;;  %s3757_s13 = sshll.u32 %s7252_s25, 1 }
  0x13   : > { %v5191_v25 = vpack.c.bf16 %v1468_v20, %v1466_v19  ;;  %v373_v27 = vmul.f32 %v5179_v18, %v334_v23  ;;  %v349_v30 = vld [vmem:[%s5170_s19 + $0x80] sm:$0xff]  ;;  %v386_v31 = vmul.f32 %v5179_v18, %v347_v28  ;;  %v387_v32 = vmul.f32 %v5179_v18, %v348_v29  ;;  %v335_v35 = vld [vmem:[%s5170_s19 + $0x10] sm:$0xff]  ;;  %v336_v36 = vld [vmem:[%s5170_s19 + $0x18] sm:$0xff] }
  0x14   : > { %7087 = vst [vmem:[#allocation3_spill] sm:$0xff] %v5151_v15  ;;  %4422 = vmatprep.mubr.bf16.mxu0 %v5151_v15  ;;  %v388_v34 = vmul.f32 %v5179_v18, %v349_v30  ;;  %v5205_v37 = vadd.f32 %v5189_v24, %v372_v26  ;;  %v389_v39 = vmul.f32 %v5179_v18, %v350_v33  ;;  %v337_v41 = vld [vmem:[%s5170_s19 + $0x20] sm:$0xff]  ;;  %v338_v42 = vld [vmem:[%s5170_s19 + $0x28] sm:$0xff]  ;;  %v351_v48 = vld [vmem:[%s5170_s19 + $0x90] sm:$0xff] }
  0x15   : > { %4411 = vmatpush3.bf16.msra.mxu0 %v4866_v4  ;;  %4848 = vmatpush3.bf16.msra.mxu1 %v4866_v4  ;;  %7088 = vst [vmem:[#allocation4_spill] sm:$0xff] %v5191_v25  ;;  %v5208_v38 = vadd.f32 %v5189_v24, %v373_v27  ;;  %v374_v40 = vmul.f32 %v5179_v18, %v335_v35  ;;  %v352_v53 = vld [vmem:[%s5170_s19 + $0x98] sm:$0xff]  ;;  %v353_v54 = vld [vmem:[%s5170_s19 + $0xa0] sm:$0xff]  ;;  %v354_v62 = vld [vmem:[%s5170_s19 + $0xa8] sm:$0xff] }
  0x16   : > { %4412 = vmatprep.subr.bf16.mxu0 %v4867_v9  ;;  %4841 = vmatprep.subr.bf16.mxu1 %v4867_v9  ;;  %v5218_v44 = vadd.f32 %v5189_v24, %v386_v31  ;;  %v5221_v45 = vadd.f32 %v5189_v24, %v387_v32  ;;  %v5224_v46 = vadd.f32 %v5189_v24, %v388_v34  ;;  %v3760_v49 = vmul.f32 -1.442695, %v5205_v37  ;;  %v339_v10 = vld [vmem:[%s5170_s19 + $0x30] sm:$0xff]  ;;  %v340_v11 = vld [vmem:[%s5170_s19 + $0x38] sm:$0xff]  ;;  %v341_v12 = vld [vmem:[%s5170_s19 + $0x40] sm:$0xff] }
  0x17   : > { %v375_v47 = vmul.f32 %v5179_v18, %v336_v36  ;;  %v3761_v50 = vmul.f32 -1.442695, %v5208_v38  ;;  %v5231_v51 = vadd.f32 %v5189_v24, %v389_v39  ;;  %v5234_v52 = vadd.f32 %v5189_v24, %v374_v40  ;;  %v355_v19 = vld [vmem:[%s5170_s19 + $0xb0] sm:$0xff]  ;;  %v356_v20 = vld [vmem:[%s5170_s19 + $0xb8] sm:$0xff]  ;;  %v357_v39 = vld [vmem:[%s5170_s19 + $0xc0] sm:$0xff] }
  0x18   : > { %v3774_v55 = vmul.f32 -1.442695, %v5218_v44  ;;  %v3775_v56 = vmul.f32 -1.442695, %v5221_v45  ;;  %v3776_v57 = vmul.f32 -1.442695, %v5224_v46  ;;  %4936 = vpow2.f32 %v3760_v49 }
  0x19   : > { %4413 = vmatpush3.bf16.msra.mxu0 %v4867_v9  ;;  %4849 = vmatpush3.bf16.msra.mxu1 %v4867_v9  ;;  %v5242_v58 = vadd.f32 %v5189_v24, %v375_v47  ;;  %v3777_v59 = vmul.f32 -1.442695, %v5231_v51  ;;  %v3762_v60 = vmul.f32 -1.442695, %v5234_v52  ;;  %v376_v61 = vmul.f32 %v5179_v18, %v337_v41  ;;  %v5290_v29 = vld [vmem:[%s7043_s3 + $0x38] sm:$0xff]  }
  0x1a   : > { %4414 = vmatprep.subr.bf16.mxu0 %v4868_v17  ;;  %4842 = vmatprep.subr.bf16.mxu1 %v4868_v17  ;;  %4938 = vpow2.f32 %v3761_v50  ;;  %v377_v0 = vmul.f32 %v5179_v18, %v338_v42  ;;  %v390_v1 = vmul.f32 %v5179_v18, %v351_v48  ;;  %v391_v5 = vmul.f32 %v5179_v18, %v352_v53  ;;  %v5295_v30 = vld [vmem:[%s7043_s3 + $0xb8] sm:$0xff]   ;;  %v343_v53 = vld [vmem:[%s5170_s19 + $0x50] sm:$0xff] }
  0x1b   : > { %v3763_v63 = vmul.f32 -1.442695, %v5242_v58  ;;  %4940 = vpow2.f32 %v3774_v55  ;;  %v5255_v4 = vadd.f32 %v5189_v24, %v376_v61  ;;  %v392_v6 = vmul.f32 %v5179_v18, %v353_v54 }
  0x1c   : > { %4942 = vpow2.f32 %v3775_v56  ;;  %v5260_v7 = vadd.f32 %v5189_v24, %v377_v0  ;;  %v5263_v8 = vadd.f32 %v5189_v24, %v390_v1  ;;  %v393_v9 = vmul.f32 %v5179_v18, %v354_v62 }
  0x1d   : > { %4415 = vmatpush3.bf16.msra.mxu0 %v4868_v17  ;;  %4850 = vmatpush3.bf16.msra.mxu1 %v4868_v17  ;;  %4944 = vpow2.f32 %v3776_v57  ;;  %v3764_v13 = vmul.f32 -1.442695, %v5255_v4  ;;  %v5271_v14 = vadd.f32 %v5189_v24, %v391_v5  ;;  %v5274_v16 = vadd.f32 %v5189_v24, %v392_v6  ;;  %v342_v17 = vld [vmem:[%s5170_s19 + $0x48] sm:$0xff]  ;;  %v344_v57 = vld [vmem:[%s5170_s19 + $0x58] sm:$0xff] }
  0x1e   : > { %4416 = vmatprep.subr.bf16.mxu0 %v4869_v21  ;;  %4843 = vmatprep.subr.bf16.mxu1 %v4869_v21  ;;  %4946 = vpow2.f32 %v3777_v59  ;;  %v3778_v22 = vmul.f32 -1.442695, %v5263_v8  ;;  %v5282_v23 = vadd.f32 %v5189_v24, %v393_v9  ;;  %v378_v28 = vmul.f32 %v5179_v18, %v339_v10  ;;  %v345_v10 = vld [vmem:[%s5170_s19 + $0x60] sm:$0xff] }
  0x1f   : > { %4948 = vpow2.f32 %v3762_v60  ;;  %v3779_v26 = vmul.f32 -1.442695, %v5271_v14  ;;  %v3780_v27 = vmul.f32 -1.442695, %v5274_v16  ;;  %v379_v32 = vmul.f32 %v5179_v18, %v340_v11 }
  0x20   : > { %4950 = vpow2.f32 %v3763_v63  ;;  %v3781_v31 = vmul.f32 -1.442695, %v5282_v23  ;;  %v380_v33 = vmul.f32 %v5179_v18, %v341_v12  ;;  %v5301_v34 = vadd.f32 %v5189_v24, %v378_v28 }
  0x21   : > { %4417 = vmatpush3.bf16.msra.mxu0 %v4869_v21  ;;  %4851 = vmatpush3.bf16.msra.mxu1 %v4869_v21  ;;  %v3765_v21 = vmul.f32 -1.442695, %v5260_v7  ;;  %4952 = vpow2.f32 %v3764_v13  ;;  %v381_v35 = vmul.f32 %v5179_v18, %v342_v17  ;;  %v394_v36 = vmul.f32 %v5179_v18, %v355_v19  ;;  %v346_v19 = vld [vmem:[%s5170_s19 + $0x68] sm:$0xff] }
  0x22   : > { %4418 = vmatprep.subr.bf16.mxu0 %v4870_v43  ;;  %4844 = vmatprep.subr.bf16.mxu1 %v4870_v43  ;;  %v5307_v40 = vadd.f32 %v5189_v24, %v379_v32  ;;  %v5310_v41 = vadd.f32 %v5189_v24, %v380_v33  ;;  %v395_v42 = vmul.f32 %v5179_v18, %v356_v20  ;;  %v3766_v47 = vmul.f32 -1.442695, %v5301_v34 }
  0x23   : > { %4954 = vpow2.f32 %v3765_v21  ;;  %v5316_v48 = vadd.f32 %v5189_v24, %v381_v35  ;;  %v5322_v50 = vadd.f32 %v5189_v24, %v394_v36  ;;  %v396_v56 = vmul.f32 %v5179_v18, %v357_v39  ;;  %v360_v35 = vld [vmem:[%s5170_s19 + $0xd8] sm:$0xff] }
  0x24   : > { %4956 = vpow2.f32 %v3778_v22  ;;  %v3767_v49 = vmul.f32 -1.442695, %v5307_v40  ;;  %v5326_v54 = vmul.f32 -1.442695, %v5310_v41  ;;  %v5329_v55 = vadd.f32 %v5189_v24, %v395_v42 }
  0x25   : > { %4419 = vmatpush3.bf16.msra.mxu0 %v4870_v43  ;;  %4852 = vmatpush3.bf16.msra.mxu1 %v4870_v43  ;;  %v358_v43 = vld [vmem:[%s5170_s19 + $0xc8] sm:$0xff]  ;;  %4958 = vpow2.f32 %v3779_v26  ;;  %v4937_v59 = vpop.eup %4936  ;;  %v5334_v60 = vmul.f32 -1.442695, %v5316_v48  ;;  %v382_v62 = vmul.f32 %v5179_v18, %v343_v53  ;;  %v5339_v1 = vadd.f32 %v5189_v24, %v396_v56 }
  0x26   : > { %4420 = vmatprep.subr.bf16.mxu0 %v4871_v2  ;;  %4845 = vmatprep.subr.bf16.mxu1 %v4871_v2  ;;  %4960 = vpow2.f32 %v3780_v27  ;;  %v397_v61 = vmul.f32 %v5179_v18, %v358_v43  ;;  %v539_v0 = vadd.f32 1.0, %v4937_v59  ;;  %v383_v9 = vmul.f32 %v5179_v18, %v344_v57  ;;  %v359_v27 = vld [vmem:[%s5170_s19 + $0xd0] sm:$0xff] }
  0x27   : > { %4962 = vpow2.f32 %v3781_v31  ;;  %v4939_v63 = vpop.eup %4938  ;;  %7089 = vst [vmem:[#allocation5_spill] sm:$0xff] %v5339_v1  ;;  %v5347_v13 = vmul.f32 -1.442695, %v5322_v50  ;;  %v5350_v17 = vmul.f32 -1.442695, %v5329_v55  ;;  %v5357_v26 = vadd.f32 %v5189_v24, %v382_v62 }
  0x28   : > { %4964 = vpow2.f32 %v3766_v47  ;;  %v540_v5 = vadd.f32 1.0, %v4939_v63  ;;  %v5342_v6 = vadd.f32 %v5189_v24, %v397_v61  ;;  %v5354_v22 = vmul.f32 -1.442695, %v5339_v1 }
  0x29   : > { %4421 = vmatpush3.bf16.msra.mxu0 %v4871_v2  ;;  %4853 = vmatpush3.bf16.msra.mxu1 %v4871_v2  ;;  %v4941_v2 = vpop.eup %4940  ;;  %4966 = vpow2.f32 %v3767_v49  ;;  %7091 = vst [vmem:[#allocation7_spill] sm:$0xff] %v5357_v26  ;;  %v384_v33 = vmul.f32 %v5179_v18, %v345_v10  ;;  %v5366_v42 = vadd.f32 %v5189_v24, %v383_v9 }
  0x2a   : > { %4454 = vmatprep.subr.bf16.mxu1 %v5290_v29  ;;  %4502 = vmatprep.subr.bf16.mxu0 %v5295_v30  ;;  %7090 = vst [vmem:[#allocation6_spill] sm:$0xff] %v5342_v6  ;;  %v4943_v11 = vpop.eup %4942  ;;  %4968 = vrcp.f32 %v539_v0  ;;  %v553_v12 = vadd.f32 1.0, %v4941_v2  ;;  %v5361_v32 = vmul.f32 -1.442695, %v5342_v6  ;;  %v385_v43 = vmul.f32 %v5179_v18, %v346_v19 }
  0x2b   : > { %v4945_v20 = vpop.eup %4944  ;;  %4970 = vrcp.f32 %v540_v5  ;;  %v554_v21 = vadd.f32 1.0, %v4943_v11  ;;  %7092 = vst [vmem:[#allocation8_spill] sm:$0xff] %v5366_v42  ;;  %v5370_v53 = vadd.f32 %v5189_v24, %v384_v33  ;;  %v398_v56 = vmul.f32 %v5179_v18, %v359_v27  ;;  %v361_v33 = vld [vmem:[%s5170_s19 + $0xe0] sm:$0xff] }
  0x2c   : > { %v4947_v28 = vpop.eup %4946  ;;  %4972 = vrcp.f32 %v553_v12  ;;  %v555_v31 = vadd.f32 1.0, %v4945_v20  ;;  %v5374_v61 = vadd.f32 %v5189_v24, %v385_v43  ;;  %v399_v62 = vmul.f32 %v5179_v18, %v360_v35 }
  0x2d   : > { %v4949_v36 = vpop.eup %4948  ;;  %4974 = vrcp.f32 %v554_v21  ;;  %v556_v39 = vadd.f32 1.0, %v4947_v28  ;;  %7093 = vst [vmem:[#allocation9_spill] sm:$0xff] %v5370_v53  ;;  %v5378_v2 = vmul.f32 -1.442695, %v5357_v26  ;;  %v5381_v10 = vmul.f32 -1.442695, %v5366_v42 }
  0x2e   : > { %v4951_v47 = vpop.eup %4950  ;;  %4976 = vrcp.f32 %v555_v31  ;;  %v541_v49 = vadd.f32 1.0, %v4949_v36  ;;  %7094 = vst [vmem:[#allocation10_spill] sm:$0xff] %v5374_v61  ;;  %v5384_v11 = vmul.f32 -1.442695, %v5370_v53  ;;  %v5387_v20 = vmul.f32 -1.442695, %v5374_v61 }
  0x2f   : > { %v4953_v57 = vpop.eup %4952  ;;  %4978 = vrcp.f32 %v556_v39  ;;  %v542_v59 = vadd.f32 1.0, %v4951_v47  ;;  %v5390_v21 = vadd.f32 %v5189_v24, %v398_v56  ;;  %v5393_v31 = vadd.f32 %v5189_v24, %v399_v62  ;;  %v362_v39 = vld [vmem:[%s5170_s19 + $0xe8] sm:$0xff] }
  0x30   : > { %v4955_v63 = vpop.eup %4954  ;;  %4980 = vrcp.f32 %v541_v49  ;;  %v543_v0 = vadd.f32 1.0, %v4953_v57 }
  0x31   : > { %v4957_v5 = vpop.eup %4956  ;;  %4982 = vrcp.f32 %v542_v59  ;;  %v544_v9 = vadd.f32 1.0, %v4955_v63  ;;  %7095 = vst [vmem:[#allocation11_spill] sm:$0xff] %v5390_v21  ;;  %7096 = vst [vmem:[#allocation12_spill] sm:$0xff] %v5393_v31  ;;  %v5398_v56 = vmul.f32 -1.442695, %v5390_v21  ;;  %v400_v59 = vmul.f32 %v5179_v18, %v361_v33 }
  0x32   : > { %v4959_v12 = vpop.eup %4958  ;;  %4984 = vrcp.f32 %v543_v0  ;;  %v557_v19 = vadd.f32 1.0, %v4957_v5  ;;  %v5402_v0 = vmul.f32 -1.442695, %v5393_v31  ;;  %v401_v5 = vmul.f32 %v5179_v18, %v362_v39 }
  0x33   : > { %v4961_v27 = vpop.eup %4960  ;;  %4986 = vrcp.f32 %v544_v9  ;;  %v558_v28 = vadd.f32 1.0, %v4959_v12 }
  0x34   : > { %v4963_v35 = vpop.eup %4962  ;;  %4988 = vrcp.f32 %v557_v19  ;;  %v559_v36 = vadd.f32 1.0, %v4961_v27 }
  0x35   : > { %v4965_v43 = vpop.eup %4964  ;;  %4990 = vrcp.f32 %v558_v28  ;;  %v560_v47 = vadd.f32 1.0, %v4963_v35 }
  0x36   : > { %v4967_v49 = vpop.eup %4966  ;;  %4992 = vrcp.f32 %v559_v36  ;;  %v545_v57 = vadd.f32 1.0, %v4965_v43  ;;  %v5410_v36 = vadd.f32 %v5189_v24, %v400_v59 }
  0x37   : > { %v4969_v63 = vpop.eup %4968  ;;  %4994 = vrcp.f32 %v560_v47  ;;  %v546_v62 = vadd.f32 1.0, %v4967_v49 }
  0x38   : > { %v4971_v9 = vpop.eup %4970  ;;  %v635_v12 = vmul.f32 %v4969_v63, %v5205_v37  ;;  %4996 = vrcp.f32 %v545_v57  ;;  %v5415_v37 = vadd.f32 %v5189_v24, %v401_v5 }
  0x39   : > { %v4973_v19 = vpop.eup %4972  ;;  %v636_v27 = vmul.f32 %v4971_v9, %v5208_v38  ;;  %4998 = vrcp.f32 %v546_v62  ;;  %v4875_v9 = vld [vmem:[%s7043_s3 + $0xb0] sm:$0xff]  }
  0x3a   : > { %v4975_v28 = vpop.eup %4974  ;;  %v703_v35 = vrot.slane %v635_v12, 7  ;;  %v649_v33 = vmul.f32 %v4973_v19, %v5218_v44  ;;  %5000 = vpow2.f32 %v5326_v54 }
  0x3b   : > { %v4977_v43 = vpop.eup %4976  ;;  %v704_v47 = vrot.slane %v636_v27, 7  ;;  %v650_v18 = vmul.f32 %v4975_v28, %v5221_v45  ;;  %5002 = vpow2.f32 %v5334_v60 }
  0x3c   : > { %v4979_v38 = vpop.eup %4978  ;;  %v5418_v39 = vsel %vm700_vm0, 0.0, %v703_v35  ;;  %v5420_v49 = vrot.slane %v649_v33, 7  ;;  %v651_v44 = vmul.f32 %v4977_v43, %v5224_v46  ;;  %5004 = vpow2.f32 %v5347_v13 }
  0x3d   : > { %v4981_v54 = vpop.eup %4980  ;;  %v5425_v57 = vsel %vm700_vm0, %v703_v35, %v704_v47  ;;  %v5428_v45 = vsel %vm700_vm0, %v704_v47, 0.0  ;;  %v905_v24 = vrot.slane %v5418_v39, 1  ;;  %v725_v12 = vrot.slane %v650_v18, 7 }
  0x3e   : > { %v4983_v59 = vpop.eup %4982  ;;  %v906_v63 = vrot.slane %v5425_v57, 1  ;;  %v908_v62 = vrot.slane %v5428_v45, 1  ;;  %v5435_v46 = vpack.c.bf16 %v5425_v57, %v703_v35  ;;  %v5441_v19 = vsel %vm700_vm0, 0.0, %v5420_v49 }
  0x3f   : > { %v4985_v5 = vpop.eup %4984  ;;  %v652_v27 = vmul.f32 %v4979_v38, %v5231_v51  ;;  %v940_v35 = vrot.slane %v5441_v19, 1  ;;  %v5447_v47 = vrot.slane %v651_v44, 7  ;;  %v5456_v13 = vsel %vm700_vm0, %v5420_v49, %v725_v12 }
  0x40   : > { %7097 = vst [vmem:[#allocation13_spill] sm:$0xff] %v5435_v46  ;;  %v4987_v28 = vpop.eup %4986  ;;  %v907_v33 = vsel %vm899_vm1, %v905_v24, %v906_v63  ;;  %v909_v43 = vsel %vm899_vm1, %v906_v63, %v908_v62  ;;  %v5459_v51 = vsel %vm700_vm0, %v725_v12, 0.0  ;;  %v941_v63 = vrot.slane %v5456_v13, 1 }
  0x41   : > { %v4989_v18 = vpop.eup %4988  ;;  %v5452_v60 = vpack.c.bf16 %v909_v43, %v907_v33  ;;  %v728_v38 = vrot.slane %v652_v27, 7  ;;  %v943_v44 = vrot.slane %v5459_v51, 1  ;;  %v5465_v62 = vsel %vm700_vm0, 0.0, %v5447_v47 }
  0x42   : > { %v4991_v24 = vpop.eup %4990  ;;  %v637_v33 = vmul.f32 %v4981_v54, %v5234_v52  ;;  %v945_v27 = vrot.slane %v5465_v62, 1  ;;  %v638_v46 = vmul.f32 %v4983_v59, %v5242_v58  ;;  %v942_v52 = vsel %vm899_vm1, %v940_v35, %v941_v63 }
  0x43   : > { %7098 = vst [vmem:[#allocation14_spill] sm:$0xff] %v5452_v60  ;;  %v4993_v43 = vpop.eup %4992  ;;  %4423 = vmatmul.mubr.bf16.vlgmr.msra.gmra.mxu0 %v5452_v60  ;;  %v5471_v15 = vsel %vm700_vm0, %v5447_v47, %v728_v38  ;;  %v5474_v12 = vsel %vm700_vm0, %v728_v38, 0.0  ;;  %v944_v54 = vsel %vm899_vm1, %v941_v63, %v943_v44  ;;  %v639_v61 = vmul.f32 %v4985_v5, %v5255_v4  ;;  %v4874_v44 = vld [vmem:[%s7043_s3 + $0x30] sm:$0xff]  }
  0x44   : > { %v4995_v25 = vpop.eup %4994  ;;  %v946_v60 = vrot.slane %v5471_v15, 1  ;;  %v948_v31 = vrot.slane %v5474_v12, 1  ;;  %4503 = vmatpush3.bf16.msra.mxu0 %v5295_v30  ;;  %v5486_v21 = vpack.c.bf16 %v944_v54, %v942_v52  ;;  %v5488_v58 = vrot.slane %v637_v33, 7  ;;  %v4879_v33 = vld [vmem:[%s7043_s3 + $0xa0] sm:$0xff]  }
  0x45   : > { %v4997_v38 = vpop.eup %4996  ;;  %4504 = vmatprep.subr.bf16.mxu0 %v4875_v9  ;;  %v707_v59 = vrot.slane %v638_v46, 7  ;;  %v640_v30 = vmul.f32 %v4987_v28, %v5260_v7  ;;  %v653_v52 = vmul.f32 %v4989_v18, %v5263_v8  ;;  %v5521_v18 = vrot.slane %v639_v61, 7 }
  0x46   : > { %7099 = vst [vmem:[#allocation15_spill] sm:$0xff] %v5486_v21  ;;  %v5491_v53 = vpop.eup %4998  ;;  %v947_v35 = vsel %vm899_vm1, %v945_v27, %v946_v60  ;;  %v949_v63 = vsel %vm899_vm1, %v946_v60, %v948_v31  ;;  %4438 = vmatprep.mubr.bf16.mxu1 %v5486_v21  ;;  %v5511_v31 = vsel %vm700_vm0, 0.0, %v5488_v58  ;;  %5006 = vpow2.f32 %v5350_v17 }
  0x47   : > { %v5500_v54 = vpop.eup %5000  ;;  %v5503_v46 = vpack.c.bf16 %v949_v63, %v947_v35  ;;  %v5507_v4 = vsel %vm700_vm0, %v5488_v58, %v707_v59  ;;  %v5514_v60 = vsel %vm700_vm0, %v707_v59, 0.0  ;;  %v910_v8 = vrot.slane %v5511_v31, 1 }
  0x48   : > { %v5516_v7 = vpop.eup %5002  ;;  %4505 = vmatpush3.bf16.msra.mxu0 %v4875_v9  ;;  %v911_v5 = vrot.slane %v5507_v4, 1  ;;  %v913_v28 = vrot.slane %v5514_v60, 1  ;;  %v710_v59 = vrot.slane %v640_v30, 7  ;;  %v654_v35 = vmul.f32 %v4991_v24, %v5271_v14  ;;  %v4876_v30 = vld [vmem:[%s7043_s3 + $0x28] sm:$0xff]  }
  0x49   : > { %7100 = vst [vmem:[#allocation16_spill] sm:$0xff] %v5503_v46  ;;  %v5526_v27 = vpop.eup %5004  ;;  %4439 = vmatmul.mubr.bf16.vlgmr.msra.gmra.mxu1 %v5503_v46  ;;  %v5530_v9 = vrot.slane %v653_v52, 7  ;;  %4506 = vmatprep.subr.bf16.mxu0 %v4877_v3  ;;  %v655_v63 = vmul.f32 %v4993_v43, %v5274_v16  ;;  %v5538_v42 = vsel %vm700_vm0, 0.0, %v5521_v18  ;;  %v656_v14 = vmul.f32 %v4995_v25, %v5282_v23 }
  0x4a   : > { %4455 = vmatpush3.bf16.msra.mxu1 %v5290_v29  ;;  %v912_v61 = vsel %vm899_vm1, %v910_v8, %v911_v5  ;;  %v914_v21 = vsel %vm899_vm1, %v911_v5, %v913_v28  ;;  %v5548_v16 = vsel %vm700_vm0, %v5521_v18, %v710_v59  ;;  %v5551_v29 = vsel %vm700_vm0, %v710_v59, 0.0 }
  0x4b   : > { %4456 = vmatprep.subr.bf16.mxu1 %v4874_v44  ;;  %v5544_v24 = vpack.c.bf16 %v914_v21, %v912_v61  ;;  %v915_v43 = vrot.slane %v5538_v42, 1  ;;  %v916_v52 = vrot.slane %v5548_v16, 1  ;;  %v918_v8 = vrot.slane %v5551_v29, 1  ;;  %v4881_v61 = vld [vmem:[%s7043_s3 + $0x98] sm:$0xff]  }
  0x4c   : > { %v731_v5 = vrot.slane %v654_v35, 7  ;;  %v5558_v25 = vsel %vm700_vm0, 0.0, %v5530_v9  ;;  %4507 = vmatpush3.bf16.msra.mxu0 %v4877_v3  ;;  %v5562_v21 = vrot.slane %v655_v63, 7  ;;  %v734_v28 = vrot.slane %v656_v14, 7 }
  0x4d   : > { %7101 = vst [vmem:[#allocation17_spill] sm:$0xff] %v5544_v24  ;;  %4426 = vmatprep.mubr.bf16.mxu0 %v5544_v24  ;;  %v950_v23 = vrot.slane %v5558_v25, 1  ;;  %4508 = vmatprep.subr.bf16.mxu0 %v4879_v33  ;;  %v641_v59 = vmul.f32 %v4997_v38, %v5301_v34  ;;  %v917_v35 = vsel %vm899_vm1, %v915_v43, %v916_v52  ;;  %v4878_v34 = vld [vmem:[%s7043_s3 + $0x20] sm:$0xff]  }
  0x4e   : > { %7102 = vst [vmem:[#allocation18_spill] sm:$0xff] %v5562_v21  ;;  %4457 = vmatpush3.bf16.msra.mxu1 %v4874_v44  ;;  %v919_v46 = vsel %vm899_vm1, %v916_v52, %v918_v8  ;;  %v5572_v3 = vsel %vm700_vm0, %v5530_v9, %v731_v5  ;;  %v5575_v63 = vsel %vm700_vm0, %v731_v5, 0.0  ;;  %v5586_v43 = vsel %vm700_vm0, %v5562_v21, %v734_v28 }
  0x4f   : > { %v5580_v38 = vpack.c.bf16 %v919_v46, %v917_v35  ;;  %v951_v14 = vrot.slane %v5572_v3, 1  ;;  %v953_v44 = vrot.slane %v5575_v63, 1  ;;  %4458 = vmatprep.subr.bf16.mxu1 %v4876_v30  ;;  %v5590_v52 = vsel %vm700_vm0, 0.0, %v5562_v21  ;;  %v4883_v35 = vld [vmem:[%s7043_s3 + $0x90] sm:$0xff]  }
  0x50   : > { %v5593_v8 = vsel %vm700_vm0, %v734_v28, 0.0  ;;  %v956_v5 = vrot.slane %v5586_v43, 1  ;;  %4509 = vmatpush3.bf16.msra.mxu0 %v4879_v33  ;;  %v642_v46 = vmul.f32 %v5491_v53, %v5307_v40  ;;  %v955_v6 = vrot.slane %v5590_v52, 1 }
  0x51   : > { %7103 = vst [vmem:[#allocation19_spill] sm:$0xff] %v5580_v38  ;;  %4427 = vmatmul.mubr.bf16.gmra.mxu0 %v5580_v38  ;;  %v952_v24 = vsel %vm899_vm1, %v950_v23, %v951_v14  ;;  %v954_v26 = vsel %vm899_vm1, %v951_v14, %v953_v44  ;;  %v958_v28 = vrot.slane %v5593_v8, 1  ;;  %4510 = vmatprep.subr.bf16.mxu0 %v4881_v61  ;;  %v5608_v33 = vrot.slane %v641_v59, 7 }
  0x52   : > { %v5606_v1 = vpack.c.bf16 %v954_v26, %v952_v24  ;;  %4459 = vmatpush3.bf16.msra.mxu1 %v4876_v30  ;;  %v713_v40 = vrot.slane %v642_v46, 7  ;;  %v547_v53 = vadd.f32 1.0, %v5500_v54  ;;  %v957_v21 = vsel %vm899_vm1, %v955_v6, %v956_v5  ;;  %v4880_v26 = vld [vmem:[%s7043_s3 + $0x18] sm:$0xff]  }
  0x53   : > { %v959_v38 = vsel %vm899_vm1, %v956_v5, %v958_v28  ;;  %4460 = vmatprep.subr.bf16.mxu1 %v4878_v34  ;;  %v548_v23 = vadd.f32 1.0, %v5516_v7  ;;  %v5627_v6 = vsel %vm700_vm0, 0.0, %v5608_v33  ;;  %v7105_v14 = vrot.slane %v5425_v57, 2  ;;  %v4887_v57 = vld [vmem:[%s7043_s3 + $0x80] sm:$0xff]  }
  0x54   : > { %4442 = vmatprep.mubr.bf16.mxu1 %v5606_v1  ;;  %v5619_v30 = vpack.c.bf16 %v959_v38, %v957_v21  ;;  %v5623_v54 = vsel %vm700_vm0, %v5608_v33, %v713_v40  ;;  %v5630_v7 = vsel %vm700_vm0, %v713_v40, 0.0  ;;  %4511 = vmatpush3.bf16.msra.mxu0 %v4881_v61  ;;  %v920_v17 = vrot.slane %v5627_v6, 1  ;;  %v4885_v21 = vld [vmem:[%s7043_s3 + $0x88] sm:$0xff]  }
  0x55   : > { %v921_v24 = vrot.slane %v5623_v54, 1  ;;  %v923_v59 = vrot.slane %v5630_v7, 1  ;;  %5008 = vrcp.f32 %v547_v53  ;;  %4512 = vmatprep.subr.bf16.mxu0 %v4883_v35  ;;  %v561_v38 = vadd.f32 1.0, %v5526_v27 }
  0x56   : > { %7104 = vst [vmem:[#allocation20_spill] sm:$0xff] %v5619_v30  ;;  %4443 = vmatmul.mubr.bf16.gmra.mxu1 %v5619_v30  ;;  %5010 = vrcp.f32 %v548_v23  ;;  %v7106_v61 = vrot.slane %v5418_v39, 2  ;;  %v7107_v5 = vrot.slane %v5428_v45, 2  ;;  %v7108_v46 = vmov %v7105_v14  ;;  %v4882_v39 = vld [vmem:[%s7043_s3 + $0x10] sm:$0xff]  }
  0x57   : > { %4461 = vmatpush3.bf16.msra.mxu1 %v4878_v34  ;;  %v922_v40 = vsel %vm899_vm1, %v920_v17, %v921_v24  ;;  %v924_v53 = vsel %vm899_vm1, %v921_v24, %v923_v59  ;;  %5012 = vpow2.f32 %v5354_v22  ;;  %v1474_v45 = vrot.slane %v5511_v31, 2  ;;  %v4884_v31 = vld [vmem:[%s7043_s3 + $0x8] sm:$0xff]  }
  0x58   : > { %v1471_v44 = vsel %vm1463_vm2, %v7106_v61, %v7105_v14  ;;  %v1473_v28 = vsel %vm1463_vm2, %v7108_v46, %v7107_v5  ;;  %v5655_v23 = vpack.c.bf16 %v924_v53, %v922_v40  ;;  %5014 = vrcp.f32 %v561_v38  ;;  %4462 = vmatprep.subr.bf16.mxu1 %v4880_v26  ;;  %4513 = vmatpush3.bf16.msra.mxu0 %v4883_v35 }
  0x59   : > { %v5653_v27 = vpack.c.bf16 %v1473_v28, %v1471_v44  ;;  %v1475_v34 = vrot.slane %v5507_v4, 2  ;;  %5016 = vpow2.f32 %v5361_v32  ;;  %4514 = vmatprep.subr.bf16.mxu0 %v4885_v21  ;;  %v1477_v22 = vrot.slane %v5514_v60, 2 }
  0x5a   : > { %v5669_v17 = vpack.c.bf16 %v5507_v4, %v5488_v58  ;;  %v1479_v24 = vrot.slane %v5538_v42, 2  ;;  %4430 = vmatprep.mubr.bf16.mxu0 %v5655_v23  ;;  %5018 = vpow2.f32 %v5378_v2  ;;  %v1480_v32 = vrot.slane %v5548_v16, 2  ;;  %v5685_v42 = vld [vmem:[%s7043_s3 + $0x138] sm:$0xff]  }
  0x5b   : > { %v1476_v35 = vsel %vm1463_vm2, %v1474_v45, %v1475_v34  ;;  %v1482_v60 = vrot.slane %v5551_v29, 2  ;;  %4463 = vmatpush3.bf16.msra.mxu1 %v4880_v26  ;;  %5020 = vpow2.f32 %v5381_v10  ;;  %v3788_v58 = vmul.f32 -1.442695, %v5410_v36 }
  0x5c   : > { %v1478_v2 = vsel %vm1463_vm2, %v1475_v34, %v1477_v22  ;;  %v5690_v4 = vpack.c.bf16 %v5548_v16, %v5521_v18  ;;  %4464 = vmatprep.subr.bf16.mxu1 %v4882_v39  ;;  %5022 = vpow2.f32 %v5384_v11  ;;  %4515 = vmatpush3.bf16.msra.mxu0 %v4885_v21  ;;  %v1481_v10 = vsel %vm1463_vm2, %v1479_v24, %v1480_v32  ;;  %v5007_v21 = vpop.eup %5006 }
  0x5d   : > { %v5693_v29 = vpack.c.bf16 %v1478_v2, %v1476_v35  ;;  %v1483_v26 = vsel %vm1463_vm2, %v1480_v32, %v1482_v60  ;;  %5024 = vpow2.f32 %v5387_v20  ;;  %v3789_v59 = vmul.f32 -1.442695, %v5415_v37  ;;  %4516 = vmatprep.subr.bf16.mxu0 %v4887_v57 }
  0x5e   : > { %v5699_v38 = vpack.c.bf16 %v1483_v26, %v1481_v10  ;;  %5026 = vpow2.f32 %v5398_v56  ;;  %v5704_v18 = vpack.c.bf16 %v5623_v54, %v5608_v33  ;;  %v1504_v11 = vrot.slane %v5441_v19, 2  ;;  %v4886_v56 = vld [vmem:[%s7043_s3] sm:$0xff]  }
  0x5f   : > { %7109 = vst [vmem:[#allocation21_spill] sm:$0xff] %v5693_v29  ;;  %v1505_v16 = vrot.slane %v5456_v13, 2  ;;  %4465 = vmatpush3.bf16.msra.mxu1 %v4882_v39  ;;  %5028 = vpow2.f32 %v5402_v0  ;;  %v1507_v20 = vrot.slane %v5459_v51, 2  ;;  %v5716_v19 = vpack.c.bf16 %v5456_v13, %v5420_v49 }
  0x60   : > { %7110 = vst [vmem:[#allocation22_spill] sm:$0xff] %v5699_v38  ;;  %4466 = vmatprep.subr.bf16.mxu1 %v4884_v31  ;;  %5030 = vpow2.f32 %v3788_v58  ;;  %4517 = vmatpush3.bf16.msra.mxu0 %v4887_v57  ;;  %v562_v14 = vadd.f32 1.0, %v5007_v21  ;;  %v1509_v51 = vrot.slane %v5465_v62, 2  ;;  %v1510_v5 = vrot.slane %v5471_v15, 2 }
  0x61   : > { %v1506_v33 = vsel %vm1463_vm2, %v1504_v11, %v1505_v16  ;;  %5032 = vpow2.f32 %v3789_v59  ;;  %4598 = vmatprep.subr.bf16.mxu0 %v5685_v42  ;;  %v1508_v0 = vsel %vm1463_vm2, %v1505_v16, %v1507_v20  ;;  %v1512_v46 = vrot.slane %v5474_v12, 2  ;;  %v5736_v12 = vld [vmem:[%s7043_s3 + $0xf8] sm:$0xff]  }
  0x62   : > { %v5009_v61 = vpop.eup %5008  ;;  %v5721_v44 = vpack.c.bf16 %v1508_v0, %v1506_v33  ;;  %v5727_v28 = vpack.c.bf16 %v5471_v15, %v5447_v47  ;;  %5034 = vrcp.f32 %v562_v14  ;;  %v1514_v40 = vrot.slane %v5558_v25, 2 }
  0x63   : > { %v5011_v49 = vpop.eup %5010  ;;  %v643_v13 = vmul.f32 %v5009_v61, %v5310_v41  ;;  %4467 = vmatpush3.bf16.msra.mxu1 %v4884_v31  ;;  %v1515_v62 = vrot.slane %v5572_v3, 2  ;;  %v1511_v15 = vsel %vm1463_vm2, %v1509_v51, %v1510_v5  ;;  %v1513_v47 = vsel %vm1463_vm2, %v1510_v5, %v1512_v46 }
  0x64   : > { %v5013_v53 = vpop.eup %5012  ;;  %v644_v39 = vmul.f32 %v5011_v49, %v5316_v48  ;;  %4468 = vmatprep.subr.bf16.mxu1 %v4886_v56  ;;  %v1517_v41 = vrot.slane %v5575_v63, 2  ;;  %v5743_v34 = vpack.c.bf16 %v1513_v47, %v1511_v15  ;;  %v5749_v35 = vpack.c.bf16 %v5572_v3, %v5530_v9 }
  0x65   : > { %v5015_v57 = vpop.eup %5014  ;;  %v5741_v45 = vrot.slane %v643_v13, 7  ;;  %v563_v25 = vadd.f32 1.0, %v5013_v53  ;;  %v1516_v48 = vsel %vm1463_vm2, %v1514_v40, %v1515_v62 }
  0x66   : > { %v5017_v22 = vpop.eup %5016  ;;  %v716_v24 = vrot.slane %v644_v39, 7  ;;  %v1518_v31 = vsel %vm1463_vm2, %v1515_v62, %v1517_v41  ;;  %v657_v3 = vmul.f32 %v5015_v57, %v5322_v50  ;;  %v1519_v39 = vrot.slane %v5590_v52, 2 }
  0x67   : > { %v5019_v32 = vpop.eup %5018  ;;  %v5753_v63 = vsel %vm700_vm0, 0.0, %v5741_v45  ;;  %v564_v60 = vadd.f32 1.0, %v5017_v22  ;;  %5036 = vrcp.f32 %v563_v25  ;;  %4469 = vmatpush3.bf16.msra.mxu1 %v4886_v56  ;;  %v5755_v58 = vpack.c.bf16 %v1518_v31, %v1516_v48  ;;  %v7111_v22 = vld [vmem:[#allocation18_spill] sm:$0xff] }
  0x68   : > { %v5021_v2 = vpop.eup %5020  ;;  %v5759_v10 = vsel %vm700_vm0, %v5741_v45, %v716_v24  ;;  %v5762_v26 = vsel %vm700_vm0, %v716_v24, 0.0  ;;  %v925_v9 = vrot.slane %v5753_v63, 1  ;;  %4550 = vmatprep.subr.bf16.mxu1 %v5736_v12  ;;  %v549_v20 = vadd.f32 1.0, %v5019_v32 }
  0x69   : > { %v5023_v59 = vpop.eup %5022  ;;  %v926_v11 = vrot.slane %v5759_v10, 1  ;;  %v928_v16 = vrot.slane %v5762_v26, 1  ;;  %5038 = vrcp.f32 %v564_v60  ;;  %v550_v56 = vadd.f32 1.0, %v5021_v2 }
  0x6a   : > { %v5025_v21 = vpop.eup %5024  ;;  %v551_v33 = vadd.f32 1.0, %v5023_v59  ;;  %5040 = vrcp.f32 %v549_v20  ;;  %v736_v13 = vrot.slane %v657_v3, 7  ;;  %v1520_v41 = vrot.slane %v5586_v43, 2  ;;  %v7112_v3 = vld [vmem:[#allocation5_spill] sm:$0xff]  ;;  %v7113_v20 = vld [vmem:[#allocation6_spill] sm:$0xff] }
  0x6b   : > { %v5027_v14 = vpop.eup %5026  ;;  %v927_v0 = vsel %vm899_vm1, %v925_v9, %v926_v11  ;;  %v929_v51 = vsel %vm899_vm1, %v926_v11, %v928_v16  ;;  %5042 = vrcp.f32 %v550_v56  ;;  %v552_v5 = vadd.f32 1.0, %v5025_v21 }
  0x6c   : > { %v5029_v61 = vpop.eup %5028  ;;  %v5771_v50 = vpack.c.bf16 %v929_v51, %v927_v0  ;;  %v565_v46 = vadd.f32 1.0, %v5027_v14  ;;  %5044 = vrcp.f32 %v551_v33  ;;  %v1522_v57 = vrot.slane %v5593_v8, 2 }
  0x6d   : > { %v5031_v49 = vpop.eup %5030  ;;  %v566_v40 = vadd.f32 1.0, %v5029_v61  ;;  %5046 = vrcp.f32 %v552_v5  ;;  %v5779_v48 = vsel %vm700_vm0, 0.0, %v736_v13  ;;  %v5783_v24 = vpack.c.bf16 %v5586_v43, %v7111_v22  ;;  %v7117_v22 = vld [vmem:[#allocation9_spill] sm:$0xff] }
  0x6e   : > { %v5033_v62 = vpop.eup %5032  ;;  %4431 = vmatmul.mubr.bf16.gmra.mxu0 %v5771_v50  ;;  %v567_v53 = vadd.f32 1.0, %v5031_v49  ;;  %5048 = vrcp.f32 %v565_v46  ;;  %v1521_v52 = vsel %vm1463_vm2, %v1519_v39, %v1520_v41  ;;  %v1523_v31 = vsel %vm1463_vm2, %v1520_v41, %v1522_v57 }
  0x6f   : > { %v568_v15 = vadd.f32 1.0, %v5033_v62  ;;  %v5035_v47 = vpop.eup %5034  ;;  %5050 = vrcp.f32 %v566_v40  ;;  %v5787_v60 = vpack.c.bf16 %v1523_v31, %v1521_v52  ;;  %v960_v8 = vrot.slane %v5779_v48, 1  ;;  %v7115_v40 = vld [vmem:[#allocation7_spill] sm:$0xff] }
  0x70   : > { %v658_v25 = vmul.f32 %v5035_v47, %v5329_v55  ;;  %5052 = vrcp.f32 %v567_v53 }
  0x71   : > { %5054 = vrcp.f32 %v568_v15 }
  0x72   : > { %v737_v32 = vrot.slane %v658_v25, 7 }
  0x74   : > { %v5037_v2 = vpop.eup %5036  ;;  %v5791_v55 = vsel %vm700_vm0, %v736_v13, %v737_v32  ;;  %v5794_v9 = vsel %vm700_vm0, %v737_v32, 0.0 }
  0x75   : > { %v659_v43 = vmul.f32 %v5037_v2, %v7112_v3  ;;  %v961_v11 = vrot.slane %v5791_v55, 1  ;;  %v963_v16 = vrot.slane %v5794_v9, 1  ;;  %v5803_v33 = vpack.c.bf16 %v5791_v55, %v736_v13  ;;  %v7116_v13 = vld [vmem:[#allocation8_spill] sm:$0xff]  ;;  %v7118_v3 = vld [vmem:[#allocation10_spill] sm:$0xff] }
  0x76   : > { %v5039_v59 = vpop.eup %5038 }
  0x77   : > { %v660_v21 = vmul.f32 %v5039_v59, %v7113_v20  ;;  %v5800_v56 = vrot.slane %v659_v43, 7  ;;  %v5041_v14 = vpop.eup %5040  ;;  %v962_v0 = vsel %vm899_vm1, %v960_v8, %v961_v11  ;;  %v964_v51 = vsel %vm899_vm1, %v961_v11, %v963_v16  ;;  %v7119_v20 = vld [vmem:[#allocation11_spill] sm:$0xff] }
  0x78   : > { %v5043_v61 = vpop.eup %5042  ;;  %v5807_v5 = vpack.c.bf16 %v964_v51, %v962_v0  ;;  %v645_v62 = vmul.f32 %v5041_v14, %v7115_v40 }
  0x79   : > { %v740_v46 = vrot.slane %v660_v21, 7  ;;  %v5811_v49 = vsel %vm700_vm0, 0.0, %v5800_v56  ;;  %v5045_v53 = vpop.eup %5044  ;;  %v646_v15 = vmul.f32 %v5043_v61, %v7116_v13 }
  0x7a   : > { %7114 = vst [vmem:[#allocation18_spill] sm:$0xff] %v5807_v5  ;;  %v965_v39 = vrot.slane %v5811_v49, 1  ;;  %v5047_v47 = vpop.eup %5046  ;;  %4446 = vmatprep.mubr.bf16.mxu1 %v5807_v5  ;;  %v5824_v25 = vrot.slane %v645_v62, 7  ;;  %v647_v52 = vmul.f32 %v5045_v53, %v7117_v22  ;;  %v7121_v22 = vld [vmem:[#allocation12_spill] sm:$0xff] }
  0x7b   : > { %v5819_v41 = vsel %vm700_vm0, %v5800_v56, %v740_v46  ;;  %v5822_v57 = vsel %vm700_vm0, %v740_v46, 0.0  ;;  %v5049_v31 = vpop.eup %5048  ;;  %v719_v8 = vrot.slane %v646_v15, 7  ;;  %v648_v43 = vmul.f32 %v5047_v47, %v7118_v3 }
  0x7c   : > { %v966_v32 = vrot.slane %v5819_v41, 1  ;;  %v968_v2 = vrot.slane %v5822_v57, 1  ;;  %v5051_v59 = vpop.eup %5050  ;;  %v5832_v11 = vsel %vm700_vm0, 0.0, %v5824_v25  ;;  %v5834_v16 = vrot.slane %v647_v52, 7 }
  0x7d   : > { %v661_v21 = vmul.f32 %v5049_v31, %v7119_v20  ;;  %v5053_v14 = vpop.eup %5052  ;;  %v5841_v61 = vsel %vm700_vm0, %v5824_v25, %v719_v8  ;;  %v5844_v46 = vsel %vm700_vm0, %v719_v8, 0.0  ;;  %v930_v62 = vrot.slane %v5832_v11, 1 }
  0x7e   : > { %v967_v0 = vsel %vm899_vm1, %v965_v39, %v966_v32  ;;  %v969_v51 = vsel %vm899_vm1, %v966_v32, %v968_v2  ;;  %v931_v53 = vrot.slane %v5841_v61, 1  ;;  %v933_v13 = vrot.slane %v5844_v46, 1  ;;  %v5055_v15 = vpop.eup %5054 }
  0x7f   : > { %v5846_v40 = vpack.c.bf16 %v969_v51, %v967_v0  ;;  %v722_v47 = vrot.slane %v648_v43, 7  ;;  %v5853_v39 = vsel %vm700_vm0, 0.0, %v5834_v16  ;;  %v662_v52 = vmul.f32 %v5051_v59, %v7121_v22 }
  0x80   : > { %v742_v31 = vrot.slane %v661_v21, 7  ;;  %v932_v32 = vsel %vm899_vm1, %v930_v62, %v931_v53  ;;  %v934_v2 = vsel %vm899_vm1, %v931_v53, %v933_v13  ;;  %v935_v8 = vrot.slane %v5853_v39, 1 }
  0x81   : > { %7120 = vst [vmem:[#allocation5_spill] sm:$0xff] %v5846_v40  ;;  %4447 = vmatmul.mubr.bf16.gmra.mxu1 %v5846_v40  ;;  %v663_v3 = vmul.f32 %v5053_v14, %v5410_v36  ;;  %v5861_v20 = vpack.c.bf16 %v934_v2, %v932_v32  ;;  %v5865_v43 = vsel %vm700_vm0, %v5834_v16, %v722_v47  ;;  %v5868_v0 = vsel %vm700_vm0, %v722_v47, 0.0 }
  0x82   : > { %v743_v59 = vrot.slane %v662_v52, 7  ;;  %v936_v21 = vrot.slane %v5865_v43, 1  ;;  %v938_v51 = vrot.slane %v5868_v0, 1  ;;  %v5873_v62 = vsel %vm700_vm0, 0.0, %v742_v31 }
  0x83   : > { %v664_v53 = vmul.f32 %v5055_v15, %v5415_v37  ;;  %4434 = vmatprep.mubr.bf16.mxu0 %v5861_v20  ;;  %v970_v13 = vrot.slane %v5873_v62, 1  ;;  %v745_v47 = vrot.slane %v663_v3, 7 }
  0x84   : > { %v5878_v36 = vsel %vm700_vm0, %v742_v31, %v743_v59  ;;  %v5881_v14 = vsel %vm700_vm0, %v743_v59, 0.0  ;;  %v937_v22 = vsel %vm899_vm1, %v935_v8, %v936_v21  ;;  %v939_v52 = vsel %vm899_vm1, %v936_v21, %v938_v51 }
  0x85   : > { %v971_v32 = vrot.slane %v5878_v36, 1  ;;  %v973_v2 = vrot.slane %v5881_v14, 1  ;;  %v5888_v37 = vpack.c.bf16 %v939_v52, %v937_v22  ;;  %v746_v15 = vrot.slane %v664_v53, 7  ;;  %v7123_v22 = vld [vmem:[#allocation4_spill] sm:$0xff] }
  0x86   : > { %v5891_v40 = vsel %vm700_vm0, 0.0, %v745_v47 }
  0x87   : > { %v972_v59 = vsel %vm899_vm1, %v970_v13, %v971_v32  ;;  %v974_v5 = vsel %vm899_vm1, %v971_v32, %v973_v2  ;;  %v975_v3 = vrot.slane %v5891_v40, 1  ;;  %4435 = vmatmul.mubr.bf16.gmra.mxu0 %v5888_v37  ;;  %v5900_v21 = vsel %vm700_vm0, %v745_v47, %v746_v15  ;;  %v7124_v32 = vld [vmem:[#allocation2_spill] sm:$0xff] }
  0x88   : > { %v5897_v8 = vpack.c.bf16 %v974_v5, %v972_v59  ;;  %v5903_v51 = vsel %vm700_vm0, %v746_v15, 0.0  ;;  %v976_v53 = vrot.slane %v5900_v21, 1  ;;  %4518 = vmatprep.mubr.bf16.mxu0 %v7123_v22  ;;  %v5914_v2 = vpack.c.bf16 %v7124_v32, %v7124_v32  ;;  %v363_v22 = vld [vmem:[%s5170_s19 + $0xf0] sm:$0xff] }
  0x89   : > { %v978_v13 = vrot.slane %v5903_v51, 1  ;;  %v5936_v32 = vpack.c.bf16 %v5878_v36, %v742_v31  ;;  %v4893_v31 = vld [vmem:[%s7043_s3 + $0x128] sm:$0xff]  }
  0x8a   : > { %7122 = vst [vmem:[#allocation6_spill] sm:$0xff] %v5897_v8  ;;  %4450 = vmatprep.mubr.bf16.mxu1 %v5897_v8  ;;  %v977_v5 = vsel %vm899_vm1, %v975_v3, %v976_v53  ;;  %7125 = vst [vmem:[#allocation7_spill] sm:$0xff] %v5914_v2  ;;  %v5925_v8 = vpack.c.bf16 %v5819_v41, %v5800_v56  ;;  %v364_v3 = vld [vmem:[%s5170_s19 + $0xf8] sm:$0xff]  ;;  %v5942_v56 = vpack.c.bf16 %v5900_v21, %v745_v47  ;;  %v5065_v47 = vld [vmem:[%s5176_s22] ss:$0 sm:$0xff]  ;;  %s331_s19 = scalar_lea.vmem %s7047_s7, %s3757_s13 }
  0x8b   : > { %v979_v52 = vsel %vm899_vm1, %v976_v53, %v978_v13  ;;  %v4891_v53 = vld [vmem:[%s7043_s3 + $0x130] sm:$0xff]   ;;  %v1484_v13 = vrot.slane %v5627_v6, 2 }
  0x8c   : > { %v5916_v15 = vpack.c.bf16 %v979_v52, %v977_v5  ;;  %v1485_v5 = vrot.slane %v5623_v54, 2  ;;  %v1487_v52 = vrot.slane %v5630_v7, 2 }
  0x8e   : > { %7126 = vst [vmem:[#allocation8_spill] sm:$0xff] %v5916_v15  ;;  %4451 = vmatmul.mubr.bf16.gmra.mxu1 %v5916_v15  ;;  %v5064_v15 = vld [vmem:[%s5162_s16] ss:$0 sm:$0xff]  ;;  %v1486_v54 = vsel %vm1463_vm2, %v1484_v13, %v1485_v5  ;;  %v1488_v7 = vsel %vm1463_vm2, %v1485_v5, %v1487_v52  ;;  %v1490_v13 = vrot.slane %v5759_v10, 2  ;;  %v1492_v5 = vrot.slane %v5762_v26, 2  ;;  %v7129_v52 = vld [vmem:[#allocation13_spill] sm:$0xff] }
  0x8f   : > { %4470 = vmatprep.mubr.msk.bf16.mxu1 %vm5918_vm5, %v5914_v2  ;;  %v402_v30 = vmul.f32 %v5064_v15, %v363_v22  ;;  %4519 = vmatmul.mubr.bf16.vlgmr.msra.gmra.mxu0 %v5653_v27  ;;  %v403_v6 = vmul.f32 %v5064_v15, %v364_v3  ;;  %v4890_v22 = vld [vmem:[%s7043_s3 + $0xf0] sm:$0xff]   ;;  %v1489_v3 = vrot.slane %v5753_v63, 2  ;;  %v4892_v26 = vld [vmem:[%s7043_s3 + $0xe8] sm:$0xff]  }
  0x90   : > { %4599 = vmatpush3.bf16.msra.mxu0 %v5685_v42  ;;  %4522 = vmatprep.mubr.bf16.mxu0 %v5693_v29  ;;  %v5961_v42 = vpack.c.bf16 %v1488_v7, %v1486_v54  ;;  %v1495_v29 = vrot.slane %v5841_v61, 2 }
  0x91   : > { %4600 = vmatprep.subr.bf16.mxu0 %v4891_v53  ;;  %v5954_v2 = vadd.f32 %v5065_v47, %v402_v30  ;;  %v5959_v15 = vadd.f32 %v5065_v47, %v403_v6  ;;  %v1494_v30 = vrot.slane %v5832_v11, 2  ;;  %v1497_v6 = vrot.slane %v5844_v46, 2  ;;  %v4897_v47 = vld [vmem:[%s7043_s3 + $0x118] sm:$0xff]  }
  0x92   : > { %v1491_v46 = vsel %vm1463_vm2, %v1489_v3, %v1490_v13  ;;  %v4894_v3 = vld [vmem:[%s7043_s3 + $0xe0] sm:$0xff]  }
  0x93   : > { %v3790_v63 = vmul.f32 -1.442695, %v5954_v2  ;;  %v3791_v11 = vmul.f32 -1.442695, %v5959_v15  ;;  %v1496_v54 = vsel %vm1463_vm2, %v1494_v30, %v1495_v29  ;;  %v1498_v7 = vsel %vm1463_vm2, %v1495_v29, %v1497_v6 }
  0x94   : > { %4601 = vmatpush3.bf16.msra.mxu0 %v4891_v53  ;;  %v4895_v53 = vld [vmem:[%s7043_s3 + $0x120] sm:$0xff]   ;;  %v1500_v29 = vrot.slane %v5865_v43, 2  ;;  %v6021_v6 = vpack.c.bf16 %v5759_v10, %v5741_v45 }
  0x95   : > { %4602 = vmatprep.subr.bf16.mxu0 %v4893_v31  ;;  %5056 = vpow2.f32 %v3790_v63  ;;  %v6028_v63 = vpack.c.bf16 %v5841_v61, %v5824_v25  ;;  %v4903_v45 = vld [vmem:[%s7043_s3 + $0x100] sm:$0xff]   ;;  %v4900_v25 = vld [vmem:[%s7043_s3 + $0xc8] sm:$0xff]  }
  0x96   : > { %4471 = vmatmul.mubr.msk.bf16.vlgmr.msra.gmra.mxu1 %vm5918_vm5, %v7129_v52  ;;  %5058 = vpow2.f32 %v3791_v11  ;;  %v4898_v11 = vld [vmem:[%s7043_s3 + $0xd0] sm:$0xff]  }
  0x97   : > { %4551 = vmatpush3.bf16.msra.mxu1 %v5736_v12  ;;  %4474 = vmatprep.mubr.msk.bf16.mxu1 %vm5918_vm5, %v5669_v17  ;;  %v1493_v12 = vsel %vm1463_vm2, %v1490_v13, %v1492_v5  ;;  %v1499_v13 = vrot.slane %v5853_v39, 2  ;;  %v1502_v5 = vrot.slane %v5868_v0, 2  ;;  %v4896_v39 = vld [vmem:[%s7043_s3 + $0xd8] sm:$0xff]  }
  0x98   : > { %4523 = vmatmul.mubr.bf16.gmra.mxu0 %v5699_v38  ;;  %4552 = vmatprep.subr.bf16.mxu1 %v4890_v22  ;;  %v5993_v38 = vpack.c.bf16 %v1493_v12, %v1491_v46  ;;  %v6051_v46 = vpack.c.bf16 %v5865_v43, %v5834_v16  ;;  %v6056_v12 = vld [vmem:[%s7043_s3 + $0x1b8] sm:$0xff]   ;;  %v1524_v16 = vrot.slane %v5779_v48, 2  ;;  %v1525_v43 = vrot.slane %v5791_v55, 2 }
  0x99   : > { %4526 = vmatprep.mubr.bf16.mxu0 %v5961_v42  ;;  %4603 = vmatpush3.bf16.msra.mxu0 %v4893_v31  ;;  %v5998_v31 = vpack.c.bf16 %v1498_v7, %v1496_v54  ;;  %v1501_v0 = vsel %vm1463_vm2, %v1499_v13, %v1500_v29  ;;  %v1503_v30 = vsel %vm1463_vm2, %v1500_v29, %v1502_v5  ;;  %v4902_v7 = vld [vmem:[%s7043_s3 + $0xc0] sm:$0xff]   ;;  %v6075_v13 = vld [vmem:[%s7043_s3 + $0x178] sm:$0xff]   ;;  %v1529_v29 = vrot.slane %v5811_v49, 2 }
  0x9a   : > { %4604 = vmatprep.subr.bf16.mxu0 %v4895_v53  ;;  %v1526_v48 = vsel %vm1463_vm2, %v1524_v16, %v1525_v43  ;;  %v1530_v5 = vrot.slane %v5819_v41, 2 }
  0x9b   : > { %4553 = vmatpush3.bf16.msra.mxu1 %v4890_v22  ;;  %v4899_v22 = vld [vmem:[%s7043_s3 + $0x110] sm:$0xff]  }
  0x9c   : > { %4554 = vmatprep.subr.bf16.mxu1 %v4892_v26  ;;  %v1531_v49 = vsel %vm1463_vm2, %v1529_v29, %v1530_v5 }
  0x9d   : > { %4605 = vmatpush3.bf16.msra.mxu0 %v4895_v53  ;;  %v4901_v53 = vld [vmem:[%s7043_s3 + $0x108] sm:$0xff]  }
  0x9e   : > { %4475 = vmatmul.mubr.msk.bf16.gmra.mxu1 %vm5918_vm5, %v5690_v4  ;;  %4606 = vmatprep.subr.bf16.mxu0 %v4897_v47 }
  0x9f   : > { %4478 = vmatprep.mubr.msk.bf16.mxu1 %vm5918_vm5, %v5704_v18  ;;  %4555 = vmatpush3.bf16.msra.mxu1 %v4892_v26  ;;  %v6030_v26 = vpack.c.bf16 %v1503_v30, %v1501_v0  ;;  %v1535_v0 = vrot.slane %v5878_v36, 2  ;;  %v1537_v30 = vrot.slane %v5881_v14, 2 }
  0xa0   : > { %4527 = vmatmul.mubr.bf16.gmra.mxu0 %v5993_v38  ;;  %4556 = vmatprep.subr.bf16.mxu1 %v4894_v3 }
  0xa1   : > { %4530 = vmatprep.mubr.bf16.mxu0 %v5998_v31  ;;  %4607 = vmatpush3.bf16.msra.mxu0 %v4897_v47 }
  0xa2   : > { %4608 = vmatprep.subr.bf16.mxu0 %v4899_v22  ;;  %v5057_v10 = vpop.eup %5056 }
  0xa3   : > { %4557 = vmatpush3.bf16.msra.mxu1 %v4894_v3  ;;  %v5059_v61 = vpop.eup %5058  ;;  %v569_v54 = vadd.f32 1.0, %v5057_v10  ;;  %v1527_v3 = vrot.slane %v5794_v9, 2  ;;  %v1540_v10 = vrot.slane %v5900_v21, 2 }
  0xa4   : > { %4558 = vmatprep.subr.bf16.mxu1 %v4896_v39  ;;  %v570_v47 = vadd.f32 1.0, %v5059_v61 }
  0xa5   : > { %4609 = vmatpush3.bf16.msra.mxu0 %v4899_v22  ;;  %5060 = vrcp.f32 %v569_v54  ;;  %v1528_v55 = vsel %vm1463_vm2, %v1525_v43, %v1527_v3  ;;  %v1532_v22 = vrot.slane %v5822_v57, 2  ;;  %v7130_v43 = vld [vmem:[#allocation14_spill] sm:$0xff] }
  0xa6   : > { %4479 = vmatmul.mubr.msk.bf16.gmra.mxu1 %vm5918_vm5, %v6021_v6  ;;  %4610 = vmatprep.subr.bf16.mxu0 %v4901_v53  ;;  %5062 = vrcp.f32 %v570_v47  ;;  %v6081_v9 = vpack.c.bf16 %v1528_v55, %v1526_v48 }
  0xa7   : > { %4482 = vmatprep.mubr.msk.bf16.mxu1 %vm5918_vm5, %v6028_v63  ;;  %4559 = vmatpush3.bf16.msra.mxu1 %v4896_v39  ;;  %v1534_v39 = vrot.slane %v5873_v62, 2  ;;  %v1533_v41 = vsel %vm1463_vm2, %v1530_v5, %v1532_v22  ;;  %v1538_v62 = vsel %vm1463_vm2, %v1535_v0, %v1537_v30  ;;  %v7132_v30 = vld [vmem:[#allocation19_spill] sm:$0xff] }
  0xa8   : > { %4531 = vmatmul.mubr.bf16.gmra.mxu0 %v6030_v26  ;;  %4560 = vmatprep.subr.bf16.mxu1 %v4898_v11  ;;  %v6101_v36 = vpack.c.bf16 %v1533_v41, %v1531_v49  ;;  %v4909_v49 = vld [vmem:[%s7043_s3 + $0x1a8] sm:$0xff]   ;;  %v4906_v41 = vld [vmem:[%s7043_s3 + $0x170] sm:$0xff]  }
  0xa9   : > { %4534 = vmatprep.mubr.bf16.mxu0 %v5721_v44  ;;  %4611 = vmatpush3.bf16.msra.mxu0 %v4901_v53  ;;  %v1536_v57 = vsel %vm1463_vm2, %v1534_v39, %v1535_v0  ;;  %v4907_v39 = vld [vmem:[%s7043_s3 + $0x1b0] sm:$0xff]   ;;  %v7131_v0 = vld [vmem:[#allocation17_spill] sm:$0xff] }
  0xaa   : > { %4612 = vmatprep.subr.bf16.mxu0 %v4903_v45 }
  0xab   : > { %4561 = vmatpush3.bf16.msra.mxu1 %v4898_v11  ;;  %v6103_v11 = vpack.c.bf16 %v1538_v62, %v1536_v57  ;;  %v4913_v57 = vld [vmem:[%s7043_s3 + $0x198] sm:$0xff]   ;;  %v4915_v62 = vld [vmem:[%s7043_s3 + $0x190] sm:$0xff]  }
  0xac   : > { %4562 = vmatprep.subr.bf16.mxu1 %v4900_v25 }
  0xad   : > { %4613 = vmatpush3.bf16.msra.mxu0 %v4903_v45  ;;  %v1539_v45 = vrot.slane %v5891_v40, 2 }
  0xae   : > { %4483 = vmatmul.mubr.msk.bf16.gmra.mxu1 %vm5918_vm5, %v6051_v46  ;;  %4694 = vmatprep.subr.bf16.mxu0 %v6056_v12 }
  0xaf   : > { %4486 = vmatprep.mubr.msk.bf16.mxu1 %vm5918_vm5, %v5716_v19  ;;  %4563 = vmatpush3.bf16.msra.mxu1 %v4900_v25  ;;  %v1542_v25 = vrot.slane %v5903_v51, 2  ;;  %v1541_v40 = vsel %vm1463_vm2, %v1539_v45, %v1540_v10  ;;  %v4914_v45 = vld [vmem:[%s7043_s3 + $0x150] sm:$0xff]  }
  0xb0   : > { %4535 = vmatmul.mubr.bf16.gmra.mxu0 %v5743_v34  ;;  %4564 = vmatprep.subr.bf16.mxu1 %v4902_v7 }
  0xb1   : > { %4538 = vmatprep.mubr.bf16.mxu0 %v5755_v58  ;;  %v1543_v21 = vsel %vm1463_vm2, %v1540_v10, %v1542_v25  ;;  %v4919_v10 = vld [vmem:[%s7043_s3 + $0x180] sm:$0xff]   ;;  %v7133_v25 = vld [vmem:[#allocation15_spill] sm:$0xff] }
  0xb2   : > { %v5061_v53 = vpop.eup %5060  ;;  %v6120_v51 = vpack.c.bf16 %v1543_v21, %v1541_v40  ;;  %v4921_v40 = vld [vmem:[%s7043_s3 + $0x238] sm:$0xff]   ;;  %v4918_v21 = vld [vmem:[%s7043_s3 + $0x140] sm:$0xff]  }
  0xb3   : > { %4565 = vmatpush3.bf16.msra.mxu1 %v4902_v7  ;;  %v5063_v14 = vpop.eup %5062  ;;  %v665_v61 = vmul.f32 %v5061_v53, %v5954_v2  ;;  %v4912_v53 = vld [vmem:[%s7043_s3 + $0x158] sm:$0xff]  }
  0xb4   : > { %4646 = vmatprep.subr.bf16.mxu1 %v6075_v13  ;;  %v666_v54 = vmul.f32 %v5063_v14, %v5959_v15  ;;  %v4917_v14 = vld [vmem:[%s7043_s3 + $0x188] sm:$0xff]  }
  0xb5   : > { %v6122_v7 = vrot.slane %v665_v61, 7  ;;  %v4916_v61 = vld [vmem:[%s7043_s3 + $0x148] sm:$0xff]  }
  0xb6   : > { %4487 = vmatmul.mubr.msk.bf16.gmra.mxu1 %vm5918_vm5, %v5727_v28  ;;  %v749_v47 = vrot.slane %v666_v54, 7  ;;  %v7134_v54 = vld [vmem:[#allocation16_spill] sm:$0xff] }
  0xb7   : > { %4490 = vmatprep.mubr.msk.bf16.mxu1 %vm5918_vm5, %v5749_v35  ;;  %v6137_v15 = vsel %vm700_vm0, 0.0, %v6122_v7 }
  0xb8   : > { %4539 = vmatmul.mubr.bf16.gmra.mxu0 %v5787_v60  ;;  %v6133_v2 = vsel %vm700_vm0, %v6122_v7, %v749_v47  ;;  %v6140_v16 = vsel %vm700_vm0, %v749_v47, 0.0  ;;  %v2377_v3 = vrot.slane %v6137_v15, 2  ;;  %v4920_v47 = vld [vmem:[%s7043_s3 + $0x1f8] sm:$0xff]  }
  0xb9   : > { %4542 = vmatprep.mubr.bf16.mxu0 %v6081_v9  ;;  %v2378_v48 = vrot.slane %v6133_v2, 2  ;;  %v2380_v55 = vrot.slane %v6140_v16, 2 }
  0xbb   : > { %v2379_v29 = vsel %vm1463_vm2, %v2377_v3, %v2378_v48  ;;  %v2381_v5 = vsel %vm1463_vm2, %v2378_v48, %v2380_v55  ;;  %v7136_v3 = vld [vmem:[#allocation18_spill] sm:$0xff]  ;;  %v7137_v48 = vld [vmem:[#allocation5_spill] sm:$0xff]  ;;  %v2111_v55 = vrot.slane %v6137_v15, 1 }
  0xbc   : > { %v6148_v22 = vpack.c.bf16 %v2381_v5, %v2379_v29  ;;  %v2112_v29 = vrot.slane %v6133_v2, 1  ;;  %v2114_v5 = vrot.slane %v6140_v16, 1  ;;  %v6275_v16 = vpack.c.bf16 %v6133_v2, %v6122_v7  ;;  %v4922_v7 = vld [vmem:[%s7043_s3 + $0x1f0] sm:$0xff]   ;;  %v7142_v2 = vld [vmem:[#allocation22_spill] sm:$0xff] }
  0xbe   : > { %4491 = vmatmul.mubr.msk.bf16.gmra.mxu1 %vm5918_vm5, %v5783_v24  ;;  %v2115_v15 = vsel %vm899_vm1, %v2112_v29, %v2114_v5 }
  0xbf   : > { %4494 = vmatprep.mubr.msk.bf16.mxu1 %vm5918_vm5, %v5803_v33 }
  0xc0   : > { %4543 = vmatmul.mubr.bf16.gmra.mxu0 %v6101_v36 }
  0xc1   : > { %4546 = vmatprep.mubr.bf16.mxu0 %v6103_v11 }
  0xc6   : > { %4495 = vmatmul.mubr.msk.bf16.gmra.mxu1 %vm5918_vm5, %v5925_v8 }
  0xc7   : > { %4498 = vmatprep.mubr.msk.bf16.mxu1 %vm5918_vm5, %v5936_v32 }
  0xc8   : > { %4547 = vmatmul.mubr.bf16.gmra.mxu0 %v6120_v51 }
  0xc9   : > { %4614 = vmatprep.mubr.bf16.mxu0 %v7130_v43  ;;  %v7135_v43 = vld [vmem:[#allocation20_spill] sm:$0xff] }
  0xce   : > { %4499 = vmatmul.mubr.msk.bf16.gmra.mxu1 %vm5918_vm5, %v5942_v56 }
  0xcf   : > { %4566 = vmatprep.mubr.msk.bf16.mxu1 %vm5918_vm5, %v7129_v52  ;;  %v4911_v52 = vld [vmem:[%s7043_s3 + $0x1a0] sm:$0xff]  }
  0xd0   : > { %4615 = vmatmul.mubr.bf16.vlgmr.msra.gmra.mxu0 %v7131_v0 }
  0xd1   : > { %4695 = vmatpush3.bf16.msra.mxu0 %v6056_v12  ;;  %4618 = vmatprep.mubr.bf16.mxu0 %v7132_v30  ;;  %v4908_v12 = vld [vmem:[%s7043_s3 + $0x168] sm:$0xff]  }
  0xd2   : > { %4696 = vmatprep.subr.bf16.mxu0 %v4907_v39 }
  0xd5   : > { %4697 = vmatpush3.bf16.msra.mxu0 %v4907_v39  ;;  %v7138_v39 = vld [vmem:[#allocation6_spill] sm:$0xff] }
  0xd6   : > { %4567 = vmatmul.mubr.msk.bf16.vlgmr.msra.gmra.mxu1 %vm5918_vm5, %v5669_v17  ;;  %4698 = vmatprep.subr.bf16.mxu0 %v4909_v49 }
  0xd7   : > { %4647 = vmatpush3.bf16.msra.mxu1 %v6075_v13  ;;  %4570 = vmatprep.mubr.msk.bf16.mxu1 %vm5918_vm5, %v5690_v4  ;;  %v4910_v13 = vld [vmem:[%s7043_s3 + $0x160] sm:$0xff]  }
  0xd8   : > { %4619 = vmatmul.mubr.bf16.gmra.mxu0 %v5655_v23  ;;  %4648 = vmatprep.subr.bf16.mxu1 %v4906_v41 }
  0xd9   : > { %4622 = vmatprep.mubr.bf16.mxu0 %v5771_v50  ;;  %4699 = vmatpush3.bf16.msra.mxu0 %v4909_v49  ;;  %v7139_v49 = vld [vmem:[#allocation8_spill] sm:$0xff] }
  0xda   : > { %4700 = vmatprep.subr.bf16.mxu0 %v4911_v52 }
  0xdb   : > { %4649 = vmatpush3.bf16.msra.mxu1 %v4906_v41  ;;  %v2113_v41 = vsel %vm899_vm1, %v2111_v55, %v2112_v29 }
  0xdc   : > { %4650 = vmatprep.subr.bf16.mxu1 %v4908_v12 }
  0xdd   : > { %4701 = vmatpush3.bf16.msra.mxu0 %v4911_v52  ;;  %v6261_v52 = vpack.c.bf16 %v2115_v15, %v2113_v41 }
  0xde   : > { %4571 = vmatmul.mubr.msk.bf16.gmra.mxu1 %vm5918_vm5, %v5704_v18  ;;  %4702 = vmatprep.subr.bf16.mxu0 %v4913_v57 }
  0xdf   : > { %4574 = vmatprep.mubr.msk.bf16.mxu1 %vm5918_vm5, %v6021_v6  ;;  %4651 = vmatpush3.bf16.msra.mxu1 %v4908_v12  ;;  %7140 = vst [vmem:[#allocation9_spill] sm:$0xff] %v6261_v52  ;;  %v4923_v12 = vld [vmem:[%s7043_s3 + $0x230] sm:$0xff]  }
  0xe0   : > { %4623 = vmatmul.mubr.bf16.gmra.mxu0 %v5861_v20  ;;  %4652 = vmatprep.subr.bf16.mxu1 %v4910_v13 }
  0xe1   : > { %4626 = vmatprep.mubr.bf16.mxu0 %v5888_v37  ;;  %4703 = vmatpush3.bf16.msra.mxu0 %v4913_v57 }
  0xe2   : > { %4704 = vmatprep.subr.bf16.mxu0 %v4915_v62 }
  0xe3   : > { %4653 = vmatpush3.bf16.msra.mxu1 %v4910_v13  ;;  %v4929_v13 = vld [vmem:[%s7043_s3 + $0x218] sm:$0xff]  }
  0xe4   : > { %4654 = vmatprep.subr.bf16.mxu1 %v4912_v53 }
  0xe5   : > { %4705 = vmatpush3.bf16.msra.mxu0 %v4915_v62 }
  0xe6   : > { %4575 = vmatmul.mubr.msk.bf16.gmra.mxu1 %vm5918_vm5, %v6028_v63  ;;  %4706 = vmatprep.subr.bf16.mxu0 %v4917_v14 }
  0xe7   : > { %4578 = vmatprep.mubr.msk.bf16.mxu1 %vm5918_vm5, %v6051_v46  ;;  %4655 = vmatpush3.bf16.msra.mxu1 %v4912_v53  ;;  %v4928_v53 = vld [vmem:[%s7043_s3 + $0x1d8] sm:$0xff]  }
  0xe8   : > { %4627 = vmatmul.mubr.bf16.gmra.mxu0 %v7133_v25  ;;  %4656 = vmatprep.subr.bf16.mxu1 %v4914_v45 }
  0xe9   : > { %4630 = vmatprep.mubr.bf16.mxu0 %v7134_v54  ;;  %4707 = vmatpush3.bf16.msra.mxu0 %v4917_v14 }
  0xea   : > { %4708 = vmatprep.subr.bf16.mxu0 %v4919_v10 }
  0xeb   : > { %4657 = vmatpush3.bf16.msra.mxu1 %v4914_v45 }
  0xec   : > { %4658 = vmatprep.subr.bf16.mxu1 %v4916_v61 }
  0xed   : > { %4709 = vmatpush3.bf16.msra.mxu0 %v4919_v10  ;;  %v4933_v10 = vld [vmem:[%s7043_s3 + $0x208] sm:$0xff]  }
  0xee   : > { %4579 = vmatmul.mubr.msk.bf16.gmra.mxu1 %vm5918_vm5, %v5716_v19  ;;  %4790 = vmatprep.subr.bf16.mxu0 %v4921_v40 }
  0xef   : > { %4582 = vmatprep.mubr.msk.bf16.mxu1 %vm5918_vm5, %v5727_v28  ;;  %4659 = vmatpush3.bf16.msra.mxu1 %v4916_v61  ;;  %v4930_v61 = vld [vmem:[%s7043_s3 + $0x1d0] sm:$0xff]  }
  0xf0   : > { %4631 = vmatmul.mubr.bf16.gmra.mxu0 %v5606_v1  ;;  %4660 = vmatprep.subr.bf16.mxu1 %v4918_v21 }
  0xf1   : > { %4634 = vmatprep.mubr.bf16.mxu0 %v7135_v43 }
  0xf3   : > { %4661 = vmatpush3.bf16.msra.mxu1 %v4918_v21 }
  0xf4   : > { %4742 = vmatprep.subr.bf16.mxu1 %v4920_v47 }
  0xf6   : > { %4583 = vmatmul.mubr.msk.bf16.gmra.mxu1 %vm5918_vm5, %v5749_v35 }
  0xf7   : > { %4586 = vmatprep.mubr.msk.bf16.mxu1 %vm5918_vm5, %v5783_v24 }
  0xf8   : > { %4635 = vmatmul.mubr.bf16.gmra.mxu0 %v7136_v3 }
  0xf9   : > { %4638 = vmatprep.mubr.bf16.mxu0 %v7137_v48 }
  0xfe   : > { %4587 = vmatmul.mubr.msk.bf16.gmra.mxu1 %vm5918_vm5, %v5803_v33 }
  0xff   : > { %4590 = vmatprep.mubr.msk.bf16.mxu1 %vm5918_vm5, %v5925_v8 }
 0x100   : > { %4639 = vmatmul.mubr.bf16.gmra.mxu0 %v7138_v39 }
 0x101   : > { %4642 = vmatprep.mubr.bf16.mxu0 %v7139_v49 }
 0x103   : > { %v6307_v57 = vpop.f32.mrf.mxu0 }
 0x105   : > { %v6318_v62 = vpop.f32.mrf.mxu0 }
 0x106   : > { %4591 = vmatmul.mubr.msk.bf16.gmra.mxu1 %vm5918_vm5, %v5936_v32 }
 0x107   : > { %4594 = vmatprep.mubr.msk.bf16.mxu1 %vm5918_vm5, %v5942_v56  ;;  %v6331_v14 = vpop.f32.mrf.mxu0 }
 0x108   : > { %4643 = vmatmul.mubr.bf16.gmra.mxu0 %v6261_v52 }
 0x109   : > { %4710 = vmatprep.mubr.msk.bf16.mxu0 %vm5918_vm5, %v5669_v17  ;;  %v4925_v17 = vld [vmem:[%s7043_s3 + $0x228] sm:$0xff]   ;;  %v6336_v45 = vpop.f32.mrf.mxu1 }
 0x10e   : > { %4595 = vmatmul.mubr.msk.bf16.gmra.mxu1 %vm5918_vm5, %v6275_v16 }
 0x10f   : > { %4662 = vmatprep.mubr.bf16.mxu1 %v5653_v27  ;;  %v7141_v27 = vld [vmem:[#allocation21_spill] sm:$0xff] }
 0x110   : > { %4711 = vmatmul.mubr.msk.bf16.vlgmr.msra.gmra.mxu0 %vm5918_vm5, %v5690_v4  ;;  %v4927_v4 = vld [vmem:[%s7043_s3 + $0x220] sm:$0xff]  }
 0x111   : > { %4791 = vmatpush3.bf16.msra.mxu0 %v4921_v40  ;;  %4714 = vmatprep.mubr.msk.bf16.mxu0 %vm5918_vm5, %v5704_v18  ;;  %v4924_v18 = vld [vmem:[%s7043_s3 + $0x1e8] sm:$0xff]   ;;  %v6346_v40 = vpop.f32.mrf.mxu1 }
 0x112   : > { %4792 = vmatprep.subr.bf16.mxu0 %v4923_v12 }
 0x113   : > { %v6364_v55 = vpop.f32.mrf.mxu1 }
 0x115   : > { %4793 = vmatpush3.bf16.msra.mxu0 %v4923_v12  ;;  %v6371_v5 = vpop.f32.mrf.mxu1 }
 0x116   : > { %4663 = vmatmul.mubr.bf16.vlgmr.msra.gmra.mxu1 %v7141_v27  ;;  %4794 = vmatprep.subr.bf16.mxu0 %v4925_v17 }
 0x117   : > { %4743 = vmatpush3.bf16.msra.mxu1 %v4920_v47  ;;  %4666 = vmatprep.mubr.bf16.mxu1 %v7142_v2  ;;  %v4932_v47 = vld [vmem:[%s7043_s3 + $0x1c8] sm:$0xff]   ;;  %v6383_v41 = vpop.f32.mrf.mxu1 }
 0x118   : > { %4715 = vmatmul.mubr.msk.bf16.gmra.mxu0 %vm5918_vm5, %v6021_v6  ;;  %4744 = vmatprep.subr.bf16.mxu1 %v4922_v7  ;;  %v4926_v6 = vld [vmem:[%s7043_s3 + $0x1e0] sm:$0xff]  }
 0x119   : > { %4718 = vmatprep.mubr.msk.bf16.mxu0 %vm5918_vm5, %v6028_v63  ;;  %4795 = vmatpush3.bf16.msra.mxu0 %v4925_v17  ;;  %v4931_v63 = vld [vmem:[%s7043_s3 + $0x210] sm:$0xff]   ;;  %v6387_v12 = vpop.f32.mrf.mxu1 }
 0x11a   : > { %4796 = vmatprep.subr.bf16.mxu0 %v4927_v4 }
 0x11b   : > { %4745 = vmatpush3.bf16.msra.mxu1 %v4922_v7  ;;  %v6396_v17 = vpop.f32.mrf.mxu1 }
 0x11c   : > { %4746 = vmatprep.subr.bf16.mxu1 %v4924_v18 }
 0x11d   : > { %4797 = vmatpush3.bf16.msra.mxu0 %v4927_v4  ;;  %v6403_v7 = vpop.f32.mrf.mxu1 }
 0x11e   : > { %4667 = vmatmul.mubr.bf16.gmra.mxu1 %v5961_v42  ;;  %4798 = vmatprep.subr.bf16.mxu0 %v4929_v13 }
 0x11f   : > { %4670 = vmatprep.mubr.bf16.mxu1 %v5993_v38  ;;  %4747 = vmatpush3.bf16.msra.mxu1 %v4924_v18 }
 0x120   : > { %4719 = vmatmul.mubr.msk.bf16.gmra.mxu0 %vm5918_vm5, %v6051_v46  ;;  %4748 = vmatprep.subr.bf16.mxu1 %v4926_v6  ;;  %v6341_v46 = vpop.f32.mrf.mxu0 }
 0x121   : > { %4722 = vmatprep.mubr.msk.bf16.mxu0 %vm5918_vm5, %v5716_v19  ;;  %4799 = vmatpush3.bf16.msra.mxu0 %v4929_v13  ;;  %v4935_v19 = vld [vmem:[%s7043_s3 + $0x200] sm:$0xff]  }
 0x122   : > { %4800 = vmatprep.subr.bf16.mxu0 %v4931_v63  ;;  %v6356_v21 = vpop.f32.mrf.mxu0 }
 0x123   : > { %4749 = vmatpush3.bf16.msra.mxu1 %v4926_v6 }
 0x124   : > { %4750 = vmatprep.subr.bf16.mxu1 %v4928_v53  ;;  %v6366_v29 = vpop.f32.mrf.mxu0 }
 0x125   : > { %4801 = vmatpush3.bf16.msra.mxu0 %v4931_v63 }
 0x126   : > { %4671 = vmatmul.mubr.bf16.gmra.mxu1 %v5998_v31  ;;  %4802 = vmatprep.subr.bf16.mxu0 %v4933_v10 }
 0x127   : > { %4674 = vmatprep.mubr.bf16.mxu1 %v6030_v26  ;;  %4751 = vmatpush3.bf16.msra.mxu1 %v4928_v53 }
 0x128   : > { %4723 = vmatmul.mubr.msk.bf16.gmra.mxu0 %vm5918_vm5, %v5727_v28  ;;  %4752 = vmatprep.subr.bf16.mxu1 %v4930_v61  ;;  %v4934_v28 = vld [vmem:[%s7043_s3 + $0x1c0] sm:$0xff]  }
 0x129   : > { %4726 = vmatprep.mubr.msk.bf16.mxu0 %vm5918_vm5, %v5749_v35  ;;  %4803 = vmatpush3.bf16.msra.mxu0 %v4933_v10  ;;  %v6378_v35 = vpop.f32.mrf.mxu0 }
 0x12a   : > { %4804 = vmatprep.subr.bf16.mxu0 %v4935_v19 }
 0x12b   : > { %4753 = vmatpush3.bf16.msra.mxu1 %v4930_v61  ;;  %v6385_v15 = vpop.f32.mrf.mxu0 }
 0x12c   : > { %4754 = vmatprep.subr.bf16.mxu1 %v4932_v47 }
 0x12d   : > { %4805 = vmatpush3.bf16.msra.mxu0 %v4935_v19 }
 0x12e   : > { %4675 = vmatmul.mubr.bf16.gmra.mxu1 %v5721_v44 }
 0x12f   : > { %4678 = vmatprep.mubr.bf16.mxu1 %v5743_v34  ;;  %4755 = vmatpush3.bf16.msra.mxu1 %v4932_v47 }
 0x130   : > { %4727 = vmatmul.mubr.msk.bf16.gmra.mxu0 %vm5918_vm5, %v5783_v24  ;;  %4756 = vmatprep.subr.bf16.mxu1 %v4934_v28  ;;  %v6394_v24 = vpop.f32.mrf.mxu0 }
 0x131   : > { %4730 = vmatprep.mubr.msk.bf16.mxu0 %vm5918_vm5, %v5803_v33 }
 0x132   : > { %v6401_v33 = vpop.f32.mrf.mxu0 }
 0x133   : > { %4757 = vmatpush3.bf16.msra.mxu1 %v4934_v28 }
 0x136   : > { %4679 = vmatmul.mubr.bf16.gmra.mxu1 %v5755_v58 }
 0x137   : > { %4682 = vmatprep.mubr.bf16.mxu1 %v5787_v60 }
 0x138   : > { %4731 = vmatmul.mubr.msk.bf16.gmra.mxu0 %vm5918_vm5, %v5925_v8  ;;  %v6410_v8 = vpop.f32.mrf.mxu0 }
 0x139   : > { %4734 = vmatprep.mubr.msk.bf16.mxu0 %vm5918_vm5, %v5936_v32 }
 0x13a   : > { %v6419_v18 = vpop.f32.mrf.mxu0 }
 0x13e   : > { %4683 = vmatmul.mubr.bf16.gmra.mxu1 %v6081_v9 }
 0x13f   : > { %4686 = vmatprep.mubr.bf16.mxu1 %v6101_v36 }
 0x140   : > { %4735 = vmatmul.mubr.msk.bf16.gmra.mxu0 %vm5918_vm5, %v5942_v56  ;;  %v7146_v56 = vld [vmem:[#allocation7_spill] sm:$0xff] }
 0x141   : > { %v6412_v4 = vpop.f32.mrf.mxu1  ;;  %4738 = vmatprep.mubr.msk.bf16.mxu0 %vm5918_vm5, %v6275_v16 }
 0x142   : > { %7143 = vst [vmem:[#allocation10_spill] sm:$0xff] %v6412_v4 }
 0x143   : > { %v6417_v32 = vpop.f32.mrf.mxu1 }
 0x144   : > { %7144 = vst [vmem:[#allocation11_spill] sm:$0xff] %v6417_v32 }
 0x145   : > { %v6422_v13 = vpop.f32.mrf.mxu1 }
 0x146   : > { %4687 = vmatmul.mubr.bf16.gmra.mxu1 %v6103_v11  ;;  %7145 = vst [vmem:[#allocation12_spill] sm:$0xff] %v6422_v13 }
 0x147   : > { %4690 = vmatprep.mubr.bf16.mxu1 %v6120_v51  ;;  %v6425_v6 = vpop.f32.mrf.mxu0  ;;  %v6431_v63 = vpop.f32.mrf.mxu1 }
 0x148   : > { %4739 = vmatmul.mubr.msk.bf16.gmra.mxu0 %vm5918_vm5, %v7146_v56  ;;  %7147 = vst [vmem:[#allocation2_spill] sm:$0xff] %v6431_v63 }
 0x149   : > { %4806 = vmatprep.mubr.bf16.mxu0 %v7141_v27  ;;  %v6433_v16 = vpop.f32.mrf.mxu0 }
 0x14b   : > { %v6435_v53 = vpop.f32.mrf.mxu0 }
 0x14d   : > { %v6440_v61 = vpop.f32.mrf.mxu0 }
 0x14e   : > { %v6437_v10 = vpop.f32.mrf.mxu1  ;;  %4691 = vmatmul.mubr.bf16.gmra.mxu1 %v6148_v22 }
 0x14f   : > { %7148 = vst [vmem:[#allocation13_spill] sm:$0xff] %v6437_v10  ;;  %4758 = vmatprep.mubr.bf16.mxu1 %v7131_v0  ;;  %v4520_v59 = vpop.f32.mrf.mxu0 }
 0x150   : > { %v6443_v19 = vpop.f32.mrf.mxu1  ;;  %4807 = vmatmul.mubr.bf16.vlgmr.msra.gmra.mxu0 %v7142_v2 }
 0x151   : > { %7149 = vst [vmem:[#allocation14_spill] sm:$0xff] %v6443_v19  ;;  %4810 = vmatprep.mubr.bf16.mxu0 %v5961_v42  ;;  %v1691_v47 = vpop.f32.mrf.mxu0 }
 0x152   : > { %v6447_v27 = vpop.f32.mrf.mxu1 }
 0x153   : > { %7150 = vst [vmem:[#allocation17_spill] sm:$0xff] %v6447_v27  ;;  %v4521_v56 = vpop.f32.mrf.mxu0 }
 0x154   : > { %v6449_v28 = vpop.f32.mrf.mxu1 }
 0x155   : > { %7151 = vst [vmem:[#allocation19_spill] sm:$0xff] %v6449_v28  ;;  %v1694_v63 = vpop.f32.mrf.mxu0 }
 0x156   : > { %v4472_v10 = vpop.f32.mrf.mxu1  ;;  %4759 = vmatmul.mubr.bf16.vlgmr.msra.gmra.mxu1 %v7132_v30 }
 0x157   : > { %v1345_v13 = vadd.f32 %v4472_v10, %v6307_v57  ;;  %4762 = vmatprep.mubr.bf16.mxu1 %v5655_v23 }
 0x158   : > { %v1336_v0 = vpop.f32.mrf.mxu1  ;;  %v4524_v19 = vpop.f32.mrf.mxu0  ;;  %4811 = vmatmul.mubr.bf16.gmra.mxu0 %v5993_v38 }
 0x159   : > { %v1337_v42 = vadd.f32 %v1336_v0, %v6318_v62  ;;  %4814 = vmatprep.mubr.bf16.mxu0 %v5998_v31  ;;  %v6457_v2 = vadd.f32 %v4520_v59, %v1345_v13 }
 0x15a   : > { %v4473_v28 = vpop.f32.mrf.mxu1  ;;  %v1707_v27 = vpop.f32.mrf.mxu0 }
 0x15b   : > { %v1348_v32 = vadd.f32 %v4473_v28, %v6331_v14  ;;  %v6460_v30 = vadd.f32 %v1691_v47, %v1337_v42 }
 0x15c   : > { %v1339_v52 = vpop.f32.mrf.mxu1  ;;  %v4525_v57 = vpop.f32.mrf.mxu0 }
 0x15d   : > { %v1340_v23 = vadd.f32 %v1339_v52, %v6341_v46  ;;  %v6463_v10 = vadd.f32 %v4521_v56, %v1348_v32 }
 0x15e   : > { %v4476_v4 = vpop.f32.mrf.mxu1  ;;  %4763 = vmatmul.mubr.bf16.gmra.mxu1 %v5771_v50  ;;  %v1710_v38 = vpop.f32.mrf.mxu0 }
 0x15f   : > { %v1361_v31 = vadd.f32 %v4476_v4, %v6356_v21  ;;  %4766 = vmatprep.mubr.bf16.mxu1 %v5861_v20  ;;  %v6468_v62 = vadd.f32 %v1694_v63, %v1340_v23 }
 0x160   : > { %v1352_v13 = vpop.f32.mrf.mxu1  ;;  %v4528_v14 = vpop.f32.mrf.mxu0  ;;  %4815 = vmatmul.mubr.bf16.gmra.mxu0 %v6030_v26 }
 0x161   : > { %v1353_v59 = vadd.f32 %v1352_v13, %v6366_v29  ;;  %4818 = vmatprep.mubr.bf16.mxu0 %v5721_v44  ;;  %v6473_v52 = vadd.f32 %v4524_v19, %v1361_v31 }
 0x162   : > { %v4477_v46 = vpop.f32.mrf.mxu1  ;;  %v1723_v32 = vpop.f32.mrf.mxu0 }
 0x163   : > { %v1364_v50 = vadd.f32 %v4477_v46, %v6378_v35  ;;  %v6476_v47 = vadd.f32 %v1707_v27, %v1353_v59 }
 0x164   : > { %v1355_v21 = vpop.f32.mrf.mxu1  ;;  %v4529_v20 = vpop.f32.mrf.mxu0 }
 0x165   : > { %v1356_v4 = vadd.f32 %v1355_v21, %v6385_v15  ;;  %v6479_v63 = vadd.f32 %v4525_v57, %v1364_v50 }
 0x166   : > { %v4480_v28 = vpop.f32.mrf.mxu1  ;;  %4767 = vmatmul.mubr.bf16.gmra.mxu1 %v5888_v37  ;;  %v1726_v26 = vpop.f32.mrf.mxu0 }
 0x167   : > { %v1377_v44 = vadd.f32 %v4480_v28, %v6394_v24  ;;  %4770 = vmatprep.mubr.bf16.mxu1 %v7133_v25  ;;  %v6484_v29 = vadd.f32 %v1710_v38, %v1356_v4 }
 0x168   : > { %v1368_v19 = vpop.f32.mrf.mxu1  ;;  %v4532_v35 = vpop.f32.mrf.mxu0  ;;  %4819 = vmatmul.mubr.bf16.gmra.mxu0 %v5743_v34 }
 0x169   : > { %v1369_v27 = vadd.f32 %v1368_v19, %v6401_v33  ;;  %4822 = vmatprep.mubr.bf16.mxu0 %v5755_v58  ;;  %v6489_v15 = vadd.f32 %v4528_v14, %v1377_v44 }
 0x16a   : > { %v4481_v56 = vpop.f32.mrf.mxu1  ;;  %v1739_v0 = vpop.f32.mrf.mxu0 }
 0x16b   : > { %v1380_v37 = vadd.f32 %v4481_v56, %v6410_v8  ;;  %v6492_v42 = vadd.f32 %v1723_v32, %v1369_v27 }
 0x16c   : > { %v1371_v24 = vpop.f32.mrf.mxu1  ;;  %v4533_v25 = vpop.f32.mrf.mxu0 }
 0x16d   : > { %v1372_v57 = vadd.f32 %v1371_v24, %v6419_v18  ;;  %v6495_v23 = vadd.f32 %v4529_v20, %v1380_v37 }
 0x16e   : > { %v4484_v38 = vpop.f32.mrf.mxu1  ;;  %4771 = vmatmul.mubr.bf16.gmra.mxu1 %v7134_v54  ;;  %v1742_v34 = vpop.f32.mrf.mxu0 }
 0x16f   : > { %v1393_v58 = vadd.f32 %v4484_v38, %v6425_v6  ;;  %4774 = vmatprep.mubr.bf16.mxu1 %v5606_v1  ;;  %v6500_v33 = vadd.f32 %v1726_v26, %v1372_v57 }
 0x170   : > { %v1384_v31 = vpop.f32.mrf.mxu1  ;;  %v4536_v8 = vpop.f32.mrf.mxu0  ;;  %4823 = vmatmul.mubr.bf16.gmra.mxu0 %v5787_v60 }
 0x171   : > { %v1385_v13 = vadd.f32 %v1384_v31, %v6433_v16  ;;  %4826 = vmatprep.mubr.bf16.mxu0 %v6081_v9  ;;  %v6505_v18 = vadd.f32 %v4532_v35, %v1393_v58  ;;  %v7153_v58 = vld [vmem:[#allocation9_spill] sm:$0xff] }
 0x172   : > { %v4485_v14 = vpop.f32.mrf.mxu1  ;;  %v1755_v59 = vpop.f32.mrf.mxu0 }
 0x173   : > { %v1396_v54 = vadd.f32 %v4485_v14, %v6435_v53  ;;  %v6508_v46 = vadd.f32 %v1739_v0, %v1385_v13  ;;  %v7154_v13 = vld [vmem:[#allocation4_spill] sm:$0xff]  ;;  %v7155_v14 = vld [vmem:[#allocation11_spill] sm:$0xff] }
 0x174   : > { %v1387_v6 = vpop.f32.mrf.mxu1  ;;  %v4537_v1 = vpop.f32.mrf.mxu0 }
 0x175   : > { %v1388_v32 = vadd.f32 %v1387_v6, %v6440_v61  ;;  %v6511_v50 = vadd.f32 %v4533_v25, %v1396_v54 }
 0x176   : > { %v4488_v21 = vpop.f32.mrf.mxu1  ;;  %4775 = vmatmul.mubr.bf16.gmra.mxu1 %v7135_v43  ;;  %v1758_v60 = vpop.f32.mrf.mxu0 }
 0x177   : > { %v1409_v9 = vadd.f32 %v4488_v21, %v6336_v45  ;;  %4778 = vmatprep.mubr.bf16.mxu1 %v7136_v3  ;;  %v6516_v16 = vadd.f32 %v1742_v34, %v1388_v32 }
 0x178   : > { %v1400_v20 = vpop.f32.mrf.mxu1  ;;  %v4540_v53 = vpop.f32.mrf.mxu0  ;;  %4827 = vmatmul.mubr.bf16.gmra.mxu0 %v6101_v36 }
 0x179   : > { %v1401_v4 = vadd.f32 %v1400_v20, %v6346_v40  ;;  %4830 = vmatprep.mubr.bf16.mxu0 %v6103_v11  ;;  %v6521_v61 = vadd.f32 %v4536_v8, %v1409_v9  ;;  %v7157_v9 = vld [vmem:[#allocation2_spill] sm:$0xff] }
 0x17a   : > { %v4489_v28 = vpop.f32.mrf.mxu1  ;;  %v1771_v26 = vpop.f32.mrf.mxu0 }
 0x17b   : > { %v1412_v43 = vadd.f32 %v4489_v28, %v6364_v55  ;;  %v6524_v44 = vadd.f32 %v1755_v59, %v1401_v4  ;;  %v7158_v28 = vld [vmem:[#allocation3_spill] sm:$0xff] }
 0x17c   : > { %v1403_v45 = vpop.f32.mrf.mxu1  ;;  %v4541_v3 = vpop.f32.mrf.mxu0 }
 0x17d   : > { %v1404_v19 = vadd.f32 %v1403_v45, %v6371_v5  ;;  %v6527_v35 = vadd.f32 %v4537_v1, %v1412_v43  ;;  %v7156_v1 = vld [vmem:[#allocation12_spill] sm:$0xff]  ;;  %v7159_v43 = vld [vmem:[#allocation13_spill] sm:$0xff] }
 0x17e   : > { %v4492_v27 = vpop.f32.mrf.mxu1  ;;  %4779 = vmatmul.mubr.bf16.gmra.mxu1 %v7137_v48  ;;  %v1774_v36 = vpop.f32.mrf.mxu0 }
 0x17f   : > { %v1425_v11 = vadd.f32 %v4492_v27, %v6383_v41  ;;  %4782 = vmatprep.mubr.bf16.mxu1 %v7138_v39  ;;  %v6532_v40 = vadd.f32 %v1758_v60, %v1404_v19 }
 0x180   : > { %v1416_v56 = vpop.f32.mrf.mxu1  ;;  %v4544_v55 = vpop.f32.mrf.mxu0  ;;  %4831 = vmatmul.mubr.bf16.gmra.mxu0 %v6120_v51 }
 0x181   : > { %v1417_v0 = vadd.f32 %v1416_v56, %v6387_v12  ;;  %4834 = vmatprep.mubr.bf16.mxu0 %v6148_v22  ;;  %v6537_v5 = vadd.f32 %v4540_v53, %v1425_v11  ;;  %v7152_v12 = vld [vmem:[#allocation10_spill] sm:$0xff] }
 0x182   : > { %v4493_v37 = vpop.f32.mrf.mxu1  ;;  %v1787_v24 = vpop.f32.mrf.mxu0 }
 0x183   : > { %v1428_v48 = vadd.f32 %v4493_v37, %v6396_v17  ;;  %v6540_v25 = vadd.f32 %v1771_v26, %v1417_v0  ;;  %v7161_v37 = vld [vmem:[#allocation17_spill] sm:$0xff] }
 0x184   : > { %v1419_v41 = vpop.f32.mrf.mxu1  ;;  %v4545_v39 = vpop.f32.mrf.mxu0 }
 0x185   : > { %v1420_v57 = vadd.f32 %v1419_v41, %v6403_v7  ;;  %v6543_v38 = vadd.f32 %v4541_v3, %v1428_v48 }
 0x186   : > { %v4496_v34 = vpop.f32.mrf.mxu1  ;;  %4783 = vmatmul.mubr.bf16.gmra.mxu1 %v7139_v49  ;;  %v1790_v51 = vpop.f32.mrf.mxu0 }
 0x187   : > { %v1441_v22 = vadd.f32 %v4496_v34, %v7152_v12  ;;  %4786 = vmatprep.mubr.bf16.mxu1 %v7153_v58  ;;  %v6548_v31 = vadd.f32 %v1774_v36, %v1420_v57  ;;  %v7160_v36 = vld [vmem:[#allocation14_spill] sm:$0xff]  ;;  %v7162_v57 = vld [vmem:[#allocation19_spill] sm:$0xff] }
 0x188   : > { %v1432_v8 = vpop.f32.mrf.mxu1  ;;  %v4548_v17 = vpop.f32.mrf.mxu0  ;;  %4835 = vmatmul.mubr.bf16.gmra.mxu0 %v7154_v13 }
 0x189   : > { %v1433_v59 = vadd.f32 %v1432_v8, %v7155_v14  ;;  %v6552_v54 = vadd.f32 %v4544_v55, %v1441_v22 }
 0x18a   : > { %v4497_v7 = vpop.f32.mrf.mxu1  ;;  %v1803_v6 = vpop.f32.mrf.mxu0 }
 0x18b   : > { %v1444_v32 = vadd.f32 %v4497_v7, %v7156_v1  ;;  %v6555_v49 = vadd.f32 %v1787_v24, %v1433_v59 }
 0x18c   : > { %v1435_v21 = vpop.f32.mrf.mxu1  ;;  %v4549_v60 = vpop.f32.mrf.mxu0 }
 0x18d   : > { %v1436_v20 = vadd.f32 %v1435_v21, %v7157_v9  ;;  %v6558_v53 = vadd.f32 %v4545_v39, %v1444_v32 }
 0x18e   : > { %v4500_v4 = vpop.f32.mrf.mxu1  ;;  %4787 = vmatmul.mubr.bf16.gmra.mxu1 %v7158_v28  ;;  %v1806_v26 = vpop.f32.mrf.mxu0 }
 0x18f   : > { %v1457_v45 = vadd.f32 %v4500_v4, %v7159_v43  ;;  %v6562_v3 = vadd.f32 %v1790_v51, %v1436_v20 }
 0x190   : > { %v1448_v19 = vpop.f32.mrf.mxu1  ;;  %v4616_v27 = vpop.f32.mrf.mxu0 }
 0x191   : > { %v1449_v11 = vadd.f32 %v1448_v19, %v7160_v36  ;;  %v6565_v56 = vadd.f32 %v4548_v17, %v1457_v45 }
 0x192   : > { %v4501_v55 = vpop.f32.mrf.mxu1  ;;  %v2218_v0 = vpop.f32.mrf.mxu0 }
 0x193   : > { %v1460_v24 = vadd.f32 %v4501_v55, %v7161_v37  ;;  %v6568_v48 = vadd.f32 %v1803_v6, %v1449_v11 }
 0x194   : > { %v1451_v41 = vpop.f32.mrf.mxu1  ;;  %v4617_v39 = vpop.f32.mrf.mxu0 }
 0x195   : > { %v1452_v34 = vadd.f32 %v1451_v41, %v7162_v57  ;;  %v6571_v12 = vadd.f32 %v4549_v60, %v1460_v24 }
 0x196   : > { %v4568_v51 = vpop.f32.mrf.mxu1  ;;  %v2221_v22 = vpop.f32.mrf.mxu0 }
 0x197   : > { %v2079_v58 = vadd.f32 %v4568_v51, %v6457_v2  ;;  %v6574_v8 = vadd.f32 %v1806_v26, %v1452_v34 }
 0x198   : > { %v1950_v17 = vpop.f32.mrf.mxu1  ;;  %v4620_v13 = vpop.f32.mrf.mxu0 }
 0x199   : > { %v2077_v14 = vadd.f32 %v1950_v17, %v6460_v30  ;;  %v6577_v59 = vadd.f32 %v4616_v27, %v2079_v58 }
 0x19a   : > { %v4569_v7 = vpop.f32.mrf.mxu1  ;;  %v2234_v6 = vpop.f32.mrf.mxu0 }
 0x19b   : > { %v2080_v1 = vadd.f32 %v4569_v7, %v6463_v10  ;;  %v6580_v32 = vadd.f32 %v2218_v0, %v2077_v14 }
 0x19c   : > { %v1953_v21 = vpop.f32.mrf.mxu1  ;;  %v4621_v60 = vpop.f32.mrf.mxu0 }
 0x19d   : > { %v2078_v9 = vadd.f32 %v1953_v21, %v6468_v62  ;;  %v6583_v20 = vadd.f32 %v4617_v39, %v2080_v1 }
 0x19e   : > { %v4572_v2 = vpop.f32.mrf.mxu1  ;;  %v2237_v4 = vpop.f32.mrf.mxu0 }
 0x19f   : > { %v2083_v28 = vadd.f32 %v4572_v2, %v6473_v52  ;;  %v6586_v26 = vadd.f32 %v2221_v22, %v2078_v9 }
 0x1a0   : > { %v1966_v30 = vpop.f32.mrf.mxu1  ;;  %v4624_v43 = vpop.f32.mrf.mxu0 }
 0x1a1   : > { %v2081_v45 = vadd.f32 %v1966_v30, %v6476_v47  ;;  %v6589_v19 = vadd.f32 %v4620_v13, %v2083_v28 }
 0x1a2   : > { %v4573_v10 = vpop.f32.mrf.mxu1  ;;  %v2250_v27 = vpop.f32.mrf.mxu0 }
 0x1a3   : > { %v2084_v36 = vadd.f32 %v4573_v10, %v6479_v63  ;;  %v6592_v11 = vadd.f32 %v2234_v6, %v2081_v45 }
 0x1a4   : > { %v1969_v62 = vpop.f32.mrf.mxu1  ;;  %v4625_v55 = vpop.f32.mrf.mxu0 }
 0x1a5   : > { %v2082_v0 = vadd.f32 %v1969_v62, %v6484_v29  ;;  %v6595_v37 = vadd.f32 %v4621_v60, %v2084_v36 }
 0x1a6   : > { %v4576_v52 = vpop.f32.mrf.mxu1  ;;  %v2253_v24 = vpop.f32.mrf.mxu0 }
 0x1a7   : > { %v2087_v41 = vadd.f32 %v4576_v52, %v6489_v15  ;;  %v6598_v39 = vadd.f32 %v2237_v4, %v2082_v0 }
 0x1a8   : > { %v1982_v47 = vpop.f32.mrf.mxu1  ;;  %v4628_v57 = vpop.f32.mrf.mxu0 }
 0x1a9   : > { %v2085_v34 = vadd.f32 %v1982_v47, %v6492_v42  ;;  %v6601_v51 = vadd.f32 %v4624_v43, %v2087_v41 }
 0x1aa   : > { %v4577_v63 = vpop.f32.mrf.mxu1  ;;  %v2266_v22 = vpop.f32.mrf.mxu0 }
 0x1ab   : > { %v2088_v58 = vadd.f32 %v4577_v63, %v6495_v23  ;;  %v6604_v17 = vadd.f32 %v2250_v27, %v2085_v34 }
 0x1ac   : > { %v1985_v29 = vpop.f32.mrf.mxu1  ;;  %v4629_v13 = vpop.f32.mrf.mxu0 }
 0x1ad   : > { %v2086_v14 = vadd.f32 %v1985_v29, %v6500_v33  ;;  %v6607_v7 = vadd.f32 %v4625_v55, %v2088_v58 }
 0x1ae   : > { %v4580_v15 = vpop.f32.mrf.mxu1  ;;  %v2269_v6 = vpop.f32.mrf.mxu0 }
 0x1af   : > { %v2091_v1 = vadd.f32 %v4580_v15, %v6505_v18  ;;  %v6610_v21 = vadd.f32 %v2253_v24, %v2086_v14 }
 0x1b0   : > { %v1998_v42 = vpop.f32.mrf.mxu1  ;;  %v4632_v60 = vpop.f32.mrf.mxu0 }
 0x1b1   : > { %v2089_v9 = vadd.f32 %v1998_v42, %v6508_v46  ;;  %v6613_v2 = vadd.f32 %v4628_v57, %v2091_v1 }
 0x1b2   : > { %v4581_v23 = vpop.f32.mrf.mxu1  ;;  %v2282_v4 = vpop.f32.mrf.mxu0 }
 0x1b3   : > { %v2092_v28 = vadd.f32 %v4581_v23, %v6511_v50  ;;  %v6616_v30 = vadd.f32 %v2266_v22, %v2089_v9 }
 0x1b4   : > { %v2001_v33 = vpop.f32.mrf.mxu1  ;;  %v4633_v43 = vpop.f32.mrf.mxu0 }
 0x1b5   : > { %v2090_v45 = vadd.f32 %v2001_v33, %v6516_v16  ;;  %v6619_v10 = vadd.f32 %v4629_v13, %v2092_v28 }
 0x1b6   : > { %v4584_v18 = vpop.f32.mrf.mxu1  ;;  %v2285_v27 = vpop.f32.mrf.mxu0 }
 0x1b7   : > { %v2095_v36 = vadd.f32 %v4584_v18, %v6521_v61  ;;  %v6622_v62 = vadd.f32 %v2269_v6, %v2090_v45 }
 0x1b8   : > { %v2014_v46 = vpop.f32.mrf.mxu1  ;;  %v4636_v55 = vpop.f32.mrf.mxu0 }
 0x1b9   : > { %v2093_v0 = vadd.f32 %v2014_v46, %v6524_v44  ;;  %v6625_v52 = vadd.f32 %v4632_v60, %v2095_v36 }
 0x1ba   : > { %v4585_v50 = vpop.f32.mrf.mxu1  ;;  %v2298_v24 = vpop.f32.mrf.mxu0 }
 0x1bb   : > { %v2096_v41 = vadd.f32 %v4585_v50, %v6527_v35  ;;  %v6628_v47 = vadd.f32 %v2282_v4, %v2093_v0 }
 0x1bc   : > { %v2017_v16 = vpop.f32.mrf.mxu1  ;;  %v4637_v57 = vpop.f32.mrf.mxu0 }
 0x1bd   : > { %v2094_v34 = vadd.f32 %v2017_v16, %v6532_v40  ;;  %v6631_v63 = vadd.f32 %v4633_v43, %v2096_v41 }
 0x1be   : > { %v4588_v61 = vpop.f32.mrf.mxu1  ;;  %v2301_v22 = vpop.f32.mrf.mxu0 }
 0x1bf   : > { %v2099_v58 = vadd.f32 %v4588_v61, %v6537_v5  ;;  %v6634_v29 = vadd.f32 %v2285_v27, %v2094_v34 }
 0x1c0   : > { %v2030_v44 = vpop.f32.mrf.mxu1  ;;  %v4640_v13 = vpop.f32.mrf.mxu0 }
 0x1c1   : > { %7163 = vst [vmem:[#allocation15_spill] sm:$0xff] %v6634_v29  ;;  %v2097_v14 = vadd.f32 %v2030_v44, %v6540_v25  ;;  %v6637_v15 = vadd.f32 %v4636_v55, %v2099_v58 }
 0x1c2   : > { %v4589_v35 = vpop.f32.mrf.mxu1  ;;  %v2314_v6 = vpop.f32.mrf.mxu0 }
 0x1c3   : > { %7164 = vst [vmem:[#allocation16_spill] sm:$0xff] %v6637_v15  ;;  %v2100_v1 = vadd.f32 %v4589_v35, %v6543_v38  ;;  %v6640_v42 = vadd.f32 %v2298_v24, %v2097_v14 }
 0x1c4   : > { %v2033_v40 = vpop.f32.mrf.mxu1  ;;  %v4641_v60 = vpop.f32.mrf.mxu0 }
 0x1c5   : > { %7165 = vst [vmem:[#allocation20_spill] sm:$0xff] %v6640_v42  ;;  %v2098_v9 = vadd.f32 %v2033_v40, %v6548_v31  ;;  %v6643_v23 = vadd.f32 %v4637_v57, %v2100_v1 }
 0x1c6   : > { %v4592_v5 = vpop.f32.mrf.mxu1  ;;  %v2317_v4 = vpop.f32.mrf.mxu0 }
 0x1c7   : > { %7166 = vst [vmem:[#allocation18_spill] sm:$0xff] %v6643_v23  ;;  %v2103_v28 = vadd.f32 %v4592_v5, %v6552_v54  ;;  %v6646_v33 = vadd.f32 %v2301_v22, %v2098_v9 }
 0x1c8   : > { %v2046_v25 = vpop.f32.mrf.mxu1  ;;  %v4644_v43 = vpop.f32.mrf.mxu0 }
 0x1c9   : > { %7167 = vst [vmem:[#allocation5_spill] sm:$0xff] %v6646_v33  ;;  %v2101_v45 = vadd.f32 %v2046_v25, %v6555_v49  ;;  %v6649_v18 = vadd.f32 %v4640_v13, %v2103_v28 }
 0x1ca   : > { %v4593_v38 = vpop.f32.mrf.mxu1  ;;  %v2330_v27 = vpop.f32.mrf.mxu0 }
 0x1cb   : > { %7168 = vst [vmem:[#allocation6_spill] sm:$0xff] %v6649_v18  ;;  %v2104_v36 = vadd.f32 %v4593_v38, %v6558_v53  ;;  %v6652_v46 = vadd.f32 %v2314_v6, %v2101_v45 }
 0x1cc   : > { %v2049_v31 = vpop.f32.mrf.mxu1  ;;  %v4645_v55 = vpop.f32.mrf.mxu0 }
 0x1cd   : > { %7169 = vst [vmem:[#allocation8_spill] sm:$0xff] %v6652_v46  ;;  %v2102_v0 = vadd.f32 %v2049_v31, %v6562_v3  ;;  %v6655_v50 = vadd.f32 %v4641_v60, %v2104_v36 }
 0x1ce   : > { %v4596_v54 = vpop.f32.mrf.mxu1  ;;  %v2333_v24 = vpop.f32.mrf.mxu0 }
 0x1cf   : > { %7170 = vst [vmem:[#allocation21_spill] sm:$0xff] %v6655_v50  ;;  %v2107_v41 = vadd.f32 %v4596_v54, %v6565_v56  ;;  %v6658_v16 = vadd.f32 %v2317_v4, %v2102_v0 }
 0x1d0   : > { %v2062_v49 = vpop.f32.mrf.mxu1  ;;  %v6660_v57 = vpop.f32.mrf.mxu0 }
 0x1d1   : > { %7171 = vst [vmem:[#allocation22_spill] sm:$0xff] %v6658_v16  ;;  %v2105_v34 = vadd.f32 %v2062_v49, %v6568_v48  ;;  %v6663_v53 = vadd.f32 %v4644_v43, %v2107_v41 }
 0x1d2   : > { %v4597_v61 = vpop.f32.mrf.mxu1  ;;  %v6665_v22 = vpop.f32.mrf.mxu0 }
 0x1d3   : > { %7172 = vst [vmem:[#allocation7_spill] sm:$0xff] %v6663_v53  ;;  %v2108_v3 = vadd.f32 %v4597_v61, %v6571_v12  ;;  %v6668_v58 = vadd.f32 %v2330_v27, %v2105_v34 }
 0x1d4   : > { %v2065_v44 = vpop.f32.mrf.mxu1  ;;  %v6670_v13 = vpop.f32.mrf.mxu0 }
 0x1d5   : > { %7173 = vst [vmem:[#allocation10_spill] sm:$0xff] %v6668_v58  ;;  %v2106_v56 = vadd.f32 %v2065_v44, %v6574_v8  ;;  %v6673_v14 = vadd.f32 %v4645_v55, %v2108_v3 }
 0x1d6   : > { %v4664_v35 = vpop.f32.mrf.mxu1  ;;  %v6675_v6 = vpop.f32.mrf.mxu0 }
 0x1d7   : > { %7174 = vst [vmem:[#allocation9_spill] sm:$0xff] %v6673_v14  ;;  %v6677_v48 = vadd.f32 %v2333_v24, %v2106_v56 }
 0x1d8   : > { %v2484_v1 = vpop.f32.mrf.mxu1  ;;  %v6679_v40 = vpop.f32.mrf.mxu0 }
 0x1d9   : > { %7175 = vst [vmem:[#allocation4_spill] sm:$0xff] %v6677_v48 }
 0x1da   : > { %v4665_v60 = vpop.f32.mrf.mxu1  ;;  %v6681_v9 = vpop.f32.mrf.mxu0 }
 0x1dc   : > { %v2487_v12 = vpop.f32.mrf.mxu1  ;;  %v6683_v5 = vpop.f32.mrf.mxu0 }
 0x1de   : > { %v4668_v4 = vpop.f32.mrf.mxu1  ;;  %v6685_v28 = vpop.f32.mrf.mxu0 }
 0x1e0   : > { %v2500_v8 = vpop.f32.mrf.mxu1  ;;  %v6687_v25 = vpop.f32.mrf.mxu0 }
 0x1e2   : > { %v4669_v43 = vpop.f32.mrf.mxu1  ;;  %v6689_v45 = vpop.f32.mrf.mxu0 }
 0x1e4   : > { %v2503_v38 = vpop.f32.mrf.mxu1  ;;  %v6691_v27 = vpop.f32.mrf.mxu0 }
 0x1e6   : > { %v4672_v36 = vpop.f32.mrf.mxu1  ;;  %v6693_v31 = vpop.f32.mrf.mxu0 }
 0x1e8   : > { %v2516_v55 = vpop.f32.mrf.mxu1  ;;  %v6695_v0 = vpop.f32.mrf.mxu0 }
 0x1ea   : > { %v6697_v54 = vpop.f32.mrf.mxu1  ;;  %v6699_v24 = vpop.f32.mrf.mxu0 }
 0x1eb   : > { %7176 = vst [vmem:[#allocation11_spill] sm:$0xff] %v6699_v24 }
 0x1ec   : > { %v6701_v41 = vpop.f32.mrf.mxu1  ;;  %v6703_v49 = vpop.f32.mrf.mxu0 }
 0x1ed   : > { %7177 = vst [vmem:[#allocation12_spill] sm:$0xff] %v6703_v49  ;;  %v2615_v49 = vadd.f32 %v2500_v8, %v6592_v11  ;;  %v6798_v11 = vld [vmem:[%s7044_s4] ss:$0 sm:$0xff] }
 0x1ee   : > { %v6705_v34 = vpop.f32.mrf.mxu1  ;;  %v6707_v61 = vpop.f32.mrf.mxu0 }
 0x1ef   : > { %7178 = vst [vmem:[#allocation2_spill] sm:$0xff] %v6707_v61 }
 0x1f0   : > { %v6709_v3 = vpop.f32.mrf.mxu1  ;;  %v6711_v44 = vpop.f32.mrf.mxu0 }
 0x1f1   : > { %7179 = vst [vmem:[#allocation3_spill] sm:$0xff] %v6711_v44 }
 0x1f2   : > { %v6713_v56 = vpop.f32.mrf.mxu1  ;;  %v6715_v48 = vpop.f32.mrf.mxu0 }
 0x1f3   : > { %7180 = vst [vmem:[#allocation13_spill] sm:$0xff] %v6715_v48 }
 0x1f4   : > { %v6717_v14 = vpop.f32.mrf.mxu1  ;;  %v6719_v58 = vpop.f32.mrf.mxu0 }
 0x1f5   : > { %7181 = vst [vmem:[#allocation14_spill] sm:$0xff] %v6719_v58 }
 0x1f6   : > { %v6721_v53 = vpop.f32.mrf.mxu1  ;;  %v6723_v16 = vpop.f32.mrf.mxu0 }
 0x1f7   : > { %7182 = vst [vmem:[#allocation17_spill] sm:$0xff] %v6723_v16 }
 0x1f8   : > { %v6725_v50 = vpop.f32.mrf.mxu1  ;;  %v6727_v46 = vpop.f32.mrf.mxu0 }
 0x1f9   : > { %7183 = vst [vmem:[#allocation19_spill] sm:$0xff] %v6727_v46 }
 0x1fa   : > { %v6729_v18 = vpop.f32.mrf.mxu1  ;;  %v6731_v33 = vpop.f32.mrf.mxu0 }
 0x1fb   : > { %7184 = vst [vmem:[#allocation23_spill] sm:$0xff] %v6731_v33 }
 0x1fc   : > { %v6733_v23 = vpop.f32.mrf.mxu1  ;;  %v6735_v42 = vpop.f32.mrf.mxu0 }
 0x1fd   : > { %7185 = vst [vmem:[#allocation24_spill] sm:$0xff] %v6733_v23  ;;  %7186 = vst [vmem:[#allocation25_spill] sm:$0xff] %v6735_v42 }
 0x1fe   : > { %v6737_v15 = vpop.f32.mrf.mxu1  ;;  %v6739_v29 = vpop.f32.mrf.mxu0 }
 0x1ff   : > { %7187 = vst [vmem:[#allocation26_spill] sm:$0xff] %v6737_v15  ;;  %7188 = vst [vmem:[#allocation27_spill] sm:$0xff] %v6739_v29 }
 0x200   : > { %v6741_v58 = vpop.f32.mrf.mxu1  ;;  %v6743_v48 = vpop.f32.mrf.mxu0 }
 0x201   : > { %7189 = vst [vmem:[#allocation28_spill] sm:$0xff] %v6741_v58  ;;  %7190 = vst [vmem:[#allocation29_spill] sm:$0xff] %v6743_v48 }
 0x202   : > { %v6745_v16 = vpop.f32.mrf.mxu1  ;;  %v6747_v44 = vpop.f32.mrf.mxu0 }
 0x203   : > { %7191 = vst [vmem:[#allocation30_spill] sm:$0xff] %v6745_v16  ;;  %7192 = vst [vmem:[#allocation31_spill] sm:$0xff] %v6747_v44 }
 0x204   : > { %v6749_v46 = vpop.f32.mrf.mxu1  ;;  %v6751_v61 = vpop.f32.mrf.mxu0 }
 0x205   : > { %7193 = vst [vmem:[#allocation32_spill] sm:$0xff] %v6749_v46  ;;  %7194 = vst [vmem:[#allocation33_spill] sm:$0xff] %v6751_v61 }
 0x206   : > { %v6753_v33 = vpop.f32.mrf.mxu1  ;;  %v6755_v23 = vpop.f32.mrf.mxu0 }
 0x207   : > { %7195 = vst [vmem:[#allocation34_spill] sm:$0xff] %v6753_v33  ;;  %7196 = vst [vmem:[#allocation35_spill] sm:$0xff] %v6755_v23  ;;  %v2613_v23 = vadd.f32 %v4664_v35, %v6577_v59  ;;  %v2618_v59 = vadd.f32 %v4669_v43, %v6595_v37  ;;  %v2616_v35 = vadd.f32 %v2503_v38, %v6598_v39 }
 0x208   : > { %v6757_v42 = vpop.f32.mrf.mxu1  ;;  %v6759_v15 = vpop.f32.mrf.mxu0  ;;  %v2624_v43 = vadd.f32 %v6717_v14, %v6622_v62  ;;  %v2629_v38 = vadd.f32 %v6721_v53, %v6625_v52  ;;  %v2630_v62 = vadd.f32 %v6729_v18, %v6631_v63 }
 0x209   : > { %7197 = vst [vmem:[#allocation36_spill] sm:$0xff] %v6757_v42  ;;  %7198 = vst [vmem:[#allocation37_spill] sm:$0xff] %v6759_v15 }
 0x20a   : > { %v6761_v29 = vpop.f32.mrf.mxu1  ;;  %v6763_v58 = vpop.f32.mrf.mxu0 }
 0x20b   : > { %7199 = vst [vmem:[#allocation38_spill] sm:$0xff] %v6761_v29  ;;  %7200 = vst [vmem:[#allocation39_spill] sm:$0xff] %v6763_v58  ;;  %v2611_v29 = vadd.f32 %v2484_v1, %v6580_v32  ;;  %v2614_v58 = vadd.f32 %v4665_v60, %v6583_v20  ;;  %v2621_v32 = vadd.f32 %v4672_v36, %v6601_v51 }
 0x20c   : > { %v6765_v48 = vpop.f32.mrf.mxu1  ;;  %v6767_v16 = vpop.f32.mrf.mxu0 }
 0x20d   : > { %7201 = vst [vmem:[#allocation40_spill] sm:$0xff] %v6765_v48  ;;  %7202 = vst [vmem:[#allocation41_spill] sm:$0xff] %v6767_v16  ;;  %v2872_v39 = vadd.f32 %v6670_v13, %v2614_v58  ;;  %v6810_v58 = vadd.f32 %v6685_v28, %v2616_v35 }
 0x20e   : > { %v6769_v44 = vpop.f32.mrf.mxu1  ;;  %v6771_v46 = vpop.f32.mrf.mxu0 }
 0x20f   : > { %7203 = vst [vmem:[#allocation42_spill] sm:$0xff] %v6769_v44  ;;  %7204 = vst [vmem:[#allocation43_spill] sm:$0xff] %v6771_v46  ;;  %v2612_v44 = vadd.f32 %v2487_v12, %v6586_v26  ;;  %v2617_v46 = vadd.f32 %v4668_v4, %v6589_v19  ;;  %v2869_v26 = vadd.f32 %v6665_v22, %v2611_v29 }
 0x210   : > { %v6773_v61 = vpop.f32.mrf.mxu1  ;;  %v4808_v33 = vpop.f32.mrf.mxu0  ;;  %v2619_v19 = vadd.f32 %v2516_v55, %v6604_v17  ;;  %v2622_v29 = vadd.f32 %v6697_v54, %v6607_v7  ;;  %v6805_v17 = vld [vmem:[%s322_s27] ss:$0 sm:$0xff]  ;;  %v2873_v12 = vadd.f32 %v6681_v9, %v2615_v49  ;;  %v2876_v4 = vadd.f32 %v6683_v5, %v2618_v59 }
 0x211   : > { %7205 = vst [vmem:[#allocation44_spill] sm:$0xff] %v6773_v61  ;;  %v2871_v61 = vadd.f32 %v6660_v57, %v2613_v23  ;;  %v2870_v1 = vadd.f32 %v6675_v6, %v2612_v44  ;;  %v2620_v7 = vadd.f32 %v6701_v41, %v6610_v21  ;;  %v2623_v9 = vadd.f32 %v6709_v3, %v6616_v30  ;;  %v7208_v44 = vld [vmem:[#allocation12_spill] sm:$0xff] }
 0x212   : > { %v6776_v42 = vpop.f32.mrf.mxu1  ;;  %v3258_v15 = vpop.f32.mrf.mxu0  ;;  %v6830_v28 = vadd.f32 %v6689_v45, %v2619_v19  ;;  %v2626_v30 = vadd.f32 %v6713_v56, %v6619_v10  ;;  %v6841_v45 = vadd.f32 %v6691_v27, %v2622_v29  ;;  %v2627_v54 = vadd.f32 %v6725_v50, %v6628_v47  ;;  %v7211_v19 = vld [vmem:[#allocation13_spill] sm:$0xff] }
 0x213   : > { %7206 = vst [vmem:[#allocation45_spill] sm:$0xff] %v6776_v42  ;;  %v6851_v49 = vadd.f32 %v6693_v31, %v2620_v7  ;;  %v7209_v31 = vld [vmem:[#allocation2_spill] sm:$0xff] }
 0x214   : > { %v6780_v48 = vpop.f32.mrf.mxu1  ;;  %v4809_v16 = vpop.f32.mrf.mxu0  ;;  %v6863_v56 = vadd.f32 %v7208_v44, %v2626_v30  ;;  %v6866_v59 = vadd.f32 %v7209_v31, %v2624_v43  ;;  %v7216_v7 = vld [vmem:[#allocation26_spill] sm:$0xff] }
 0x216   : > { %v4760_v42 = vpop.f32.mrf.mxu1  ;;  %v3261_v24 = vpop.f32.mrf.mxu0 }
 0x217   : > { %v3129_v20 = vadd.f32 %v4760_v42, %v2871_v61  ;;  %v2875_v42 = vadd.f32 %v6679_v40, %v2617_v46  ;;  %v6814_v46 = vadd.f32 %v6687_v25, %v2621_v32  ;;  %v2625_v40 = vadd.f32 %v6705_v34, %v6613_v2 }
 0x218   : > { %v3000_v37 = vpop.f32.mrf.mxu1  ;;  %v4812_v23 = vpop.f32.mrf.mxu0 }
 0x219   : > { %v3387_v57 = vadd.f32 %v4808_v33, %v3129_v20  ;;  %v3127_v51 = vadd.f32 %v3000_v37, %v2869_v26  ;;  %v6854_v27 = vadd.f32 %v6695_v0, %v2625_v40  ;;  %v7210_v0 = vld [vmem:[#allocation3_spill] sm:$0xff]  ;;  %v6874_v37 = vadd.f32 %v7211_v19, %v2627_v54  ;;  %v7217_v54 = vld [vmem:[#allocation20_spill] sm:$0xff]  ;;  %v7221_v19 = vld [vmem:[#allocation18_spill] sm:$0xff] }
 0x21a   : > { %v4761_v22 = vpop.f32.mrf.mxu1  ;;  %v3274_v60 = vpop.f32.mrf.mxu0  ;;  %v6869_v35 = vadd.f32 %v7210_v0, %v2629_v38 }
 0x21b   : > { %v3426_v33 = vadd.f32 %v6798_v11, %v3387_v57  ;;  %v3385_v13 = vadd.f32 %v3258_v15, %v3127_v51  ;;  %v3130_v6 = vadd.f32 %v4761_v22, %v2872_v39  ;;  %v7212_v39 = vld [vmem:[#allocation15_spill] sm:$0xff]  ;;  %v7214_v22 = vld [vmem:[#allocation14_spill] sm:$0xff] }
 0x21c   : > { %v3003_v15 = vpop.f32.mrf.mxu1  ;;  %v4813_v5 = vpop.f32.mrf.mxu0 }
 0x21d   : > { %v3465_v21 = vadd.f32 %v6805_v17, %v3426_v33  ;;  %v3424_v8 = vadd.f32 %v6798_v11, %v3385_v13  ;;  %v3388_v2 = vadd.f32 %v4809_v16, %v3130_v6  ;;  %v3128_v25 = vadd.f32 %v3003_v15, %v2870_v1  ;;  %v7215_v6 = vld [vmem:[#allocation16_spill] sm:$0xff] }
 0x21e   : > { %v4764_v36 = vpop.f32.mrf.mxu1  ;;  %v3277_v55 = vpop.f32.mrf.mxu0  ;;  %v2633_v40 = vadd.f32 %v7216_v7, %v7215_v6 }
 0x21f   : > { %3605 = vst [vmem:[%s6827_s9 + $0x10] sm:$0xff] %v3465_v21  ;;  %v3463_v16 = vadd.f32 %v6805_v17, %v3424_v8  ;;  %v3427_v10 = vadd.f32 %v6798_v11, %v3388_v2  ;;  %v3386_v41 = vadd.f32 %v3261_v24, %v3128_v25  ;;  %v3133_v14 = vadd.f32 %v4764_v36, %v2875_v42  ;;  %v7207_v24 = vld [vmem:[#allocation11_spill] sm:$0xff] }
 0x220   : > { %v3016_v52 = vpop.f32.mrf.mxu1  ;;  %v4816_v53 = vpop.f32.mrf.mxu0  ;;  %v6860_v61 = vadd.f32 %v7207_v24, %v2623_v9  ;;  %v3535_v9 = vmul.f32 %v3465_v21, %v3465_v21 }
 0x221   : > { %3603 = vst [vmem:[%s6827_s9] sm:$0xff] %v3463_v16  ;;  %v3466_v47 = vadd.f32 %v6805_v17, %v3427_v10  ;;  %v3425_v50 = vadd.f32 %v6798_v11, %v3386_v41  ;;  %v3131_v34 = vadd.f32 %v3016_v52, %v2873_v12  ;;  %v3391_v63 = vadd.f32 %v4812_v23, %v3133_v14  ;;  %v7213_v23 = vld [vmem:[#allocation24_spill] sm:$0xff]  ;;  %v7219_v52 = vld [vmem:[#allocation17_spill] sm:$0xff] }
 0x222   : > { %v4765_v18 = vpop.f32.mrf.mxu1  ;;  %v3290_v3 = vpop.f32.mrf.mxu0  ;;  %v2628_v57 = vadd.f32 %v7213_v23, %v7212_v39  ;;  %v3533_v51 = vmul.f32 %v3463_v16, %v3463_v16  ;;  %v6880_v12 = vadd.f32 %v7214_v22, %v2630_v62  ;;  %v7222_v39 = vld [vmem:[#allocation30_spill] sm:$0xff] }
 0x223   : > { %3606 = vst [vmem:[%s6827_s9 + $0x18] sm:$0xff] %v3466_v47  ;;  %v3464_v32 = vadd.f32 %v6805_v17, %v3425_v50  ;;  %v3389_v20 = vadd.f32 %v3274_v60, %v3131_v34  ;;  %v3134_v26 = vadd.f32 %v4765_v18, %v2876_v4  ;;  %v3430_v1 = vadd.f32 %v6798_v11, %v3391_v63 }
 0x224   : > { %v3019_v42 = vpop.f32.mrf.mxu1  ;;  %v4817_v29 = vpop.f32.mrf.mxu0  ;;  %v3536_v50 = vmul.f32 %v3466_v47, %v3466_v47  ;;  %v2634_v23 = vadd.f32 %v7222_v39, %v7221_v19 }
 0x225   : > { %v3495_v33 = vadd.f32 %v3464_v32, %v3463_v16  ;;  %v3534_v13 = vmul.f32 %v3464_v32, %v3464_v32  ;;  %3604 = vst [vmem:[%s6827_s9 + $0x8] sm:$0xff] %v3464_v32  ;;  %v3428_v60 = vadd.f32 %v6798_v11, %v3389_v20  ;;  %v3392_v4 = vadd.f32 %v4813_v5, %v3134_v26  ;;  %v7218_v16 = vld [vmem:[#allocation28_spill] sm:$0xff] }
 0x226   : > { %v3469_v15 = vadd.f32 %v6805_v17, %v3430_v1  ;;  %v3132_v8 = vadd.f32 %v3019_v42, %v6810_v58  ;;  %v4768_v2 = vpop.f32.mrf.mxu1  ;;  %v3293_v25 = vpop.f32.mrf.mxu0  ;;  %v2631_v5 = vadd.f32 %v7218_v16, %v7217_v54  ;;  %v6895_v58 = vadd.f32 %v7219_v52, %v2628_v57 }
 0x227   : > { %v3496_v30 = vadd.f32 %v3495_v33, %v3465_v21  ;;  %v3565_v43 = vadd.f32 %v3534_v13, %v3533_v51  ;;  %v3467_v38 = vadd.f32 %v6805_v17, %v3428_v60  ;;  %v3431_v36 = vadd.f32 %v6798_v11, %v3392_v4  ;;  %v7223_v13 = vld [vmem:[#allocation23_spill] sm:$0xff] }
 0x228   : > { %3609 = vst [vmem:[%s6827_s9 + $0x30] sm:$0xff] %v3469_v15  ;;  %v3390_v10 = vadd.f32 %v3277_v55, %v3132_v8  ;;  %v3137_v41 = vadd.f32 %v4768_v2, %v6814_v46  ;;  %v3032_v62 = vpop.f32.mrf.mxu1  ;;  %v4820_v14 = vpop.f32.mrf.mxu0  ;;  %v7220_v46 = vld [vmem:[#allocation19_spill] sm:$0xff]  ;;  %v6912_v60 = vadd.f32 %v7223_v13, %v2631_v5  ;;  %v7225_v8 = vld [vmem:[#allocation32_spill] sm:$0xff] }
 0x229   : > { %v3566_v21 = vadd.f32 %v3565_v43, %v3535_v9  ;;  %v3497_v34 = vadd.f32 %v3496_v30, %v3466_v47  ;;  %3607 = vst [vmem:[%s6827_s9 + $0x20] sm:$0xff] %v3467_v38  ;;  %v3470_v24 = vadd.f32 %v6805_v17, %v3431_v36  ;;  %v3135_v44 = vadd.f32 %v3032_v62, %v6830_v28 }
 0x22a   : > { %v3429_v63 = vadd.f32 %v6798_v11, %v3390_v10  ;;  %v3395_v18 = vadd.f32 %v4816_v53, %v3137_v41  ;;  %v4769_v55 = vpop.f32.mrf.mxu1  ;;  %v3306_v31 = vpop.f32.mrf.mxu0  ;;  %v6902_v0 = vadd.f32 %v7220_v46, %v2633_v40  ;;  %v3537_v20 = vmul.f32 %v3467_v38, %v3467_v38 }
 0x22b   : > { %v3498_v32 = vadd.f32 %v3497_v34, %v3467_v38  ;;  %v3567_v26 = vadd.f32 %v3566_v21, %v3536_v50  ;;  %3610 = vst [vmem:[%s6827_s9 + $0x38] sm:$0xff] %v3470_v24  ;;  %v3138_v47 = vadd.f32 %v4769_v55, %v6841_v45  ;;  %v3393_v28 = vadd.f32 %v3290_v3, %v3135_v44  ;;  %v7224_v3 = vld [vmem:[#allocation5_spill] sm:$0xff]  ;;  %v7228_v44 = vld [vmem:[#allocation34_spill] sm:$0xff] }
 0x22c   : > { %v3468_v57 = vadd.f32 %v6805_v17, %v3429_v63  ;;  %v3434_v53 = vadd.f32 %v6798_v11, %v3395_v18  ;;  %v3035_v51 = vpop.f32.mrf.mxu1  ;;  %v4821_v1 = vpop.f32.mrf.mxu0  ;;  %v2632_v2 = vadd.f32 %v7225_v8, %v7224_v3  ;;  %v3539_v43 = vmul.f32 %v3469_v15, %v3469_v15  ;;  %v7226_v34 = vld [vmem:[#allocation25_spill] sm:$0xff]  ;;  %v7227_v18 = vld [vmem:[#allocation6_spill] sm:$0xff] }
 0x22d   : > { %v3568_v42 = vadd.f32 %v3567_v26, %v3537_v20  ;;  %v3396_v22 = vadd.f32 %v4817_v29, %v3138_v47  ;;  %v3136_v33 = vadd.f32 %v3035_v51, %v6851_v49  ;;  %v3432_v7 = vadd.f32 %v6798_v11, %v3393_v28 }
 0x22e   : > { %v3499_v4 = vadd.f32 %v3498_v32, %v3468_v57  ;;  %v3538_v45 = vmul.f32 %v3468_v57, %v3468_v57  ;;  %3608 = vst [vmem:[%s6827_s9 + $0x28] sm:$0xff] %v3468_v57  ;;  %v3473_v6 = vadd.f32 %v6805_v17, %v3434_v53  ;;  %v4772_v40 = vpop.f32.mrf.mxu1  ;;  %v3309_v9 = vpop.f32.mrf.mxu0  ;;  %v6928_v63 = vadd.f32 %v7226_v34, %v2634_v23 }
 0x22f   : > { %v3435_v29 = vadd.f32 %v6798_v11, %v3396_v22  ;;  %v3394_v30 = vadd.f32 %v3293_v25, %v3136_v33  ;;  %v3141_v49 = vadd.f32 %v4772_v40, %v6854_v27  ;;  %v3471_v54 = vadd.f32 %v6805_v17, %v3432_v7  ;;  %v7229_v33 = vld [vmem:[#allocation27_spill] sm:$0xff] }
 0x230   : > { %v3500_v38 = vadd.f32 %v3499_v4, %v3469_v15  ;;  %v3569_v36 = vadd.f32 %v3568_v42, %v3538_v45  ;;  %3613 = vst [vmem:[%s6827_s9 + $0x50] sm:$0xff] %v3473_v6  ;;  %v3048_v16 = vpop.f32.mrf.mxu1  ;;  %v4824_v5 = vpop.f32.mrf.mxu0  ;;  %v3540_v25 = vmul.f32 %v3470_v24, %v3470_v24  ;;  %v2637_v55 = vadd.f32 %v7228_v44, %v7227_v18  ;;  %v7231_v4 = vld [vmem:[#allocation36_spill] sm:$0xff] }
 0x231   : > { %v3474_v10 = vadd.f32 %v6805_v17, %v3435_v29  ;;  %v3433_v41 = vadd.f32 %v6798_v11, %v3394_v30  ;;  %v3399_v62 = vadd.f32 %v4820_v14, %v3141_v49  ;;  %v3139_v52 = vadd.f32 %v3048_v16, %v6860_v61  ;;  %3611 = vst [vmem:[%s6827_s9 + $0x40] sm:$0xff] %v3471_v54 }
 0x232   : > { %v3570_v50 = vadd.f32 %v3569_v36, %v3539_v43  ;;  %v3501_v21 = vadd.f32 %v3500_v38, %v3470_v24  ;;  %v4773_v27 = vpop.f32.mrf.mxu1  ;;  %v3322_v15 = vpop.f32.mrf.mxu0  ;;  %v3541_v20 = vmul.f32 %v3471_v54, %v3471_v54  ;;  %v6941_v13 = vadd.f32 %v7229_v33, %v2632_v2  ;;  %v7232_v36 = vld [vmem:[#allocation29_spill] sm:$0xff] }
 0x233   : > { %3614 = vst [vmem:[%s6827_s9 + $0x58] sm:$0xff] %v3474_v10  ;;  %v3472_v46 = vadd.f32 %v6805_v17, %v3433_v41  ;;  %v3438_v14 = vadd.f32 %v6798_v11, %v3399_v62  ;;  %v3397_v32 = vadd.f32 %v3306_v31, %v3139_v52  ;;  %v3142_v24 = vadd.f32 %v4773_v27, %v6863_v56  ;;  %v7230_v56 = vld [vmem:[#allocation8_spill] sm:$0xff] }
 0x234   : > { %v3502_v61 = vadd.f32 %v3501_v21, %v3471_v54  ;;  %v3571_v26 = vadd.f32 %v3570_v50, %v3540_v25  ;;  %v3051_v47 = vpop.f32.mrf.mxu1  ;;  %v4825_v19 = vpop.f32.mrf.mxu0  ;;  %v2635_v45 = vadd.f32 %v7231_v4, %v7230_v56  ;;  %v3543_v8 = vmul.f32 %v3473_v6, %v3473_v6  ;;  %v7234_v21 = vld [vmem:[#allocation38_spill] sm:$0xff] }
 0x235   : > { %v3542_v39 = vmul.f32 %v3472_v46, %v3472_v46  ;;  %3612 = vst [vmem:[%s6827_s9 + $0x48] sm:$0xff] %v3472_v46  ;;  %v3477_v23 = vadd.f32 %v6805_v17, %v3438_v14  ;;  %v3436_v57 = vadd.f32 %v6798_v11, %v3397_v32  ;;  %v3140_v53 = vadd.f32 %v3051_v47, %v6866_v59  ;;  %v7235_v47 = vld [vmem:[#allocation31_spill] sm:$0xff] }
 0x236   : > { %v3572_v28 = vadd.f32 %v3571_v26, %v3541_v20  ;;  %v3503_v51 = vadd.f32 %v3502_v61, %v3472_v46  ;;  %v3400_v31 = vadd.f32 %v4821_v1, %v3142_v24  ;;  %v4776_v42 = vpop.f32.mrf.mxu1  ;;  %v3325_v22 = vpop.f32.mrf.mxu0  ;;  %v6953_v54 = vadd.f32 %v7232_v36, %v2637_v55 }
 0x237   : > { %3617 = vst [vmem:[%s6827_s9 + $0x70] sm:$0xff] %v3477_v23  ;;  %v3475_v7 = vadd.f32 %v6805_v17, %v3436_v57  ;;  %v3398_v40 = vadd.f32 %v3309_v9, %v3140_v53  ;;  %v3145_v3 = vadd.f32 %v4776_v42, %v6869_v35  ;;  %v3544_v9 = vmul.f32 %v3474_v10, %v3474_v10  ;;  %v7236_v57 = vld [vmem:[#allocation22_spill] sm:$0xff]  ;;  %v7237_v53 = vld [vmem:[#allocation40_spill] sm:$0xff] }
 0x238   : > { %v3504_v59 = vadd.f32 %v3503_v51, %v3473_v6  ;;  %v3573_v29 = vadd.f32 %v3572_v28, %v3542_v39  ;;  %v3439_v30 = vadd.f32 %v6798_v11, %v3400_v31  ;;  %v3064_v1 = vpop.f32.mrf.mxu1  ;;  %v4828_v49 = vpop.f32.mrf.mxu0  ;;  %v2893_v39 = vadd.f32 %v7235_v47, %v2635_v45 }
 0x239   : > { %3615 = vst [vmem:[%s6827_s9 + $0x60] sm:$0xff] %v3475_v7  ;;  %v3437_v2 = vadd.f32 %v6798_v11, %v3398_v40  ;;  %v3403_v43 = vadd.f32 %v4824_v5, %v3145_v3  ;;  %v3143_v38 = vadd.f32 %v3064_v1, %v6874_v37  ;;  %v7233_v37 = vld [vmem:[#allocation21_spill] sm:$0xff]  ;;  %v3545_v18 = vmul.f32 %v3475_v7, %v3475_v7 }
 0x23a   : > { %v3574_v16 = vadd.f32 %v3573_v29, %v3543_v8  ;;  %v3505_v35 = vadd.f32 %v3504_v59, %v3474_v10  ;;  %v3478_v6 = vadd.f32 %v6805_v17, %v3439_v30  ;;  %v4777_v41 = vpop.f32.mrf.mxu1  ;;  %v3338_v62 = vpop.f32.mrf.mxu0  ;;  %v2638_v27 = vadd.f32 %v7234_v21, %v7233_v37  ;;  %v7238_v8 = vld [vmem:[#allocation33_spill] sm:$0xff] }
 0x23b   : > { %v3476_v52 = vadd.f32 %v6805_v17, %v3437_v2  ;;  %v3442_v25 = vadd.f32 %v6798_v11, %v3403_v43  ;;  %v3401_v50 = vadd.f32 %v3322_v15, %v3143_v38  ;;  %v3146_v5 = vadd.f32 %v4777_v41, %v6880_v12  ;;  %v7239_v43 = vld [vmem:[#allocation7_spill] sm:$0xff]  ;;  %v7240_v38 = vld [vmem:[#allocation42_spill] sm:$0xff] }
 0x23c   : > { %v3506_v34 = vadd.f32 %v3505_v35, %v3475_v7  ;;  %v3575_v44 = vadd.f32 %v3574_v16, %v3544_v9  ;;  %3618 = vst [vmem:[%s6827_s9 + $0x78] sm:$0xff] %v3478_v6  ;;  %v3067_v10 = vpop.f32.mrf.mxu1  ;;  %v4829_v55 = vpop.f32.mrf.mxu0  ;;  %v2636_v28 = vadd.f32 %v7237_v53, %v7236_v57  ;;  %v2896_v59 = vadd.f32 %v7238_v8, %v2638_v27 }
 0x23d   : > { %v3546_v46 = vmul.f32 %v3476_v52, %v3476_v52  ;;  %3616 = vst [vmem:[%s6827_s9 + $0x68] sm:$0xff] %v3476_v52  ;;  %v3481_v14 = vadd.f32 %v6805_v17, %v3442_v25  ;;  %v3440_v32 = vadd.f32 %v6798_v11, %v3401_v50  ;;  %v3404_v61 = vadd.f32 %v4825_v19, %v3146_v5 }
 0x23e   : > { %v3576_v15 = vadd.f32 %v3575_v44, %v3545_v18  ;;  %v3507_v20 = vadd.f32 %v3506_v34, %v3476_v52  ;;  %v3144_v12 = vadd.f32 %v3067_v10, %v6895_v58  ;;  %v4780_v26 = vpop.f32.mrf.mxu1  ;;  %v3341_v24 = vpop.f32.mrf.mxu0  ;;  %v3547_v19 = vmul.f32 %v3477_v23, %v3477_v23  ;;  %v7241_v18 = vld [vmem:[#allocation35_spill] sm:$0xff]  ;;  %v7242_v10 = vld [vmem:[#allocation10_spill] sm:$0xff] }
 0x23f   : > { %3621 = vst [vmem:[%s6827_s9 + $0x90] sm:$0xff] %v3481_v14  ;;  %v3479_v51 = vadd.f32 %v6805_v17, %v3440_v32  ;;  %v3443_v31 = vadd.f32 %v6798_v11, %v3404_v61  ;;  %v3149_v42 = vadd.f32 %v4780_v26, %v6902_v0  ;;  %v3548_v29 = vmul.f32 %v3478_v6, %v3478_v6 }
 0x240   : > { %v3508_v33 = vadd.f32 %v3507_v20, %v3477_v23  ;;  %v3577_v56 = vadd.f32 %v3576_v15, %v3546_v46  ;;  %v3402_v4 = vadd.f32 %v3325_v22, %v3144_v12  ;;  %v3080_v58 = vpop.f32.mrf.mxu1  ;;  %v4832_v7 = vpop.f32.mrf.mxu0  ;;  %v2641_v22 = vadd.f32 %v7240_v38, %v7239_v43  ;;  %v7243_v46 = vld [vmem:[#allocation44_spill] sm:$0xff] }
 0x241   : > { %3619 = vst [vmem:[%s6827_s9 + $0x80] sm:$0xff] %v3479_v51  ;;  %v3482_v45 = vadd.f32 %v6805_v17, %v3443_v31  ;;  %v3407_v40 = vadd.f32 %v4828_v49, %v3149_v42  ;;  %v3147_v3 = vadd.f32 %v3080_v58, %v6912_v60  ;;  %v3549_v16 = vmul.f32 %v3479_v51, %v3479_v51  ;;  %v7246_v58 = vld [vmem:[#allocation45_spill] sm:$0xff]  ;;  %v7247_v38 = vld [vmem:[#allocation4_spill] sm:$0xff] }
 0x242   : > { %v3578_v30 = vadd.f32 %v3577_v56, %v3547_v19  ;;  %v3509_v1 = vadd.f32 %v3508_v33, %v3478_v6  ;;  %v3441_v0 = vadd.f32 %v6798_v11, %v3402_v4  ;;  %v4781_v2 = vpop.f32.mrf.mxu1  ;;  %v3354_v23 = vpop.f32.mrf.mxu0  ;;  %v2894_v44 = vadd.f32 %v7241_v18, %v2636_v28  ;;  %v7245_v4 = vld [vmem:[#allocation9_spill] sm:$0xff] }
 0x243   : > { %3622 = vst [vmem:[%s6827_s9 + $0x98] sm:$0xff] %v3482_v45  ;;  %v3446_v36 = vadd.f32 %v6798_v11, %v3407_v40  ;;  %v3405_v9 = vadd.f32 %v3338_v62, %v3147_v3  ;;  %v3150_v49 = vadd.f32 %v4781_v2, %v6928_v63  ;;  %v2639_v32 = vadd.f32 %v7243_v46, %v7242_v10 }
 0x244   : > { %v3510_v60 = vadd.f32 %v3509_v1, %v3479_v51  ;;  %v3579_v35 = vadd.f32 %v3578_v30, %v3548_v29  ;;  %v3480_v6 = vadd.f32 %v6805_v17, %v3441_v0  ;;  %v3083_v41 = vpop.f32.mrf.mxu1  ;;  %v4833_v52 = vpop.f32.mrf.mxu0  ;;  %v3551_v20 = vmul.f32 %v3481_v14, %v3481_v14  ;;  %v7244_v51 = vld [vmem:[#allocation37_spill] sm:$0xff] }
 0x245   : > { %v3485_v25 = vadd.f32 %v6805_v17, %v3446_v36  ;;  %v3444_v50 = vadd.f32 %v6798_v11, %v3405_v9  ;;  %v3408_v5 = vadd.f32 %v4829_v55, %v3150_v49  ;;  %v3148_v37 = vadd.f32 %v3083_v41, %v6941_v13 }
 0x246   : > { %v3580_v21 = vadd.f32 %v3579_v35, %v3549_v16  ;;  %v3511_v27 = vadd.f32 %v3510_v60, %v3480_v6  ;;  %v3550_v62 = vmul.f32 %v3480_v6, %v3480_v6  ;;  %3620 = vst [vmem:[%s6827_s9 + $0x88] sm:$0xff] %v3480_v6  ;;  %v4784_v63 = vpop.f32.mrf.mxu1  ;;  %v3357_v34 = vpop.f32.mrf.mxu0  ;;  %v2899_v31 = vadd.f32 %v7244_v51, %v2641_v22 }
 0x247   : > { %3625 = vst [vmem:[%s6827_s9 + $0xb0] sm:$0xff] %v3485_v25  ;;  %v3483_v61 = vadd.f32 %v6805_v17, %v3444_v50  ;;  %v3447_v15 = vadd.f32 %v6798_v11, %v3408_v5  ;;  %v3406_v55 = vadd.f32 %v3341_v24, %v3148_v37  ;;  %v3153_v26 = vadd.f32 %v4784_v63, %v6953_v54  ;;  %v7248_v5 = vld [vmem:[#allocation39_spill] sm:$0xff]  ;;  %v7249_v63 = vld [vmem:[#allocation41_spill] sm:$0xff] }
 0x248   : > { %v3512_v13 = vadd.f32 %v3511_v27, %v3481_v14  ;;  %v3581_v12 = vadd.f32 %v3580_v21, %v3550_v62  ;;  %v3096_v47 = vpop.f32.mrf.mxu1  ;;  %v3552_v42 = vmul.f32 %v3482_v45, %v3482_v45  ;;  %v4836_v14 = vpop.f32.mrf.mxu0  ;;  %v2642_v40 = vadd.f32 %v7246_v58, %v7245_v4 }
 0x249   : > { %3623 = vst [vmem:[%s6827_s9 + $0xa0] sm:$0xff] %v3483_v61  ;;  %v3486_v57 = vadd.f32 %v6805_v17, %v3447_v15  ;;  %v3445_v53 = vadd.f32 %v6798_v11, %v3406_v55  ;;  %v3151_v28 = vadd.f32 %v3096_v47, %v2893_v39  ;;  %v3411_v24 = vadd.f32 %v4832_v7, %v3153_v26 }
 0x24a   : > { %v3582_v19 = vadd.f32 %v3581_v12, %v3551_v20  ;;  %v3513_v33 = vadd.f32 %v3512_v13, %v3482_v45  ;;  %v4785_v56 = vpop.f32.mrf.mxu1  ;;  %v3553_v30 = vmul.f32 %v3483_v61, %v3483_v61  ;;  %v2640_v22 = vadd.f32 %v6780_v48, %v7247_v38  ;;  %v3370_v49 = vpop.f32.mrf.mxu0  ;;  %v7250_v20 = vld [vmem:[#allocation43_spill] sm:$0xff] }
 0x24b   : > { %3626 = vst [vmem:[%s6827_s9 + $0xb8] sm:$0xff] %v3486_v57  ;;  %v3484_v54 = vadd.f32 %v6805_v17, %v3445_v53  ;;  %v3409_v3 = vadd.f32 %v3354_v23, %v3151_v28  ;;  %v3154_v8 = vadd.f32 %v4785_v56, %v2896_v59  ;;  %v3450_v1 = vadd.f32 %v6798_v11, %v3411_v24 }
 0x24c   : > { %v3514_v29 = vadd.f32 %v3513_v33, %v3483_v61  ;;  %v3583_v39 = vadd.f32 %v3582_v19, %v3552_v42  ;;  %v3099_v0 = vpop.f32.mrf.mxu1  ;;  %v3555_v41 = vmul.f32 %v3485_v25, %v3485_v25  ;;  %v2897_v48 = vadd.f32 %v7248_v5, %v2639_v32 }
 0x24d   : > { %v3554_v2 = vmul.f32 %v3484_v54, %v3484_v54  ;;  %3624 = vst [vmem:[%s6827_s9 + $0xa8] sm:$0xff] %v3484_v54  ;;  %v3448_v7 = vadd.f32 %v6798_v11, %v3409_v3  ;;  %v3412_v45 = vadd.f32 %v4833_v52, %v3154_v8  ;;  %v3152_v43 = vadd.f32 %v3099_v0, %v2894_v44 }
 0x24e   : > { %v3584_v36 = vadd.f32 %v3583_v39, %v3553_v30  ;;  %v3515_v23 = vadd.f32 %v3514_v29, %v3484_v54  ;;  %v3489_v59 = vadd.f32 %v6805_v17, %v3450_v1  ;;  %v4788_v9 = vpop.f32.mrf.mxu1  ;;  %v2900_v18 = vadd.f32 %v7249_v63, %v2642_v40 }
 0x24f   : > { %v3487_v60 = vadd.f32 %v6805_v17, %v3448_v7  ;;  %v3451_v16 = vadd.f32 %v6798_v11, %v3412_v45  ;;  %v3410_v35 = vadd.f32 %v3357_v34, %v3152_v43  ;;  %v3157_v6 = vadd.f32 %v4788_v9, %v2899_v31 }
 0x250   : > { %v3516_v50 = vadd.f32 %v3515_v23, %v3485_v25  ;;  %v3585_v52 = vadd.f32 %v3584_v36, %v3554_v2  ;;  %3629 = vst [vmem:[%s6827_s9 + $0xd0] sm:$0xff] %v3489_v59  ;;  %v3112_v37 = vpop.f32.mrf.mxu1  ;;  %v3556_v44 = vmul.f32 %v3486_v57, %v3486_v57  ;;  %v4837_v25 = vpop.f32.mrf.mxu0  ;;  %v2898_v13 = vadd.f32 %v7250_v20, %v2640_v22 }
 0x251   : > { %3627 = vst [vmem:[%s6827_s9 + $0xc0] sm:$0xff] %v3487_v60  ;;  %v3490_v21 = vadd.f32 %v6805_v17, %v3451_v16  ;;  %v3449_v27 = vadd.f32 %v6798_v11, %v3410_v35  ;;  %v3415_v62 = vadd.f32 %v4836_v14, %v3157_v6  ;;  %v3155_v46 = vadd.f32 %v3112_v37, %v2897_v48 }
 0x252   : > { %v3586_v10 = vadd.f32 %v3585_v52, %v3555_v41  ;;  %v3517_v34 = vadd.f32 %v3516_v50, %v3486_v57  ;;  %v4789_v61 = vpop.f32.mrf.mxu1  ;;  %v3557_v26 = vmul.f32 %v3487_v60, %v3487_v60  ;;  %v3373_v56 = vpop.f32.mrf.mxu0  ;;  %v3559_v58 = vmul.f32 %v3489_v59, %v3489_v59 }
 0x253   : > { %3630 = vst [vmem:[%s6827_s9 + $0xd8] sm:$0xff] %v3490_v21  ;;  %v3488_v15 = vadd.f32 %v6805_v17, %v3449_v27  ;;  %v3454_v32 = vadd.f32 %v6798_v11, %v3415_v62  ;;  %v3158_v55 = vadd.f32 %v4789_v61, %v2900_v18  ;;  %v3413_v53 = vadd.f32 %v3370_v49, %v3155_v46 }
 0x254   : > { %v3518_v12 = vadd.f32 %v3517_v34, %v3487_v60  ;;  %v3587_v47 = vadd.f32 %v3586_v10, %v3556_v44  ;;  %v3115_v28 = vpop.f32.mrf.mxu1  ;;  %v3560_v30 = vmul.f32 %v3490_v21, %v3490_v21 }
 0x255   : > { %v3558_v51 = vmul.f32 %v3488_v15, %v3488_v15  ;;  %3628 = vst [vmem:[%s6827_s9 + $0xc8] sm:$0xff] %v3488_v15  ;;  %v3493_v57 = vadd.f32 %v6805_v17, %v3454_v32  ;;  %v3416_v31 = vadd.f32 %v4837_v25, %v3158_v55  ;;  %v3156_v42 = vadd.f32 %v3115_v28, %v2898_v13 }
 0x256   : > { %v3588_v19 = vadd.f32 %v3587_v47, %v3557_v26  ;;  %v3519_v33 = vadd.f32 %v3518_v12, %v3488_v15  ;;  %v3452_v24 = vadd.f32 %v6798_v11, %v3413_v53 }
 0x257   : > { %3633 = vst [vmem:[%s6827_s9 + $0xf0] sm:$0xff] %v3493_v57  ;;  %v3455_v14 = vadd.f32 %v6798_v11, %v3416_v31  ;;  %v3414_v4 = vadd.f32 %v3373_v56, %v3156_v42  ;;  %v3563_v36 = vmul.f32 %v3493_v57, %v3493_v57 }
 0x258   : > { %v3520_v40 = vadd.f32 %v3519_v33, %v3489_v59  ;;  %v3589_v54 = vadd.f32 %v3588_v19, %v3558_v51  ;;  %v3491_v3 = vadd.f32 %v6805_v17, %v3452_v24 }
 0x259   : > { %v3494_v8 = vadd.f32 %v6805_v17, %v3455_v14  ;;  %v3453_v29 = vadd.f32 %v6798_v11, %v3414_v4 }
 0x25a   : > { %v3590_v39 = vadd.f32 %v3589_v54, %v3559_v58  ;;  %v3521_v1 = vadd.f32 %v3520_v40, %v3490_v21  ;;  %3631 = vst [vmem:[%s6827_s9 + $0xe0] sm:$0xff] %v3491_v3  ;;  %v3561_v7 = vmul.f32 %v3491_v3, %v3491_v3 }
 0x25b   : > { %3634 = vst [vmem:[%s6827_s9 + $0xf8] sm:$0xff] %v3494_v8  ;;  %v3492_v0 = vadd.f32 %v6805_v17, %v3453_v29  ;;  %v3564_v9 = vmul.f32 %v3494_v8, %v3494_v8 }
 0x25c   : > { %v3522_v2 = vadd.f32 %v3521_v1, %v3491_v3  ;;  %v3591_v45 = vadd.f32 %v3590_v39, %v3560_v30 }
 0x25d   : > { %v3562_v43 = vmul.f32 %v3492_v0, %v3492_v0  ;;  %3632 = vst [vmem:[%s6827_s9 + $0xe8] sm:$0xff] %v3492_v0 }
 0x25e   : > { %v3592_v38 = vadd.f32 %v3591_v45, %v3561_v7  ;;  %v3523_v22 = vadd.f32 %v3522_v2, %v3492_v0 }
 0x260   : > { %v3524_v23 = vadd.f32 %v3523_v22, %v3493_v57  ;;  %v3593_v59 = vadd.f32 %v3592_v38, %v3562_v43 }
 0x262   : > { %v3525_v11 = vadd.f32 %v3524_v23, %v3494_v8  ;;  %v3594_v49 = vadd.f32 %v3593_v59, %v3563_v36 }
 0x264   : > { %v3526_v60 = vrot.slane %v3525_v11, 4  ;;  %v3595_v16 = vadd.f32 %v3594_v49, %v3564_v9 }
 0x266   : > { %v3527_v35 = vadd.f32 %v3526_v60, %v3525_v11  ;;  %v3596_v6 = vrot.slane %v3595_v16, 4 }
 0x268   : > { %v3528_v41 = vrot.slane %v3527_v35, 2  ;;  %v3597_v17 = vadd.f32 %v3596_v6, %v3595_v16 }
 0x26a   : > { %v3529_v50 = vadd.f32 %v3528_v41, %v3527_v35  ;;  %v3598_v52 = vrot.slane %v3597_v17, 2 }
 0x26c   : > { %v3530_v5 = vrot.slane %v3529_v50, 1  ;;  %v3599_v48 = vadd.f32 %v3598_v52, %v3597_v17 }
 0x26e   : > { %v3531_v37 = vadd.f32 %v3530_v5, %v3529_v50  ;;  %v3600_v21 = vrot.slane %v3599_v48, 1 }
 0x270   : > { %3532 = vst [vmem:[%s331_s19] sm:$0x1] %v3531_v37  ;;  %v3601_v27 = vadd.f32 %v3600_v21, %v3599_v48 }
 0x272   : > { %3602 = vst [vmem:[%s331_s19 + $0x1] sm:$0x1] %v3601_v27 }
 0x273 PF: > { %s18_s24 = sadd.s32 1, %s5072_s24  }
 0x274   : > { %p15_p4 = scmp.ge.s32.totalorder %s18_s24, 4  }
 0x276   :  { %17 = sbr.rel (!%p15_p4) target bundleno = 1 (0x1), region = 103 }

// kernel: unet_residual_block.5
= control target key start
LH: loop header
LB: loop body
LE: loop exit
PB: predicated region body
PF: predicated region fallthrough
CT: control target
= control target key end

     0   :  { %11 = vsyncpa [#allocation3], 0  ;;  %s7051_s0 = inlined_call_operand.vmem [shape: f32[2,256,128], index: 0, kind: input, shape index: {}]   ;;  %s7052_s1 = inlined_call_operand.vmem [shape: f32[2,1,128], index: 1, kind: input, shape index: {}]   ;;  %s7053_s2 = inlined_call_operand.vmem [shape: f32[2,1,128], index: 2, kind: input, shape index: {}]   ;;  %s7054_s3 = inlined_call_operand.vmem [shape: bf16[3,3,128,128], index: 3, kind: input, shape index: {}]   ;;  %s7055_s4 = inlined_call_operand.vmem [shape: f32[1,128], index: 4, kind: input, shape index: {}]   ;;  %s7056_s5 = inlined_call_operand.vmem [shape: f32[2,256,128], index: 5, kind: input, shape index: {}]   ;;  %s7057_s6 = inlined_call_operand.hbm [shape: f32[2,256,128], index: 6, kind: output, shape index: {}]  }
   0x1   :  { %13 = vsyncpa [#allocation3 + $0x1], 0  ;;  %s5079_s21 = smov 0   ;;  %s5081_s22 = smov 0  }
   0x2   :  { %s5083_s23 = smov 0   ;;  %s5085_s24 = smov 0  }
   0x3 LB: > { %s5100_s25 = sadd.s32 4294967295, %s5037_s24   ;;  %s3624_s26 = sadd.s32 4294967294, %s5037_s24   ;;  %s5037_s24 = sphi %s5085_s24, %s7266_s24   ;;  %s5033_s23 = sphi %s5083_s23, %s7265_s23   ;;  %s5029_s22 = sphi %s5081_s22, %s7264_s22   ;;  %s5025_s21 = sphi %s5079_s21, %s7263_s21  }
   0x4   : > { %s5104_s27 = sadd.s32 1, %s5037_s24   ;;  %s172_s28 = sadd.s32 1, %s5033_s23 }
   0x5   : > { %s169_s29 = ssub.s32 %s5037_s24, %s5104_s27  ;;  %p182_p0 = scmp.ne.s32.totalorder %s5033_s23, %s5029_s22 }
   0x6   : > { %p170_p1 = scmp.eq.s32.totalorder %s169_s29, 0  ;;  %p183_p2 = scmp.eq.s32.totalorder %s5100_s25, 1 }
   0x7   : > { %p188_p3 = scmp.ne.s32.totalorder %s5029_s22, %s5025_s21  ;;  %p189_p4 = scmp.eq.s32.totalorder %s3624_s26, 1 }
   0x8   : > { %s5115_s30 = scalar_select %p170_p1, %s5033_s23, %s172_s28  }
   0x9   : > { %p5117_p5 = por %p183_p2, %p182_p0  ;;  %p5121_p6 = por %p189_p4, %p188_p3 }
   0xa   : > { %p3627_p7 = scmp.ge.s32.totalorder %s5037_s24, 1  ;;  %p241_p8 = scmp.lt.s32.totalorder %s5037_s24, 3 }
   0xc   : > { %p242_p9 = pnand %p3627_p7, %p241_p8 }
   0xe   : > { %245 = sbr.rel (%p242_p9) target bundleno = 627 (0x273), region = 44 }
  0x13   : > { %v4775_v0 = vld [vmem:[%s7054_s3 + $0x78] sm:$0xff]   ;;  %vm666_vm0 = vcmask 1040384   ;;  %v4776_v1 = vld [vmem:[%s7054_s3 + $0x70] sm:$0xff]   ;;  %v5039_v2 = vmov 0.0   ;;  %v4777_v4 = vld [vmem:[%s7054_s3 + $0x68] sm:$0xff]   ;;  %vm865_vm1 = vcmask 1046528  }
  0x14   : > { %4284 = vmatprep.subr.bf16.mxu0 %v4775_v0  ;;  %4716 = vmatprep.subr.bf16.mxu1 %v4775_v0  ;;  %v5133_v3 = vrot.slane %v5039_v2, 7  ;;  %v4778_v9 = vld [vmem:[%s7054_s3 + $0x60] sm:$0xff]   ;;  %p282_p10 = scmp.lt.s32.totalorder %s5100_s25, 1  ;;  %vm1429_vm2 = vcmask 1045504   ;;  %v4779_v17 = vld [vmem:[%s7054_s3 + $0x58] sm:$0xff]   ;;  %v4780_v21 = vld [vmem:[%s7054_s3 + $0x50] sm:$0xff]  }
  0x15   : > { %4285 = vmatpush3.bf16.msra.mxu0 %v4775_v0  ;;  %4724 = vmatpush3.bf16.msra.mxu1 %v4775_v0  ;;  %v4781_v43 = vld [vmem:[%s7054_s3 + $0x48] sm:$0xff]   ;;  %v4782_v2 = vld [vmem:[%s7054_s3 + $0x40] sm:$0xff]   ;;  %vm3699_vm3 = vmneg %vm666_vm0  ;;  %vm5040_vm4 = vmmov 1   ;;  %s279_s19 = sand.u32 1, %s5029_s22   ;;  %s4067_s9 = sshll.u32 %s5100_s25, 12 }
  0x16   : > { %7098 = vst [vmem:[#allocation5_spill] sm:$0xff] %v5133_v3  ;;  %4286 = vmatprep.subr.bf16.mxu0 %v4776_v1  ;;  %4717 = vmatprep.subr.bf16.mxu1 %v4776_v1  ;;  %v767_v5 = vsel %vm666_vm0, 0.0, %v5133_v3  ;;  %v784_v6 = vsel %vm666_vm0, %v5133_v3, 0.0  ;;  %v867_v8 = vrot.slane %v5133_v3, 1  ;;  %s5150_s17 = scalar_select %p282_p10, %s5100_s25, 1  ;;  %v1431_v16 = vrot.slane %v5133_v3, 2  ;;  %vm5919_vm5 = vmpackc.low %vm5040_vm4, %vm3699_vm3 }
  0x17   : > { %v866_v7 = vrot.slane %v767_v5, 1  ;;  %v869_v10 = vrot.slane %v784_v6, 1  ;;  %v1430_v12 = vrot.slane %v767_v5, 2  ;;  %v1433_v13 = vrot.slane %v784_v6, 2  ;;  %v4788_v3 = vld [vmem:[%s7054_s3 + $0xa8] sm:$0xff]   ;;  %s7003_s15 = scalar_lea.hbm %s7057_s6, %s4067_s9  ;;  %s7011_s25 = scalar_lea.sflag [#allocation3], %s279_s19 }
  0x18   : > { %s4065_s20 = sshll.u32 %s5150_s17, 8  ;;  %s5163_s29 = scalar_lea.vmem %s7052_s1, %s5150_s17 }
  0x19   : > { %4287 = vmatpush3.bf16.msra.mxu0 %v4776_v1  ;;  %4725 = vmatpush3.bf16.msra.mxu1 %v4776_v1  ;;  %v868_v11 = vsel %vm865_vm1, %v866_v7, %v867_v8  ;;  %v870_v14 = vsel %vm865_vm1, %v867_v8, %v869_v10  ;;  %s5171_s11 = scalar_lea.vmem %s7051_s0, %s4065_s20  ;;  %s5177_s14 = scalar_lea.vmem %s7053_s2, %s5150_s17  ;;  %v5180_v18 = vld [vmem:[%s5163_s29] ss:$0 sm:$0xff]  ;;  %v1432_v19 = vsel %vm1429_vm2, %v1430_v12, %v1431_v16 }
  0x1a   : > { %4288 = vmatprep.subr.bf16.mxu0 %v4777_v4  ;;  %4718 = vmatprep.subr.bf16.mxu1 %v4777_v4  ;;  %v5152_v15 = vpack.c.bf16 %v870_v14, %v868_v11  ;;  %v1434_v20 = vsel %vm1429_vm2, %v1431_v16, %v1433_v13  ;;  %v299_v22 = vld [vmem:[%s5171_s11] sm:$0xff]  ;;  %v300_v23 = vld [vmem:[%s5171_s11 + $0x8] sm:$0xff]  ;;  %v313_v28 = vld [vmem:[%s5171_s11 + $0x70] sm:$0xff]  ;;  %s3628_s17 = sshll.u32 %s279_s19, 8  ;;  %s5041_s18 = smov [#allocation2]  }
  0x1b   : > { %v5190_v24 = vld [vmem:[%s5177_s14] ss:$0 sm:$0xff]  ;;  %v5192_v25 = vpack.c.bf16 %v1434_v20, %v1432_v19  ;;  %v338_v26 = vmul.f32 %v5180_v18, %v299_v22  ;;  %v339_v27 = vmul.f32 %v5180_v18, %v300_v23  ;;  %v314_v29 = vld [vmem:[%s5171_s11 + $0x78] sm:$0xff]  ;;  %v352_v31 = vmul.f32 %v5180_v18, %v313_v28  ;;  %v316_v33 = vld [vmem:[%s5171_s11 + $0x88] sm:$0xff] }
  0x1c   : > { %7099 = vst [vmem:[#allocation6_spill] sm:$0xff] %v5152_v15  ;;  %4300 = vmatprep.mubr.bf16.mxu0 %v5152_v15  ;;  %v315_v30 = vld [vmem:[%s5171_s11 + $0x80] sm:$0xff]  ;;  %v353_v32 = vmul.f32 %v5180_v18, %v314_v29  ;;  %v301_v35 = vld [vmem:[%s5171_s11 + $0x10] sm:$0xff]  ;;  %v302_v36 = vld [vmem:[%s5171_s11 + $0x18] sm:$0xff]  ;;  %v355_v39 = vmul.f32 %v5180_v18, %v316_v33 }
  0x1d   : > { %4289 = vmatpush3.bf16.msra.mxu0 %v4777_v4  ;;  %4726 = vmatpush3.bf16.msra.mxu1 %v4777_v4  ;;  %7100 = vst [vmem:[#allocation7_spill] sm:$0xff] %v5192_v25  ;;  %v354_v34 = vmul.f32 %v5180_v18, %v315_v30  ;;  %v5206_v37 = vadd.f32 %v5190_v24, %v338_v26  ;;  %v303_v41 = vld [vmem:[%s5171_s11 + $0x20] sm:$0xff]  ;;  %v304_v42 = vld [vmem:[%s5171_s11 + $0x28] sm:$0xff]  ;;  %v317_v48 = vld [vmem:[%s5171_s11 + $0x90] sm:$0xff] }
  0x1e   : > { %4290 = vmatprep.subr.bf16.mxu0 %v4778_v9  ;;  %4719 = vmatprep.subr.bf16.mxu1 %v4778_v9  ;;  %v5209_v38 = vadd.f32 %v5190_v24, %v339_v27  ;;  %v340_v40 = vmul.f32 %v5180_v18, %v301_v35  ;;  %v5219_v44 = vadd.f32 %v5190_v24, %v352_v31  ;;  %v318_v53 = vld [vmem:[%s5171_s11 + $0x98] sm:$0xff]  ;;  %v319_v54 = vld [vmem:[%s5171_s11 + $0xa0] sm:$0xff]  ;;  %v320_v62 = vld [vmem:[%s5171_s11 + $0xa8] sm:$0xff] }
  0x1f   : > { %v5222_v45 = vadd.f32 %v5190_v24, %v353_v32  ;;  %v5225_v46 = vadd.f32 %v5190_v24, %v354_v34  ;;  %v341_v47 = vmul.f32 %v5180_v18, %v302_v36  ;;  %v3635_v49 = vmul.f32 -1.442695, %v5206_v37  ;;  %v305_v10 = vld [vmem:[%s5171_s11 + $0x30] sm:$0xff]  ;;  %v306_v11 = vld [vmem:[%s5171_s11 + $0x38] sm:$0xff]  ;;  %v307_v12 = vld [vmem:[%s5171_s11 + $0x40] sm:$0xff] }
  0x20   : > { %v3636_v50 = vmul.f32 -1.442695, %v5209_v38  ;;  %v5232_v51 = vadd.f32 %v5190_v24, %v355_v39  ;;  %v5235_v52 = vadd.f32 %v5190_v24, %v340_v40  ;;  %v3649_v55 = vmul.f32 -1.442695, %v5219_v44  ;;  %v321_v19 = vld [vmem:[%s5171_s11 + $0xb0] sm:$0xff]  ;;  %v322_v20 = vld [vmem:[%s5171_s11 + $0xb8] sm:$0xff] }
  0x21   : > { %4291 = vmatpush3.bf16.msra.mxu0 %v4778_v9  ;;  %4727 = vmatpush3.bf16.msra.mxu1 %v4778_v9  ;;  %v3650_v56 = vmul.f32 -1.442695, %v5222_v45  ;;  %v3651_v57 = vmul.f32 -1.442695, %v5225_v46  ;;  %v5243_v58 = vadd.f32 %v5190_v24, %v341_v47  ;;  %4847 = vpow2.f32 %v3635_v49  ;;  %v5291_v29 = vld [vmem:[%s7054_s3 + $0x38] sm:$0xff]   ;;  %v323_v39 = vld [vmem:[%s5171_s11 + $0xc0] sm:$0xff] }
  0x22   : > { %4292 = vmatprep.subr.bf16.mxu0 %v4779_v17  ;;  %4720 = vmatprep.subr.bf16.mxu1 %v4779_v17  ;;  %v3652_v59 = vmul.f32 -1.442695, %v5232_v51  ;;  %v3637_v60 = vmul.f32 -1.442695, %v5235_v52  ;;  %v342_v61 = vmul.f32 %v5180_v18, %v303_v41  ;;  %4849 = vpow2.f32 %v3636_v50  ;;  %v5296_v30 = vld [vmem:[%s7054_s3 + $0xb8] sm:$0xff]  }
  0x23   : > { %v3638_v63 = vmul.f32 -1.442695, %v5243_v58  ;;  %v343_v0 = vmul.f32 %v5180_v18, %v304_v42  ;;  %v356_v1 = vmul.f32 %v5180_v18, %v317_v48  ;;  %4851 = vpow2.f32 %v3649_v55 }
  0x24   : > { %v5256_v4 = vadd.f32 %v5190_v24, %v342_v61  ;;  %v357_v5 = vmul.f32 %v5180_v18, %v318_v53  ;;  %v358_v6 = vmul.f32 %v5180_v18, %v319_v54  ;;  %4853 = vpow2.f32 %v3650_v56  ;;  %v309_v53 = vld [vmem:[%s5171_s11 + $0x50] sm:$0xff] }
  0x25   : > { %4293 = vmatpush3.bf16.msra.mxu0 %v4779_v17  ;;  %4728 = vmatpush3.bf16.msra.mxu1 %v4779_v17  ;;  %v5261_v7 = vadd.f32 %v5190_v24, %v343_v0  ;;  %v5264_v8 = vadd.f32 %v5190_v24, %v356_v1  ;;  %v359_v9 = vmul.f32 %v5180_v18, %v320_v62  ;;  %4855 = vpow2.f32 %v3651_v57  ;;  %v308_v17 = vld [vmem:[%s5171_s11 + $0x48] sm:$0xff]  ;;  %v310_v57 = vld [vmem:[%s5171_s11 + $0x58] sm:$0xff] }
  0x26   : > { %4294 = vmatprep.subr.bf16.mxu0 %v4780_v21  ;;  %4721 = vmatprep.subr.bf16.mxu1 %v4780_v21  ;;  %v3639_v13 = vmul.f32 -1.442695, %v5256_v4  ;;  %v5272_v14 = vadd.f32 %v5190_v24, %v357_v5  ;;  %v5275_v16 = vadd.f32 %v5190_v24, %v358_v6  ;;  %4857 = vpow2.f32 %v3652_v59 }
  0x27   : > { %v3653_v22 = vmul.f32 -1.442695, %v5264_v8  ;;  %v5283_v23 = vadd.f32 %v5190_v24, %v359_v9  ;;  %4859 = vpow2.f32 %v3637_v60  ;;  %v344_v28 = vmul.f32 %v5180_v18, %v305_v10  ;;  %v311_v10 = vld [vmem:[%s5171_s11 + $0x60] sm:$0xff] }
  0x28   : > { %v3654_v26 = vmul.f32 -1.442695, %v5272_v14  ;;  %v3655_v27 = vmul.f32 -1.442695, %v5275_v16  ;;  %4861 = vpow2.f32 %v3638_v63  ;;  %v345_v32 = vmul.f32 %v5180_v18, %v306_v11 }
  0x29   : > { %4295 = vmatpush3.bf16.msra.mxu0 %v4780_v21  ;;  %4729 = vmatpush3.bf16.msra.mxu1 %v4780_v21  ;;  %v3640_v21 = vmul.f32 -1.442695, %v5261_v7  ;;  %v3656_v31 = vmul.f32 -1.442695, %v5283_v23  ;;  %v346_v33 = vmul.f32 %v5180_v18, %v307_v12  ;;  %4863 = vpow2.f32 %v3639_v13 }
  0x2a   : > { %4296 = vmatprep.subr.bf16.mxu0 %v4781_v43  ;;  %4722 = vmatprep.subr.bf16.mxu1 %v4781_v43  ;;  %v5302_v34 = vadd.f32 %v5190_v24, %v344_v28  ;;  %v347_v35 = vmul.f32 %v5180_v18, %v308_v17  ;;  %v360_v36 = vmul.f32 %v5180_v18, %v321_v19  ;;  %v312_v19 = vld [vmem:[%s5171_s11 + $0x68] sm:$0xff] }
  0x2b   : > { %4865 = vpow2.f32 %v3640_v21  ;;  %v5308_v40 = vadd.f32 %v5190_v24, %v345_v32  ;;  %v5311_v41 = vadd.f32 %v5190_v24, %v346_v33  ;;  %v361_v42 = vmul.f32 %v5180_v18, %v322_v20 }
  0x2c   : > { %4867 = vpow2.f32 %v3653_v22  ;;  %v3641_v47 = vmul.f32 -1.442695, %v5302_v34  ;;  %v5317_v48 = vadd.f32 %v5190_v24, %v347_v35  ;;  %v5323_v50 = vadd.f32 %v5190_v24, %v360_v36  ;;  %v326_v35 = vld [vmem:[%s5171_s11 + $0xd8] sm:$0xff] }
  0x2d   : > { %4297 = vmatpush3.bf16.msra.mxu0 %v4781_v43  ;;  %4730 = vmatpush3.bf16.msra.mxu1 %v4781_v43  ;;  %v324_v43 = vld [vmem:[%s5171_s11 + $0xc8] sm:$0xff]  ;;  %4869 = vpow2.f32 %v3654_v26  ;;  %v3642_v49 = vmul.f32 -1.442695, %v5308_v40  ;;  %v5327_v54 = vmul.f32 -1.442695, %v5311_v41  ;;  %v5330_v55 = vadd.f32 %v5190_v24, %v361_v42 }
  0x2e   : > { %4298 = vmatprep.subr.bf16.mxu0 %v4782_v2  ;;  %4723 = vmatprep.subr.bf16.mxu1 %v4782_v2  ;;  %4871 = vpow2.f32 %v3655_v27  ;;  %v362_v56 = vmul.f32 %v5180_v18, %v323_v39  ;;  %v4848_v59 = vpop.eup %4847  ;;  %v5335_v60 = vmul.f32 -1.442695, %v5317_v48  ;;  %v363_v61 = vmul.f32 %v5180_v18, %v324_v43  ;;  %v325_v27 = vld [vmem:[%s5171_s11 + $0xd0] sm:$0xff] }
  0x2f   : > { %4873 = vpow2.f32 %v3656_v31  ;;  %v348_v62 = vmul.f32 %v5180_v18, %v309_v53  ;;  %v4850_v63 = vpop.eup %4849  ;;  %v505_v0 = vadd.f32 1.0, %v4848_v59  ;;  %v349_v9 = vmul.f32 %v5180_v18, %v310_v57 }
  0x30   : > { %4875 = vpow2.f32 %v3641_v47  ;;  %v5340_v1 = vadd.f32 %v5190_v24, %v362_v56  ;;  %v506_v5 = vadd.f32 1.0, %v4850_v63  ;;  %v5343_v6 = vadd.f32 %v5190_v24, %v363_v61 }
  0x31   : > { %4299 = vmatpush3.bf16.msra.mxu0 %v4782_v2  ;;  %4731 = vmatpush3.bf16.msra.mxu1 %v4782_v2  ;;  %v4852_v2 = vpop.eup %4851  ;;  %4877 = vpow2.f32 %v3642_v49  ;;  %v5348_v13 = vmul.f32 -1.442695, %v5323_v50  ;;  %v5351_v17 = vmul.f32 -1.442695, %v5330_v55  ;;  %v5358_v26 = vadd.f32 %v5190_v24, %v348_v62 }
  0x32   : > { %4332 = vmatprep.subr.bf16.mxu1 %v5291_v29  ;;  %4380 = vmatprep.subr.bf16.mxu0 %v5296_v30  ;;  %7101 = vst [vmem:[#allocation8_spill] sm:$0xff] %v5340_v1  ;;  %7102 = vst [vmem:[#allocation9_spill] sm:$0xff] %v5343_v6  ;;  %v4854_v11 = vpop.eup %4853  ;;  %4879 = vrcp.f32 %v505_v0  ;;  %v519_v12 = vadd.f32 1.0, %v4852_v2  ;;  %v5355_v22 = vmul.f32 -1.442695, %v5340_v1  ;;  %v350_v33 = vmul.f32 %v5180_v18, %v311_v10 }
  0x33   : > { %v4856_v20 = vpop.eup %4855  ;;  %4881 = vrcp.f32 %v506_v5  ;;  %v520_v21 = vadd.f32 1.0, %v4854_v11  ;;  %7103 = vst [vmem:[#allocation10_spill] sm:$0xff] %v5358_v26  ;;  %v5362_v32 = vmul.f32 -1.442695, %v5343_v6  ;;  %v5367_v42 = vadd.f32 %v5190_v24, %v349_v9 }
  0x34   : > { %v4858_v28 = vpop.eup %4857  ;;  %4883 = vrcp.f32 %v519_v12  ;;  %v521_v31 = vadd.f32 1.0, %v4856_v20  ;;  %v351_v43 = vmul.f32 %v5180_v18, %v312_v19  ;;  %v5371_v53 = vadd.f32 %v5190_v24, %v350_v33  ;;  %v327_v33 = vld [vmem:[%s5171_s11 + $0xe0] sm:$0xff] }
  0x35   : > { %v4860_v36 = vpop.eup %4859  ;;  %4885 = vrcp.f32 %v520_v21  ;;  %v522_v39 = vadd.f32 1.0, %v4858_v28  ;;  %7104 = vst [vmem:[#allocation11_spill] sm:$0xff] %v5367_v42  ;;  %v364_v56 = vmul.f32 %v5180_v18, %v325_v27  ;;  %v365_v62 = vmul.f32 %v5180_v18, %v326_v35 }
  0x36   : > { %v4862_v47 = vpop.eup %4861  ;;  %4887 = vrcp.f32 %v521_v31  ;;  %v507_v49 = vadd.f32 1.0, %v4860_v36  ;;  %7105 = vst [vmem:[#allocation12_spill] sm:$0xff] %v5371_v53  ;;  %v5375_v61 = vadd.f32 %v5190_v24, %v351_v43  ;;  %v5379_v2 = vmul.f32 -1.442695, %v5358_v26 }
  0x37   : > { %v4864_v57 = vpop.eup %4863  ;;  %4889 = vrcp.f32 %v522_v39  ;;  %v508_v59 = vadd.f32 1.0, %v4862_v47  ;;  %v5382_v10 = vmul.f32 -1.442695, %v5367_v42  ;;  %v5385_v11 = vmul.f32 -1.442695, %v5371_v53  ;;  %v328_v39 = vld [vmem:[%s5171_s11 + $0xe8] sm:$0xff] }
  0x38   : > { %7106 = vst [vmem:[#allocation13_spill] sm:$0xff] %v5375_v61  ;;  %v4866_v63 = vpop.eup %4865  ;;  %4891 = vrcp.f32 %v507_v49  ;;  %v509_v0 = vadd.f32 1.0, %v4864_v57  ;;  %v5388_v20 = vmul.f32 -1.442695, %v5375_v61  ;;  %v5391_v21 = vadd.f32 %v5190_v24, %v364_v56 }
  0x39   : > { %v4868_v5 = vpop.eup %4867  ;;  %4893 = vrcp.f32 %v508_v59  ;;  %v510_v9 = vadd.f32 1.0, %v4866_v63  ;;  %v5394_v31 = vadd.f32 %v5190_v24, %v365_v62  ;;  %v366_v59 = vmul.f32 %v5180_v18, %v327_v33 }
  0x3a   : > { %v4870_v12 = vpop.eup %4869  ;;  %4895 = vrcp.f32 %v509_v0  ;;  %v523_v19 = vadd.f32 1.0, %v4868_v5  ;;  %7107 = vst [vmem:[#allocation14_spill] sm:$0xff] %v5391_v21  ;;  %v5399_v56 = vmul.f32 -1.442695, %v5391_v21  ;;  %v367_v5 = vmul.f32 %v5180_v18, %v328_v39 }
  0x3b   : > { %v4872_v27 = vpop.eup %4871  ;;  %4897 = vrcp.f32 %v510_v9  ;;  %v524_v28 = vadd.f32 1.0, %v4870_v12  ;;  %7108 = vst [vmem:[#allocation15_spill] sm:$0xff] %v5394_v31  ;;  %v5403_v0 = vmul.f32 -1.442695, %v5394_v31 }
  0x3c   : > { %v4874_v35 = vpop.eup %4873  ;;  %4899 = vrcp.f32 %v523_v19  ;;  %v525_v36 = vadd.f32 1.0, %v4872_v27 }
  0x3d   : > { %v4876_v43 = vpop.eup %4875  ;;  %4901 = vrcp.f32 %v524_v28  ;;  %v526_v47 = vadd.f32 1.0, %v4874_v35 }
  0x3e   : > { %v4878_v49 = vpop.eup %4877  ;;  %4903 = vrcp.f32 %v525_v36  ;;  %v511_v57 = vadd.f32 1.0, %v4876_v43  ;;  %v5411_v36 = vadd.f32 %v5190_v24, %v366_v59 }
  0x3f   : > { %v4880_v63 = vpop.eup %4879  ;;  %4905 = vrcp.f32 %v526_v47  ;;  %v512_v62 = vadd.f32 1.0, %v4878_v49 }
  0x40   : > { %v4882_v9 = vpop.eup %4881  ;;  %v601_v12 = vmul.f32 %v4880_v63, %v5206_v37  ;;  %4907 = vrcp.f32 %v511_v57  ;;  %v5416_v37 = vadd.f32 %v5190_v24, %v367_v5 }
  0x41   : > { %v4884_v19 = vpop.eup %4883  ;;  %v602_v27 = vmul.f32 %v4882_v9, %v5209_v38  ;;  %4909 = vrcp.f32 %v512_v62  ;;  %v4786_v9 = vld [vmem:[%s7054_s3 + $0xb0] sm:$0xff]  }
  0x42   : > { %v4886_v28 = vpop.eup %4885  ;;  %v669_v35 = vrot.slane %v601_v12, 7  ;;  %v615_v33 = vmul.f32 %v4884_v19, %v5219_v44  ;;  %4911 = vpow2.f32 %v5327_v54 }
  0x43   : > { %v4888_v43 = vpop.eup %4887  ;;  %v670_v47 = vrot.slane %v602_v27, 7  ;;  %v616_v18 = vmul.f32 %v4886_v28, %v5222_v45  ;;  %4913 = vpow2.f32 %v5335_v60 }
  0x44   : > { %v4890_v38 = vpop.eup %4889  ;;  %v5419_v39 = vsel %vm666_vm0, 0.0, %v669_v35  ;;  %v5421_v49 = vrot.slane %v615_v33, 7  ;;  %v617_v44 = vmul.f32 %v4888_v43, %v5225_v46  ;;  %4915 = vpow2.f32 %v5348_v13 }
  0x45   : > { %v4892_v54 = vpop.eup %4891  ;;  %v5426_v57 = vsel %vm666_vm0, %v669_v35, %v670_v47  ;;  %v5429_v45 = vsel %vm666_vm0, %v670_v47, 0.0  ;;  %v871_v24 = vrot.slane %v5419_v39, 1  ;;  %v691_v12 = vrot.slane %v616_v18, 7 }
  0x46   : > { %v4894_v59 = vpop.eup %4893  ;;  %v872_v63 = vrot.slane %v5426_v57, 1  ;;  %v874_v62 = vrot.slane %v5429_v45, 1  ;;  %v5436_v46 = vpack.c.bf16 %v5426_v57, %v669_v35  ;;  %v5442_v19 = vsel %vm666_vm0, 0.0, %v5421_v49 }
  0x47   : > { %v4896_v5 = vpop.eup %4895  ;;  %v618_v27 = vmul.f32 %v4890_v38, %v5232_v51  ;;  %v906_v35 = vrot.slane %v5442_v19, 1  ;;  %v5448_v47 = vrot.slane %v617_v44, 7  ;;  %v5457_v13 = vsel %vm666_vm0, %v5421_v49, %v691_v12 }
  0x48   : > { %7109 = vst [vmem:[#allocation16_spill] sm:$0xff] %v5436_v46  ;;  %v4898_v28 = vpop.eup %4897  ;;  %v873_v33 = vsel %vm865_vm1, %v871_v24, %v872_v63  ;;  %v875_v43 = vsel %vm865_vm1, %v872_v63, %v874_v62  ;;  %v5460_v51 = vsel %vm666_vm0, %v691_v12, 0.0  ;;  %v907_v63 = vrot.slane %v5457_v13, 1 }
  0x49   : > { %v4900_v18 = vpop.eup %4899  ;;  %v5453_v60 = vpack.c.bf16 %v875_v43, %v873_v33  ;;  %v694_v38 = vrot.slane %v618_v27, 7  ;;  %v909_v44 = vrot.slane %v5460_v51, 1  ;;  %v5466_v62 = vsel %vm666_vm0, 0.0, %v5448_v47 }
  0x4a   : > { %v4902_v24 = vpop.eup %4901  ;;  %v603_v33 = vmul.f32 %v4892_v54, %v5235_v52  ;;  %v911_v27 = vrot.slane %v5466_v62, 1  ;;  %v604_v46 = vmul.f32 %v4894_v59, %v5243_v58  ;;  %v908_v52 = vsel %vm865_vm1, %v906_v35, %v907_v63 }
  0x4b   : > { %7110 = vst [vmem:[#allocation17_spill] sm:$0xff] %v5453_v60  ;;  %v4904_v43 = vpop.eup %4903  ;;  %4301 = vmatmul.mubr.bf16.vlgmr.msra.gmra.mxu0 %v5453_v60  ;;  %v5472_v15 = vsel %vm666_vm0, %v5448_v47, %v694_v38  ;;  %v5475_v12 = vsel %vm666_vm0, %v694_v38, 0.0  ;;  %v910_v54 = vsel %vm865_vm1, %v907_v63, %v909_v44  ;;  %v605_v61 = vmul.f32 %v4896_v5, %v5256_v4  ;;  %v4785_v44 = vld [vmem:[%s7054_s3 + $0x30] sm:$0xff]  }
  0x4c   : > { %v4906_v25 = vpop.eup %4905  ;;  %v912_v60 = vrot.slane %v5472_v15, 1  ;;  %v914_v31 = vrot.slane %v5475_v12, 1  ;;  %4381 = vmatpush3.bf16.msra.mxu0 %v5296_v30  ;;  %v5487_v21 = vpack.c.bf16 %v910_v54, %v908_v52  ;;  %v5489_v58 = vrot.slane %v603_v33, 7  ;;  %v4790_v33 = vld [vmem:[%s7054_s3 + $0xa0] sm:$0xff]  }
  0x4d   : > { %v4908_v38 = vpop.eup %4907  ;;  %4382 = vmatprep.subr.bf16.mxu0 %v4786_v9  ;;  %v673_v59 = vrot.slane %v604_v46, 7  ;;  %v606_v30 = vmul.f32 %v4898_v28, %v5261_v7  ;;  %v619_v52 = vmul.f32 %v4900_v18, %v5264_v8  ;;  %v5522_v18 = vrot.slane %v605_v61, 7 }
  0x4e   : > { %7111 = vst [vmem:[#allocation18_spill] sm:$0xff] %v5487_v21  ;;  %v5492_v53 = vpop.eup %4909  ;;  %v913_v35 = vsel %vm865_vm1, %v911_v27, %v912_v60  ;;  %v915_v63 = vsel %vm865_vm1, %v912_v60, %v914_v31  ;;  %4316 = vmatprep.mubr.bf16.mxu1 %v5487_v21  ;;  %v5512_v31 = vsel %vm666_vm0, 0.0, %v5489_v58  ;;  %4917 = vpow2.f32 %v5351_v17 }
  0x4f   : > { %v5501_v54 = vpop.eup %4911  ;;  %v5504_v46 = vpack.c.bf16 %v915_v63, %v913_v35  ;;  %v5508_v4 = vsel %vm666_vm0, %v5489_v58, %v673_v59  ;;  %v5515_v60 = vsel %vm666_vm0, %v673_v59, 0.0  ;;  %v876_v8 = vrot.slane %v5512_v31, 1 }
  0x50   : > { %v5517_v7 = vpop.eup %4913  ;;  %4383 = vmatpush3.bf16.msra.mxu0 %v4786_v9  ;;  %v877_v5 = vrot.slane %v5508_v4, 1  ;;  %v879_v28 = vrot.slane %v5515_v60, 1  ;;  %v676_v59 = vrot.slane %v606_v30, 7  ;;  %v620_v35 = vmul.f32 %v4902_v24, %v5272_v14  ;;  %v4787_v30 = vld [vmem:[%s7054_s3 + $0x28] sm:$0xff]  }
  0x51   : > { %7112 = vst [vmem:[#allocation19_spill] sm:$0xff] %v5504_v46  ;;  %v5527_v27 = vpop.eup %4915  ;;  %4317 = vmatmul.mubr.bf16.vlgmr.msra.gmra.mxu1 %v5504_v46  ;;  %v5531_v9 = vrot.slane %v619_v52, 7  ;;  %4384 = vmatprep.subr.bf16.mxu0 %v4788_v3  ;;  %v621_v63 = vmul.f32 %v4904_v43, %v5275_v16  ;;  %v5539_v42 = vsel %vm666_vm0, 0.0, %v5522_v18  ;;  %v622_v14 = vmul.f32 %v4906_v25, %v5283_v23 }
  0x52   : > { %4333 = vmatpush3.bf16.msra.mxu1 %v5291_v29  ;;  %v878_v61 = vsel %vm865_vm1, %v876_v8, %v877_v5  ;;  %v880_v21 = vsel %vm865_vm1, %v877_v5, %v879_v28  ;;  %v5549_v16 = vsel %vm666_vm0, %v5522_v18, %v676_v59  ;;  %v5552_v29 = vsel %vm666_vm0, %v676_v59, 0.0 }
  0x53   : > { %4334 = vmatprep.subr.bf16.mxu1 %v4785_v44  ;;  %v5545_v24 = vpack.c.bf16 %v880_v21, %v878_v61  ;;  %v881_v43 = vrot.slane %v5539_v42, 1  ;;  %v882_v52 = vrot.slane %v5549_v16, 1  ;;  %v884_v8 = vrot.slane %v5552_v29, 1  ;;  %v4792_v61 = vld [vmem:[%s7054_s3 + $0x98] sm:$0xff]  }
  0x54   : > { %v697_v5 = vrot.slane %v620_v35, 7  ;;  %v5559_v25 = vsel %vm666_vm0, 0.0, %v5531_v9  ;;  %4385 = vmatpush3.bf16.msra.mxu0 %v4788_v3  ;;  %v5563_v21 = vrot.slane %v621_v63, 7  ;;  %v700_v28 = vrot.slane %v622_v14, 7 }
  0x55   : > { %7113 = vst [vmem:[#allocation20_spill] sm:$0xff] %v5545_v24  ;;  %4304 = vmatprep.mubr.bf16.mxu0 %v5545_v24  ;;  %v916_v23 = vrot.slane %v5559_v25, 1  ;;  %4386 = vmatprep.subr.bf16.mxu0 %v4790_v33  ;;  %v607_v59 = vmul.f32 %v4908_v38, %v5302_v34  ;;  %v883_v35 = vsel %vm865_vm1, %v881_v43, %v882_v52  ;;  %v4789_v34 = vld [vmem:[%s7054_s3 + $0x20] sm:$0xff]  }
  0x56   : > { %7114 = vst [vmem:[#allocation21_spill] sm:$0xff] %v5563_v21  ;;  %4335 = vmatpush3.bf16.msra.mxu1 %v4785_v44  ;;  %v885_v46 = vsel %vm865_vm1, %v882_v52, %v884_v8  ;;  %v5573_v3 = vsel %vm666_vm0, %v5531_v9, %v697_v5  ;;  %v5576_v63 = vsel %vm666_vm0, %v697_v5, 0.0  ;;  %v5587_v43 = vsel %vm666_vm0, %v5563_v21, %v700_v28 }
  0x57   : > { %v5581_v38 = vpack.c.bf16 %v885_v46, %v883_v35  ;;  %v917_v14 = vrot.slane %v5573_v3, 1  ;;  %v919_v44 = vrot.slane %v5576_v63, 1  ;;  %4336 = vmatprep.subr.bf16.mxu1 %v4787_v30  ;;  %v5591_v52 = vsel %vm666_vm0, 0.0, %v5563_v21  ;;  %v4794_v35 = vld [vmem:[%s7054_s3 + $0x90] sm:$0xff]  }
  0x58   : > { %v5594_v8 = vsel %vm666_vm0, %v700_v28, 0.0  ;;  %v922_v5 = vrot.slane %v5587_v43, 1  ;;  %4387 = vmatpush3.bf16.msra.mxu0 %v4790_v33  ;;  %v608_v46 = vmul.f32 %v5492_v53, %v5308_v40  ;;  %v921_v6 = vrot.slane %v5591_v52, 1 }
  0x59   : > { %7115 = vst [vmem:[#allocation22_spill] sm:$0xff] %v5581_v38  ;;  %4305 = vmatmul.mubr.bf16.gmra.mxu0 %v5581_v38  ;;  %v918_v24 = vsel %vm865_vm1, %v916_v23, %v917_v14  ;;  %v920_v26 = vsel %vm865_vm1, %v917_v14, %v919_v44  ;;  %v924_v28 = vrot.slane %v5594_v8, 1  ;;  %4388 = vmatprep.subr.bf16.mxu0 %v4792_v61  ;;  %v5609_v33 = vrot.slane %v607_v59, 7 }
  0x5a   : > { %v5607_v1 = vpack.c.bf16 %v920_v26, %v918_v24  ;;  %4337 = vmatpush3.bf16.msra.mxu1 %v4787_v30  ;;  %v679_v40 = vrot.slane %v608_v46, 7  ;;  %v513_v53 = vadd.f32 1.0, %v5501_v54  ;;  %v923_v21 = vsel %vm865_vm1, %v921_v6, %v922_v5  ;;  %v4791_v26 = vld [vmem:[%s7054_s3 + $0x18] sm:$0xff]  }
  0x5b   : > { %v925_v38 = vsel %vm865_vm1, %v922_v5, %v924_v28  ;;  %4338 = vmatprep.subr.bf16.mxu1 %v4789_v34  ;;  %v514_v23 = vadd.f32 1.0, %v5517_v7  ;;  %v5628_v6 = vsel %vm666_vm0, 0.0, %v5609_v33  ;;  %v7117_v14 = vrot.slane %v5426_v57, 2  ;;  %v4798_v57 = vld [vmem:[%s7054_s3 + $0x80] sm:$0xff]  }
  0x5c   : > { %4320 = vmatprep.mubr.bf16.mxu1 %v5607_v1  ;;  %v5620_v30 = vpack.c.bf16 %v925_v38, %v923_v21  ;;  %v5624_v54 = vsel %vm666_vm0, %v5609_v33, %v679_v40  ;;  %v5631_v7 = vsel %vm666_vm0, %v679_v40, 0.0  ;;  %4389 = vmatpush3.bf16.msra.mxu0 %v4792_v61  ;;  %v886_v17 = vrot.slane %v5628_v6, 1  ;;  %v4796_v21 = vld [vmem:[%s7054_s3 + $0x88] sm:$0xff]  }
  0x5d   : > { %v887_v24 = vrot.slane %v5624_v54, 1  ;;  %v889_v59 = vrot.slane %v5631_v7, 1  ;;  %4919 = vrcp.f32 %v513_v53  ;;  %4390 = vmatprep.subr.bf16.mxu0 %v4794_v35  ;;  %v527_v38 = vadd.f32 1.0, %v5527_v27 }
  0x5e   : > { %7116 = vst [vmem:[#allocation23_spill] sm:$0xff] %v5620_v30  ;;  %4321 = vmatmul.mubr.bf16.gmra.mxu1 %v5620_v30  ;;  %4921 = vrcp.f32 %v514_v23  ;;  %v7118_v61 = vrot.slane %v5419_v39, 2  ;;  %v7119_v5 = vrot.slane %v5429_v45, 2  ;;  %v7120_v46 = vmov %v7117_v14  ;;  %v4793_v39 = vld [vmem:[%s7054_s3 + $0x10] sm:$0xff]  }
  0x5f   : > { %4339 = vmatpush3.bf16.msra.mxu1 %v4789_v34  ;;  %v888_v40 = vsel %vm865_vm1, %v886_v17, %v887_v24  ;;  %v890_v53 = vsel %vm865_vm1, %v887_v24, %v889_v59  ;;  %4923 = vpow2.f32 %v5355_v22  ;;  %v1440_v45 = vrot.slane %v5512_v31, 2  ;;  %v4795_v31 = vld [vmem:[%s7054_s3 + $0x8] sm:$0xff]  }
  0x60   : > { %v1437_v44 = vsel %vm1429_vm2, %v7118_v61, %v7117_v14  ;;  %v1439_v28 = vsel %vm1429_vm2, %v7120_v46, %v7119_v5  ;;  %v5656_v23 = vpack.c.bf16 %v890_v53, %v888_v40  ;;  %4925 = vrcp.f32 %v527_v38  ;;  %4340 = vmatprep.subr.bf16.mxu1 %v4791_v26  ;;  %4391 = vmatpush3.bf16.msra.mxu0 %v4794_v35 }
  0x61   : > { %v5654_v27 = vpack.c.bf16 %v1439_v28, %v1437_v44  ;;  %v1441_v34 = vrot.slane %v5508_v4, 2  ;;  %4927 = vpow2.f32 %v5362_v32  ;;  %4392 = vmatprep.subr.bf16.mxu0 %v4796_v21  ;;  %v1443_v22 = vrot.slane %v5515_v60, 2 }
  0x62   : > { %v5670_v17 = vpack.c.bf16 %v5508_v4, %v5489_v58  ;;  %v1445_v24 = vrot.slane %v5539_v42, 2  ;;  %4308 = vmatprep.mubr.bf16.mxu0 %v5656_v23  ;;  %4929 = vpow2.f32 %v5379_v2  ;;  %v1446_v32 = vrot.slane %v5549_v16, 2  ;;  %v5686_v42 = vld [vmem:[%s7054_s3 + $0x138] sm:$0xff]  }
  0x63   : > { %v1442_v35 = vsel %vm1429_vm2, %v1440_v45, %v1441_v34  ;;  %v1448_v60 = vrot.slane %v5552_v29, 2  ;;  %4341 = vmatpush3.bf16.msra.mxu1 %v4791_v26  ;;  %4931 = vpow2.f32 %v5382_v10  ;;  %v3663_v58 = vmul.f32 -1.442695, %v5411_v36 }
  0x64   : > { %v1444_v2 = vsel %vm1429_vm2, %v1441_v34, %v1443_v22  ;;  %v5691_v4 = vpack.c.bf16 %v5549_v16, %v5522_v18  ;;  %4342 = vmatprep.subr.bf16.mxu1 %v4793_v39  ;;  %4933 = vpow2.f32 %v5385_v11  ;;  %4393 = vmatpush3.bf16.msra.mxu0 %v4796_v21  ;;  %v1447_v10 = vsel %vm1429_vm2, %v1445_v24, %v1446_v32  ;;  %v4918_v21 = vpop.eup %4917 }
  0x65   : > { %v5694_v29 = vpack.c.bf16 %v1444_v2, %v1442_v35  ;;  %v1449_v26 = vsel %vm1429_vm2, %v1446_v32, %v1448_v60  ;;  %4935 = vpow2.f32 %v5388_v20  ;;  %v3664_v59 = vmul.f32 -1.442695, %v5416_v37  ;;  %4394 = vmatprep.subr.bf16.mxu0 %v4798_v57 }
  0x66   : > { %v5700_v38 = vpack.c.bf16 %v1449_v26, %v1447_v10  ;;  %4937 = vpow2.f32 %v5399_v56  ;;  %v5705_v18 = vpack.c.bf16 %v5624_v54, %v5609_v33  ;;  %v1470_v11 = vrot.slane %v5442_v19, 2  ;;  %v4797_v56 = vld [vmem:[%s7054_s3] sm:$0xff]  }
  0x67   : > { %7121 = vst [vmem:[#allocation24_spill] sm:$0xff] %v5694_v29  ;;  %v1471_v16 = vrot.slane %v5457_v13, 2  ;;  %4343 = vmatpush3.bf16.msra.mxu1 %v4793_v39  ;;  %4939 = vpow2.f32 %v5403_v0  ;;  %v1473_v20 = vrot.slane %v5460_v51, 2  ;;  %v5717_v19 = vpack.c.bf16 %v5457_v13, %v5421_v49 }
  0x68   : > { %7122 = vst [vmem:[#allocation25_spill] sm:$0xff] %v5700_v38  ;;  %4344 = vmatprep.subr.bf16.mxu1 %v4795_v31  ;;  %4941 = vpow2.f32 %v3663_v58  ;;  %4395 = vmatpush3.bf16.msra.mxu0 %v4798_v57  ;;  %v528_v14 = vadd.f32 1.0, %v4918_v21  ;;  %v1475_v51 = vrot.slane %v5466_v62, 2  ;;  %v1476_v5 = vrot.slane %v5472_v15, 2 }
  0x69   : > { %v1472_v33 = vsel %vm1429_vm2, %v1470_v11, %v1471_v16  ;;  %4943 = vpow2.f32 %v3664_v59  ;;  %4476 = vmatprep.subr.bf16.mxu0 %v5686_v42  ;;  %v1474_v0 = vsel %vm1429_vm2, %v1471_v16, %v1473_v20  ;;  %v1478_v46 = vrot.slane %v5475_v12, 2  ;;  %v5737_v12 = vld [vmem:[%s7054_s3 + $0xf8] sm:$0xff]  }
  0x6a   : > { %v4920_v61 = vpop.eup %4919  ;;  %v5722_v44 = vpack.c.bf16 %v1474_v0, %v1472_v33  ;;  %v5728_v28 = vpack.c.bf16 %v5472_v15, %v5448_v47  ;;  %4945 = vrcp.f32 %v528_v14  ;;  %v1480_v40 = vrot.slane %v5559_v25, 2 }
  0x6b   : > { %v4922_v49 = vpop.eup %4921  ;;  %v609_v13 = vmul.f32 %v4920_v61, %v5311_v41  ;;  %4345 = vmatpush3.bf16.msra.mxu1 %v4795_v31  ;;  %v1481_v62 = vrot.slane %v5573_v3, 2  ;;  %v1477_v15 = vsel %vm1429_vm2, %v1475_v51, %v1476_v5  ;;  %v1479_v47 = vsel %vm1429_vm2, %v1476_v5, %v1478_v46 }
  0x6c   : > { %v4924_v53 = vpop.eup %4923  ;;  %v610_v39 = vmul.f32 %v4922_v49, %v5317_v48  ;;  %4346 = vmatprep.subr.bf16.mxu1 %v4797_v56  ;;  %v1483_v41 = vrot.slane %v5576_v63, 2  ;;  %v5744_v34 = vpack.c.bf16 %v1479_v47, %v1477_v15  ;;  %v5750_v35 = vpack.c.bf16 %v5573_v3, %v5531_v9 }
  0x6d   : > { %v4926_v57 = vpop.eup %4925  ;;  %v5742_v45 = vrot.slane %v609_v13, 7  ;;  %v529_v25 = vadd.f32 1.0, %v4924_v53  ;;  %v1482_v48 = vsel %vm1429_vm2, %v1480_v40, %v1481_v62 }
  0x6e   : > { %v4928_v22 = vpop.eup %4927  ;;  %v682_v24 = vrot.slane %v610_v39, 7  ;;  %v1484_v31 = vsel %vm1429_vm2, %v1481_v62, %v1483_v41  ;;  %v623_v3 = vmul.f32 %v4926_v57, %v5323_v50  ;;  %v1485_v39 = vrot.slane %v5591_v52, 2 }
  0x6f   : > { %v4930_v32 = vpop.eup %4929  ;;  %v5754_v63 = vsel %vm666_vm0, 0.0, %v5742_v45  ;;  %v530_v60 = vadd.f32 1.0, %v4928_v22  ;;  %4947 = vrcp.f32 %v529_v25  ;;  %4347 = vmatpush3.bf16.msra.mxu1 %v4797_v56  ;;  %v5756_v58 = vpack.c.bf16 %v1484_v31, %v1482_v48  ;;  %v7123_v22 = vld [vmem:[#allocation21_spill] sm:$0xff] }
  0x70   : > { %v4932_v2 = vpop.eup %4931  ;;  %v5760_v10 = vsel %vm666_vm0, %v5742_v45, %v682_v24  ;;  %v5763_v26 = vsel %vm666_vm0, %v682_v24, 0.0  ;;  %v891_v9 = vrot.slane %v5754_v63, 1  ;;  %4428 = vmatprep.subr.bf16.mxu1 %v5737_v12  ;;  %v515_v20 = vadd.f32 1.0, %v4930_v32 }
  0x71   : > { %v4934_v59 = vpop.eup %4933  ;;  %v892_v11 = vrot.slane %v5760_v10, 1  ;;  %v894_v16 = vrot.slane %v5763_v26, 1  ;;  %4949 = vrcp.f32 %v530_v60  ;;  %v516_v56 = vadd.f32 1.0, %v4932_v2 }
  0x72   : > { %v4936_v21 = vpop.eup %4935  ;;  %v517_v33 = vadd.f32 1.0, %v4934_v59  ;;  %4951 = vrcp.f32 %v515_v20  ;;  %v702_v13 = vrot.slane %v623_v3, 7  ;;  %v1486_v41 = vrot.slane %v5587_v43, 2  ;;  %v7124_v3 = vld [vmem:[#allocation8_spill] sm:$0xff]  ;;  %v7125_v20 = vld [vmem:[#allocation9_spill] sm:$0xff] }
  0x73   : > { %v4938_v14 = vpop.eup %4937  ;;  %v893_v0 = vsel %vm865_vm1, %v891_v9, %v892_v11  ;;  %v895_v51 = vsel %vm865_vm1, %v892_v11, %v894_v16  ;;  %4953 = vrcp.f32 %v516_v56  ;;  %v518_v5 = vadd.f32 1.0, %v4936_v21 }
  0x74   : > { %v4940_v61 = vpop.eup %4939  ;;  %v5772_v50 = vpack.c.bf16 %v895_v51, %v893_v0  ;;  %v531_v46 = vadd.f32 1.0, %v4938_v14  ;;  %4955 = vrcp.f32 %v517_v33  ;;  %v1488_v57 = vrot.slane %v5594_v8, 2 }
  0x75   : > { %v4942_v49 = vpop.eup %4941  ;;  %v532_v40 = vadd.f32 1.0, %v4940_v61  ;;  %4957 = vrcp.f32 %v518_v5  ;;  %v5780_v48 = vsel %vm666_vm0, 0.0, %v702_v13  ;;  %v5784_v24 = vpack.c.bf16 %v5587_v43, %v7123_v22  ;;  %v7129_v22 = vld [vmem:[#allocation12_spill] sm:$0xff] }
  0x76   : > { %v4944_v62 = vpop.eup %4943  ;;  %4309 = vmatmul.mubr.bf16.gmra.mxu0 %v5772_v50  ;;  %v533_v53 = vadd.f32 1.0, %v4942_v49  ;;  %4959 = vrcp.f32 %v531_v46  ;;  %v1487_v52 = vsel %vm1429_vm2, %v1485_v39, %v1486_v41  ;;  %v1489_v31 = vsel %vm1429_vm2, %v1486_v41, %v1488_v57 }
  0x77   : > { %v534_v15 = vadd.f32 1.0, %v4944_v62  ;;  %v4946_v47 = vpop.eup %4945  ;;  %4961 = vrcp.f32 %v532_v40  ;;  %v5788_v60 = vpack.c.bf16 %v1489_v31, %v1487_v52  ;;  %v926_v8 = vrot.slane %v5780_v48, 1  ;;  %v7127_v40 = vld [vmem:[#allocation10_spill] sm:$0xff] }
  0x78   : > { %v624_v25 = vmul.f32 %v4946_v47, %v5330_v55  ;;  %4963 = vrcp.f32 %v533_v53 }
  0x79   : > { %4965 = vrcp.f32 %v534_v15 }
  0x7a   : > { %v703_v32 = vrot.slane %v624_v25, 7 }
  0x7c   : > { %v4948_v2 = vpop.eup %4947  ;;  %v5792_v55 = vsel %vm666_vm0, %v702_v13, %v703_v32  ;;  %v5795_v9 = vsel %vm666_vm0, %v703_v32, 0.0 }
  0x7d   : > { %v625_v43 = vmul.f32 %v4948_v2, %v7124_v3  ;;  %v927_v11 = vrot.slane %v5792_v55, 1  ;;  %v929_v16 = vrot.slane %v5795_v9, 1  ;;  %v5804_v33 = vpack.c.bf16 %v5792_v55, %v702_v13  ;;  %v7128_v13 = vld [vmem:[#allocation11_spill] sm:$0xff]  ;;  %v7130_v3 = vld [vmem:[#allocation13_spill] sm:$0xff] }
  0x7e   : > { %v4950_v59 = vpop.eup %4949 }
  0x7f   : > { %v626_v21 = vmul.f32 %v4950_v59, %v7125_v20  ;;  %v5801_v56 = vrot.slane %v625_v43, 7  ;;  %v4952_v14 = vpop.eup %4951  ;;  %v928_v0 = vsel %vm865_vm1, %v926_v8, %v927_v11  ;;  %v930_v51 = vsel %vm865_vm1, %v927_v11, %v929_v16  ;;  %v7131_v20 = vld [vmem:[#allocation14_spill] sm:$0xff] }
  0x80   : > { %v4954_v61 = vpop.eup %4953  ;;  %v5808_v5 = vpack.c.bf16 %v930_v51, %v928_v0  ;;  %v611_v62 = vmul.f32 %v4952_v14, %v7127_v40 }
  0x81   : > { %v706_v46 = vrot.slane %v626_v21, 7  ;;  %v5812_v49 = vsel %vm666_vm0, 0.0, %v5801_v56  ;;  %v4956_v53 = vpop.eup %4955  ;;  %v612_v15 = vmul.f32 %v4954_v61, %v7128_v13 }
  0x82   : > { %7126 = vst [vmem:[#allocation21_spill] sm:$0xff] %v5808_v5  ;;  %v931_v39 = vrot.slane %v5812_v49, 1  ;;  %v4958_v47 = vpop.eup %4957  ;;  %4324 = vmatprep.mubr.bf16.mxu1 %v5808_v5  ;;  %v5825_v25 = vrot.slane %v611_v62, 7  ;;  %v613_v52 = vmul.f32 %v4956_v53, %v7129_v22  ;;  %v7133_v22 = vld [vmem:[#allocation15_spill] sm:$0xff] }
  0x83   : > { %v5820_v41 = vsel %vm666_vm0, %v5801_v56, %v706_v46  ;;  %v5823_v57 = vsel %vm666_vm0, %v706_v46, 0.0  ;;  %v4960_v31 = vpop.eup %4959  ;;  %v685_v8 = vrot.slane %v612_v15, 7  ;;  %v614_v43 = vmul.f32 %v4958_v47, %v7130_v3 }
  0x84   : > { %v932_v32 = vrot.slane %v5820_v41, 1  ;;  %v934_v2 = vrot.slane %v5823_v57, 1  ;;  %v4962_v59 = vpop.eup %4961  ;;  %v5833_v11 = vsel %vm666_vm0, 0.0, %v5825_v25  ;;  %v5835_v16 = vrot.slane %v613_v52, 7 }
  0x85   : > { %v627_v21 = vmul.f32 %v4960_v31, %v7131_v20  ;;  %v4964_v14 = vpop.eup %4963  ;;  %v5842_v61 = vsel %vm666_vm0, %v5825_v25, %v685_v8  ;;  %v5845_v46 = vsel %vm666_vm0, %v685_v8, 0.0  ;;  %v896_v62 = vrot.slane %v5833_v11, 1 }
  0x86   : > { %v933_v0 = vsel %vm865_vm1, %v931_v39, %v932_v32  ;;  %v935_v51 = vsel %vm865_vm1, %v932_v32, %v934_v2  ;;  %v897_v53 = vrot.slane %v5842_v61, 1  ;;  %v899_v13 = vrot.slane %v5845_v46, 1  ;;  %v4966_v15 = vpop.eup %4965 }
  0x87   : > { %v5847_v40 = vpack.c.bf16 %v935_v51, %v933_v0  ;;  %v688_v47 = vrot.slane %v614_v43, 7  ;;  %v5854_v39 = vsel %vm666_vm0, 0.0, %v5835_v16  ;;  %v628_v52 = vmul.f32 %v4962_v59, %v7133_v22 }
  0x88   : > { %v708_v31 = vrot.slane %v627_v21, 7  ;;  %v898_v32 = vsel %vm865_vm1, %v896_v62, %v897_v53  ;;  %v900_v2 = vsel %vm865_vm1, %v897_v53, %v899_v13  ;;  %v901_v8 = vrot.slane %v5854_v39, 1 }
  0x89   : > { %7132 = vst [vmem:[#allocation8_spill] sm:$0xff] %v5847_v40  ;;  %4325 = vmatmul.mubr.bf16.gmra.mxu1 %v5847_v40  ;;  %v629_v3 = vmul.f32 %v4964_v14, %v5411_v36  ;;  %v5862_v20 = vpack.c.bf16 %v900_v2, %v898_v32  ;;  %v5866_v43 = vsel %vm666_vm0, %v5835_v16, %v688_v47  ;;  %v5869_v0 = vsel %vm666_vm0, %v688_v47, 0.0 }
  0x8a   : > { %v709_v59 = vrot.slane %v628_v52, 7  ;;  %v902_v21 = vrot.slane %v5866_v43, 1  ;;  %v904_v51 = vrot.slane %v5869_v0, 1  ;;  %v5874_v62 = vsel %vm666_vm0, 0.0, %v708_v31 }
  0x8b   : > { %v630_v53 = vmul.f32 %v4966_v15, %v5416_v37  ;;  %4312 = vmatprep.mubr.bf16.mxu0 %v5862_v20  ;;  %v936_v13 = vrot.slane %v5874_v62, 1  ;;  %v711_v47 = vrot.slane %v629_v3, 7 }
  0x8c   : > { %v5879_v36 = vsel %vm666_vm0, %v708_v31, %v709_v59  ;;  %v5882_v14 = vsel %vm666_vm0, %v709_v59, 0.0  ;;  %v903_v22 = vsel %vm865_vm1, %v901_v8, %v902_v21  ;;  %v905_v52 = vsel %vm865_vm1, %v902_v21, %v904_v51 }
  0x8d   : > { %v937_v32 = vrot.slane %v5879_v36, 1  ;;  %v939_v2 = vrot.slane %v5882_v14, 1  ;;  %v5889_v37 = vpack.c.bf16 %v905_v52, %v903_v22  ;;  %v712_v15 = vrot.slane %v630_v53, 7  ;;  %v7135_v22 = vld [vmem:[#allocation7_spill] sm:$0xff] }
  0x8e   : > { %v5892_v40 = vsel %vm666_vm0, 0.0, %v711_v47 }
  0x8f   : > { %v938_v59 = vsel %vm865_vm1, %v936_v13, %v937_v32  ;;  %v940_v5 = vsel %vm865_vm1, %v937_v32, %v939_v2  ;;  %v941_v3 = vrot.slane %v5892_v40, 1  ;;  %4313 = vmatmul.mubr.bf16.gmra.mxu0 %v5889_v37  ;;  %v5901_v21 = vsel %vm666_vm0, %v711_v47, %v712_v15  ;;  %v7136_v32 = vld [vmem:[#allocation5_spill] sm:$0xff] }
  0x90   : > { %v5898_v8 = vpack.c.bf16 %v940_v5, %v938_v59  ;;  %v5904_v51 = vsel %vm666_vm0, %v712_v15, 0.0  ;;  %v942_v53 = vrot.slane %v5901_v21, 1  ;;  %4396 = vmatprep.mubr.bf16.mxu0 %v7135_v22  ;;  %v5915_v2 = vpack.c.bf16 %v7136_v32, %v7136_v32  ;;  %v329_v22 = vld [vmem:[%s5171_s11 + $0xf0] sm:$0xff] }
  0x91   : > { %v944_v13 = vrot.slane %v5904_v51, 1  ;;  %v5937_v32 = vpack.c.bf16 %v5879_v36, %v708_v31  ;;  %v4804_v31 = vld [vmem:[%s7054_s3 + $0x128] sm:$0xff]  }
  0x92   : > { %7134 = vst [vmem:[#allocation9_spill] sm:$0xff] %v5898_v8  ;;  %4328 = vmatprep.mubr.bf16.mxu1 %v5898_v8  ;;  %v943_v5 = vsel %vm865_vm1, %v941_v3, %v942_v53  ;;  %7137 = vst [vmem:[#allocation10_spill] sm:$0xff] %v5915_v2  ;;  %v5926_v8 = vpack.c.bf16 %v5820_v41, %v5801_v56  ;;  %v330_v3 = vld [vmem:[%s5171_s11 + $0xf8] sm:$0xff]  ;;  %v5943_v56 = vpack.c.bf16 %v5901_v21, %v711_v47  ;;  %v4976_v47 = vld [vmem:[%s5177_s14] ss:$0 sm:$0xff]  ;;  %s4981_s11 = sshll.u32 %s5041_s18, 4  ;;  %s4982_s11 = int_to_ptr.vmem [resolvable:$false] %s4981_s11 }
  0x93   : > { %v945_v52 = vsel %vm865_vm1, %v942_v53, %v944_v13  ;;  %v4802_v53 = vld [vmem:[%s7054_s3 + $0x130] sm:$0xff]   ;;  %v1450_v13 = vrot.slane %v5628_v6, 2  ;;  %s4983_s26 = scalar_lea.vmem %s4982_s11, 8192 }
  0x94   : > { %v5917_v15 = vpack.c.bf16 %v945_v52, %v943_v5  ;;  %v1451_v5 = vrot.slane %v5624_v54, 2  ;;  %v1453_v52 = vrot.slane %v5631_v7, 2 }
  0x96   : > { %7138 = vst [vmem:[#allocation11_spill] sm:$0xff] %v5917_v15  ;;  %4329 = vmatmul.mubr.bf16.gmra.mxu1 %v5917_v15  ;;  %v4975_v15 = vld [vmem:[%s5163_s29] ss:$0 sm:$0xff]  ;;  %v1452_v54 = vsel %vm1429_vm2, %v1450_v13, %v1451_v5  ;;  %v1454_v7 = vsel %vm1429_vm2, %v1451_v5, %v1453_v52  ;;  %v1456_v13 = vrot.slane %v5760_v10, 2  ;;  %v1458_v5 = vrot.slane %v5763_v26, 2  ;;  %v7141_v52 = vld [vmem:[#allocation16_spill] sm:$0xff]  ;;  %s6806_s29 = scalar_lea.vmem %s7056_s5, %s4065_s20 }
  0x97   : > { %4348 = vmatprep.mubr.msk.bf16.mxu1 %vm5919_vm5, %v5915_v2  ;;  %v368_v30 = vmul.f32 %v4975_v15, %v329_v22  ;;  %4397 = vmatmul.mubr.bf16.vlgmr.msra.gmra.mxu0 %v5654_v27  ;;  %v369_v6 = vmul.f32 %v4975_v15, %v330_v3  ;;  %v4801_v22 = vld [vmem:[%s7054_s3 + $0xf0] sm:$0xff]   ;;  %v1455_v3 = vrot.slane %v5754_v63, 2  ;;  %v4803_v26 = vld [vmem:[%s7054_s3 + $0xe8] sm:$0xff]   ;;  %s6833_s20 = scalar_lea.vmem [#allocation2], %s3628_s17 }
  0x98   : > { %4477 = vmatpush3.bf16.msra.mxu0 %v5686_v42  ;;  %4400 = vmatprep.mubr.bf16.mxu0 %v5694_v29  ;;  %v5962_v42 = vpack.c.bf16 %v1454_v7, %v1452_v54  ;;  %v1461_v29 = vrot.slane %v5842_v61, 2  ;;  %s3532_s10 = sshll.u32 %s6833_s20, 4  ;;  %s7005_s10 = int_to_ptr.vmem [resolvable:$true] %s3532_s10 }
  0x99   : > { %4478 = vmatprep.subr.bf16.mxu0 %v4802_v53  ;;  %v5955_v2 = vadd.f32 %v4976_v47, %v368_v30  ;;  %v5960_v15 = vadd.f32 %v4976_v47, %v369_v6  ;;  %v1460_v30 = vrot.slane %v5833_v11, 2  ;;  %v1463_v6 = vrot.slane %v5845_v46, 2  ;;  %v4808_v47 = vld [vmem:[%s7054_s3 + $0x118] sm:$0xff]   ;;  %s4977_s16 = scalar_lea.vmem %s7005_s10, 4096  ;;  %p4984_p0 = scmp.lt.s32.totalorder %s7005_s10, %s4982_s11 }
  0x9a   : > { %v1457_v46 = vsel %vm1429_vm2, %v1455_v3, %v1456_v13  ;;  %v4805_v3 = vld [vmem:[%s7054_s3 + $0xe0] sm:$0xff]   ;;  %p4978_p11 = scmp.ne.s32.totalorder %s7005_s10, %s4977_s16  ;;  %p4985_p1 = scmp.lt.s32.totalorder %s4983_s26, %s4977_s16 }
  0x9b   : > { %v3665_v63 = vmul.f32 -1.442695, %v5955_v2  ;;  %v3666_v11 = vmul.f32 -1.442695, %v5960_v15  ;;  %v1462_v54 = vsel %vm1429_vm2, %v1460_v30, %v1461_v29  ;;  %v1464_v7 = vsel %vm1429_vm2, %v1461_v29, %v1463_v6 }
  0x9c   : > { %4479 = vmatpush3.bf16.msra.mxu0 %v4802_v53  ;;  %v4806_v53 = vld [vmem:[%s7054_s3 + $0x120] sm:$0xff]   ;;  %v1466_v29 = vrot.slane %v5866_v43, 2  ;;  %v6022_v6 = vpack.c.bf16 %v5760_v10, %v5742_v45  ;;  %p4979_p12 = pnand %p4978_p11, %p5117_p5  ;;  %p4986_p2 = por %p4985_p1, %p4984_p0 }
  0x9d   : > { %4480 = vmatprep.subr.bf16.mxu0 %v4804_v31  ;;  %4967 = vpow2.f32 %v3665_v63  ;;  %v6029_v63 = vpack.c.bf16 %v5842_v61, %v5825_v25  ;;  %v4814_v45 = vld [vmem:[%s7054_s3 + $0x100] sm:$0xff]   ;;  %v4811_v25 = vld [vmem:[%s7054_s3 + $0xc8] sm:$0xff]  }
  0x9e   : > { %4349 = vmatmul.mubr.msk.bf16.vlgmr.msra.gmra.mxu1 %vm5919_vm5, %v7141_v52  ;;  %4969 = vpow2.f32 %v3666_v11  ;;  %v4809_v11 = vld [vmem:[%s7054_s3 + $0xd0] sm:$0xff]   ;;  %p4980_p13 = pneg %p4979_p12 }
  0x9f   : > { %4429 = vmatpush3.bf16.msra.mxu1 %v5737_v12  ;;  %4352 = vmatprep.mubr.msk.bf16.mxu1 %vm5919_vm5, %v5670_v17  ;;  %v1459_v12 = vsel %vm1429_vm2, %v1456_v13, %v1458_v5  ;;  %v1465_v13 = vrot.slane %v5854_v39, 2  ;;  %v1468_v5 = vrot.slane %v5869_v0, 2  ;;  %v4807_v39 = vld [vmem:[%s7054_s3 + $0xd8] sm:$0xff]  }
  0xa0   : > { %4401 = vmatmul.mubr.bf16.gmra.mxu0 %v5700_v38  ;;  %4430 = vmatprep.subr.bf16.mxu1 %v4801_v22  ;;  %v5994_v38 = vpack.c.bf16 %v1459_v12, %v1457_v46  ;;  %v6052_v46 = vpack.c.bf16 %v5866_v43, %v5835_v16  ;;  %v6057_v12 = vld [vmem:[%s7054_s3 + $0x1b8] sm:$0xff]   ;;  %v1490_v16 = vrot.slane %v5780_v48, 2  ;;  %v1491_v43 = vrot.slane %v5792_v55, 2  ;;  %p4987_p3 = pnand %p4986_p2, %p4980_p13 }
  0xa1   : > { %4404 = vmatprep.mubr.bf16.mxu0 %v5962_v42  ;;  %4481 = vmatpush3.bf16.msra.mxu0 %v4804_v31  ;;  %v5999_v31 = vpack.c.bf16 %v1464_v7, %v1462_v54  ;;  %v1467_v0 = vsel %vm1429_vm2, %v1465_v13, %v1466_v29  ;;  %v1469_v30 = vsel %vm1429_vm2, %v1466_v29, %v1468_v5  ;;  %v4813_v7 = vld [vmem:[%s7054_s3 + $0xc0] sm:$0xff]   ;;  %v6076_v13 = vld [vmem:[%s7054_s3 + $0x178] sm:$0xff]   ;;  %v1495_v29 = vrot.slane %v5812_v49, 2 }
  0xa2   : > { %4482 = vmatprep.subr.bf16.mxu0 %v4806_v53  ;;  %v1492_v48 = vsel %vm1429_vm2, %v1490_v16, %v1491_v43  ;;  %v1496_v5 = vrot.slane %v5820_v41, 2 }
  0xa3   : > { %4431 = vmatpush3.bf16.msra.mxu1 %v4801_v22  ;;  %v4810_v22 = vld [vmem:[%s7054_s3 + $0x110] sm:$0xff]  }
  0xa4   : > { %4432 = vmatprep.subr.bf16.mxu1 %v4803_v26  ;;  %v1497_v49 = vsel %vm1429_vm2, %v1495_v29, %v1496_v5 }
  0xa5   : > { %4483 = vmatpush3.bf16.msra.mxu0 %v4806_v53  ;;  %v4812_v53 = vld [vmem:[%s7054_s3 + $0x108] sm:$0xff]  }
  0xa6   : > { %4353 = vmatmul.mubr.msk.bf16.gmra.mxu1 %vm5919_vm5, %v5691_v4  ;;  %4484 = vmatprep.subr.bf16.mxu0 %v4808_v47 }
  0xa7   : > { %4356 = vmatprep.mubr.msk.bf16.mxu1 %vm5919_vm5, %v5705_v18  ;;  %4433 = vmatpush3.bf16.msra.mxu1 %v4803_v26  ;;  %v6031_v26 = vpack.c.bf16 %v1469_v30, %v1467_v0  ;;  %v1501_v0 = vrot.slane %v5879_v36, 2  ;;  %v1503_v30 = vrot.slane %v5882_v14, 2 }
  0xa8   : > { %4405 = vmatmul.mubr.bf16.gmra.mxu0 %v5994_v38  ;;  %4434 = vmatprep.subr.bf16.mxu1 %v4805_v3 }
  0xa9   : > { %4408 = vmatprep.mubr.bf16.mxu0 %v5999_v31  ;;  %4485 = vmatpush3.bf16.msra.mxu0 %v4808_v47 }
  0xaa   : > { %4486 = vmatprep.subr.bf16.mxu0 %v4810_v22  ;;  %v4968_v10 = vpop.eup %4967 }
  0xab   : > { %4435 = vmatpush3.bf16.msra.mxu1 %v4805_v3  ;;  %v4970_v61 = vpop.eup %4969  ;;  %v535_v54 = vadd.f32 1.0, %v4968_v10  ;;  %v1493_v3 = vrot.slane %v5795_v9, 2  ;;  %v1506_v10 = vrot.slane %v5901_v21, 2 }
  0xac   : > { %4436 = vmatprep.subr.bf16.mxu1 %v4807_v39  ;;  %v536_v47 = vadd.f32 1.0, %v4970_v61 }
  0xad   : > { %4487 = vmatpush3.bf16.msra.mxu0 %v4810_v22  ;;  %4971 = vrcp.f32 %v535_v54  ;;  %v1494_v55 = vsel %vm1429_vm2, %v1491_v43, %v1493_v3  ;;  %v1498_v22 = vrot.slane %v5823_v57, 2  ;;  %v7142_v43 = vld [vmem:[#allocation17_spill] sm:$0xff] }
  0xae   : > { %4357 = vmatmul.mubr.msk.bf16.gmra.mxu1 %vm5919_vm5, %v6022_v6  ;;  %4488 = vmatprep.subr.bf16.mxu0 %v4812_v53  ;;  %4973 = vrcp.f32 %v536_v47  ;;  %v6082_v9 = vpack.c.bf16 %v1494_v55, %v1492_v48 }
  0xaf   : > { %4360 = vmatprep.mubr.msk.bf16.mxu1 %vm5919_vm5, %v6029_v63  ;;  %4437 = vmatpush3.bf16.msra.mxu1 %v4807_v39  ;;  %v1500_v39 = vrot.slane %v5874_v62, 2  ;;  %v1499_v41 = vsel %vm1429_vm2, %v1496_v5, %v1498_v22  ;;  %v1504_v62 = vsel %vm1429_vm2, %v1501_v0, %v1503_v30  ;;  %v7144_v30 = vld [vmem:[#allocation22_spill] sm:$0xff] }
  0xb0   : > { %4409 = vmatmul.mubr.bf16.gmra.mxu0 %v6031_v26  ;;  %4438 = vmatprep.subr.bf16.mxu1 %v4809_v11  ;;  %v6102_v36 = vpack.c.bf16 %v1499_v41, %v1497_v49  ;;  %v4820_v49 = vld [vmem:[%s7054_s3 + $0x1a8] sm:$0xff]   ;;  %v4817_v41 = vld [vmem:[%s7054_s3 + $0x170] sm:$0xff]  }
  0xb1   : > { %4412 = vmatprep.mubr.bf16.mxu0 %v5722_v44  ;;  %4489 = vmatpush3.bf16.msra.mxu0 %v4812_v53  ;;  %v1502_v57 = vsel %vm1429_vm2, %v1500_v39, %v1501_v0  ;;  %v4818_v39 = vld [vmem:[%s7054_s3 + $0x1b0] sm:$0xff]   ;;  %v7143_v0 = vld [vmem:[#allocation20_spill] sm:$0xff] }
  0xb2   : > { %4490 = vmatprep.subr.bf16.mxu0 %v4814_v45 }
  0xb3   : > { %4439 = vmatpush3.bf16.msra.mxu1 %v4809_v11  ;;  %v6104_v11 = vpack.c.bf16 %v1504_v62, %v1502_v57  ;;  %v4824_v57 = vld [vmem:[%s7054_s3 + $0x198] sm:$0xff]   ;;  %v4826_v62 = vld [vmem:[%s7054_s3 + $0x190] sm:$0xff]  }
  0xb4   : > { %4440 = vmatprep.subr.bf16.mxu1 %v4811_v25 }
  0xb5   : > { %4491 = vmatpush3.bf16.msra.mxu0 %v4814_v45  ;;  %v1505_v45 = vrot.slane %v5892_v40, 2 }
  0xb6   : > { %4361 = vmatmul.mubr.msk.bf16.gmra.mxu1 %vm5919_vm5, %v6052_v46  ;;  %4572 = vmatprep.subr.bf16.mxu0 %v6057_v12 }
  0xb7   : > { %4364 = vmatprep.mubr.msk.bf16.mxu1 %vm5919_vm5, %v5717_v19  ;;  %4441 = vmatpush3.bf16.msra.mxu1 %v4811_v25  ;;  %v1508_v25 = vrot.slane %v5904_v51, 2  ;;  %v1507_v40 = vsel %vm1429_vm2, %v1505_v45, %v1506_v10  ;;  %v4825_v45 = vld [vmem:[%s7054_s3 + $0x150] sm:$0xff]  }
  0xb8   : > { %4413 = vmatmul.mubr.bf16.gmra.mxu0 %v5744_v34  ;;  %4442 = vmatprep.subr.bf16.mxu1 %v4813_v7 }
  0xb9   : > { %4416 = vmatprep.mubr.bf16.mxu0 %v5756_v58  ;;  %v1509_v21 = vsel %vm1429_vm2, %v1506_v10, %v1508_v25  ;;  %v4830_v10 = vld [vmem:[%s7054_s3 + $0x180] sm:$0xff]   ;;  %v7145_v25 = vld [vmem:[#allocation18_spill] sm:$0xff] }
  0xba   : > { %v4972_v53 = vpop.eup %4971  ;;  %v6121_v51 = vpack.c.bf16 %v1509_v21, %v1507_v40  ;;  %v4832_v40 = vld [vmem:[%s7054_s3 + $0x238] sm:$0xff]   ;;  %v4829_v21 = vld [vmem:[%s7054_s3 + $0x140] sm:$0xff]  }
  0xbb   : > { %4443 = vmatpush3.bf16.msra.mxu1 %v4813_v7  ;;  %v4974_v14 = vpop.eup %4973  ;;  %v631_v61 = vmul.f32 %v4972_v53, %v5955_v2  ;;  %v4823_v53 = vld [vmem:[%s7054_s3 + $0x158] sm:$0xff]  }
  0xbc   : > { %4524 = vmatprep.subr.bf16.mxu1 %v6076_v13  ;;  %v632_v54 = vmul.f32 %v4974_v14, %v5960_v15  ;;  %v4828_v14 = vld [vmem:[%s7054_s3 + $0x188] sm:$0xff]  }
  0xbd   : > { %v6123_v7 = vrot.slane %v631_v61, 7  ;;  %v4827_v61 = vld [vmem:[%s7054_s3 + $0x148] sm:$0xff]  }
  0xbe   : > { %4365 = vmatmul.mubr.msk.bf16.gmra.mxu1 %vm5919_vm5, %v5728_v28  ;;  %v715_v47 = vrot.slane %v632_v54, 7  ;;  %v7146_v54 = vld [vmem:[#allocation19_spill] sm:$0xff] }
  0xbf   : > { %4368 = vmatprep.mubr.msk.bf16.mxu1 %vm5919_vm5, %v5750_v35  ;;  %v6138_v15 = vsel %vm666_vm0, 0.0, %v6123_v7 }
  0xc0   : > { %4417 = vmatmul.mubr.bf16.gmra.mxu0 %v5788_v60  ;;  %v6134_v2 = vsel %vm666_vm0, %v6123_v7, %v715_v47  ;;  %v6141_v16 = vsel %vm666_vm0, %v715_v47, 0.0  ;;  %v2343_v3 = vrot.slane %v6138_v15, 2  ;;  %v4831_v47 = vld [vmem:[%s7054_s3 + $0x1f8] sm:$0xff]  }
  0xc1   : > { %4420 = vmatprep.mubr.bf16.mxu0 %v6082_v9  ;;  %v2344_v48 = vrot.slane %v6134_v2, 2  ;;  %v2346_v55 = vrot.slane %v6141_v16, 2 }
  0xc3   : > { %v2345_v29 = vsel %vm1429_vm2, %v2343_v3, %v2344_v48  ;;  %v2347_v5 = vsel %vm1429_vm2, %v2344_v48, %v2346_v55  ;;  %v7148_v3 = vld [vmem:[#allocation21_spill] sm:$0xff]  ;;  %v7149_v48 = vld [vmem:[#allocation8_spill] sm:$0xff]  ;;  %v2077_v55 = vrot.slane %v6138_v15, 1 }
  0xc4   : > { %v6149_v22 = vpack.c.bf16 %v2347_v5, %v2345_v29  ;;  %v2078_v29 = vrot.slane %v6134_v2, 1  ;;  %v2080_v5 = vrot.slane %v6141_v16, 1  ;;  %v6276_v16 = vpack.c.bf16 %v6134_v2, %v6123_v7  ;;  %v4833_v7 = vld [vmem:[%s7054_s3 + $0x1f0] sm:$0xff]   ;;  %v7154_v2 = vld [vmem:[#allocation25_spill] sm:$0xff] }
  0xc6   : > { %4369 = vmatmul.mubr.msk.bf16.gmra.mxu1 %vm5919_vm5, %v5784_v24  ;;  %v2081_v15 = vsel %vm865_vm1, %v2078_v29, %v2080_v5 }
  0xc7   : > { %4372 = vmatprep.mubr.msk.bf16.mxu1 %vm5919_vm5, %v5804_v33 }
  0xc8   : > { %4421 = vmatmul.mubr.bf16.gmra.mxu0 %v6102_v36 }
  0xc9   : > { %4424 = vmatprep.mubr.bf16.mxu0 %v6104_v11 }
  0xce   : > { %4373 = vmatmul.mubr.msk.bf16.gmra.mxu1 %vm5919_vm5, %v5926_v8 }
  0xcf   : > { %4376 = vmatprep.mubr.msk.bf16.mxu1 %vm5919_vm5, %v5937_v32 }
  0xd0   : > { %4425 = vmatmul.mubr.bf16.gmra.mxu0 %v6121_v51 }
  0xd1   : > { %4492 = vmatprep.mubr.bf16.mxu0 %v7142_v43  ;;  %v7147_v43 = vld [vmem:[#allocation23_spill] sm:$0xff] }
  0xd6   : > { %4377 = vmatmul.mubr.msk.bf16.gmra.mxu1 %vm5919_vm5, %v5943_v56 }
  0xd7   : > { %4444 = vmatprep.mubr.msk.bf16.mxu1 %vm5919_vm5, %v7141_v52  ;;  %v4822_v52 = vld [vmem:[%s7054_s3 + $0x1a0] sm:$0xff]  }
  0xd8   : > { %4493 = vmatmul.mubr.bf16.vlgmr.msra.gmra.mxu0 %v7143_v0 }
  0xd9   : > { %4573 = vmatpush3.bf16.msra.mxu0 %v6057_v12  ;;  %4496 = vmatprep.mubr.bf16.mxu0 %v7144_v30  ;;  %v4819_v12 = vld [vmem:[%s7054_s3 + $0x168] sm:$0xff]  }
  0xda   : > { %4574 = vmatprep.subr.bf16.mxu0 %v4818_v39 }
  0xdd   : > { %4575 = vmatpush3.bf16.msra.mxu0 %v4818_v39  ;;  %v7150_v39 = vld [vmem:[#allocation9_spill] sm:$0xff] }
  0xde   : > { %4445 = vmatmul.mubr.msk.bf16.vlgmr.msra.gmra.mxu1 %vm5919_vm5, %v5670_v17  ;;  %4576 = vmatprep.subr.bf16.mxu0 %v4820_v49 }
  0xdf   : > { %4525 = vmatpush3.bf16.msra.mxu1 %v6076_v13  ;;  %4448 = vmatprep.mubr.msk.bf16.mxu1 %vm5919_vm5, %v5691_v4  ;;  %v4821_v13 = vld [vmem:[%s7054_s3 + $0x160] sm:$0xff]  }
  0xe0   : > { %4497 = vmatmul.mubr.bf16.gmra.mxu0 %v5656_v23  ;;  %4526 = vmatprep.subr.bf16.mxu1 %v4817_v41 }
  0xe1   : > { %4500 = vmatprep.mubr.bf16.mxu0 %v5772_v50  ;;  %4577 = vmatpush3.bf16.msra.mxu0 %v4820_v49  ;;  %v7151_v49 = vld [vmem:[#allocation11_spill] sm:$0xff] }
  0xe2   : > { %4578 = vmatprep.subr.bf16.mxu0 %v4822_v52 }
  0xe3   : > { %4527 = vmatpush3.bf16.msra.mxu1 %v4817_v41  ;;  %v2079_v41 = vsel %vm865_vm1, %v2077_v55, %v2078_v29 }
  0xe4   : > { %4528 = vmatprep.subr.bf16.mxu1 %v4819_v12 }
  0xe5   : > { %4579 = vmatpush3.bf16.msra.mxu0 %v4822_v52  ;;  %v6262_v52 = vpack.c.bf16 %v2081_v15, %v2079_v41 }
  0xe6   : > { %4449 = vmatmul.mubr.msk.bf16.gmra.mxu1 %vm5919_vm5, %v5705_v18  ;;  %4580 = vmatprep.subr.bf16.mxu0 %v4824_v57 }
  0xe7   : > { %4452 = vmatprep.mubr.msk.bf16.mxu1 %vm5919_vm5, %v6022_v6  ;;  %4529 = vmatpush3.bf16.msra.mxu1 %v4819_v12  ;;  %7152 = vst [vmem:[#allocation12_spill] sm:$0xff] %v6262_v52  ;;  %v4834_v12 = vld [vmem:[%s7054_s3 + $0x230] sm:$0xff]  }
  0xe8   : > { %4501 = vmatmul.mubr.bf16.gmra.mxu0 %v5862_v20  ;;  %4530 = vmatprep.subr.bf16.mxu1 %v4821_v13 }
  0xe9   : > { %4504 = vmatprep.mubr.bf16.mxu0 %v5889_v37  ;;  %4581 = vmatpush3.bf16.msra.mxu0 %v4824_v57 }
  0xea   : > { %4582 = vmatprep.subr.bf16.mxu0 %v4826_v62 }
  0xeb   : > { %4531 = vmatpush3.bf16.msra.mxu1 %v4821_v13  ;;  %v4840_v13 = vld [vmem:[%s7054_s3 + $0x218] sm:$0xff]  }
  0xec   : > { %4532 = vmatprep.subr.bf16.mxu1 %v4823_v53 }
  0xed   : > { %4583 = vmatpush3.bf16.msra.mxu0 %v4826_v62 }
  0xee   : > { %4453 = vmatmul.mubr.msk.bf16.gmra.mxu1 %vm5919_vm5, %v6029_v63  ;;  %4584 = vmatprep.subr.bf16.mxu0 %v4828_v14 }
  0xef   : > { %4456 = vmatprep.mubr.msk.bf16.mxu1 %vm5919_vm5, %v6052_v46  ;;  %4533 = vmatpush3.bf16.msra.mxu1 %v4823_v53  ;;  %v4839_v53 = vld [vmem:[%s7054_s3 + $0x1d8] sm:$0xff]  }
  0xf0   : > { %4505 = vmatmul.mubr.bf16.gmra.mxu0 %v7145_v25  ;;  %4534 = vmatprep.subr.bf16.mxu1 %v4825_v45 }
  0xf1   : > { %4508 = vmatprep.mubr.bf16.mxu0 %v7146_v54  ;;  %4585 = vmatpush3.bf16.msra.mxu0 %v4828_v14 }
  0xf2   : > { %4586 = vmatprep.subr.bf16.mxu0 %v4830_v10 }
  0xf3   : > { %4535 = vmatpush3.bf16.msra.mxu1 %v4825_v45 }
  0xf4   : > { %4536 = vmatprep.subr.bf16.mxu1 %v4827_v61 }
  0xf5   : > { %4587 = vmatpush3.bf16.msra.mxu0 %v4830_v10  ;;  %v4844_v10 = vld [vmem:[%s7054_s3 + $0x208] sm:$0xff]  }
  0xf6   : > { %4457 = vmatmul.mubr.msk.bf16.gmra.mxu1 %vm5919_vm5, %v5717_v19  ;;  %4668 = vmatprep.subr.bf16.mxu0 %v4832_v40 }
  0xf7   : > { %4460 = vmatprep.mubr.msk.bf16.mxu1 %vm5919_vm5, %v5728_v28  ;;  %4537 = vmatpush3.bf16.msra.mxu1 %v4827_v61  ;;  %v4841_v61 = vld [vmem:[%s7054_s3 + $0x1d0] sm:$0xff]  }
  0xf8   : > { %4509 = vmatmul.mubr.bf16.gmra.mxu0 %v5607_v1  ;;  %4538 = vmatprep.subr.bf16.mxu1 %v4829_v21 }
  0xf9   : > { %4512 = vmatprep.mubr.bf16.mxu0 %v7147_v43 }
  0xfb   : > { %4539 = vmatpush3.bf16.msra.mxu1 %v4829_v21 }
  0xfc   : > { %4620 = vmatprep.subr.bf16.mxu1 %v4831_v47 }
  0xfe   : > { %4461 = vmatmul.mubr.msk.bf16.gmra.mxu1 %vm5919_vm5, %v5750_v35 }
  0xff   : > { %4464 = vmatprep.mubr.msk.bf16.mxu1 %vm5919_vm5, %v5784_v24 }
 0x100   : > { %4513 = vmatmul.mubr.bf16.gmra.mxu0 %v7148_v3 }
 0x101   : > { %4516 = vmatprep.mubr.bf16.mxu0 %v7149_v48 }
 0x106   : > { %4465 = vmatmul.mubr.msk.bf16.gmra.mxu1 %vm5919_vm5, %v5804_v33 }
 0x107   : > { %4468 = vmatprep.mubr.msk.bf16.mxu1 %vm5919_vm5, %v5926_v8 }
 0x108   : > { %4517 = vmatmul.mubr.bf16.gmra.mxu0 %v7150_v39 }
 0x109   : > { %4520 = vmatprep.mubr.bf16.mxu0 %v7151_v49 }
 0x10b   : > { %v6308_v57 = vpop.f32.mrf.mxu0 }
 0x10d   : > { %v6319_v62 = vpop.f32.mrf.mxu0 }
 0x10e   : > { %4469 = vmatmul.mubr.msk.bf16.gmra.mxu1 %vm5919_vm5, %v5937_v32 }
 0x10f   : > { %4472 = vmatprep.mubr.msk.bf16.mxu1 %vm5919_vm5, %v5943_v56  ;;  %v6332_v14 = vpop.f32.mrf.mxu0 }
 0x110   : > { %4521 = vmatmul.mubr.bf16.gmra.mxu0 %v6262_v52 }
 0x111   : > { %4588 = vmatprep.mubr.msk.bf16.mxu0 %vm5919_vm5, %v5670_v17  ;;  %v4836_v17 = vld [vmem:[%s7054_s3 + $0x228] sm:$0xff]   ;;  %v6337_v45 = vpop.f32.mrf.mxu1 }
 0x116   : > { %4473 = vmatmul.mubr.msk.bf16.gmra.mxu1 %vm5919_vm5, %v6276_v16 }
 0x117   : > { %4540 = vmatprep.mubr.bf16.mxu1 %v5654_v27  ;;  %v7153_v27 = vld [vmem:[#allocation24_spill] sm:$0xff] }
 0x118   : > { %4589 = vmatmul.mubr.msk.bf16.vlgmr.msra.gmra.mxu0 %vm5919_vm5, %v5691_v4  ;;  %v4838_v4 = vld [vmem:[%s7054_s3 + $0x220] sm:$0xff]  }
 0x119   : > { %4669 = vmatpush3.bf16.msra.mxu0 %v4832_v40  ;;  %4592 = vmatprep.mubr.msk.bf16.mxu0 %vm5919_vm5, %v5705_v18  ;;  %v4835_v18 = vld [vmem:[%s7054_s3 + $0x1e8] sm:$0xff]   ;;  %v6347_v40 = vpop.f32.mrf.mxu1 }
 0x11a   : > { %4670 = vmatprep.subr.bf16.mxu0 %v4834_v12 }
 0x11b   : > { %v6365_v55 = vpop.f32.mrf.mxu1 }
 0x11d   : > { %4671 = vmatpush3.bf16.msra.mxu0 %v4834_v12  ;;  %v6372_v5 = vpop.f32.mrf.mxu1 }
 0x11e   : > { %4541 = vmatmul.mubr.bf16.vlgmr.msra.gmra.mxu1 %v7153_v27  ;;  %4672 = vmatprep.subr.bf16.mxu0 %v4836_v17 }
 0x11f   : > { %4621 = vmatpush3.bf16.msra.mxu1 %v4831_v47  ;;  %4544 = vmatprep.mubr.bf16.mxu1 %v7154_v2  ;;  %v4843_v47 = vld [vmem:[%s7054_s3 + $0x1c8] sm:$0xff]   ;;  %v6384_v41 = vpop.f32.mrf.mxu1 }
 0x120   : > { %4593 = vmatmul.mubr.msk.bf16.gmra.mxu0 %vm5919_vm5, %v6022_v6  ;;  %4622 = vmatprep.subr.bf16.mxu1 %v4833_v7  ;;  %v4837_v6 = vld [vmem:[%s7054_s3 + $0x1e0] sm:$0xff]  }
 0x121   : > { %4596 = vmatprep.mubr.msk.bf16.mxu0 %vm5919_vm5, %v6029_v63  ;;  %4673 = vmatpush3.bf16.msra.mxu0 %v4836_v17  ;;  %v4842_v63 = vld [vmem:[%s7054_s3 + $0x210] sm:$0xff]   ;;  %v6388_v12 = vpop.f32.mrf.mxu1 }
 0x122   : > { %4674 = vmatprep.subr.bf16.mxu0 %v4838_v4 }
 0x123   : > { %4623 = vmatpush3.bf16.msra.mxu1 %v4833_v7  ;;  %v6397_v17 = vpop.f32.mrf.mxu1 }
 0x124   : > { %4624 = vmatprep.subr.bf16.mxu1 %v4835_v18 }
 0x125   : > { %4675 = vmatpush3.bf16.msra.mxu0 %v4838_v4  ;;  %v6404_v7 = vpop.f32.mrf.mxu1 }
 0x126   : > { %4545 = vmatmul.mubr.bf16.gmra.mxu1 %v5962_v42  ;;  %4676 = vmatprep.subr.bf16.mxu0 %v4840_v13 }
 0x127   : > { %4548 = vmatprep.mubr.bf16.mxu1 %v5994_v38  ;;  %4625 = vmatpush3.bf16.msra.mxu1 %v4835_v18 }
 0x128   : > { %4597 = vmatmul.mubr.msk.bf16.gmra.mxu0 %vm5919_vm5, %v6052_v46  ;;  %4626 = vmatprep.subr.bf16.mxu1 %v4837_v6  ;;  %v6342_v46 = vpop.f32.mrf.mxu0 }
 0x129   : > { %4600 = vmatprep.mubr.msk.bf16.mxu0 %vm5919_vm5, %v5717_v19  ;;  %4677 = vmatpush3.bf16.msra.mxu0 %v4840_v13  ;;  %v4846_v19 = vld [vmem:[%s7054_s3 + $0x200] sm:$0xff]  }
 0x12a   : > { %4678 = vmatprep.subr.bf16.mxu0 %v4842_v63  ;;  %v6357_v21 = vpop.f32.mrf.mxu0 }
 0x12b   : > { %4627 = vmatpush3.bf16.msra.mxu1 %v4837_v6 }
 0x12c   : > { %4628 = vmatprep.subr.bf16.mxu1 %v4839_v53  ;;  %v6367_v29 = vpop.f32.mrf.mxu0 }
 0x12d   : > { %4679 = vmatpush3.bf16.msra.mxu0 %v4842_v63 }
 0x12e   : > { %4549 = vmatmul.mubr.bf16.gmra.mxu1 %v5999_v31  ;;  %4680 = vmatprep.subr.bf16.mxu0 %v4844_v10 }
 0x12f   : > { %4552 = vmatprep.mubr.bf16.mxu1 %v6031_v26  ;;  %4629 = vmatpush3.bf16.msra.mxu1 %v4839_v53 }
 0x130   : > { %4601 = vmatmul.mubr.msk.bf16.gmra.mxu0 %vm5919_vm5, %v5728_v28  ;;  %4630 = vmatprep.subr.bf16.mxu1 %v4841_v61  ;;  %v4845_v28 = vld [vmem:[%s7054_s3 + $0x1c0] sm:$0xff]  }
 0x131   : > { %4604 = vmatprep.mubr.msk.bf16.mxu0 %vm5919_vm5, %v5750_v35  ;;  %4681 = vmatpush3.bf16.msra.mxu0 %v4844_v10  ;;  %v6379_v35 = vpop.f32.mrf.mxu0 }
 0x132   : > { %4682 = vmatprep.subr.bf16.mxu0 %v4846_v19 }
 0x133   : > { %4631 = vmatpush3.bf16.msra.mxu1 %v4841_v61  ;;  %v6386_v15 = vpop.f32.mrf.mxu0 }
 0x134   : > { %4632 = vmatprep.subr.bf16.mxu1 %v4843_v47 }
 0x135   : > { %4683 = vmatpush3.bf16.msra.mxu0 %v4846_v19 }
 0x136   : > { %4553 = vmatmul.mubr.bf16.gmra.mxu1 %v5722_v44 }
 0x137   : > { %4556 = vmatprep.mubr.bf16.mxu1 %v5744_v34  ;;  %4633 = vmatpush3.bf16.msra.mxu1 %v4843_v47 }
 0x138   : > { %4605 = vmatmul.mubr.msk.bf16.gmra.mxu0 %vm5919_vm5, %v5784_v24  ;;  %4634 = vmatprep.subr.bf16.mxu1 %v4845_v28  ;;  %v6395_v24 = vpop.f32.mrf.mxu0 }
 0x139   : > { %4608 = vmatprep.mubr.msk.bf16.mxu0 %vm5919_vm5, %v5804_v33 }
 0x13a   : > { %v6402_v33 = vpop.f32.mrf.mxu0 }
 0x13b   : > { %4635 = vmatpush3.bf16.msra.mxu1 %v4845_v28 }
 0x13e   : > { %4557 = vmatmul.mubr.bf16.gmra.mxu1 %v5756_v58 }
 0x13f   : > { %4560 = vmatprep.mubr.bf16.mxu1 %v5788_v60 }
 0x140   : > { %4609 = vmatmul.mubr.msk.bf16.gmra.mxu0 %vm5919_vm5, %v5926_v8  ;;  %v6411_v8 = vpop.f32.mrf.mxu0 }
 0x141   : > { %4612 = vmatprep.mubr.msk.bf16.mxu0 %vm5919_vm5, %v5937_v32 }
 0x142   : > { %v6420_v18 = vpop.f32.mrf.mxu0 }
 0x146   : > { %4561 = vmatmul.mubr.bf16.gmra.mxu1 %v6082_v9 }
 0x147   : > { %4564 = vmatprep.mubr.bf16.mxu1 %v6102_v36 }
 0x148   : > { %4613 = vmatmul.mubr.msk.bf16.gmra.mxu0 %vm5919_vm5, %v5943_v56  ;;  %v7158_v56 = vld [vmem:[#allocation10_spill] sm:$0xff] }
 0x149   : > { %v6413_v4 = vpop.f32.mrf.mxu1  ;;  %4616 = vmatprep.mubr.msk.bf16.mxu0 %vm5919_vm5, %v6276_v16 }
 0x14a   : > { %7155 = vst [vmem:[#allocation13_spill] sm:$0xff] %v6413_v4 }
 0x14b   : > { %v6418_v32 = vpop.f32.mrf.mxu1 }
 0x14c   : > { %7156 = vst [vmem:[#allocation14_spill] sm:$0xff] %v6418_v32 }
 0x14d   : > { %v6423_v13 = vpop.f32.mrf.mxu1 }
 0x14e   : > { %4565 = vmatmul.mubr.bf16.gmra.mxu1 %v6104_v11  ;;  %7157 = vst [vmem:[#allocation15_spill] sm:$0xff] %v6423_v13 }
 0x14f   : > { %4568 = vmatprep.mubr.bf16.mxu1 %v6121_v51  ;;  %v6426_v6 = vpop.f32.mrf.mxu0  ;;  %v6432_v63 = vpop.f32.mrf.mxu1 }
 0x150   : > { %4617 = vmatmul.mubr.msk.bf16.gmra.mxu0 %vm5919_vm5, %v7158_v56  ;;  %7159 = vst [vmem:[#allocation5_spill] sm:$0xff] %v6432_v63 }
 0x151   : > { %4684 = vmatprep.mubr.bf16.mxu0 %v7153_v27  ;;  %v6434_v16 = vpop.f32.mrf.mxu0 }
 0x153   : > { %v6436_v53 = vpop.f32.mrf.mxu0 }
 0x155   : > { %v6441_v61 = vpop.f32.mrf.mxu0 }
 0x156   : > { %v6438_v10 = vpop.f32.mrf.mxu1  ;;  %4569 = vmatmul.mubr.bf16.gmra.mxu1 %v6149_v22 }
 0x157   : > { %7160 = vst [vmem:[#allocation16_spill] sm:$0xff] %v6438_v10  ;;  %4636 = vmatprep.mubr.bf16.mxu1 %v7143_v0  ;;  %v4398_v59 = vpop.f32.mrf.mxu0 }
 0x158   : > { %v6444_v19 = vpop.f32.mrf.mxu1  ;;  %4685 = vmatmul.mubr.bf16.vlgmr.msra.gmra.mxu0 %v7154_v2 }
 0x159   : > { %7161 = vst [vmem:[#allocation17_spill] sm:$0xff] %v6444_v19  ;;  %4688 = vmatprep.mubr.bf16.mxu0 %v5962_v42  ;;  %v1657_v47 = vpop.f32.mrf.mxu0 }
 0x15a   : > { %v6448_v27 = vpop.f32.mrf.mxu1 }
 0x15b   : > { %7162 = vst [vmem:[#allocation20_spill] sm:$0xff] %v6448_v27  ;;  %v4399_v56 = vpop.f32.mrf.mxu0 }
 0x15c   : > { %v6450_v28 = vpop.f32.mrf.mxu1 }
 0x15d   : > { %7163 = vst [vmem:[#allocation22_spill] sm:$0xff] %v6450_v28  ;;  %v1660_v63 = vpop.f32.mrf.mxu0 }
 0x15e   : > { %v4350_v10 = vpop.f32.mrf.mxu1  ;;  %4637 = vmatmul.mubr.bf16.vlgmr.msra.gmra.mxu1 %v7144_v30 }
 0x15f   : > { %v1311_v13 = vadd.f32 %v4350_v10, %v6308_v57  ;;  %4640 = vmatprep.mubr.bf16.mxu1 %v5656_v23 }
 0x160   : > { %v1302_v0 = vpop.f32.mrf.mxu1  ;;  %v4402_v19 = vpop.f32.mrf.mxu0  ;;  %4689 = vmatmul.mubr.bf16.gmra.mxu0 %v5994_v38 }
 0x161   : > { %v1303_v42 = vadd.f32 %v1302_v0, %v6319_v62  ;;  %4692 = vmatprep.mubr.bf16.mxu0 %v5999_v31  ;;  %v6458_v2 = vadd.f32 %v4398_v59, %v1311_v13 }
 0x162   : > { %v4351_v28 = vpop.f32.mrf.mxu1  ;;  %v1673_v27 = vpop.f32.mrf.mxu0 }
 0x163   : > { %v1314_v32 = vadd.f32 %v4351_v28, %v6332_v14  ;;  %v6461_v30 = vadd.f32 %v1657_v47, %v1303_v42 }
 0x164   : > { %v1305_v52 = vpop.f32.mrf.mxu1  ;;  %v4403_v57 = vpop.f32.mrf.mxu0 }
 0x165   : > { %v1306_v23 = vadd.f32 %v1305_v52, %v6342_v46  ;;  %v6464_v10 = vadd.f32 %v4399_v56, %v1314_v32 }
 0x166   : > { %v4354_v4 = vpop.f32.mrf.mxu1  ;;  %4641 = vmatmul.mubr.bf16.gmra.mxu1 %v5772_v50  ;;  %v1676_v38 = vpop.f32.mrf.mxu0 }
 0x167   : > { %v1327_v31 = vadd.f32 %v4354_v4, %v6357_v21  ;;  %4644 = vmatprep.mubr.bf16.mxu1 %v5862_v20  ;;  %v6469_v62 = vadd.f32 %v1660_v63, %v1306_v23 }
 0x168   : > { %v1318_v13 = vpop.f32.mrf.mxu1  ;;  %v4406_v14 = vpop.f32.mrf.mxu0  ;;  %4693 = vmatmul.mubr.bf16.gmra.mxu0 %v6031_v26 }
 0x169   : > { %v1319_v59 = vadd.f32 %v1318_v13, %v6367_v29  ;;  %4696 = vmatprep.mubr.bf16.mxu0 %v5722_v44  ;;  %v6474_v52 = vadd.f32 %v4402_v19, %v1327_v31 }
 0x16a   : > { %v4355_v46 = vpop.f32.mrf.mxu1  ;;  %v1689_v32 = vpop.f32.mrf.mxu0 }
 0x16b   : > { %v1330_v50 = vadd.f32 %v4355_v46, %v6379_v35  ;;  %v6477_v47 = vadd.f32 %v1673_v27, %v1319_v59 }
 0x16c   : > { %v1321_v21 = vpop.f32.mrf.mxu1  ;;  %v4407_v20 = vpop.f32.mrf.mxu0 }
 0x16d   : > { %v1322_v4 = vadd.f32 %v1321_v21, %v6386_v15  ;;  %v6480_v63 = vadd.f32 %v4403_v57, %v1330_v50 }
 0x16e   : > { %v4358_v28 = vpop.f32.mrf.mxu1  ;;  %4645 = vmatmul.mubr.bf16.gmra.mxu1 %v5889_v37  ;;  %v1692_v26 = vpop.f32.mrf.mxu0 }
 0x16f   : > { %v1343_v44 = vadd.f32 %v4358_v28, %v6395_v24  ;;  %4648 = vmatprep.mubr.bf16.mxu1 %v7145_v25  ;;  %v6485_v29 = vadd.f32 %v1676_v38, %v1322_v4 }
 0x170   : > { %v1334_v19 = vpop.f32.mrf.mxu1  ;;  %v4410_v35 = vpop.f32.mrf.mxu0  ;;  %4697 = vmatmul.mubr.bf16.gmra.mxu0 %v5744_v34 }
 0x171   : > { %v1335_v27 = vadd.f32 %v1334_v19, %v6402_v33  ;;  %4700 = vmatprep.mubr.bf16.mxu0 %v5756_v58  ;;  %v6490_v15 = vadd.f32 %v4406_v14, %v1343_v44 }
 0x172   : > { %v4359_v56 = vpop.f32.mrf.mxu1  ;;  %v1705_v0 = vpop.f32.mrf.mxu0 }
 0x173   : > { %v1346_v37 = vadd.f32 %v4359_v56, %v6411_v8  ;;  %v6493_v42 = vadd.f32 %v1689_v32, %v1335_v27 }
 0x174   : > { %v1337_v24 = vpop.f32.mrf.mxu1  ;;  %v4411_v25 = vpop.f32.mrf.mxu0 }
 0x175   : > { %v1338_v57 = vadd.f32 %v1337_v24, %v6420_v18  ;;  %v6496_v23 = vadd.f32 %v4407_v20, %v1346_v37 }
 0x176   : > { %v4362_v38 = vpop.f32.mrf.mxu1  ;;  %4649 = vmatmul.mubr.bf16.gmra.mxu1 %v7146_v54  ;;  %v1708_v34 = vpop.f32.mrf.mxu0 }
 0x177   : > { %v1359_v58 = vadd.f32 %v4362_v38, %v6426_v6  ;;  %4652 = vmatprep.mubr.bf16.mxu1 %v5607_v1  ;;  %v6501_v33 = vadd.f32 %v1692_v26, %v1338_v57 }
 0x178   : > { %v1350_v31 = vpop.f32.mrf.mxu1  ;;  %v4414_v8 = vpop.f32.mrf.mxu0  ;;  %4701 = vmatmul.mubr.bf16.gmra.mxu0 %v5788_v60 }
 0x179   : > { %v1351_v13 = vadd.f32 %v1350_v31, %v6434_v16  ;;  %4704 = vmatprep.mubr.bf16.mxu0 %v6082_v9  ;;  %v6506_v18 = vadd.f32 %v4410_v35, %v1359_v58  ;;  %v7165_v58 = vld [vmem:[#allocation12_spill] sm:$0xff] }
 0x17a   : > { %v4363_v14 = vpop.f32.mrf.mxu1  ;;  %v1721_v59 = vpop.f32.mrf.mxu0 }
 0x17b   : > { %v1362_v54 = vadd.f32 %v4363_v14, %v6436_v53  ;;  %v6509_v46 = vadd.f32 %v1705_v0, %v1351_v13  ;;  %v7166_v13 = vld [vmem:[#allocation7_spill] sm:$0xff]  ;;  %v7167_v14 = vld [vmem:[#allocation14_spill] sm:$0xff] }
 0x17c   : > { %v1353_v6 = vpop.f32.mrf.mxu1  ;;  %v4415_v1 = vpop.f32.mrf.mxu0 }
 0x17d   : > { %v1354_v32 = vadd.f32 %v1353_v6, %v6441_v61  ;;  %v6512_v50 = vadd.f32 %v4411_v25, %v1362_v54 }
 0x17e   : > { %v4366_v21 = vpop.f32.mrf.mxu1  ;;  %4653 = vmatmul.mubr.bf16.gmra.mxu1 %v7147_v43  ;;  %v1724_v60 = vpop.f32.mrf.mxu0 }
 0x17f   : > { %v1375_v9 = vadd.f32 %v4366_v21, %v6337_v45  ;;  %4656 = vmatprep.mubr.bf16.mxu1 %v7148_v3  ;;  %v6517_v16 = vadd.f32 %v1708_v34, %v1354_v32 }
 0x180   : > { %v1366_v20 = vpop.f32.mrf.mxu1  ;;  %v4418_v53 = vpop.f32.mrf.mxu0  ;;  %4705 = vmatmul.mubr.bf16.gmra.mxu0 %v6102_v36 }
 0x181   : > { %v1367_v4 = vadd.f32 %v1366_v20, %v6347_v40  ;;  %4708 = vmatprep.mubr.bf16.mxu0 %v6104_v11  ;;  %v6522_v61 = vadd.f32 %v4414_v8, %v1375_v9  ;;  %v7169_v9 = vld [vmem:[#allocation5_spill] sm:$0xff] }
 0x182   : > { %v4367_v28 = vpop.f32.mrf.mxu1  ;;  %v1737_v26 = vpop.f32.mrf.mxu0 }
 0x183   : > { %v1378_v43 = vadd.f32 %v4367_v28, %v6365_v55  ;;  %v6525_v44 = vadd.f32 %v1721_v59, %v1367_v4  ;;  %v7170_v28 = vld [vmem:[#allocation6_spill] sm:$0xff] }
 0x184   : > { %v1369_v45 = vpop.f32.mrf.mxu1  ;;  %v4419_v3 = vpop.f32.mrf.mxu0 }
 0x185   : > { %v1370_v19 = vadd.f32 %v1369_v45, %v6372_v5  ;;  %v6528_v35 = vadd.f32 %v4415_v1, %v1378_v43  ;;  %v7168_v1 = vld [vmem:[#allocation15_spill] sm:$0xff]  ;;  %v7171_v43 = vld [vmem:[#allocation16_spill] sm:$0xff] }
 0x186   : > { %v4370_v27 = vpop.f32.mrf.mxu1  ;;  %4657 = vmatmul.mubr.bf16.gmra.mxu1 %v7149_v48  ;;  %v1740_v36 = vpop.f32.mrf.mxu0 }
 0x187   : > { %v1391_v11 = vadd.f32 %v4370_v27, %v6384_v41  ;;  %4660 = vmatprep.mubr.bf16.mxu1 %v7150_v39  ;;  %v6533_v40 = vadd.f32 %v1724_v60, %v1370_v19 }
 0x188   : > { %v1382_v56 = vpop.f32.mrf.mxu1  ;;  %v4422_v55 = vpop.f32.mrf.mxu0  ;;  %4709 = vmatmul.mubr.bf16.gmra.mxu0 %v6121_v51 }
 0x189   : > { %v1383_v0 = vadd.f32 %v1382_v56, %v6388_v12  ;;  %4712 = vmatprep.mubr.bf16.mxu0 %v6149_v22  ;;  %v6538_v5 = vadd.f32 %v4418_v53, %v1391_v11  ;;  %v7164_v12 = vld [vmem:[#allocation13_spill] sm:$0xff] }
 0x18a   : > { %v4371_v37 = vpop.f32.mrf.mxu1  ;;  %v1753_v24 = vpop.f32.mrf.mxu0 }
 0x18b   : > { %v1394_v48 = vadd.f32 %v4371_v37, %v6397_v17  ;;  %v6541_v25 = vadd.f32 %v1737_v26, %v1383_v0  ;;  %v7173_v37 = vld [vmem:[#allocation20_spill] sm:$0xff] }
 0x18c   : > { %v1385_v41 = vpop.f32.mrf.mxu1  ;;  %v4423_v39 = vpop.f32.mrf.mxu0 }
 0x18d   : > { %v1386_v57 = vadd.f32 %v1385_v41, %v6404_v7  ;;  %v6544_v38 = vadd.f32 %v4419_v3, %v1394_v48 }
 0x18e   : > { %v4374_v34 = vpop.f32.mrf.mxu1  ;;  %4661 = vmatmul.mubr.bf16.gmra.mxu1 %v7151_v49  ;;  %v1756_v51 = vpop.f32.mrf.mxu0 }
 0x18f   : > { %v1407_v22 = vadd.f32 %v4374_v34, %v7164_v12  ;;  %4664 = vmatprep.mubr.bf16.mxu1 %v7165_v58  ;;  %v6549_v31 = vadd.f32 %v1740_v36, %v1386_v57  ;;  %v7172_v36 = vld [vmem:[#allocation17_spill] sm:$0xff]  ;;  %v7174_v57 = vld [vmem:[#allocation22_spill] sm:$0xff] }
 0x190   : > { %v1398_v8 = vpop.f32.mrf.mxu1  ;;  %v4426_v17 = vpop.f32.mrf.mxu0  ;;  %4713 = vmatmul.mubr.bf16.gmra.mxu0 %v7166_v13 }
 0x191   : > { %v1399_v59 = vadd.f32 %v1398_v8, %v7167_v14  ;;  %v6553_v54 = vadd.f32 %v4422_v55, %v1407_v22 }
 0x192   : > { %v4375_v7 = vpop.f32.mrf.mxu1  ;;  %v1769_v6 = vpop.f32.mrf.mxu0 }
 0x193   : > { %v1410_v32 = vadd.f32 %v4375_v7, %v7168_v1  ;;  %v6556_v49 = vadd.f32 %v1753_v24, %v1399_v59 }
 0x194   : > { %v1401_v21 = vpop.f32.mrf.mxu1  ;;  %v4427_v60 = vpop.f32.mrf.mxu0 }
 0x195   : > { %v1402_v20 = vadd.f32 %v1401_v21, %v7169_v9  ;;  %v6559_v53 = vadd.f32 %v4423_v39, %v1410_v32 }
 0x196   : > { %v4378_v4 = vpop.f32.mrf.mxu1  ;;  %4665 = vmatmul.mubr.bf16.gmra.mxu1 %v7170_v28  ;;  %v1772_v26 = vpop.f32.mrf.mxu0 }
 0x197   : > { %v1423_v45 = vadd.f32 %v4378_v4, %v7171_v43  ;;  %v6563_v3 = vadd.f32 %v1756_v51, %v1402_v20 }
 0x198   : > { %v1414_v19 = vpop.f32.mrf.mxu1  ;;  %v4494_v27 = vpop.f32.mrf.mxu0 }
 0x199   : > { %v1415_v11 = vadd.f32 %v1414_v19, %v7172_v36  ;;  %v6566_v56 = vadd.f32 %v4426_v17, %v1423_v45 }
 0x19a   : > { %v4379_v55 = vpop.f32.mrf.mxu1  ;;  %v2184_v0 = vpop.f32.mrf.mxu0 }
 0x19b   : > { %v1426_v24 = vadd.f32 %v4379_v55, %v7173_v37  ;;  %v6569_v48 = vadd.f32 %v1769_v6, %v1415_v11 }
 0x19c   : > { %v1417_v41 = vpop.f32.mrf.mxu1  ;;  %v4495_v39 = vpop.f32.mrf.mxu0 }
 0x19d   : > { %v1418_v34 = vadd.f32 %v1417_v41, %v7174_v57  ;;  %v6572_v12 = vadd.f32 %v4427_v60, %v1426_v24 }
 0x19e   : > { %v4446_v51 = vpop.f32.mrf.mxu1  ;;  %v2187_v22 = vpop.f32.mrf.mxu0 }
 0x19f   : > { %v2045_v58 = vadd.f32 %v4446_v51, %v6458_v2  ;;  %v6575_v8 = vadd.f32 %v1772_v26, %v1418_v34 }
 0x1a0   : > { %v1916_v17 = vpop.f32.mrf.mxu1  ;;  %v4498_v13 = vpop.f32.mrf.mxu0 }
 0x1a1   : > { %v2043_v14 = vadd.f32 %v1916_v17, %v6461_v30  ;;  %v6578_v59 = vadd.f32 %v4494_v27, %v2045_v58 }
 0x1a2   : > { %v4447_v7 = vpop.f32.mrf.mxu1  ;;  %v2200_v6 = vpop.f32.mrf.mxu0 }
 0x1a3   : > { %v2046_v1 = vadd.f32 %v4447_v7, %v6464_v10  ;;  %v6581_v32 = vadd.f32 %v2184_v0, %v2043_v14 }
 0x1a4   : > { %v1919_v21 = vpop.f32.mrf.mxu1  ;;  %v4499_v60 = vpop.f32.mrf.mxu0 }
 0x1a5   : > { %v2044_v9 = vadd.f32 %v1919_v21, %v6469_v62  ;;  %v6584_v20 = vadd.f32 %v4495_v39, %v2046_v1 }
 0x1a6   : > { %v4450_v2 = vpop.f32.mrf.mxu1  ;;  %v2203_v4 = vpop.f32.mrf.mxu0 }
 0x1a7   : > { %v2049_v28 = vadd.f32 %v4450_v2, %v6474_v52  ;;  %v6587_v26 = vadd.f32 %v2187_v22, %v2044_v9 }
 0x1a8   : > { %v1932_v30 = vpop.f32.mrf.mxu1  ;;  %v4502_v43 = vpop.f32.mrf.mxu0 }
 0x1a9   : > { %v2047_v45 = vadd.f32 %v1932_v30, %v6477_v47  ;;  %v6590_v19 = vadd.f32 %v4498_v13, %v2049_v28 }
 0x1aa   : > { %v4451_v10 = vpop.f32.mrf.mxu1  ;;  %v2216_v27 = vpop.f32.mrf.mxu0 }
 0x1ab   : > { %v2050_v36 = vadd.f32 %v4451_v10, %v6480_v63  ;;  %v6593_v11 = vadd.f32 %v2200_v6, %v2047_v45 }
 0x1ac   : > { %v1935_v62 = vpop.f32.mrf.mxu1  ;;  %v4503_v55 = vpop.f32.mrf.mxu0 }
 0x1ad   : > { %v2048_v0 = vadd.f32 %v1935_v62, %v6485_v29  ;;  %v6596_v37 = vadd.f32 %v4499_v60, %v2050_v36 }
 0x1ae   : > { %v4454_v52 = vpop.f32.mrf.mxu1  ;;  %v2219_v24 = vpop.f32.mrf.mxu0 }
 0x1af   : > { %v2053_v41 = vadd.f32 %v4454_v52, %v6490_v15  ;;  %v6599_v39 = vadd.f32 %v2203_v4, %v2048_v0 }
 0x1b0   : > { %v1948_v47 = vpop.f32.mrf.mxu1  ;;  %v4506_v57 = vpop.f32.mrf.mxu0 }
 0x1b1   : > { %v2051_v34 = vadd.f32 %v1948_v47, %v6493_v42  ;;  %v6602_v51 = vadd.f32 %v4502_v43, %v2053_v41 }
 0x1b2   : > { %v4455_v63 = vpop.f32.mrf.mxu1  ;;  %v2232_v22 = vpop.f32.mrf.mxu0 }
 0x1b3   : > { %v2054_v58 = vadd.f32 %v4455_v63, %v6496_v23  ;;  %v6605_v17 = vadd.f32 %v2216_v27, %v2051_v34 }
 0x1b4   : > { %v1951_v29 = vpop.f32.mrf.mxu1  ;;  %v4507_v13 = vpop.f32.mrf.mxu0 }
 0x1b5   : > { %v2052_v14 = vadd.f32 %v1951_v29, %v6501_v33  ;;  %v6608_v7 = vadd.f32 %v4503_v55, %v2054_v58 }
 0x1b6   : > { %v4458_v15 = vpop.f32.mrf.mxu1  ;;  %v2235_v6 = vpop.f32.mrf.mxu0 }
 0x1b7   : > { %v2057_v1 = vadd.f32 %v4458_v15, %v6506_v18  ;;  %v6611_v21 = vadd.f32 %v2219_v24, %v2052_v14 }
 0x1b8   : > { %v1964_v42 = vpop.f32.mrf.mxu1  ;;  %v4510_v60 = vpop.f32.mrf.mxu0 }
 0x1b9   : > { %v2055_v9 = vadd.f32 %v1964_v42, %v6509_v46  ;;  %v6614_v2 = vadd.f32 %v4506_v57, %v2057_v1 }
 0x1ba   : > { %v4459_v23 = vpop.f32.mrf.mxu1  ;;  %v2248_v4 = vpop.f32.mrf.mxu0 }
 0x1bb   : > { %v2058_v28 = vadd.f32 %v4459_v23, %v6512_v50  ;;  %v6617_v30 = vadd.f32 %v2232_v22, %v2055_v9 }
 0x1bc   : > { %v1967_v33 = vpop.f32.mrf.mxu1  ;;  %v4511_v43 = vpop.f32.mrf.mxu0 }
 0x1bd   : > { %v2056_v45 = vadd.f32 %v1967_v33, %v6517_v16  ;;  %v6620_v10 = vadd.f32 %v4507_v13, %v2058_v28 }
 0x1be   : > { %v4462_v18 = vpop.f32.mrf.mxu1  ;;  %v2251_v27 = vpop.f32.mrf.mxu0 }
 0x1bf   : > { %v2061_v36 = vadd.f32 %v4462_v18, %v6522_v61  ;;  %v6623_v62 = vadd.f32 %v2235_v6, %v2056_v45 }
 0x1c0   : > { %v1980_v46 = vpop.f32.mrf.mxu1  ;;  %v4514_v55 = vpop.f32.mrf.mxu0 }
 0x1c1   : > { %v2059_v0 = vadd.f32 %v1980_v46, %v6525_v44  ;;  %v6626_v52 = vadd.f32 %v4510_v60, %v2061_v36 }
 0x1c2   : > { %v4463_v50 = vpop.f32.mrf.mxu1  ;;  %v2264_v24 = vpop.f32.mrf.mxu0 }
 0x1c3   : > { %v2062_v41 = vadd.f32 %v4463_v50, %v6528_v35  ;;  %v6629_v47 = vadd.f32 %v2248_v4, %v2059_v0 }
 0x1c4   : > { %v1983_v16 = vpop.f32.mrf.mxu1  ;;  %v4515_v57 = vpop.f32.mrf.mxu0 }
 0x1c5   : > { %v2060_v34 = vadd.f32 %v1983_v16, %v6533_v40  ;;  %v6632_v63 = vadd.f32 %v4511_v43, %v2062_v41 }
 0x1c6   : > { %v4466_v61 = vpop.f32.mrf.mxu1  ;;  %v2267_v22 = vpop.f32.mrf.mxu0 }
 0x1c7   : > { %7175 = vst [vmem:[#allocation18_spill] sm:$0xff] %v6632_v63  ;;  %v2065_v58 = vadd.f32 %v4466_v61, %v6538_v5  ;;  %v6635_v29 = vadd.f32 %v2251_v27, %v2060_v34 }
 0x1c8   : > { %v1996_v44 = vpop.f32.mrf.mxu1  ;;  %v4518_v13 = vpop.f32.mrf.mxu0 }
 0x1c9   : > { %7176 = vst [vmem:[#allocation19_spill] sm:$0xff] %v6635_v29  ;;  %v2063_v14 = vadd.f32 %v1996_v44, %v6541_v25  ;;  %v6638_v15 = vadd.f32 %v4514_v55, %v2065_v58 }
 0x1ca   : > { %v4467_v35 = vpop.f32.mrf.mxu1  ;;  %v2280_v6 = vpop.f32.mrf.mxu0 }
 0x1cb   : > { %7177 = vst [vmem:[#allocation23_spill] sm:$0xff] %v6638_v15  ;;  %v2066_v1 = vadd.f32 %v4467_v35, %v6544_v38  ;;  %v6641_v42 = vadd.f32 %v2264_v24, %v2063_v14 }
 0x1cc   : > { %v1999_v40 = vpop.f32.mrf.mxu1  ;;  %v4519_v60 = vpop.f32.mrf.mxu0 }
 0x1cd   : > { %7178 = vst [vmem:[#allocation21_spill] sm:$0xff] %v6641_v42  ;;  %v2064_v9 = vadd.f32 %v1999_v40, %v6549_v31  ;;  %v6644_v23 = vadd.f32 %v4515_v57, %v2066_v1 }
 0x1ce   : > { %v4470_v5 = vpop.f32.mrf.mxu1  ;;  %v2283_v4 = vpop.f32.mrf.mxu0 }
 0x1cf   : > { %7179 = vst [vmem:[#allocation8_spill] sm:$0xff] %v6644_v23  ;;  %v2069_v28 = vadd.f32 %v4470_v5, %v6553_v54  ;;  %v6647_v33 = vadd.f32 %v2267_v22, %v2064_v9 }
 0x1d0   : > { %v2012_v25 = vpop.f32.mrf.mxu1  ;;  %v4522_v43 = vpop.f32.mrf.mxu0 }
 0x1d1   : > { %7180 = vst [vmem:[#allocation9_spill] sm:$0xff] %v6647_v33  ;;  %v2067_v45 = vadd.f32 %v2012_v25, %v6556_v49  ;;  %v6650_v18 = vadd.f32 %v4518_v13, %v2069_v28 }
 0x1d2   : > { %v4471_v38 = vpop.f32.mrf.mxu1  ;;  %v2296_v27 = vpop.f32.mrf.mxu0 }
 0x1d3   : > { %7181 = vst [vmem:[#allocation11_spill] sm:$0xff] %v6650_v18  ;;  %v2070_v36 = vadd.f32 %v4471_v38, %v6559_v53  ;;  %v6653_v46 = vadd.f32 %v2280_v6, %v2067_v45 }
 0x1d4   : > { %v2015_v31 = vpop.f32.mrf.mxu1  ;;  %v4523_v55 = vpop.f32.mrf.mxu0 }
 0x1d5   : > { %7182 = vst [vmem:[#allocation24_spill] sm:$0xff] %v6653_v46  ;;  %v2068_v0 = vadd.f32 %v2015_v31, %v6563_v3  ;;  %v6656_v50 = vadd.f32 %v4519_v60, %v2070_v36 }
 0x1d6   : > { %v4474_v54 = vpop.f32.mrf.mxu1  ;;  %v2299_v24 = vpop.f32.mrf.mxu0 }
 0x1d7   : > { %7183 = vst [vmem:[#allocation25_spill] sm:$0xff] %v6656_v50  ;;  %v2073_v41 = vadd.f32 %v4474_v54, %v6566_v56  ;;  %v6659_v16 = vadd.f32 %v2283_v4, %v2068_v0 }
 0x1d8   : > { %v2028_v49 = vpop.f32.mrf.mxu1  ;;  %v6661_v57 = vpop.f32.mrf.mxu0 }
 0x1d9   : > { %7184 = vst [vmem:[#allocation10_spill] sm:$0xff] %v6659_v16  ;;  %v2071_v34 = vadd.f32 %v2028_v49, %v6569_v48  ;;  %v6664_v53 = vadd.f32 %v4522_v43, %v2073_v41 }
 0x1da   : > { %v4475_v61 = vpop.f32.mrf.mxu1  ;;  %v6666_v22 = vpop.f32.mrf.mxu0 }
 0x1db   : > { %7185 = vst [vmem:[#allocation13_spill] sm:$0xff] %v6664_v53  ;;  %v2074_v3 = vadd.f32 %v4475_v61, %v6572_v12  ;;  %v6669_v58 = vadd.f32 %v2296_v27, %v2071_v34 }
 0x1dc   : > { %v2031_v44 = vpop.f32.mrf.mxu1  ;;  %v6671_v13 = vpop.f32.mrf.mxu0 }
 0x1dd   : > { %7186 = vst [vmem:[#allocation12_spill] sm:$0xff] %v6669_v58  ;;  %v2072_v56 = vadd.f32 %v2031_v44, %v6575_v8  ;;  %v6674_v14 = vadd.f32 %v4523_v55, %v2074_v3 }
 0x1de   : > { %v4542_v35 = vpop.f32.mrf.mxu1  ;;  %v6676_v6 = vpop.f32.mrf.mxu0 }
 0x1df   : > { %7187 = vst [vmem:[#allocation7_spill] sm:$0xff] %v6674_v14  ;;  %v6678_v48 = vadd.f32 %v2299_v24, %v2072_v56 }
 0x1e0   : > { %v2450_v1 = vpop.f32.mrf.mxu1  ;;  %v6680_v40 = vpop.f32.mrf.mxu0 }
 0x1e1   : > { %7188 = vst [vmem:[#allocation14_spill] sm:$0xff] %v6678_v48 }
 0x1e2   : > { %v4543_v60 = vpop.f32.mrf.mxu1  ;;  %v6682_v9 = vpop.f32.mrf.mxu0 }
 0x1e4   : > { %v6684_v12 = vpop.f32.mrf.mxu1  ;;  %v6686_v5 = vpop.f32.mrf.mxu0 }
 0x1e6   : > { %v6688_v4 = vpop.f32.mrf.mxu1  ;;  %v6690_v8 = vpop.f32.mrf.mxu0 }
 0x1e8   : > { %v6692_v28 = vpop.f32.mrf.mxu1  ;;  %v6694_v25 = vpop.f32.mrf.mxu0 }
 0x1ea   : > { %v6696_v43 = vpop.f32.mrf.mxu1  ;;  %v6698_v45 = vpop.f32.mrf.mxu0 }
 0x1ec   : > { %v6700_v38 = vpop.f32.mrf.mxu1  ;;  %v6702_v27 = vpop.f32.mrf.mxu0 }
 0x1ee   : > { %v6704_v36 = vpop.f32.mrf.mxu1  ;;  %v6706_v31 = vpop.f32.mrf.mxu0 }
 0x1f0   : > { %v6708_v55 = vpop.f32.mrf.mxu1  ;;  %v6710_v0 = vpop.f32.mrf.mxu0 }
 0x1f2   : > { %v6712_v54 = vpop.f32.mrf.mxu1  ;;  %v6714_v24 = vpop.f32.mrf.mxu0 }
 0x1f4   : > { %v6716_v41 = vpop.f32.mrf.mxu1  ;;  %v6718_v49 = vpop.f32.mrf.mxu0 }
 0x1f6   : > { %v6720_v34 = vpop.f32.mrf.mxu1  ;;  %v6722_v61 = vpop.f32.mrf.mxu0 }
 0x1f8   : > { %v6724_v3 = vpop.f32.mrf.mxu1  ;;  %v6726_v44 = vpop.f32.mrf.mxu0 }
 0x1f9   : > { %7189 = vst [vmem:[#allocation15_spill] sm:$0xff] %v6726_v44 }
 0x1fa   : > { %v6728_v56 = vpop.f32.mrf.mxu1  ;;  %v6730_v48 = vpop.f32.mrf.mxu0 }
 0x1fb   : > { %7190 = vst [vmem:[#allocation5_spill] sm:$0xff] %v6730_v48 }
 0x1fc   : > { %v6732_v14 = vpop.f32.mrf.mxu1  ;;  %v6734_v58 = vpop.f32.mrf.mxu0 }
 0x1fd   : > { %7191 = vst [vmem:[#allocation6_spill] sm:$0xff] %v6734_v58 }
 0x1fe   : > { %v6736_v53 = vpop.f32.mrf.mxu1  ;;  %v6738_v16 = vpop.f32.mrf.mxu0 }
 0x1ff   : > { %7192 = vst [vmem:[#allocation16_spill] sm:$0xff] %v6738_v16 }
 0x200   : > { %v6740_v50 = vpop.f32.mrf.mxu1  ;;  %v6742_v46 = vpop.f32.mrf.mxu0 }
 0x201   : > { %7193 = vst [vmem:[#allocation17_spill] sm:$0xff] %v6742_v46 }
 0x202   : > { %v6744_v18 = vpop.f32.mrf.mxu1  ;;  %v6746_v33 = vpop.f32.mrf.mxu0 }
 0x203   : > { %7194 = vst [vmem:[#allocation20_spill] sm:$0xff] %v6744_v18  ;;  %7195 = vst [vmem:[#allocation22_spill] sm:$0xff] %v6746_v33 }
 0x204   : > { %v6748_v23 = vpop.f32.mrf.mxu1  ;;  %v6750_v42 = vpop.f32.mrf.mxu0 }
 0x205   : > { %7196 = vst [vmem:[#allocation26_spill] sm:$0xff] %v6748_v23  ;;  %7197 = vst [vmem:[#allocation27_spill] sm:$0xff] %v6750_v42 }
 0x206   : > { %v6752_v15 = vpop.f32.mrf.mxu1  ;;  %v6754_v48 = vpop.f32.mrf.mxu0 }
 0x207   : > { %7198 = vst [vmem:[#allocation28_spill] sm:$0xff] %v6752_v15  ;;  %7199 = vst [vmem:[#allocation29_spill] sm:$0xff] %v6754_v48 }
 0x208   : > { %v6756_v58 = vpop.f32.mrf.mxu1  ;;  %v6758_v29 = vpop.f32.mrf.mxu0 }
 0x209   : > { %7200 = vst [vmem:[#allocation30_spill] sm:$0xff] %v6756_v58  ;;  %7201 = vst [vmem:[#allocation31_spill] sm:$0xff] %v6758_v29  ;;  %v2577_v58 = vadd.f32 %v2450_v1, %v6581_v32 }
 0x20a   : > { %v6760_v16 = vpop.f32.mrf.mxu1  ;;  %v6762_v44 = vpop.f32.mrf.mxu0 }
 0x20b   : > { %7202 = vst [vmem:[#allocation32_spill] sm:$0xff] %v6760_v16  ;;  %7203 = vst [vmem:[#allocation33_spill] sm:$0xff] %v6762_v44  ;;  %v2835_v32 = vadd.f32 %v6666_v22, %v2577_v58 }
 0x20c   : > { %v6764_v46 = vpop.f32.mrf.mxu1  ;;  %v6766_v18 = vpop.f32.mrf.mxu0 }
 0x20d   : > { %7204 = vst [vmem:[#allocation34_spill] sm:$0xff] %v6764_v46  ;;  %7205 = vst [vmem:[#allocation35_spill] sm:$0xff] %v6766_v18 }
 0x20e   : > { %v6768_v33 = vpop.f32.mrf.mxu1  ;;  %v6770_v23 = vpop.f32.mrf.mxu0 }
 0x20f   : > { %7206 = vst [vmem:[#allocation36_spill] sm:$0xff] %v6768_v33  ;;  %7207 = vst [vmem:[#allocation37_spill] sm:$0xff] %v6770_v23 }
 0x210   : > { %v6772_v42 = vpop.f32.mrf.mxu1  ;;  %v6774_v15 = vpop.f32.mrf.mxu0 }
 0x211   : > { %7208 = vst [vmem:[#allocation38_spill] sm:$0xff] %v6772_v42  ;;  %7209 = vst [vmem:[#allocation39_spill] sm:$0xff] %v6774_v15  ;;  %v2579_v42 = vadd.f32 %v4542_v35, %v6578_v59 }
 0x212   : > { %v6776_v48 = vpop.f32.mrf.mxu1  ;;  %v6778_v29 = vpop.f32.mrf.mxu0 }
 0x213   : > { %7210 = vst [vmem:[#allocation40_spill] sm:$0xff] %v6776_v48  ;;  %7211 = vst [vmem:[#allocation41_spill] sm:$0xff] %v6778_v29 }
 0x214   : > { %v6780_v16 = vpop.f32.mrf.mxu1  ;;  %v6782_v44 = vpop.f32.mrf.mxu0 }
 0x215   : > { %7212 = vst [vmem:[#allocation42_spill] sm:$0xff] %v6780_v16  ;;  %7213 = vst [vmem:[#allocation43_spill] sm:$0xff] %v6782_v44  ;;  %v2580_v44 = vadd.f32 %v4543_v60, %v6584_v20  ;;  %v2583_v20 = vadd.f32 %v6688_v4, %v6590_v19 }
 0x216   : > { %v6784_v46 = vpop.f32.mrf.mxu1  ;;  %v6786_v18 = vpop.f32.mrf.mxu0 }
 0x217   : > { %7214 = vst [vmem:[#allocation44_spill] sm:$0xff] %v6784_v46  ;;  %7215 = vst [vmem:[#allocation45_spill] sm:$0xff] %v6786_v18  ;;  %v2837_v46 = vadd.f32 %v6661_v57, %v2579_v42  ;;  %v6814_v42 = vld [vmem:[%s7055_s4] ss:$0 sm:$0xff]  ;;  %v2838_v60 = vadd.f32 %v6671_v13, %v2580_v44  ;;  %v2841_v13 = vadd.f32 %v6680_v40, %v2583_v20 }
 0x218   : > { %v6788_v33 = vpop.f32.mrf.mxu1  ;;  %v4686_v23 = vpop.f32.mrf.mxu0 }
 0x219   : > { %7216 = vst [vmem:[#allocation46_spill] sm:$0xff] %v6788_v33  ;;  %v2578_v33 = vadd.f32 %v6684_v12, %v6587_v26 }
 0x21a   : > { %v6791_v15 = vpop.f32.mrf.mxu1  ;;  %v3224_v48 = vpop.f32.mrf.mxu0 }
 0x21b   : > { %7217 = vst [vmem:[#allocation47_spill] sm:$0xff] %v6791_v15  ;;  %v2584_v15 = vadd.f32 %v6696_v43, %v6596_v37 }
 0x21c   : > { %v6794_v29 = vpop.f32.mrf.mxu1  ;;  %v4687_v16 = vpop.f32.mrf.mxu0 }
 0x21d   : > { %7218 = vst [vmem:[#allocation48_spill] sm:$0xff] %v6794_v29  ;;  %v2836_v29 = vadd.f32 %v6676_v6, %v2578_v33 }
 0x21e   : > { %v4638_v18 = vpop.f32.mrf.mxu1  ;;  %v3227_v63 = vpop.f32.mrf.mxu0 }
 0x21f   : > { %v3095_v59 = vadd.f32 %v4638_v18, %v2837_v46  ;;  %v2581_v18 = vadd.f32 %v6692_v28, %v6593_v11  ;;  %v3424_v46 = vld [vmem:[%s6806_s29 + $0x10] sm:$0xff] }
 0x220   : > { %v2966_v26 = vpop.f32.mrf.mxu1  ;;  %v4690_v57 = vpop.f32.mrf.mxu0 }
 0x221   : > { %v3353_v35 = vadd.f32 %v4686_v23, %v3095_v59  ;;  %v3093_v1 = vadd.f32 %v2966_v26, %v2835_v32  ;;  %v3422_v23 = vld [vmem:[%s6806_s29] sm:$0xff]  ;;  %v2839_v33 = vadd.f32 %v6682_v9, %v2581_v18  ;;  %v2842_v9 = vadd.f32 %v6686_v5, %v2584_v15 }
 0x222   : > { %v4639_v22 = vpop.f32.mrf.mxu1  ;;  %v3240_v19 = vpop.f32.mrf.mxu0 }
 0x223   : > { %v3392_v58 = vadd.f32 %v6814_v42, %v3353_v35  ;;  %v3351_v12 = vadd.f32 %v3224_v48, %v3093_v1  ;;  %v3096_v4 = vadd.f32 %v4639_v22, %v2838_v60  ;;  %v2582_v48 = vadd.f32 %v6700_v38, %v6599_v39  ;;  %v3425_v35 = vld [vmem:[%s6806_s29 + $0x18] sm:$0xff] }
 0x224   : > { %v2969_v59 = vpop.f32.mrf.mxu1  ;;  %v4691_v44 = vpop.f32.mrf.mxu0  ;;  %v2587_v39 = vadd.f32 %v6704_v36, %v6602_v51 }
 0x225   : > { %v3456_v32 = vadd.f32 %v3424_v46, %v3392_v58  ;;  %v3390_v11 = vadd.f32 %v6814_v42, %v3351_v12  ;;  %v3354_v28 = vadd.f32 %v4687_v16, %v3096_v4  ;;  %v3094_v26 = vadd.f32 %v2969_v59, %v2836_v29  ;;  %v3423_v29 = vld [vmem:[%s6806_s29 + $0x8] sm:$0xff]  ;;  %v3428_v58 = vld [vmem:[%s6806_s29 + $0x30] sm:$0xff]  ;;  %v3426_v59 = vld [vmem:[%s6806_s29 + $0x20] sm:$0xff] }
 0x226   : > { %v4642_v1 = vpop.f32.mrf.mxu1  ;;  %v3243_v6 = vpop.f32.mrf.mxu0  ;;  %v2840_v51 = vadd.f32 %v6690_v8, %v2582_v48 }
 0x227   : > { %3488 = vst [vmem:[%s6833_s20 + $0x10] sm:$0xff] %v3456_v32  ;;  %v3454_v37 = vadd.f32 %v3422_v23, %v3390_v11  ;;  %v3393_v40 = vadd.f32 %v6814_v42, %v3354_v28  ;;  %v3352_v43 = vadd.f32 %v3227_v63, %v3094_v26  ;;  %v3099_v16 = vadd.f32 %v4642_v1, %v2841_v13  ;;  %v3429_v26 = vld [vmem:[%s6806_s29 + $0x38] sm:$0xff] }
 0x228   : > { %v2982_v38 = vpop.f32.mrf.mxu1  ;;  %v4694_v20 = vpop.f32.mrf.mxu0  ;;  %v2585_v63 = vadd.f32 %v6708_v55, %v6605_v17  ;;  %v2845_v17 = vadd.f32 %v6694_v25, %v2587_v39 }
 0x229   : > { %3486 = vst [vmem:[%s6833_s20] sm:$0xff] %v3454_v37  ;;  %v3457_v60 = vadd.f32 %v3425_v35, %v3393_v40  ;;  %v3391_v18 = vadd.f32 %v6814_v42, %v3352_v43  ;;  %v3357_v46 = vadd.f32 %v4690_v57, %v3099_v16  ;;  %v3097_v22 = vadd.f32 %v2982_v38, %v2839_v33  ;;  %v3427_v37 = vld [vmem:[%s6806_s29 + $0x28] sm:$0xff] }
 0x22a   : > { %v4643_v12 = vpop.f32.mrf.mxu1  ;;  %v3256_v36 = vpop.f32.mrf.mxu0  ;;  %v2588_v57 = vadd.f32 %v6712_v54, %v6608_v7  ;;  %v2843_v7 = vadd.f32 %v6698_v45, %v2585_v63 }
 0x22b   : > { %3489 = vst [vmem:[%s6833_s20 + $0x18] sm:$0xff] %v3457_v60  ;;  %v3455_v15 = vadd.f32 %v3423_v29, %v3391_v18  ;;  %v3396_v5 = vadd.f32 %v6814_v42, %v3357_v46  ;;  %v3355_v4 = vadd.f32 %v3240_v19, %v3097_v22  ;;  %v3100_v23 = vadd.f32 %v4643_v12, %v2842_v9  ;;  %v3432_v29 = vld [vmem:[%s6806_s29 + $0x50] sm:$0xff]  ;;  %v3430_v46 = vld [vmem:[%s6806_s29 + $0x40] sm:$0xff] }
 0x22c   : > { %v2985_v13 = vpop.f32.mrf.mxu1  ;;  %v4695_v55 = vpop.f32.mrf.mxu0  ;;  %v2586_v19 = vadd.f32 %v6716_v41, %v6611_v21  ;;  %v2846_v21 = vadd.f32 %v6702_v27, %v2588_v57  ;;  %v2595_v57 = vadd.f32 %v6736_v53, %v6626_v52 }
 0x22d   : > { %3487 = vst [vmem:[%s6833_s20 + $0x8] sm:$0xff] %v3455_v15  ;;  %v3460_v8 = vadd.f32 %v3428_v58, %v3396_v5  ;;  %v3394_v32 = vadd.f32 %v6814_v42, %v3355_v4  ;;  %v3358_v11 = vadd.f32 %v4691_v44, %v3100_v23  ;;  %v3098_v28 = vadd.f32 %v2985_v13, %v2840_v51 }
 0x22e   : > { %v4646_v48 = vpop.f32.mrf.mxu1  ;;  %v3259_v54 = vpop.f32.mrf.mxu0  ;;  %v2591_v44 = vadd.f32 %v6720_v34, %v6614_v2  ;;  %v2844_v2 = vadd.f32 %v6706_v31, %v2586_v19  ;;  %v2590_v51 = vadd.f32 %v6732_v14, %v6623_v62 }
 0x22f   : > { %3492 = vst [vmem:[%s6833_s20 + $0x30] sm:$0xff] %v3460_v8  ;;  %v3458_v25 = vadd.f32 %v3426_v59, %v3394_v32  ;;  %v3397_v35 = vadd.f32 %v6814_v42, %v3358_v11  ;;  %v3356_v1 = vadd.f32 %v3243_v6, %v3098_v28  ;;  %v3103_v33 = vadd.f32 %v4646_v48, %v2845_v17  ;;  %v3431_v59 = vld [vmem:[%s6806_s29 + $0x48] sm:$0xff]  ;;  %v3436_v11 = vld [vmem:[%s6806_s29 + $0x70] sm:$0xff] }
 0x230   : > { %v2998_v40 = vpop.f32.mrf.mxu1  ;;  %v4698_v41 = vpop.f32.mrf.mxu0  ;;  %v2589_v6 = vadd.f32 %v6724_v3, %v6617_v30  ;;  %v2849_v30 = vadd.f32 %v6710_v0, %v2591_v44  ;;  %v2593_v32 = vadd.f32 %v6740_v50, %v6629_v47  ;;  %v2848_v52 = vadd.f32 %v6722_v61, %v2590_v51  ;;  %v7228_v51 = vld [vmem:[#allocation21_spill] sm:$0xff] }
 0x231   : > { %3490 = vst [vmem:[%s6833_s20 + $0x20] sm:$0xff] %v3458_v25  ;;  %v3461_v45 = vadd.f32 %v3429_v26, %v3397_v35  ;;  %v3395_v43 = vadd.f32 %v6814_v42, %v3356_v1  ;;  %v3361_v16 = vadd.f32 %v4694_v20, %v3103_v33  ;;  %v3101_v39 = vadd.f32 %v2998_v40, %v2843_v7  ;;  %v7219_v7 = vld [vmem:[#allocation18_spill] sm:$0xff]  ;;  %v3434_v35 = vld [vmem:[%s6806_s29 + $0x60] sm:$0xff]  ;;  %v7221_v33 = vld [vmem:[#allocation15_spill] sm:$0xff] }
 0x232   : > { %v4647_v38 = vpop.f32.mrf.mxu1  ;;  %v3272_v34 = vpop.f32.mrf.mxu0  ;;  %v2592_v20 = vadd.f32 %v6728_v56, %v6620_v10  ;;  %v2847_v10 = vadd.f32 %v6714_v24, %v2589_v6  ;;  %v2853_v47 = vadd.f32 %v7221_v33, %v2595_v57 }
 0x233   : > { %3493 = vst [vmem:[%s6833_s20 + $0x38] sm:$0xff] %v3461_v45  ;;  %v3459_v27 = vadd.f32 %v3427_v37, %v3395_v43  ;;  %v3400_v9 = vadd.f32 %v6814_v42, %v3361_v16  ;;  %v3359_v60 = vadd.f32 %v3256_v36, %v3101_v39  ;;  %v3104_v18 = vadd.f32 %v4647_v38, %v2846_v21  ;;  %v3433_v36 = vld [vmem:[%s6806_s29 + $0x58] sm:$0xff]  ;;  %v7222_v21 = vld [vmem:[#allocation19_spill] sm:$0xff]  ;;  %v7224_v39 = vld [vmem:[#allocation5_spill] sm:$0xff] }
 0x234   : > { %v3001_v22 = vpop.f32.mrf.mxu1  ;;  %v4699_v3 = vpop.f32.mrf.mxu0  ;;  %v2850_v62 = vadd.f32 %v6718_v49, %v2592_v20  ;;  %v3437_v43 = vld [vmem:[%s6806_s29 + $0x78] sm:$0xff]  ;;  %v2851_v6 = vadd.f32 %v7224_v39, %v2593_v32  ;;  %v3435_v20 = vld [vmem:[%s6806_s29 + $0x68] sm:$0xff] }
 0x235   : > { %3491 = vst [vmem:[%s6833_s20 + $0x28] sm:$0xff] %v3459_v27  ;;  %v3464_v31 = vadd.f32 %v3432_v29, %v3400_v9  ;;  %v3398_v63 = vadd.f32 %v6814_v42, %v3359_v60  ;;  %v3362_v58 = vadd.f32 %v4695_v55, %v3104_v18  ;;  %v3102_v12 = vadd.f32 %v3001_v22, %v2844_v2  ;;  %v7225_v9 = vld [vmem:[#allocation23_spill] sm:$0xff]  ;;  %v7226_v60 = vld [vmem:[#allocation28_spill] sm:$0xff]  ;;  %v7227_v22 = vld [vmem:[#allocation6_spill] sm:$0xff] }
 0x236   : > { %v4650_v15 = vpop.f32.mrf.mxu1  ;;  %v3275_v56 = vpop.f32.mrf.mxu0  ;;  %v2599_v18 = vadd.f32 %v7226_v60, %v7225_v9  ;;  %v3444_v9 = vld [vmem:[%s6806_s29 + $0xb0] sm:$0xff] }
 0x237   : > { %3496 = vst [vmem:[%s6833_s20 + $0x50] sm:$0xff] %v3464_v31  ;;  %v3462_v0 = vadd.f32 %v3430_v46, %v3398_v63  ;;  %v3401_v5 = vadd.f32 %v6814_v42, %v3362_v58  ;;  %v3360_v4 = vadd.f32 %v3259_v54, %v3102_v12  ;;  %v3107_v23 = vadd.f32 %v4650_v15, %v2849_v30  ;;  %v7220_v54 = vld [vmem:[#allocation20_spill] sm:$0xff] }
 0x238   : > { %v3014_v13 = vpop.f32.mrf.mxu1  ;;  %v4702_v14 = vpop.f32.mrf.mxu0  ;;  %v2596_v25 = vadd.f32 %v7220_v54, %v7219_v7  ;;  %v3441_v7 = vld [vmem:[%s6806_s29 + $0x98] sm:$0xff] }
 0x239   : > { %3494 = vst [vmem:[%s6833_s20 + $0x40] sm:$0xff] %v3462_v0  ;;  %v3465_v24 = vadd.f32 %v3433_v36, %v3401_v5  ;;  %v3399_v17 = vadd.f32 %v6814_v42, %v3360_v4  ;;  %v3365_v55 = vadd.f32 %v4698_v41, %v3107_v23  ;;  %v3105_v8 = vadd.f32 %v3014_v13, %v2847_v10  ;;  %v7223_v41 = vld [vmem:[#allocation26_spill] sm:$0xff]  ;;  %v3440_v10 = vld [vmem:[%s6806_s29 + $0x90] sm:$0xff]  ;;  %v7230_v0 = vld [vmem:[#allocation16_spill] sm:$0xff] }
 0x23a   : > { %v4651_v28 = vpop.f32.mrf.mxu1  ;;  %v3288_v53 = vpop.f32.mrf.mxu0  ;;  %v2594_v45 = vadd.f32 %v7223_v41, %v7222_v21  ;;  %v2854_v30 = vadd.f32 %v7227_v22, %v2596_v25  ;;  %v7229_v36 = vld [vmem:[#allocation30_spill] sm:$0xff] }
 0x23b   : > { %3497 = vst [vmem:[%s6833_s20 + $0x58] sm:$0xff] %v3465_v24  ;;  %v3463_v49 = vadd.f32 %v3431_v59, %v3399_v17  ;;  %v3404_v19 = vadd.f32 %v6814_v42, %v3365_v55  ;;  %v3363_v26 = vadd.f32 %v3272_v34, %v3105_v8  ;;  %v3108_v48 = vadd.f32 %v4651_v28, %v2850_v62  ;;  %v7231_v62 = vld [vmem:[#allocation8_spill] sm:$0xff]  ;;  %v3438_v17 = vld [vmem:[%s6806_s29 + $0x80] sm:$0xff]  ;;  %v7236_v25 = vld [vmem:[#allocation22_spill] sm:$0xff] }
 0x23c   : > { %v3017_v1 = vpop.f32.mrf.mxu1  ;;  %v4703_v50 = vpop.f32.mrf.mxu0  ;;  %v2597_v15 = vadd.f32 %v7229_v36, %v7228_v51  ;;  %v2852_v5 = vadd.f32 %v7230_v0, %v2594_v45  ;;  %v7232_v24 = vld [vmem:[#allocation32_spill] sm:$0xff]  ;;  %v7233_v8 = vld [vmem:[#allocation17_spill] sm:$0xff]  ;;  %v3439_v21 = vld [vmem:[%s6806_s29 + $0x88] sm:$0xff] }
 0x23d   : > { %3495 = vst [vmem:[%s6833_s20 + $0x48] sm:$0xff] %v3463_v49  ;;  %v3468_v61 = vadd.f32 %v3436_v11, %v3404_v19  ;;  %v3402_v44 = vadd.f32 %v6814_v42, %v3363_v26  ;;  %v3366_v37 = vadd.f32 %v4699_v3, %v3108_v48  ;;  %v3106_v40 = vadd.f32 %v3017_v1, %v2848_v52  ;;  %v7234_v26 = vld [vmem:[#allocation9_spill] sm:$0xff]  ;;  %v7235_v48 = vld [vmem:[#allocation34_spill] sm:$0xff]  ;;  %v7239_v45 = vld [vmem:[#allocation27_spill] sm:$0xff] }
 0x23e   : > { %v4654_v16 = vpop.f32.mrf.mxu1  ;;  %v3291_v29 = vpop.f32.mrf.mxu0  ;;  %v2857_v32 = vadd.f32 %v7233_v8, %v2599_v18  ;;  %v7242_v18 = vld [vmem:[#allocation29_spill] sm:$0xff] }
 0x23f   : > { %3500 = vst [vmem:[%s6833_s20 + $0x70] sm:$0xff] %v3468_v61  ;;  %v3466_v38 = vadd.f32 %v3434_v35, %v3402_v44  ;;  %v3405_v2 = vadd.f32 %v6814_v42, %v3366_v37  ;;  %v3364_v34 = vadd.f32 %v3275_v56, %v3106_v40  ;;  %v3111_v27 = vadd.f32 %v4654_v16, %v2853_v47  ;;  %v7237_v37 = vld [vmem:[#allocation11_spill] sm:$0xff]  ;;  %v7238_v40 = vld [vmem:[#allocation36_spill] sm:$0xff]  ;;  %v3442_v51 = vld [vmem:[%s6806_s29 + $0xa0] sm:$0xff] }
 0x240   : > { %v3030_v46 = vpop.f32.mrf.mxu1  ;;  %v4706_v3 = vpop.f32.mrf.mxu0  ;;  %v2855_v35 = vadd.f32 %v7236_v25, %v2597_v15  ;;  %v7245_v15 = vld [vmem:[#allocation31_spill] sm:$0xff] }
 0x241   : > { %3498 = vst [vmem:[%s6833_s20 + $0x60] sm:$0xff] %v3466_v38  ;;  %v3469_v31 = vadd.f32 %v3437_v43, %v3405_v2  ;;  %v3403_v63 = vadd.f32 %v6814_v42, %v3364_v34  ;;  %v3369_v58 = vadd.f32 %v4702_v14, %v3111_v27  ;;  %v3109_v12 = vadd.f32 %v3030_v46, %v2851_v6  ;;  %v7240_v34 = vld [vmem:[#allocation24_spill] sm:$0xff]  ;;  %v7241_v27 = vld [vmem:[#allocation38_spill] sm:$0xff] }
 0x242   : > { %v4655_v56 = vpop.f32.mrf.mxu1  ;;  %v3304_v4 = vpop.f32.mrf.mxu0  ;;  %v2600_v14 = vadd.f32 %v7232_v24, %v7231_v62  ;;  %v3445_v62 = vld [vmem:[%s6806_s29 + $0xb8] sm:$0xff] }
 0x243   : > { %3501 = vst [vmem:[%s6833_s20 + $0x78] sm:$0xff] %v3469_v31  ;;  %v3467_v23 = vadd.f32 %v3435_v20, %v3403_v63  ;;  %v3408_v57 = vadd.f32 %v6814_v42, %v3369_v58  ;;  %v3367_v59 = vadd.f32 %v3288_v53, %v3109_v12  ;;  %v3112_v13 = vadd.f32 %v4655_v56, %v2854_v30  ;;  %v7243_v58 = vld [vmem:[#allocation25_spill] sm:$0xff]  ;;  %v7244_v12 = vld [vmem:[#allocation40_spill] sm:$0xff] }
 0x244   : > { %v3033_v55 = vpop.f32.mrf.mxu1  ;;  %v4707_v11 = vpop.f32.mrf.mxu0  ;;  %v2598_v53 = vadd.f32 %v7235_v48, %v7234_v26  ;;  %v2858_v43 = vadd.f32 %v7239_v45, %v2600_v14  ;;  %v7248_v14 = vld [vmem:[#allocation33_spill] sm:$0xff]  ;;  %v3443_v26 = vld [vmem:[%s6806_s29 + $0xa8] sm:$0xff] }
 0x245   : > { %3499 = vst [vmem:[%s6833_s20 + $0x68] sm:$0xff] %v3467_v23  ;;  %v3472_v28 = vadd.f32 %v3440_v10, %v3408_v57  ;;  %v3406_v52 = vadd.f32 %v6814_v42, %v3367_v59  ;;  %v3370_v49 = vadd.f32 %v4703_v50, %v3112_v13  ;;  %v3110_v19 = vadd.f32 %v3033_v55, %v2852_v5  ;;  %v7246_v59 = vld [vmem:[#allocation10_spill] sm:$0xff] }
 0x246   : > { %v4658_v54 = vpop.f32.mrf.mxu1  ;;  %v3307_v1 = vpop.f32.mrf.mxu0  ;;  %v2603_v50 = vadd.f32 %v7238_v40, %v7237_v37  ;;  %v2856_v20 = vadd.f32 %v7242_v18, %v2598_v53  ;;  %v7251_v53 = vld [vmem:[#allocation35_spill] sm:$0xff]  ;;  %v7254_v40 = vld [vmem:[#allocation37_spill] sm:$0xff] }
 0x247   : > { %3504 = vst [vmem:[%s6833_s20 + $0x90] sm:$0xff] %v3472_v28  ;;  %v3470_v33 = vadd.f32 %v3438_v17, %v3406_v52  ;;  %v3409_v47 = vadd.f32 %v6814_v42, %v3370_v49  ;;  %v3368_v61 = vadd.f32 %v3291_v29, %v3110_v19  ;;  %v3115_v44 = vadd.f32 %v4658_v54, %v2857_v32  ;;  %v7249_v49 = vld [vmem:[#allocation13_spill] sm:$0xff] }
 0x248   : > { %v3046_v41 = vpop.f32.mrf.mxu1  ;;  %v4710_v16 = vpop.f32.mrf.mxu0  ;;  %v2601_v29 = vadd.f32 %v7241_v27, %v7240_v34  ;;  %v2861_v10 = vadd.f32 %v7245_v15, %v2603_v50  ;;  %v7257_v27 = vld [vmem:[#allocation39_spill] sm:$0xff] }
 0x249   : > { %3502 = vst [vmem:[%s6833_s20 + $0x80] sm:$0xff] %v3470_v33  ;;  %v3473_v39 = vadd.f32 %v3441_v7, %v3409_v47  ;;  %v3407_v6 = vadd.f32 %v6814_v42, %v3368_v61  ;;  %v3373_v38 = vadd.f32 %v4706_v3, %v3115_v44  ;;  %v3113_v2 = vadd.f32 %v3046_v41, %v2855_v35  ;;  %v7252_v47 = vld [vmem:[#allocation12_spill] sm:$0xff]  ;;  %v7253_v61 = vld [vmem:[#allocation46_spill] sm:$0xff]  ;;  %v3448_v44 = vld [vmem:[%s6806_s29 + $0xd0] sm:$0xff] }
 0x24a   : > { %v4659_v60 = vpop.f32.mrf.mxu1  ;;  %v3320_v46 = vpop.f32.mrf.mxu0  ;;  %v2604_v3 = vadd.f32 %v7244_v12, %v7243_v58  ;;  %v2859_v17 = vadd.f32 %v7248_v14, %v2601_v29  ;;  %v7260_v12 = vld [vmem:[#allocation41_spill] sm:$0xff] }
 0x24b   : > { %3505 = vst [vmem:[%s6833_s20 + $0x98] sm:$0xff] %v3473_v39  ;;  %v3471_v22 = vadd.f32 %v3439_v21, %v3407_v6  ;;  %v3412_v30 = vadd.f32 %v6814_v42, %v3373_v38  ;;  %v3371_v31 = vadd.f32 %v3304_v4, %v3113_v2  ;;  %v3116_v63 = vadd.f32 %v4659_v60, %v2858_v43  ;;  %v7247_v4 = vld [vmem:[#allocation42_spill] sm:$0xff]  ;;  %v7255_v6 = vld [vmem:[#allocation7_spill] sm:$0xff]  ;;  %v3446_v2 = vld [vmem:[%s6806_s29 + $0xc0] sm:$0xff] }
 0x24c   : > { %v3049_v36 = vpop.f32.mrf.mxu1  ;;  %v4711_v56 = vpop.f32.mrf.mxu0  ;;  %v2602_v13 = vadd.f32 %v7247_v4, %v7246_v59  ;;  %v2862_v7 = vadd.f32 %v7251_v53, %v2604_v3 }
 0x24d   : > { %3503 = vst [vmem:[%s6833_s20 + $0x88] sm:$0xff] %v3471_v22  ;;  %v3476_v0 = vadd.f32 %v3444_v9, %v3412_v30  ;;  %v3410_v5 = vadd.f32 %v6814_v42, %v3371_v31  ;;  %v3374_v23 = vadd.f32 %v4707_v11, %v3116_v63  ;;  %v3114_v57 = vadd.f32 %v3049_v36, %v2856_v20  ;;  %v7250_v11 = vld [vmem:[#allocation44_spill] sm:$0xff]  ;;  %v7258_v22 = vld [vmem:[#allocation14_spill] sm:$0xff] }
 0x24e   : > { %v4662_v24 = vpop.f32.mrf.mxu1  ;;  %v3323_v55 = vpop.f32.mrf.mxu0  ;;  %v2607_v19 = vadd.f32 %v7250_v11, %v7249_v49  ;;  %v2860_v50 = vadd.f32 %v7254_v40, %v2602_v13  ;;  %v7259_v30 = vld [vmem:[#allocation48_spill] sm:$0xff]  ;;  %v3450_v49 = vld [vmem:[%s6806_s29 + $0xe0] sm:$0xff] }
 0x24f   : > { %3508 = vst [vmem:[%s6833_s20 + $0xb0] sm:$0xff] %v3476_v0  ;;  %v3474_v8 = vadd.f32 %v3442_v51, %v3410_v5  ;;  %v3413_v32 = vadd.f32 %v6814_v42, %v3374_v23  ;;  %v3372_v28 = vadd.f32 %v3307_v1, %v3114_v57  ;;  %v3119_v52 = vadd.f32 %v4662_v24, %v2861_v10  ;;  %v3449_v31 = vld [vmem:[%s6806_s29 + $0xd8] sm:$0xff]  ;;  %v3447_v0 = vld [vmem:[%s6806_s29 + $0xc8] sm:$0xff] }
 0x250   : > { %v3062_v48 = vpop.f32.mrf.mxu1  ;;  %v2605_v1 = vadd.f32 %v7253_v61, %v7252_v47  ;;  %v4714_v21 = vpop.f32.mrf.mxu0  ;;  %v2865_v29 = vadd.f32 %v7257_v27, %v2607_v19  ;;  %v3451_v47 = vld [vmem:[%s6806_s29 + $0xe8] sm:$0xff] }
 0x251   : > { %3506 = vst [vmem:[%s6833_s20 + $0xa0] sm:$0xff] %v3474_v8  ;;  %v3477_v54 = vadd.f32 %v3445_v62, %v3413_v32  ;;  %v3411_v25 = vadd.f32 %v6814_v42, %v3372_v28  ;;  %v3377_v35 = vadd.f32 %v4710_v16, %v3119_v52  ;;  %v3117_v33 = vadd.f32 %v3062_v48, %v2859_v17  ;;  %v7256_v16 = vld [vmem:[#allocation47_spill] sm:$0xff]  ;;  %v7262_v17 = vld [vmem:[#allocation45_spill] sm:$0xff] }
 0x252   : > { %v4663_v37 = vpop.f32.mrf.mxu1  ;;  %v2608_v38 = vadd.f32 %v7256_v16, %v7255_v6  ;;  %v3336_v58 = vpop.f32.mrf.mxu0  ;;  %v2863_v3 = vadd.f32 %v7260_v12, %v2605_v1  ;;  %v3452_v62 = vld [vmem:[%s6806_s29 + $0xf0] sm:$0xff] }
 0x253   : > { %3509 = vst [vmem:[%s6833_s20 + $0xb8] sm:$0xff] %v3477_v54  ;;  %v3475_v41 = vadd.f32 %v3443_v26, %v3411_v25  ;;  %v3416_v45 = vadd.f32 %v6814_v42, %v3377_v35  ;;  %v3375_v43 = vadd.f32 %v3320_v46, %v3117_v33  ;;  %v3120_v39 = vadd.f32 %v4663_v37, %v2862_v7  ;;  %v3453_v7 = vld [vmem:[%s6806_s29 + $0xf8] sm:$0xff] }
 0x254   : > { %v3065_v34 = vpop.f32.mrf.mxu1  ;;  %v2606_v46 = vadd.f32 %v7259_v30, %v7258_v22  ;;  %v4715_v24 = vpop.f32.mrf.mxu0 }
 0x255   : > { %3507 = vst [vmem:[%s6833_s20 + $0xa8] sm:$0xff] %v3475_v41  ;;  %v3480_v9 = vadd.f32 %v3448_v44, %v3416_v45  ;;  %v3414_v60 = vadd.f32 %v6814_v42, %v3375_v43  ;;  %v3378_v18 = vadd.f32 %v4711_v56, %v3120_v39  ;;  %v3118_v20 = vadd.f32 %v3065_v34, %v2860_v50  ;;  %v7261_v56 = vld [vmem:[#allocation43_spill] sm:$0xff] }
 0x256   : > { %v4666_v63 = vpop.f32.mrf.mxu1  ;;  %v2866_v23 = vadd.f32 %v7261_v56, %v2608_v38  ;;  %v3339_v54 = vpop.f32.mrf.mxu0 }
 0x257   : > { %3512 = vst [vmem:[%s6833_s20 + $0xd0] sm:$0xff] %v3480_v9  ;;  %v3478_v51 = vadd.f32 %v3446_v2, %v3414_v60  ;;  %v3417_v36 = vadd.f32 %v6814_v42, %v3378_v18  ;;  %v3376_v15 = vadd.f32 %v3323_v55, %v3118_v20  ;;  %v3123_v10 = vadd.f32 %v4666_v63, %v2865_v29 }
 0x258   : > { %v3078_v5 = vpop.f32.mrf.mxu1  ;;  %v2864_v55 = vadd.f32 %v7262_v17, %v2606_v46 }
 0x259   : > { %3510 = vst [vmem:[%s6833_s20 + $0xc0] sm:$0xff] %v3478_v51  ;;  %v3481_v57 = vadd.f32 %v3449_v31, %v3417_v36  ;;  %v3415_v59 = vadd.f32 %v6814_v42, %v3376_v15  ;;  %v3381_v4 = vadd.f32 %v4714_v21, %v3123_v10  ;;  %v3121_v13 = vadd.f32 %v3078_v5, %v2863_v3 }
 0x25a   : > { %v4667_v14 = vpop.f32.mrf.mxu1 }
 0x25b   : > { %3513 = vst [vmem:[%s6833_s20 + $0xd8] sm:$0xff] %v3481_v57  ;;  %v3479_v8 = vadd.f32 %v3447_v0, %v3415_v59  ;;  %v3420_v32 = vadd.f32 %v6814_v42, %v3381_v4  ;;  %v3379_v28 = vadd.f32 %v3336_v58, %v3121_v13  ;;  %v3124_v52 = vadd.f32 %v4667_v14, %v2866_v23 }
 0x25c   : > { %v3081_v11 = vpop.f32.mrf.mxu1 }
 0x25d   : > { %3511 = vst [vmem:[%s6833_s20 + $0xc8] sm:$0xff] %v3479_v8  ;;  %v3484_v19 = vadd.f32 %v3452_v62, %v3420_v32  ;;  %v3418_v26 = vadd.f32 %v6814_v42, %v3379_v28  ;;  %v3382_v48 = vadd.f32 %v4715_v24, %v3124_v52  ;;  %v3122_v53 = vadd.f32 %v3081_v11, %v2864_v55 }
 0x25f   : > { %3516 = vst [vmem:[%s6833_s20 + $0xf0] sm:$0xff] %v3484_v19  ;;  %v3482_v25 = vadd.f32 %v3450_v49, %v3418_v26  ;;  %v3421_v35 = vadd.f32 %v6814_v42, %v3382_v48  ;;  %v3380_v33 = vadd.f32 %v3339_v54, %v3122_v53 }
 0x261   : > { %3514 = vst [vmem:[%s6833_s20 + $0xe0] sm:$0xff] %v3482_v25  ;;  %v3485_v61 = vadd.f32 %v3453_v7, %v3421_v35  ;;  %v3419_v1 = vadd.f32 %v6814_v42, %v3380_v33 }
 0x263   : > { %3517 = vst [vmem:[%s6833_s20 + $0xf8] sm:$0xff] %v3485_v61  ;;  %v3483_v44 = vadd.f32 %v3451_v47, %v3419_v1 }
 0x265   : > { %3515 = vst [vmem:[%s6833_s20 + $0xe8] sm:$0xff] %v3483_v44 }
 0x266   : > { %4990 = shalt.err (!%p4987_p3)
}
 0x267   : > { %s4991_s19 = scalar_lea.hbm %s7003_s15, 4096  ;;  %s4995_s14 = scalar_lea.hbm %s7057_s6, 8192 }
 0x268   : > { %p4992_p4 = scmp.ne.s32.totalorder %s7003_s15, %s4991_s19  ;;  %p4996_p9 = scmp.lt.s32.totalorder %s7003_s15, %s7057_s6 }
 0x269   : > { %p4997_p10 = scmp.lt.s32.totalorder %s4995_s14, %s4991_s19 }
 0x26a   : > { %p4993_p7 = pnand %p4992_p4, %p5117_p5 }
 0x26b   : > { %p4998_p11 = por %p4997_p10, %p4996_p9 }
 0x26c   : > { %p4994_p8 = pneg %p4993_p7 }
 0x26e   : > { %p4999_p12 = pnand %p4998_p11, %p4994_p8 }
 0x270   : > { %5002 = shalt.err (!%p4999_p12)
}
 0x271   : > { %s5042_s9 = smov 128   ;;  %s5043_s12 = smov 8  }
 0x272   : > { %4732 = dma.vmem_to_hbm [thread:$0]  (%p5117_p5), %s7005_s10, 4096, %s7003_s15, %s7011_s25, %s5042_s9, %s5042_s9, %s5043_s12  }
 0x273 PF: > { %p4738_p13 = scmp.ge.s32.totalorder %s5037_s24, 2  ;;  %s3547_s13 = sand.u32 1, %s5025_s21  }
 0x274   : > { %s3548_s16 = scalar_lea.sflag [#allocation3], %s3547_s13 }
 0x275   : > { %p4735_p0 = pnand %p4738_p13, %p5121_p6 }
 0x277   : > { %p4736_p1 = pneg %p4735_p0 }
 0x279   : > { %5020 = dma.done.wait (%p4736_p1), %s3548_s16, 4096  }
 0x27a   : > { %5022 = vsyncadd (%p4736_p1), %s3548_s16, 4294963200  ;;  %p16_p2 = scmp.ge.s32.totalorder %s5104_s27, 4   ;;  %s7263_s21 = smov %s5029_s22 }
 0x27b   : > { %s7264_s22 = smov %s5033_s23  ;;  %s7265_s23 = smov %s5115_s30 }
 0x27c   : > { %s7266_s24 = smov %s5104_s27  ;;  %18 = sbr.rel (!%p16_p2) target bundleno = 3 (0x3), region = 96 }
 0x281   :  { %3553 = vsyncpa [#allocation3], 1 }
 0x282   :  { %3555 = vsyncpa [#allocation3 + $0x1], 1 }

</bundles_post_ra>
